<compile_context>
chip_gen: v7x
topology: tpu7x:2x2x1
jax: 0.10.0
libtpu: 0.0.40
codegen_flags: <defaults>
</compile_context>

<pallas_src>
import functools

import jax
import jax.numpy as jnp
from jax.experimental import pallas as pl
from jax.experimental.pallas import tpu as pltpu


def _rup(x, m):
    return ((x + m - 1) // m) * m


def _pad_to(a, shape):
    return jnp.pad(a, [(0, t - s) for s, t in zip(a.shape, shape)])


# -----------------------------------------------------------------------------
# Fused kernel: expand 1x1 + BN1 + ReLU -> depthwise KxK -> BN2 + ReLU -> SE
#               -> project 1x1 + BN3 -> (+ residual)
# -----------------------------------------------------------------------------
def _inverted_residual_kernel(
    x_ref,                    # (N*H*W, CP)         lane-dense input rows (zero-padded chans)
    w_pw_ref,                 # (CP, MP)            conv_pw weight (expand 1x1)
    g1_ref, b1_ref,           # (1, MP)             bn1 gamma / beta
    w_dw_ref,                 # (K*K, MP)           depthwise weights, tap-major
    g2_ref, b2_ref,           # (1, MP)             bn2 gamma / beta
    se_w1_ref, se_b1_ref,     # (MP, RP), (1, RP)   SE reduce
    se_w2_ref, se_b2_ref,     # (RP, MP), (1, MP)   SE expand
    w_pwl_ref,                # (MP, OP)            conv_pwl weight (project 1x1)
    g3_ref, b3_ref,           # (1, OP)             bn3 gamma / beta
    out_ref,                  # (N*Ho*Wo, OP)       lane-dense output
    y_scr,                    # VMEM (N, H+2p, Wp, MP)  halo-padded activations for dw conv
    a_scr,                    # VMEM (N*Ho*Wo, MP)      raw depthwise output (pre-BN2)
    *, N, H, W, K, stride, pad, Ho, Wo, Wp, MP, OP, has_se, has_residual, eps):
    f32 = jnp.float32
    n_in = N * H * W
    n_out = N * Ho * Wo
    HB = max(1, min(8, H))           # input spatial-row block  -> ~(HB*W, 128) chunks
    HOB = max(1, min(8, Ho))         # output spatial-row block for the depthwise stage
    RC = max(1, min(128, Ho * Wo))   # flat row chunk for the pointwise / BN passes

    # Small per-channel vectors, hoisted once (tiny, stay in vregs).
    g1 = g1_ref[...]; b1 = b1_ref[...]
    g2 = g2_ref[...]; b2 = b2_ref[...]
    g3 = g3_ref[...]; b3 = b3_ref[...]
    w_dw = w_dw_ref[...]             # (K*K, MP)

    # NOTE: BN variance uses E[x^2]-(E[x])^2 with a >=0 clamp; at these activation scales
    # (near-zero means) cancellation is negligible vs PyTorch's two-pass variance.

    # ---------- Stage 1: expand 1x1 (MXU) -- streaming BN1 batch statistics ----------
    s1 = jnp.zeros((1, MP), f32)
    ss1 = jnp.zeros((1, MP), f32)
    for n in range(N):
        for h0 in range(0, H, HB):
            hb = min(HB, H - h0)
            r0 = n * H * W + h0 * W
            y1 = jnp.dot(x_ref[r0:r0 + hb * W, :], w_pw_ref[...],
                         preferred_element_type=f32)              # (hb*W, MP)
            s1 = s1 + jnp.sum(y1, axis=0, keepdims=True)
            ss1 = ss1 + jnp.sum(y1 * y1, axis=0, keepdims=True)
    mu1 = s1 * (1.0 / n_in)
    var1 = jnp.maximum(ss1 * (1.0 / n_in) - mu1 * mu1, 0.0)
    sc1 = jax.lax.rsqrt(var1 + eps) * g1
    sh1 = b1 - mu1 * sc1

    # ---- Stage 2: recompute expand, BN1 + ReLU, write halo-padded activations ----
    # Only the halo border is zeroed; the interior is overwritten directly below.
    if pad > 0:
        y_scr[:, 0:pad, :, :] = jnp.zeros((N, pad, Wp, MP), f32)
        y_scr[:, pad + H:H + 2 * pad, :, :] = jnp.zeros((N, pad, Wp, MP), f32)
        y_scr[:, pad:pad + H, 0:pad, :] = jnp.zeros((N, H, pad, MP), f32)
        y_scr[:, pad:pad + H, pad + W:W + 2 * pad, :] = jnp.zeros((N, H, pad, MP), f32)
    for n in range(N):
        for h0 in range(0, H, HB):
            hb = min(HB, H - h0)
            r0 = n * H * W + h0 * W
            y1 = jnp.dot(x_ref[r0:r0 + hb * W, :], w_pw_ref[...],
                         preferred_element_type=f32)
            y1 = jnp.maximum(y1 * sc1 + sh1, 0.0)
            y_scr[n:n + 1, pad + h0:pad + h0 + hb, pad:pad + W, :] = (
                y1.reshape(1, hb, W, MP))

    # ---- Stage 3: depthwise KxK (tap accumulation in vregs, ONE store) + BN2 stats ----
    s2 = jnp.zeros((1, MP), f32)
    ss2 = jnp.zeros((1, MP), f32)
    for n in range(N):
        for oh0 in range(0, Ho, HOB):
            hob = min(HOB, Ho - oh0)
            acc = None
            for kh in range(K):
                for kw in range(K):
                    if stride == 1:
                        patch = y_scr[n:n + 1, kh + oh0:kh + oh0 + hob,
                                      kw:kw + Wo, :]
                    else:
                        patch = y_scr[n:n + 1,
                                      pl.ds(kh + oh0 * stride, hob, stride=stride),
                                      pl.ds(kw, Wo, stride=stride), :]
                    term = patch * w_dw[kh * K + kw, :]            # (MP,) bcast
                    acc = term if acc is None else acc + term      # first tap = assign
            rows = acc.reshape(hob * Wo, MP)
            s2 = s2 + jnp.sum(rows, axis=0, keepdims=True)
            ss2 = ss2 + jnp.sum(rows * rows, axis=0, keepdims=True)
            r0 = n * Ho * Wo + oh0 * Wo
            a_scr[r0:r0 + hob * Wo, :] = rows                      # single store per block
    mu2 = s2 * (1.0 / n_out)
    var2 = jnp.maximum(ss2 * (1.0 / n_out) - mu2 * mu2, 0.0)
    sc2 = jax.lax.rsqrt(var2 + eps) * g2
    sh2 = b2 - mu2 * sc2

    # ---------------- Stage 4: SqueezeExcite gate (per image, batched matmuls) --------
    gate = None
    if has_se:
        pooled_rows = []
        inv_sp = 1.0 / (Ho * Wo)
        for n in range(N):
            p = jnp.zeros((1, MP), f32)
            for c0 in range(0, Ho * Wo, RC):
                rc = min(RC, Ho * Wo - c0)
                r0 = n * Ho * Wo + c0
                y2 = jnp.maximum(a_scr[r0:r0 + rc, :] * sc2 + sh2, 0.0)
                p = p + jnp.sum(y2, axis=0, keepdims=True)
            pooled_rows.append(p * inv_sp)
        pooled = jnp.concatenate(pooled_rows, axis=0)              # (N, MP)
        r = jnp.maximum(
            jnp.dot(pooled, se_w1_ref[...], preferred_element_type=f32)
            + se_b1_ref[...], 0.0)                                 # (N, RP)
        e = jnp.dot(r, se_w2_ref[...], preferred_element_type=f32) + se_b2_ref[...]
        gate = jnp.clip(e + 3.0, 0.0, 6.0) * (1.0 / 6.0)           # hard_sigmoid, (N, MP)

    # Raw projected z for one row chunk (BN2 normalize + ReLU + SE gate are recomputed —
    # a couple of VPU ops + an MXU call are cheaper than an extra store+load pass).
    def project_chunk(n, c0, rc):
        r0 = n * Ho * Wo + c0
        y2 = jnp.maximum(a_scr[r0:r0 + rc, :] * sc2 + sh2, 0.0)
        if has_se:
            y2 = y2 * gate[n:n + 1, :]
        return jnp.dot(y2, w_pwl_ref[...], preferred_element_type=f32)  # (rc, OP)

    # ---------------- Stage 5: project 1x1 -- streaming BN3 batch statistics ----------
    s3 = jnp.zeros((1, OP), f32)
    ss3 = jnp.zeros((1, OP), f32)
    for n in range(N):
        for c0 in range(0, Ho * Wo, RC):
            rc = min(RC, Ho * Wo - c0)
            z = project_chunk(n, c0, rc)
            s3 = s3 + jnp.sum(z, axis=0, keepdims=True)
            ss3 = ss3 + jnp.sum(z * z, axis=0, keepdims=True)
    mu3 = s3 * (1.0 / n_out)
    var3 = jnp.maximum(ss3 * (1.0 / n_out) - mu3 * mu3, 0.0)
    sc3 = jax.lax.rsqrt(var3 + eps) * g3
    sh3 = b3 - mu3 * sc3

    # ---- Stage 6: recompute projection, BN3 (+ residual), single lane-dense store ----
    for n in range(N):
        for c0 in range(0, Ho * Wo, RC):
            rc = min(RC, Ho * Wo - c0)
            z = project_chunk(n, c0, rc) * sc3 + sh3
            r0 = n * Ho * Wo + c0
            if has_residual:   # stride==1 and Cin==out_chs  =>  CP==OP, same row order
                z = z + x_ref[r0:r0 + rc, :]
            out_ref[r0:r0 + rc, :] = z


_VMEM = pl.BlockSpec(memory_space=pltpu.MemorySpace.VMEM)


# -----------------------------------------------------------------------------
# Wrapper (layout glue + pallas_call plumbing).  Takes PyTorch-style NCHW.
# -----------------------------------------------------------------------------
def inverted_residual(x_nchw, params, *, in_chs, out_chs, kernel_size,
                      stride=1, exp_ratio=1.0, se_ratio=0.0, noskip=False,
                      eps=1e-5):
    N, C, H, W = x_nchw.shape
    assert C == in_chs
    mid = int(in_chs * exp_ratio)
    has_se = se_ratio is not None and se_ratio > 0.0
    has_residual = (in_chs == out_chs and stride == 1) and (not noskip)
    pad = kernel_size // 2
    Ho = (H + 2 * pad - kernel_size) // stride + 1
    Wo = (W + 2 * pad - kernel_size) // stride + 1
    CP = _rup(in_chs, 128)
    MP = _rup(mid, 128)
    OP = _rup(out_chs, 128)
    Wp = _rup(W + 2 * pad, 8)          # sublane-aligned halo width

    # NCHW -> channels-last rows, zero-padded to a lane-dense multiple-of-128 width so
    # the input load is unmasked and the residual folds into the single output store.
    x2d = jnp.transpose(x_nchw, (0, 2, 3, 1)).reshape(N * H * W, in_chs)
    x2d = _pad_to(x2d.astype(jnp.float32), (N * H * W, CP))

    kern = functools.partial(
        _inverted_residual_kernel,
        N=N, H=H, W=W, K=kernel_size, stride=stride, pad=pad,
        Ho=Ho, Wo=Wo, Wp=Wp, MP=MP, OP=OP,
        has_se=has_se, has_residual=has_residual, eps=eps)

    out2d = pl.pallas_call(
        kern,
        out_shape=jax.ShapeDtypeStruct((N * Ho * Wo, OP), jnp.float32),
        in_specs=[_VMEM] * 14,
        out_specs=_VMEM,
        scratch_shapes=[
            pltpu.VMEM((N, H + 2 * pad, Wp, MP), jnp.float32),
            pltpu.VMEM((N * Ho * Wo, MP), jnp.float32),
        ],
        # Grid-less fused call: training-mode BN needs full-batch stats, and at these
        # shapes everything (<2 MiB) fits comfortably in VMEM on v5e/v6e/v7x.
        compiler_params=pltpu.CompilerParams(vmem_limit_bytes=32 * 1024 * 1024),
    )(x2d,
      params["pw_w"], params["bn1_g"], params["bn1_b"],
      params["dw_w"], params["bn2_g"], params["bn2_b"],
      params["se_w1"], params["se_b1"], params["se_w2"], params["se_b2"],
      params["pwl_w"], params["bn3_g"], params["bn3_b"])

    out = out2d.reshape(N, Ho, Wo, OP)[:, :, :, :out_chs]
    return jnp.transpose(out, (0, 3, 1, 2))                          # NHWC -> NCHW


# -----------------------------------------------------------------------------
# Deterministic parameter init (shapes follow the PyTorch __init__), converted to
# the kernel's zero-padded channels-last layouts.  Zero-padded gamma/weight lanes
# guarantee padded lanes stay exactly 0 through every stage.
# -----------------------------------------------------------------------------
def init_params(key, in_chs, out_chs, kernel_size, exp_ratio, se_ratio):
    mid = int(in_chs * exp_ratio)
    has_se = se_ratio is not None and se_ratio > 0.0
    red = max(1, int(mid * se_ratio)) if has_se else 1
    CP, MP, OP, RP = (_rup(in_chs, 128), _rup(mid, 128),
                      _rup(out_chs, 128), _rup(red, 128))
    ks = jax.random.split(key, 13)
    f32 = jnp.float32

    # conv_pw.weight: (mid, in, 1, 1) -> (CP, MP)
    w_pw = _pad_to(0.1 * jax.random.normal(ks[0], (mid, in_chs), f32).T, (CP, MP))
    bn1_g = _pad_to(1.0 + 0.1 * jax.random.normal(ks[1], (1, mid), f32), (1, MP))
    bn1_b = _pad_to(0.1 * jax.random.normal(ks[2], (1, mid), f32), (1, MP))

    # conv_dw.weight: (mid, 1, K, K) -> (K*K, MP), tap-major
    dw_t = 0.1 * jax.random.normal(ks[3], (mid, kernel_size, kernel_size), f32)
    dw = jnp.transpose(dw_t, (1, 2, 0)).reshape(kernel_size * kernel_size, mid)
    dw_w = _pad_to(dw, (kernel_size * kernel_size, MP))
    bn2_g = _pad_to(1.0 + 0.1 * jax.random.normal(ks[4], (1, mid), f32), (1, MP))
    bn2_b = _pad_to(0.1 * jax.random.normal(ks[5], (1, mid), f32), (1, MP))

    # SqueezeExcite: conv_reduce (red, mid, 1, 1) -> (MP, RP); conv_expand (mid, red, 1, 1) -> (RP, MP)
    se_w1 = _pad_to(0.1 * jax.random.normal(ks[6], (red, mid), f32).T, (MP, RP))
    se_b1 = _pad_to(0.1 * jax.random.normal(ks[7], (1, red), f32), (1, RP))
    se_w2 = _pad_to(0.1 * jax.random.normal(ks[8], (mid, red), f32).T, (RP, MP))
    se_b2 = _pad_to(0.1 * jax.random.normal(ks[9], (1, mid), f32), (1, MP))

    # conv_pwl.weight: (out, mid, 1, 1) -> (MP, OP)
    pwl_w = _pad_to(0.1 * jax.random.normal(ks[10], (out_chs, mid), f32).T, (MP, OP))
    bn3_g = _pad_to(1.0 + 0.1 * jax.random.normal(ks[11], (1, out_chs), f32), (1, OP))
    bn3_b = _pad_to(0.1 * jax.random.normal(ks[12], (1, out_chs), f32), (1, OP))

    return dict(pw_w=w_pw, bn1_g=bn1_g, bn1_b=bn1_b,
                dw_w=dw_w, bn2_g=bn2_g, bn2_b=bn2_b,
                se_w1=se_w1, se_b1=se_b1, se_w2=se_w2, se_b2=se_b2,
                pwl_w=pwl_w, bn3_g=bn3_g, bn3_b=bn3_b)


if __name__ == "__main__":
    in_chs, out_chs, ksize, stride = 4, 4, 3, 1            # residual path exercised
    exp_ratio, se_ratio = 2.0, 0.25                        # mid = 8, SE reduce = 2
    key = jax.random.PRNGKey(0)
    kx, kp = jax.random.split(key)
    x = jax.random.normal(kx, (2, in_chs, 16, 16), jnp.float32)   # NCHW like PyTorch
    params = init_params(kp, in_chs, out_chs, ksize, exp_ratio, se_ratio)

    fwd = jax.jit(functools.partial(
        inverted_residual, in_chs=in_chs, out_chs=out_chs, kernel_size=ksize,
        stride=stride, exp_ratio=exp_ratio, se_ratio=se_ratio, eps=1e-5))
    out = fwd(x, params)
    jax.block_until_ready(out)
    assert out.shape == (2, out_chs, 16, 16), out.shape
    assert bool(jnp.all(jnp.isfinite(out)))
    print("KERNEL_OK")
</pallas_src>

<mosaic_0001>
module attributes {stable_mosaic.version = 11 : i64} {
  func.func @_inverted_residual_kernel(%arg0: memref<512x128xf32, #tpu.memory_space<vmem>>, %arg1: memref<128x128xf32, #tpu.memory_space<vmem>>, %arg2: memref<1x128xf32, #tpu.memory_space<vmem>>, %arg3: memref<1x128xf32, #tpu.memory_space<vmem>>, %arg4: memref<9x128xf32, #tpu.memory_space<vmem>>, %arg5: memref<1x128xf32, #tpu.memory_space<vmem>>, %arg6: memref<1x128xf32, #tpu.memory_space<vmem>>, %arg7: memref<128x128xf32, #tpu.memory_space<vmem>>, %arg8: memref<1x128xf32, #tpu.memory_space<vmem>>, %arg9: memref<128x128xf32, #tpu.memory_space<vmem>>, %arg10: memref<1x128xf32, #tpu.memory_space<vmem>>, %arg11: memref<128x128xf32, #tpu.memory_space<vmem>>, %arg12: memref<1x128xf32, #tpu.memory_space<vmem>>, %arg13: memref<1x128xf32, #tpu.memory_space<vmem>>, %arg14: memref<512x128xf32, #tpu.memory_space<vmem>>, %arg15: memref<2x18x24x128xf32, #tpu.memory_space<vmem>>, %arg16: memref<512x128xf32, #tpu.memory_space<vmem>>) attributes {dimension_semantics = [], scalar_prefetch = 0 : i64, scratch_operands = 2 : i64, tpu.core_type = #tpu.core_type<tc>} {
    %c0 = arith.constant 0 : index
    %c0_0 = arith.constant 0 : index
    %0 = vector.load %arg2[%c0, %c0_0] : memref<1x128xf32, #tpu.memory_space<vmem>>, vector<1x128xf32>
    %c0_1 = arith.constant 0 : index
    %c0_2 = arith.constant 0 : index
    %1 = vector.load %arg3[%c0_1, %c0_2] : memref<1x128xf32, #tpu.memory_space<vmem>>, vector<1x128xf32>
    %c0_3 = arith.constant 0 : index
    %c0_4 = arith.constant 0 : index
    %2 = vector.load %arg5[%c0_3, %c0_4] : memref<1x128xf32, #tpu.memory_space<vmem>>, vector<1x128xf32>
    %c0_5 = arith.constant 0 : index
    %c0_6 = arith.constant 0 : index
    %3 = vector.load %arg6[%c0_5, %c0_6] : memref<1x128xf32, #tpu.memory_space<vmem>>, vector<1x128xf32>
    %c0_7 = arith.constant 0 : index
    %c0_8 = arith.constant 0 : index
    %4 = vector.load %arg12[%c0_7, %c0_8] : memref<1x128xf32, #tpu.memory_space<vmem>>, vector<1x128xf32>
    %c0_9 = arith.constant 0 : index
    %c0_10 = arith.constant 0 : index
    %5 = vector.load %arg13[%c0_9, %c0_10] : memref<1x128xf32, #tpu.memory_space<vmem>>, vector<1x128xf32>
    %c0_11 = arith.constant 0 : index
    %c0_12 = arith.constant 0 : index
    %6 = vector.load %arg4[%c0_11, %c0_12] : memref<9x128xf32, #tpu.memory_space<vmem>>, vector<9x128xf32>
    %cst = arith.constant 0.000000e+00 : f32
    %7 = vector.broadcast %cst : f32 to vector<1x128xf32>
    %cst_13 = arith.constant 0.000000e+00 : f32
    %8 = vector.broadcast %cst_13 : f32 to vector<1x128xf32>
    %c0_14 = arith.constant 0 : index
    %c0_15 = arith.constant 0 : index
    %9 = vector.load %arg0[%c0_14, %c0_15] : memref<512x128xf32, #tpu.memory_space<vmem>>, vector<128x128xf32>
    %c0_16 = arith.constant 0 : index
    %c0_17 = arith.constant 0 : index
    %10 = vector.load %arg1[%c0_16, %c0_17] : memref<128x128xf32, #tpu.memory_space<vmem>>, vector<128x128xf32>
    %cst_18 = arith.constant dense<0.000000e+00> : vector<128x128xf32>
    %11 = tpu.matmul %9, %10, %cst_18 {dimension_numbers = #tpu.dot_dimension_numbers<[1], [0], [0], [1], [0, 0, 1, 1], [], []>} : vector<128x128xf32>, vector<128x128xf32>, vector<128x128xf32> -> vector<128x128xf32>
    %cst_19 = arith.constant dense<0.000000e+00> : vector<128xf32>
    %12 = vector.multi_reduction <add>, %11, %cst_19 [0] : vector<128x128xf32> to vector<128xf32>
    %13 = vector.shape_cast %12 : vector<128xf32> to vector<1x128xf32>
    %14 = arith.addf %7, %13 : vector<1x128xf32>
    %15 = arith.mulf %11, %11 : vector<128x128xf32>
    %cst_20 = arith.constant dense<0.000000e+00> : vector<128xf32>
    %16 = vector.multi_reduction <add>, %15, %cst_20 [0] : vector<128x128xf32> to vector<128xf32>
    %17 = vector.shape_cast %16 : vector<128xf32> to vector<1x128xf32>
    %18 = arith.addf %8, %17 : vector<1x128xf32>
    %c128 = arith.constant 128 : index
    %c0_21 = arith.constant 0 : index
    %19 = vector.load %arg0[%c128, %c0_21] : memref<512x128xf32, #tpu.memory_space<vmem>>, vector<128x128xf32>
    %c0_22 = arith.constant 0 : index
    %c0_23 = arith.constant 0 : index
    %20 = vector.load %arg1[%c0_22, %c0_23] : memref<128x128xf32, #tpu.memory_space<vmem>>, vector<128x128xf32>
    %cst_24 = arith.constant dense<0.000000e+00> : vector<128x128xf32>
    %21 = tpu.matmul %19, %20, %cst_24 {dimension_numbers = #tpu.dot_dimension_numbers<[1], [0], [0], [1], [0, 0, 1, 1], [], []>} : vector<128x128xf32>, vector<128x128xf32>, vector<128x128xf32> -> vector<128x128xf32>
    %cst_25 = arith.constant dense<0.000000e+00> : vector<128xf32>
    %22 = vector.multi_reduction <add>, %21, %cst_25 [0] : vector<128x128xf32> to vector<128xf32>
    %23 = vector.shape_cast %22 : vector<128xf32> to vector<1x128xf32>
    %24 = arith.addf %14, %23 : vector<1x128xf32>
    %25 = arith.mulf %21, %21 : vector<128x128xf32>
    %cst_26 = arith.constant dense<0.000000e+00> : vector<128xf32>
    %26 = vector.multi_reduction <add>, %25, %cst_26 [0] : vector<128x128xf32> to vector<128xf32>
    %27 = vector.shape_cast %26 : vector<128xf32> to vector<1x128xf32>
    %28 = arith.addf %18, %27 : vector<1x128xf32>
    %c256 = arith.constant 256 : index
    %c0_27 = arith.constant 0 : index
    %29 = vector.load %arg0[%c256, %c0_27] : memref<512x128xf32, #tpu.memory_space<vmem>>, vector<128x128xf32>
    %c0_28 = arith.constant 0 : index
    %c0_29 = arith.constant 0 : index
    %30 = vector.load %arg1[%c0_28, %c0_29] : memref<128x128xf32, #tpu.memory_space<vmem>>, vector<128x128xf32>
    %cst_30 = arith.constant dense<0.000000e+00> : vector<128x128xf32>
    %31 = tpu.matmul %29, %30, %cst_30 {dimension_numbers = #tpu.dot_dimension_numbers<[1], [0], [0], [1], [0, 0, 1, 1], [], []>} : vector<128x128xf32>, vector<128x128xf32>, vector<128x128xf32> -> vector<128x128xf32>
    %cst_31 = arith.constant dense<0.000000e+00> : vector<128xf32>
    %32 = vector.multi_reduction <add>, %31, %cst_31 [0] : vector<128x128xf32> to vector<128xf32>
    %33 = vector.shape_cast %32 : vector<128xf32> to vector<1x128xf32>
    %34 = arith.addf %24, %33 : vector<1x128xf32>
    %35 = arith.mulf %31, %31 : vector<128x128xf32>
    %cst_32 = arith.constant dense<0.000000e+00> : vector<128xf32>
    %36 = vector.multi_reduction <add>, %35, %cst_32 [0] : vector<128x128xf32> to vector<128xf32>
    %37 = vector.shape_cast %36 : vector<128xf32> to vector<1x128xf32>
    %38 = arith.addf %28, %37 : vector<1x128xf32>
    %c384 = arith.constant 384 : index
    %c0_33 = arith.constant 0 : index
    %39 = vector.load %arg0[%c384, %c0_33] : memref<512x128xf32, #tpu.memory_space<vmem>>, vector<128x128xf32>
    %c0_34 = arith.constant 0 : index
    %c0_35 = arith.constant 0 : index
    %40 = vector.load %arg1[%c0_34, %c0_35] : memref<128x128xf32, #tpu.memory_space<vmem>>, vector<128x128xf32>
    %cst_36 = arith.constant dense<0.000000e+00> : vector<128x128xf32>
    %41 = tpu.matmul %39, %40, %cst_36 {dimension_numbers = #tpu.dot_dimension_numbers<[1], [0], [0], [1], [0, 0, 1, 1], [], []>} : vector<128x128xf32>, vector<128x128xf32>, vector<128x128xf32> -> vector<128x128xf32>
    %cst_37 = arith.constant dense<0.000000e+00> : vector<128xf32>
    %42 = vector.multi_reduction <add>, %41, %cst_37 [0] : vector<128x128xf32> to vector<128xf32>
    %43 = vector.shape_cast %42 : vector<128xf32> to vector<1x128xf32>
    %44 = arith.addf %34, %43 : vector<1x128xf32>
    %45 = arith.mulf %41, %41 : vector<128x128xf32>
    %cst_38 = arith.constant dense<0.000000e+00> : vector<128xf32>
    %46 = vector.multi_reduction <add>, %45, %cst_38 [0] : vector<128x128xf32> to vector<128xf32>
    %47 = vector.shape_cast %46 : vector<128xf32> to vector<1x128xf32>
    %48 = arith.addf %38, %47 : vector<1x128xf32>
    %cst_39 = arith.constant 0.001953125 : f32
    %49 = vector.broadcast %cst_39 : f32 to vector<1x128xf32>
    %50 = arith.mulf %44, %49 : vector<1x128xf32>
    %cst_40 = arith.constant 0.001953125 : f32
    %51 = vector.broadcast %cst_40 : f32 to vector<1x128xf32>
    %52 = arith.mulf %48, %51 : vector<1x128xf32>
    %53 = arith.mulf %50, %50 : vector<1x128xf32>
    %54 = arith.subf %52, %53 : vector<1x128xf32>
    %cst_41 = arith.constant 0.000000e+00 : f32
    %55 = vector.broadcast %cst_41 : f32 to vector<1x128xf32>
    %56 = arith.maximumf %54, %55 : vector<1x128xf32>
    %cst_42 = arith.constant 9.99999974E-6 : f32
    %57 = vector.broadcast %cst_42 : f32 to vector<1x128xf32>
    %58 = arith.addf %56, %57 : vector<1x128xf32>
    %59 = math.rsqrt %58 : vector<1x128xf32>
    %60 = arith.mulf %59, %0 : vector<1x128xf32>
    %61 = arith.mulf %50, %60 : vector<1x128xf32>
    %62 = arith.subf %1, %61 : vector<1x128xf32>
    %cst_43 = arith.constant 0.000000e+00 : f32
    %63 = vector.broadcast %cst_43 : f32 to vector<2x1x24x128xf32>
    %c0_44 = arith.constant 0 : index
    %c0_45 = arith.constant 0 : index
    %c0_46 = arith.constant 0 : index
    %c0_47 = arith.constant 0 : index
    %64 = vector.load %arg15[%c0_44, %c0_45, %c0_46, %c0_47] : memref<2x18x24x128xf32, #tpu.memory_space<vmem>>, vector<2x1x24x128xf32>
    tpu.vector_store %arg15[%c0_44, %c0_45, %c0_46, %c0_47], %63 {strides = array<i32>} : memref<2x18x24x128xf32, #tpu.memory_space<vmem>>, vector<2x1x24x128xf32>,
    %cst_48 = arith.constant 0.000000e+00 : f32
    %65 = vector.broadcast %cst_48 : f32 to vector<2x1x24x128xf32>
    %c0_49 = arith.constant 0 : index
    %c17 = arith.constant 17 : index
    %c0_50 = arith.constant 0 : index
    %c0_51 = arith.constant 0 : index
    %66 = vector.load %arg15[%c0_49, %c17, %c0_50, %c0_51] : memref<2x18x24x128xf32, #tpu.memory_space<vmem>>, vector<2x1x24x128xf32>
    tpu.vector_store %arg15[%c0_49, %c17, %c0_50, %c0_51], %65 {strides = array<i32>} : memref<2x18x24x128xf32, #tpu.memory_space<vmem>>, vector<2x1x24x128xf32>,
    %cst_52 = arith.constant 0.000000e+00 : f32
    %67 = vector.broadcast %cst_52 : f32 to vector<2x16x1x128xf32>
    %c0_53 = arith.constant 0 : index
    %c1 = arith.constant 1 : index
    %c0_54 = arith.constant 0 : index
    %c0_55 = arith.constant 0 : index
    %68 = vector.load %arg15[%c0_53, %c1, %c0_54, %c0_55] : memref<2x18x24x128xf32, #tpu.memory_space<vmem>>, vector<2x16x1x128xf32>
    tpu.vector_store %arg15[%c0_53, %c1, %c0_54, %c0_55], %67 {strides = array<i32>} : memref<2x18x24x128xf32, #tpu.memory_space<vmem>>, vector<2x16x1x128xf32>,
    %cst_56 = arith.constant 0.000000e+00 : f32
    %69 = vector.broadcast %cst_56 : f32 to vector<2x16x1x128xf32>
    %c0_57 = arith.constant 0 : index
    %c1_58 = arith.constant 1 : index
    %c17_59 = arith.constant 17 : index
    %c0_60 = arith.constant 0 : index
    %70 = vector.load %arg15[%c0_57, %c1_58, %c17_59, %c0_60] : memref<2x18x24x128xf32, #tpu.memory_space<vmem>>, vector<2x16x1x128xf32>
    tpu.vector_store %arg15[%c0_57, %c1_58, %c17_59, %c0_60], %69 {strides = array<i32>} : memref<2x18x24x128xf32, #tpu.memory_space<vmem>>, vector<2x16x1x128xf32>,
    %c0_61 = arith.constant 0 : index
    %c0_62 = arith.constant 0 : index
    %71 = vector.load %arg0[%c0_61, %c0_62] : memref<512x128xf32, #tpu.memory_space<vmem>>, vector<128x128xf32>
    %c0_63 = arith.constant 0 : index
    %c0_64 = arith.constant 0 : index
    %72 = vector.load %arg1[%c0_63, %c0_64] : memref<128x128xf32, #tpu.memory_space<vmem>>, vector<128x128xf32>
    %cst_65 = arith.constant dense<0.000000e+00> : vector<128x128xf32>
    %73 = tpu.matmul %71, %72, %cst_65 {dimension_numbers = #tpu.dot_dimension_numbers<[1], [0], [0], [1], [0, 0, 1, 1], [], []>} : vector<128x128xf32>, vector<128x128xf32>, vector<128x128xf32> -> vector<128x128xf32>
    %74 = vector.broadcast %60 : vector<1x128xf32> to vector<128x128xf32>
    %75 = arith.mulf %73, %74 : vector<128x128xf32>
    %76 = vector.broadcast %62 : vector<1x128xf32> to vector<128x128xf32>
    %77 = arith.addf %75, %76 : vector<128x128xf32>
    %cst_66 = arith.constant 0.000000e+00 : f32
    %78 = vector.broadcast %cst_66 : f32 to vector<128x128xf32>
    %79 = arith.maximumf %77, %78 : vector<128x128xf32>
    %80 = vector.shape_cast %79 : vector<128x128xf32> to vector<1x8x16x128xf32>
    %c0_67 = arith.constant 0 : index
    %c1_68 = arith.constant 1 : index
    %c1_69 = arith.constant 1 : index
    %c0_70 = arith.constant 0 : index
    %81 = vector.load %arg15[%c0_67, %c1_68, %c1_69, %c0_70] : memref<2x18x24x128xf32, #tpu.memory_space<vmem>>, vector<1x8x16x128xf32>
    tpu.vector_store %arg15[%c0_67, %c1_68, %c1_69, %c0_70], %80 {strides = array<i32>} : memref<2x18x24x128xf32, #tpu.memory_space<vmem>>, vector<1x8x16x128xf32>,
    %c128_71 = arith.constant 128 : index
    %c0_72 = arith.constant 0 : index
    %82 = vector.load %arg0[%c128_71, %c0_72] : memref<512x128xf32, #tpu.memory_space<vmem>>, vector<128x128xf32>
    %c0_73 = arith.constant 0 : index
    %c0_74 = arith.constant 0 : index
    %83 = vector.load %arg1[%c0_73, %c0_74] : memref<128x128xf32, #tpu.memory_space<vmem>>, vector<128x128xf32>
    %cst_75 = arith.constant dense<0.000000e+00> : vector<128x128xf32>
    %84 = tpu.matmul %82, %83, %cst_75 {dimension_numbers = #tpu.dot_dimension_numbers<[1], [0], [0], [1], [0, 0, 1, 1], [], []>} : vector<128x128xf32>, vector<128x128xf32>, vector<128x128xf32> -> vector<128x128xf32>
    %85 = vector.broadcast %60 : vector<1x128xf32> to vector<128x128xf32>
    %86 = arith.mulf %84, %85 : vector<128x128xf32>
    %87 = vector.broadcast %62 : vector<1x128xf32> to vector<128x128xf32>
    %88 = arith.addf %86, %87 : vector<128x128xf32>
    %cst_76 = arith.constant 0.000000e+00 : f32
    %89 = vector.broadcast %cst_76 : f32 to vector<128x128xf32>
    %90 = arith.maximumf %88, %89 : vector<128x128xf32>
    %91 = vector.shape_cast %90 : vector<128x128xf32> to vector<1x8x16x128xf32>
    %c0_77 = arith.constant 0 : index
    %c9 = arith.constant 9 : index
    %c1_78 = arith.constant 1 : index
    %c0_79 = arith.constant 0 : index
    %92 = vector.load %arg15[%c0_77, %c9, %c1_78, %c0_79] : memref<2x18x24x128xf32, #tpu.memory_space<vmem>>, vector<1x8x16x128xf32>
    tpu.vector_store %arg15[%c0_77, %c9, %c1_78, %c0_79], %91 {strides = array<i32>} : memref<2x18x24x128xf32, #tpu.memory_space<vmem>>, vector<1x8x16x128xf32>,
    %c256_80 = arith.constant 256 : index
    %c0_81 = arith.constant 0 : index
    %93 = vector.load %arg0[%c256_80, %c0_81] : memref<512x128xf32, #tpu.memory_space<vmem>>, vector<128x128xf32>
    %c0_82 = arith.constant 0 : index
    %c0_83 = arith.constant 0 : index
    %94 = vector.load %arg1[%c0_82, %c0_83] : memref<128x128xf32, #tpu.memory_space<vmem>>, vector<128x128xf32>
    %cst_84 = arith.constant dense<0.000000e+00> : vector<128x128xf32>
    %95 = tpu.matmul %93, %94, %cst_84 {dimension_numbers = #tpu.dot_dimension_numbers<[1], [0], [0], [1], [0, 0, 1, 1], [], []>} : vector<128x128xf32>, vector<128x128xf32>, vector<128x128xf32> -> vector<128x128xf32>
    %96 = vector.broadcast %60 : vector<1x128xf32> to vector<128x128xf32>
    %97 = arith.mulf %95, %96 : vector<128x128xf32>
    %98 = vector.broadcast %62 : vector<1x128xf32> to vector<128x128xf32>
    %99 = arith.addf %97, %98 : vector<128x128xf32>
    %cst_85 = arith.constant 0.000000e+00 : f32
    %100 = vector.broadcast %cst_85 : f32 to vector<128x128xf32>
    %101 = arith.maximumf %99, %100 : vector<128x128xf32>
    %102 = vector.shape_cast %101 : vector<128x128xf32> to vector<1x8x16x128xf32>
    %c1_86 = arith.constant 1 : index
    %c1_87 = arith.constant 1 : index
    %c1_88 = arith.constant 1 : index
    %c0_89 = arith.constant 0 : index
    %103 = vector.load %arg15[%c1_86, %c1_87, %c1_88, %c0_89] : memref<2x18x24x128xf32, #tpu.memory_space<vmem>>, vector<1x8x16x128xf32>
    tpu.vector_store %arg15[%c1_86, %c1_87, %c1_88, %c0_89], %102 {strides = array<i32>} : memref<2x18x24x128xf32, #tpu.memory_space<vmem>>, vector<1x8x16x128xf32>,
    %c384_90 = arith.constant 384 : index
    %c0_91 = arith.constant 0 : index
    %104 = vector.load %arg0[%c384_90, %c0_91] : memref<512x128xf32, #tpu.memory_space<vmem>>, vector<128x128xf32>
    %c0_92 = arith.constant 0 : index
    %c0_93 = arith.constant 0 : index
    %105 = vector.load %arg1[%c0_92, %c0_93] : memref<128x128xf32, #tpu.memory_space<vmem>>, vector<128x128xf32>
    %cst_94 = arith.constant dense<0.000000e+00> : vector<128x128xf32>
    %106 = tpu.matmul %104, %105, %cst_94 {dimension_numbers = #tpu.dot_dimension_numbers<[1], [0], [0], [1], [0, 0, 1, 1], [], []>} : vector<128x128xf32>, vector<128x128xf32>, vector<128x128xf32> -> vector<128x128xf32>
    %107 = vector.broadcast %60 : vector<1x128xf32> to vector<128x128xf32>
    %108 = arith.mulf %106, %107 : vector<128x128xf32>
    %109 = vector.broadcast %62 : vector<1x128xf32> to vector<128x128xf32>
    %110 = arith.addf %108, %109 : vector<128x128xf32>
    %cst_95 = arith.constant 0.000000e+00 : f32
    %111 = vector.broadcast %cst_95 : f32 to vector<128x128xf32>
    %112 = arith.maximumf %110, %111 : vector<128x128xf32>
    %113 = vector.shape_cast %112 : vector<128x128xf32> to vector<1x8x16x128xf32>
    %c1_96 = arith.constant 1 : index
    %c9_97 = arith.constant 9 : index
    %c1_98 = arith.constant 1 : index
    %c0_99 = arith.constant 0 : index
    %114 = vector.load %arg15[%c1_96, %c9_97, %c1_98, %c0_99] : memref<2x18x24x128xf32, #tpu.memory_space<vmem>>, vector<1x8x16x128xf32>
    tpu.vector_store %arg15[%c1_96, %c9_97, %c1_98, %c0_99], %113 {strides = array<i32>} : memref<2x18x24x128xf32, #tpu.memory_space<vmem>>, vector<1x8x16x128xf32>,
    %cst_100 = arith.constant 0.000000e+00 : f32
    %115 = vector.broadcast %cst_100 : f32 to vector<1x128xf32>
    %cst_101 = arith.constant 0.000000e+00 : f32
    %116 = vector.broadcast %cst_101 : f32 to vector<1x128xf32>
    %c0_102 = arith.constant 0 : index
    %c0_103 = arith.constant 0 : index
    %c0_104 = arith.constant 0 : index
    %c0_105 = arith.constant 0 : index
    %117 = vector.load %arg15[%c0_102, %c0_103, %c0_104, %c0_105] : memref<2x18x24x128xf32, #tpu.memory_space<vmem>>, vector<1x8x16x128xf32>
    %118 = vector.extract_strided_slice %6 {offsets = [0, 0], sizes = [1, 128], strides = [1, 1]} : vector<9x128xf32> to vector<1x128xf32>
    %119 = vector.shape_cast %118 : vector<1x128xf32> to vector<128xf32>
    %120 = vector.shape_cast %119 : vector<128xf32> to vector<1x1x1x128xf32>
    %121 = vector.broadcast %120 : vector<1x1x1x128xf32> to vector<1x8x16x128xf32>
    %122 = arith.mulf %117, %121 : vector<1x8x16x128xf32>
    %c0_106 = arith.constant 0 : index
    %c0_107 = arith.constant 0 : index
    %c1_108 = arith.constant 1 : index
    %c0_109 = arith.constant 0 : index
    %123 = vector.load %arg15[%c0_106, %c0_107, %c1_108, %c0_109] : memref<2x18x24x128xf32, #tpu.memory_space<vmem>>, vector<1x8x16x128xf32>
    %124 = vector.extract_strided_slice %6 {offsets = [1, 0], sizes = [1, 128], strides = [1, 1]} : vector<9x128xf32> to vector<1x128xf32>
    %125 = vector.shape_cast %124 : vector<1x128xf32> to vector<128xf32>
    %126 = vector.shape_cast %125 : vector<128xf32> to vector<1x1x1x128xf32>
    %127 = vector.broadcast %126 : vector<1x1x1x128xf32> to vector<1x8x16x128xf32>
    %128 = arith.mulf %123, %127 : vector<1x8x16x128xf32>
    %129 = arith.addf %122, %128 : vector<1x8x16x128xf32>
    %c0_110 = arith.constant 0 : index
    %c0_111 = arith.constant 0 : index
    %c2 = arith.constant 2 : index
    %c0_112 = arith.constant 0 : index
    %130 = vector.load %arg15[%c0_110, %c0_111, %c2, %c0_112] : memref<2x18x24x128xf32, #tpu.memory_space<vmem>>, vector<1x8x16x128xf32>
    %131 = vector.extract_strided_slice %6 {offsets = [2, 0], sizes = [1, 128], strides = [1, 1]} : vector<9x128xf32> to vector<1x128xf32>
    %132 = vector.shape_cast %131 : vector<1x128xf32> to vector<128xf32>
    %133 = vector.shape_cast %132 : vector<128xf32> to vector<1x1x1x128xf32>
    %134 = vector.broadcast %133 : vector<1x1x1x128xf32> to vector<1x8x16x128xf32>
    %135 = arith.mulf %130, %134 : vector<1x8x16x128xf32>
    %136 = arith.addf %129, %135 : vector<1x8x16x128xf32>
    %c0_113 = arith.constant 0 : index
    %c1_114 = arith.constant 1 : index
    %c0_115 = arith.constant 0 : index
    %c0_116 = arith.constant 0 : index
    %137 = vector.load %arg15[%c0_113, %c1_114, %c0_115, %c0_116] : memref<2x18x24x128xf32, #tpu.memory_space<vmem>>, vector<1x8x16x128xf32>
    %138 = vector.extract_strided_slice %6 {offsets = [3, 0], sizes = [1, 128], strides = [1, 1]} : vector<9x128xf32> to vector<1x128xf32>
    %139 = vector.shape_cast %138 : vector<1x128xf32> to vector<128xf32>
    %140 = vector.shape_cast %139 : vector<128xf32> to vector<1x1x1x128xf32>
    %141 = vector.broadcast %140 : vector<1x1x1x128xf32> to vector<1x8x16x128xf32>
    %142 = arith.mulf %137, %141 : vector<1x8x16x128xf32>
    %143 = arith.addf %136, %142 : vector<1x8x16x128xf32>
    %c0_117 = arith.constant 0 : index
    %c1_118 = arith.constant 1 : index
    %c1_119 = arith.constant 1 : index
    %c0_120 = arith.constant 0 : index
    %144 = vector.load %arg15[%c0_117, %c1_118, %c1_119, %c0_120] : memref<2x18x24x128xf32, #tpu.memory_space<vmem>>, vector<1x8x16x128xf32>
    %145 = vector.extract_strided_slice %6 {offsets = [4, 0], sizes = [1, 128], strides = [1, 1]} : vector<9x128xf32> to vector<1x128xf32>
    %146 = vector.shape_cast %145 : vector<1x128xf32> to vector<128xf32>
    %147 = vector.shape_cast %146 : vector<128xf32> to vector<1x1x1x128xf32>
    %148 = vector.broadcast %147 : vector<1x1x1x128xf32> to vector<1x8x16x128xf32>
    %149 = arith.mulf %144, %148 : vector<1x8x16x128xf32>
    %150 = arith.addf %143, %149 : vector<1x8x16x128xf32>
    %c0_121 = arith.constant 0 : index
    %c1_122 = arith.constant 1 : index
    %c2_123 = arith.constant 2 : index
    %c0_124 = arith.constant 0 : index
    %151 = vector.load %arg15[%c0_121, %c1_122, %c2_123, %c0_124] : memref<2x18x24x128xf32, #tpu.memory_space<vmem>>, vector<1x8x16x128xf32>
    %152 = vector.extract_strided_slice %6 {offsets = [5, 0], sizes = [1, 128], strides = [1, 1]} : vector<9x128xf32> to vector<1x128xf32>
    %153 = vector.shape_cast %152 : vector<1x128xf32> to vector<128xf32>
    %154 = vector.shape_cast %153 : vector<128xf32> to vector<1x1x1x128xf32>
    %155 = vector.broadcast %154 : vector<1x1x1x128xf32> to vector<1x8x16x128xf32>
    %156 = arith.mulf %151, %155 : vector<1x8x16x128xf32>
    %157 = arith.addf %150, %156 : vector<1x8x16x128xf32>
    %c0_125 = arith.constant 0 : index
    %c2_126 = arith.constant 2 : index
    %c0_127 = arith.constant 0 : index
    %c0_128 = arith.constant 0 : index
    %158 = vector.load %arg15[%c0_125, %c2_126, %c0_127, %c0_128] : memref<2x18x24x128xf32, #tpu.memory_space<vmem>>, vector<1x8x16x128xf32>
    %159 = vector.extract_strided_slice %6 {offsets = [6, 0], sizes = [1, 128], strides = [1, 1]} : vector<9x128xf32> to vector<1x128xf32>
    %160 = vector.shape_cast %159 : vector<1x128xf32> to vector<128xf32>
    %161 = vector.shape_cast %160 : vector<128xf32> to vector<1x1x1x128xf32>
    %162 = vector.broadcast %161 : vector<1x1x1x128xf32> to vector<1x8x16x128xf32>
    %163 = arith.mulf %158, %162 : vector<1x8x16x128xf32>
    %164 = arith.addf %157, %163 : vector<1x8x16x128xf32>
    %c0_129 = arith.constant 0 : index
    %c2_130 = arith.constant 2 : index
    %c1_131 = arith.constant 1 : index
    %c0_132 = arith.constant 0 : index
    %165 = vector.load %arg15[%c0_129, %c2_130, %c1_131, %c0_132] : memref<2x18x24x128xf32, #tpu.memory_space<vmem>>, vector<1x8x16x128xf32>
    %166 = vector.extract_strided_slice %6 {offsets = [7, 0], sizes = [1, 128], strides = [1, 1]} : vector<9x128xf32> to vector<1x128xf32>
    %167 = vector.shape_cast %166 : vector<1x128xf32> to vector<128xf32>
    %168 = vector.shape_cast %167 : vector<128xf32> to vector<1x1x1x128xf32>
    %169 = vector.broadcast %168 : vector<1x1x1x128xf32> to vector<1x8x16x128xf32>
    %170 = arith.mulf %165, %169 : vector<1x8x16x128xf32>
    %171 = arith.addf %164, %170 : vector<1x8x16x128xf32>
    %c0_133 = arith.constant 0 : index
    %c2_134 = arith.constant 2 : index
    %c2_135 = arith.constant 2 : index
    %c0_136 = arith.constant 0 : index
    %172 = vector.load %arg15[%c0_133, %c2_134, %c2_135, %c0_136] : memref<2x18x24x128xf32, #tpu.memory_space<vmem>>, vector<1x8x16x128xf32>
    %173 = vector.extract_strided_slice %6 {offsets = [8, 0], sizes = [1, 128], strides = [1, 1]} : vector<9x128xf32> to vector<1x128xf32>
    %174 = vector.shape_cast %173 : vector<1x128xf32> to vector<128xf32>
    %175 = vector.shape_cast %174 : vector<128xf32> to vector<1x1x1x128xf32>
    %176 = vector.broadcast %175 : vector<1x1x1x128xf32> to vector<1x8x16x128xf32>
    %177 = arith.mulf %172, %176 : vector<1x8x16x128xf32>
    %178 = arith.addf %171, %177 : vector<1x8x16x128xf32>
    %179 = vector.shape_cast %178 : vector<1x8x16x128xf32> to vector<128x128xf32>
    %cst_137 = arith.constant dense<0.000000e+00> : vector<128xf32>
    %180 = vector.multi_reduction <add>, %179, %cst_137 [0] : vector<128x128xf32> to vector<128xf32>
    %181 = vector.shape_cast %180 : vector<128xf32> to vector<1x128xf32>
    %182 = arith.addf %115, %181 : vector<1x128xf32>
    %183 = arith.mulf %179, %179 : vector<128x128xf32>
    %cst_138 = arith.constant dense<0.000000e+00> : vector<128xf32>
    %184 = vector.multi_reduction <add>, %183, %cst_138 [0] : vector<128x128xf32> to vector<128xf32>
    %185 = vector.shape_cast %184 : vector<128xf32> to vector<1x128xf32>
    %186 = arith.addf %116, %185 : vector<1x128xf32>
    %c0_139 = arith.constant 0 : index
    %c0_140 = arith.constant 0 : index
    %187 = vector.load %arg16[%c0_139, %c0_140] : memref<512x128xf32, #tpu.memory_space<vmem>>, vector<128x128xf32>
    tpu.vector_store %arg16[%c0_139, %c0_140], %179 {strides = array<i32>} : memref<512x128xf32, #tpu.memory_space<vmem>>, vector<128x128xf32>,
    %c0_141 = arith.constant 0 : index
    %c8 = arith.constant 8 : index
    %c0_142 = arith.constant 0 : index
    %c0_143 = arith.constant 0 : index
    %188 = vector.load %arg15[%c0_141, %c8, %c0_142, %c0_143] : memref<2x18x24x128xf32, #tpu.memory_space<vmem>>, vector<1x8x16x128xf32>
    %189 = vector.extract_strided_slice %6 {offsets = [0, 0], sizes = [1, 128], strides = [1, 1]} : vector<9x128xf32> to vector<1x128xf32>
    %190 = vector.shape_cast %189 : vector<1x128xf32> to vector<128xf32>
    %191 = vector.shape_cast %190 : vector<128xf32> to vector<1x1x1x128xf32>
    %192 = vector.broadcast %191 : vector<1x1x1x128xf32> to vector<1x8x16x128xf32>
    %193 = arith.mulf %188, %192 : vector<1x8x16x128xf32>
    %c0_144 = arith.constant 0 : index
    %c8_145 = arith.constant 8 : index
    %c1_146 = arith.constant 1 : index
    %c0_147 = arith.constant 0 : index
    %194 = vector.load %arg15[%c0_144, %c8_145, %c1_146, %c0_147] : memref<2x18x24x128xf32, #tpu.memory_space<vmem>>, vector<1x8x16x128xf32>
    %195 = vector.extract_strided_slice %6 {offsets = [1, 0], sizes = [1, 128], strides = [1, 1]} : vector<9x128xf32> to vector<1x128xf32>
    %196 = vector.shape_cast %195 : vector<1x128xf32> to vector<128xf32>
    %197 = vector.shape_cast %196 : vector<128xf32> to vector<1x1x1x128xf32>
    %198 = vector.broadcast %197 : vector<1x1x1x128xf32> to vector<1x8x16x128xf32>
    %199 = arith.mulf %194, %198 : vector<1x8x16x128xf32>
    %200 = arith.addf %193, %199 : vector<1x8x16x128xf32>
    %c0_148 = arith.constant 0 : index
    %c8_149 = arith.constant 8 : index
    %c2_150 = arith.constant 2 : index
    %c0_151 = arith.constant 0 : index
    %201 = vector.load %arg15[%c0_148, %c8_149, %c2_150, %c0_151] : memref<2x18x24x128xf32, #tpu.memory_space<vmem>>, vector<1x8x16x128xf32>
    %202 = vector.extract_strided_slice %6 {offsets = [2, 0], sizes = [1, 128], strides = [1, 1]} : vector<9x128xf32> to vector<1x128xf32>
    %203 = vector.shape_cast %202 : vector<1x128xf32> to vector<128xf32>
    %204 = vector.shape_cast %203 : vector<128xf32> to vector<1x1x1x128xf32>
    %205 = vector.broadcast %204 : vector<1x1x1x128xf32> to vector<1x8x16x128xf32>
    %206 = arith.mulf %201, %205 : vector<1x8x16x128xf32>
    %207 = arith.addf %200, %206 : vector<1x8x16x128xf32>
    %c0_152 = arith.constant 0 : index
    %c9_153 = arith.constant 9 : index
    %c0_154 = arith.constant 0 : index
    %c0_155 = arith.constant 0 : index
    %208 = vector.load %arg15[%c0_152, %c9_153, %c0_154, %c0_155] : memref<2x18x24x128xf32, #tpu.memory_space<vmem>>, vector<1x8x16x128xf32>
    %209 = vector.extract_strided_slice %6 {offsets = [3, 0], sizes = [1, 128], strides = [1, 1]} : vector<9x128xf32> to vector<1x128xf32>
    %210 = vector.shape_cast %209 : vector<1x128xf32> to vector<128xf32>
    %211 = vector.shape_cast %210 : vector<128xf32> to vector<1x1x1x128xf32>
    %212 = vector.broadcast %211 : vector<1x1x1x128xf32> to vector<1x8x16x128xf32>
    %213 = arith.mulf %208, %212 : vector<1x8x16x128xf32>
    %214 = arith.addf %207, %213 : vector<1x8x16x128xf32>
    %c0_156 = arith.constant 0 : index
    %c9_157 = arith.constant 9 : index
    %c1_158 = arith.constant 1 : index
    %c0_159 = arith.constant 0 : index
    %215 = vector.load %arg15[%c0_156, %c9_157, %c1_158, %c0_159] : memref<2x18x24x128xf32, #tpu.memory_space<vmem>>, vector<1x8x16x128xf32>
    %216 = vector.extract_strided_slice %6 {offsets = [4, 0], sizes = [1, 128], strides = [1, 1]} : vector<9x128xf32> to vector<1x128xf32>
    %217 = vector.shape_cast %216 : vector<1x128xf32> to vector<128xf32>
    %218 = vector.shape_cast %217 : vector<128xf32> to vector<1x1x1x128xf32>
    %219 = vector.broadcast %218 : vector<1x1x1x128xf32> to vector<1x8x16x128xf32>
    %220 = arith.mulf %215, %219 : vector<1x8x16x128xf32>
    %221 = arith.addf %214, %220 : vector<1x8x16x128xf32>
    %c0_160 = arith.constant 0 : index
    %c9_161 = arith.constant 9 : index
    %c2_162 = arith.constant 2 : index
    %c0_163 = arith.constant 0 : index
    %222 = vector.load %arg15[%c0_160, %c9_161, %c2_162, %c0_163] : memref<2x18x24x128xf32, #tpu.memory_space<vmem>>, vector<1x8x16x128xf32>
    %223 = vector.extract_strided_slice %6 {offsets = [5, 0], sizes = [1, 128], strides = [1, 1]} : vector<9x128xf32> to vector<1x128xf32>
    %224 = vector.shape_cast %223 : vector<1x128xf32> to vector<128xf32>
    %225 = vector.shape_cast %224 : vector<128xf32> to vector<1x1x1x128xf32>
    %226 = vector.broadcast %225 : vector<1x1x1x128xf32> to vector<1x8x16x128xf32>
    %227 = arith.mulf %222, %226 : vector<1x8x16x128xf32>
    %228 = arith.addf %221, %227 : vector<1x8x16x128xf32>
    %c0_164 = arith.constant 0 : index
    %c10 = arith.constant 10 : index
    %c0_165 = arith.constant 0 : index
    %c0_166 = arith.constant 0 : index
    %229 = vector.load %arg15[%c0_164, %c10, %c0_165, %c0_166] : memref<2x18x24x128xf32, #tpu.memory_space<vmem>>, vector<1x8x16x128xf32>
    %230 = vector.extract_strided_slice %6 {offsets = [6, 0], sizes = [1, 128], strides = [1, 1]} : vector<9x128xf32> to vector<1x128xf32>
    %231 = vector.shape_cast %230 : vector<1x128xf32> to vector<128xf32>
    %232 = vector.shape_cast %231 : vector<128xf32> to vector<1x1x1x128xf32>
    %233 = vector.broadcast %232 : vector<1x1x1x128xf32> to vector<1x8x16x128xf32>
    %234 = arith.mulf %229, %233 : vector<1x8x16x128xf32>
    %235 = arith.addf %228, %234 : vector<1x8x16x128xf32>
    %c0_167 = arith.constant 0 : index
    %c10_168 = arith.constant 10 : index
    %c1_169 = arith.constant 1 : index
    %c0_170 = arith.constant 0 : index
    %236 = vector.load %arg15[%c0_167, %c10_168, %c1_169, %c0_170] : memref<2x18x24x128xf32, #tpu.memory_space<vmem>>, vector<1x8x16x128xf32>
    %237 = vector.extract_strided_slice %6 {offsets = [7, 0], sizes = [1, 128], strides = [1, 1]} : vector<9x128xf32> to vector<1x128xf32>
    %238 = vector.shape_cast %237 : vector<1x128xf32> to vector<128xf32>
    %239 = vector.shape_cast %238 : vector<128xf32> to vector<1x1x1x128xf32>
    %240 = vector.broadcast %239 : vector<1x1x1x128xf32> to vector<1x8x16x128xf32>
    %241 = arith.mulf %236, %240 : vector<1x8x16x128xf32>
    %242 = arith.addf %235, %241 : vector<1x8x16x128xf32>
    %c0_171 = arith.constant 0 : index
    %c10_172 = arith.constant 10 : index
    %c2_173 = arith.constant 2 : index
    %c0_174 = arith.constant 0 : index
    %243 = vector.load %arg15[%c0_171, %c10_172, %c2_173, %c0_174] : memref<2x18x24x128xf32, #tpu.memory_space<vmem>>, vector<1x8x16x128xf32>
    %244 = vector.extract_strided_slice %6 {offsets = [8, 0], sizes = [1, 128], strides = [1, 1]} : vector<9x128xf32> to vector<1x128xf32>
    %245 = vector.shape_cast %244 : vector<1x128xf32> to vector<128xf32>
    %246 = vector.shape_cast %245 : vector<128xf32> to vector<1x1x1x128xf32>
    %247 = vector.broadcast %246 : vector<1x1x1x128xf32> to vector<1x8x16x128xf32>
    %248 = arith.mulf %243, %247 : vector<1x8x16x128xf32>
    %249 = arith.addf %242, %248 : vector<1x8x16x128xf32>
    %250 = vector.shape_cast %249 : vector<1x8x16x128xf32> to vector<128x128xf32>
    %cst_175 = arith.constant dense<0.000000e+00> : vector<128xf32>
    %251 = vector.multi_reduction <add>, %250, %cst_175 [0] : vector<128x128xf32> to vector<128xf32>
    %252 = vector.shape_cast %251 : vector<128xf32> to vector<1x128xf32>
    %253 = arith.addf %182, %252 : vector<1x128xf32>
    %254 = arith.mulf %250, %250 : vector<128x128xf32>
    %cst_176 = arith.constant dense<0.000000e+00> : vector<128xf32>
    %255 = vector.multi_reduction <add>, %254, %cst_176 [0] : vector<128x128xf32> to vector<128xf32>
    %256 = vector.shape_cast %255 : vector<128xf32> to vector<1x128xf32>
    %257 = arith.addf %186, %256 : vector<1x128xf32>
    %c128_177 = arith.constant 128 : index
    %c0_178 = arith.constant 0 : index
    %258 = vector.load %arg16[%c128_177, %c0_178] : memref<512x128xf32, #tpu.memory_space<vmem>>, vector<128x128xf32>
    tpu.vector_store %arg16[%c128_177, %c0_178], %250 {strides = array<i32>} : memref<512x128xf32, #tpu.memory_space<vmem>>, vector<128x128xf32>,
    %c1_179 = arith.constant 1 : index
    %c0_180 = arith.constant 0 : index
    %c0_181 = arith.constant 0 : index
    %c0_182 = arith.constant 0 : index
    %259 = vector.load %arg15[%c1_179, %c0_180, %c0_181, %c0_182] : memref<2x18x24x128xf32, #tpu.memory_space<vmem>>, vector<1x8x16x128xf32>
    %260 = vector.extract_strided_slice %6 {offsets = [0, 0], sizes = [1, 128], strides = [1, 1]} : vector<9x128xf32> to vector<1x128xf32>
    %261 = vector.shape_cast %260 : vector<1x128xf32> to vector<128xf32>
    %262 = vector.shape_cast %261 : vector<128xf32> to vector<1x1x1x128xf32>
    %263 = vector.broadcast %262 : vector<1x1x1x128xf32> to vector<1x8x16x128xf32>
    %264 = arith.mulf %259, %263 : vector<1x8x16x128xf32>
    %c1_183 = arith.constant 1 : index
    %c0_184 = arith.constant 0 : index
    %c1_185 = arith.constant 1 : index
    %c0_186 = arith.constant 0 : index
    %265 = vector.load %arg15[%c1_183, %c0_184, %c1_185, %c0_186] : memref<2x18x24x128xf32, #tpu.memory_space<vmem>>, vector<1x8x16x128xf32>
    %266 = vector.extract_strided_slice %6 {offsets = [1, 0], sizes = [1, 128], strides = [1, 1]} : vector<9x128xf32> to vector<1x128xf32>
    %267 = vector.shape_cast %266 : vector<1x128xf32> to vector<128xf32>
    %268 = vector.shape_cast %267 : vector<128xf32> to vector<1x1x1x128xf32>
    %269 = vector.broadcast %268 : vector<1x1x1x128xf32> to vector<1x8x16x128xf32>
    %270 = arith.mulf %265, %269 : vector<1x8x16x128xf32>
    %271 = arith.addf %264, %270 : vector<1x8x16x128xf32>
    %c1_187 = arith.constant 1 : index
    %c0_188 = arith.constant 0 : index
    %c2_189 = arith.constant 2 : index
    %c0_190 = arith.constant 0 : index
    %272 = vector.load %arg15[%c1_187, %c0_188, %c2_189, %c0_190] : memref<2x18x24x128xf32, #tpu.memory_space<vmem>>, vector<1x8x16x128xf32>
    %273 = vector.extract_strided_slice %6 {offsets = [2, 0], sizes = [1, 128], strides = [1, 1]} : vector<9x128xf32> to vector<1x128xf32>
    %274 = vector.shape_cast %273 : vector<1x128xf32> to vector<128xf32>
    %275 = vector.shape_cast %274 : vector<128xf32> to vector<1x1x1x128xf32>
    %276 = vector.broadcast %275 : vector<1x1x1x128xf32> to vector<1x8x16x128xf32>
    %277 = arith.mulf %272, %276 : vector<1x8x16x128xf32>
    %278 = arith.addf %271, %277 : vector<1x8x16x128xf32>
    %c1_191 = arith.constant 1 : index
    %c1_192 = arith.constant 1 : index
    %c0_193 = arith.constant 0 : index
    %c0_194 = arith.constant 0 : index
    %279 = vector.load %arg15[%c1_191, %c1_192, %c0_193, %c0_194] : memref<2x18x24x128xf32, #tpu.memory_space<vmem>>, vector<1x8x16x128xf32>
    %280 = vector.extract_strided_slice %6 {offsets = [3, 0], sizes = [1, 128], strides = [1, 1]} : vector<9x128xf32> to vector<1x128xf32>
    %281 = vector.shape_cast %280 : vector<1x128xf32> to vector<128xf32>
    %282 = vector.shape_cast %281 : vector<128xf32> to vector<1x1x1x128xf32>
    %283 = vector.broadcast %282 : vector<1x1x1x128xf32> to vector<1x8x16x128xf32>
    %284 = arith.mulf %279, %283 : vector<1x8x16x128xf32>
    %285 = arith.addf %278, %284 : vector<1x8x16x128xf32>
    %c1_195 = arith.constant 1 : index
    %c1_196 = arith.constant 1 : index
    %c1_197 = arith.constant 1 : index
    %c0_198 = arith.constant 0 : index
    %286 = vector.load %arg15[%c1_195, %c1_196, %c1_197, %c0_198] : memref<2x18x24x128xf32, #tpu.memory_space<vmem>>, vector<1x8x16x128xf32>
    %287 = vector.extract_strided_slice %6 {offsets = [4, 0], sizes = [1, 128], strides = [1, 1]} : vector<9x128xf32> to vector<1x128xf32>
    %288 = vector.shape_cast %287 : vector<1x128xf32> to vector<128xf32>
    %289 = vector.shape_cast %288 : vector<128xf32> to vector<1x1x1x128xf32>
    %290 = vector.broadcast %289 : vector<1x1x1x128xf32> to vector<1x8x16x128xf32>
    %291 = arith.mulf %286, %290 : vector<1x8x16x128xf32>
    %292 = arith.addf %285, %291 : vector<1x8x16x128xf32>
    %c1_199 = arith.constant 1 : index
    %c1_200 = arith.constant 1 : index
    %c2_201 = arith.constant 2 : index
    %c0_202 = arith.constant 0 : index
    %293 = vector.load %arg15[%c1_199, %c1_200, %c2_201, %c0_202] : memref<2x18x24x128xf32, #tpu.memory_space<vmem>>, vector<1x8x16x128xf32>
    %294 = vector.extract_strided_slice %6 {offsets = [5, 0], sizes = [1, 128], strides = [1, 1]} : vector<9x128xf32> to vector<1x128xf32>
    %295 = vector.shape_cast %294 : vector<1x128xf32> to vector<128xf32>
    %296 = vector.shape_cast %295 : vector<128xf32> to vector<1x1x1x128xf32>
    %297 = vector.broadcast %296 : vector<1x1x1x128xf32> to vector<1x8x16x128xf32>
    %298 = arith.mulf %293, %297 : vector<1x8x16x128xf32>
    %299 = arith.addf %292, %298 : vector<1x8x16x128xf32>
    %c1_203 = arith.constant 1 : index
    %c2_204 = arith.constant 2 : index
    %c0_205 = arith.constant 0 : index
    %c0_206 = arith.constant 0 : index
    %300 = vector.load %arg15[%c1_203, %c2_204, %c0_205, %c0_206] : memref<2x18x24x128xf32, #tpu.memory_space<vmem>>, vector<1x8x16x128xf32>
    %301 = vector.extract_strided_slice %6 {offsets = [6, 0], sizes = [1, 128], strides = [1, 1]} : vector<9x128xf32> to vector<1x128xf32>
    %302 = vector.shape_cast %301 : vector<1x128xf32> to vector<128xf32>
    %303 = vector.shape_cast %302 : vector<128xf32> to vector<1x1x1x128xf32>
    %304 = vector.broadcast %303 : vector<1x1x1x128xf32> to vector<1x8x16x128xf32>
    %305 = arith.mulf %300, %304 : vector<1x8x16x128xf32>
    %306 = arith.addf %299, %305 : vector<1x8x16x128xf32>
    %c1_207 = arith.constant 1 : index
    %c2_208 = arith.constant 2 : index
    %c1_209 = arith.constant 1 : index
    %c0_210 = arith.constant 0 : index
    %307 = vector.load %arg15[%c1_207, %c2_208, %c1_209, %c0_210] : memref<2x18x24x128xf32, #tpu.memory_space<vmem>>, vector<1x8x16x128xf32>
    %308 = vector.extract_strided_slice %6 {offsets = [7, 0], sizes = [1, 128], strides = [1, 1]} : vector<9x128xf32> to vector<1x128xf32>
    %309 = vector.shape_cast %308 : vector<1x128xf32> to vector<128xf32>
    %310 = vector.shape_cast %309 : vector<128xf32> to vector<1x1x1x128xf32>
    %311 = vector.broadcast %310 : vector<1x1x1x128xf32> to vector<1x8x16x128xf32>
    %312 = arith.mulf %307, %311 : vector<1x8x16x128xf32>
    %313 = arith.addf %306, %312 : vector<1x8x16x128xf32>
    %c1_211 = arith.constant 1 : index
    %c2_212 = arith.constant 2 : index
    %c2_213 = arith.constant 2 : index
    %c0_214 = arith.constant 0 : index
    %314 = vector.load %arg15[%c1_211, %c2_212, %c2_213, %c0_214] : memref<2x18x24x128xf32, #tpu.memory_space<vmem>>, vector<1x8x16x128xf32>
    %315 = vector.extract_strided_slice %6 {offsets = [8, 0], sizes = [1, 128], strides = [1, 1]} : vector<9x128xf32> to vector<1x128xf32>
    %316 = vector.shape_cast %315 : vector<1x128xf32> to vector<128xf32>
    %317 = vector.shape_cast %316 : vector<128xf32> to vector<1x1x1x128xf32>
    %318 = vector.broadcast %317 : vector<1x1x1x128xf32> to vector<1x8x16x128xf32>
    %319 = arith.mulf %314, %318 : vector<1x8x16x128xf32>
    %320 = arith.addf %313, %319 : vector<1x8x16x128xf32>
    %321 = vector.shape_cast %320 : vector<1x8x16x128xf32> to vector<128x128xf32>
    %cst_215 = arith.constant dense<0.000000e+00> : vector<128xf32>
    %322 = vector.multi_reduction <add>, %321, %cst_215 [0] : vector<128x128xf32> to vector<128xf32>
    %323 = vector.shape_cast %322 : vector<128xf32> to vector<1x128xf32>
    %324 = arith.addf %253, %323 : vector<1x128xf32>
    %325 = arith.mulf %321, %321 : vector<128x128xf32>
    %cst_216 = arith.constant dense<0.000000e+00> : vector<128xf32>
    %326 = vector.multi_reduction <add>, %325, %cst_216 [0] : vector<128x128xf32> to vector<128xf32>
    %327 = vector.shape_cast %326 : vector<128xf32> to vector<1x128xf32>
    %328 = arith.addf %257, %327 : vector<1x128xf32>
    %c256_217 = arith.constant 256 : index
    %c0_218 = arith.constant 0 : index
    %329 = vector.load %arg16[%c256_217, %c0_218] : memref<512x128xf32, #tpu.memory_space<vmem>>, vector<128x128xf32>
    tpu.vector_store %arg16[%c256_217, %c0_218], %321 {strides = array<i32>} : memref<512x128xf32, #tpu.memory_space<vmem>>, vector<128x128xf32>,
    %c1_219 = arith.constant 1 : index
    %c8_220 = arith.constant 8 : index
    %c0_221 = arith.constant 0 : index
    %c0_222 = arith.constant 0 : index
    %330 = vector.load %arg15[%c1_219, %c8_220, %c0_221, %c0_222] : memref<2x18x24x128xf32, #tpu.memory_space<vmem>>, vector<1x8x16x128xf32>
    %331 = vector.extract_strided_slice %6 {offsets = [0, 0], sizes = [1, 128], strides = [1, 1]} : vector<9x128xf32> to vector<1x128xf32>
    %332 = vector.shape_cast %331 : vector<1x128xf32> to vector<128xf32>
    %333 = vector.shape_cast %332 : vector<128xf32> to vector<1x1x1x128xf32>
    %334 = vector.broadcast %333 : vector<1x1x1x128xf32> to vector<1x8x16x128xf32>
    %335 = arith.mulf %330, %334 : vector<1x8x16x128xf32>
    %c1_223 = arith.constant 1 : index
    %c8_224 = arith.constant 8 : index
    %c1_225 = arith.constant 1 : index
    %c0_226 = arith.constant 0 : index
    %336 = vector.load %arg15[%c1_223, %c8_224, %c1_225, %c0_226] : memref<2x18x24x128xf32, #tpu.memory_space<vmem>>, vector<1x8x16x128xf32>
    %337 = vector.extract_strided_slice %6 {offsets = [1, 0], sizes = [1, 128], strides = [1, 1]} : vector<9x128xf32> to vector<1x128xf32>
    %338 = vector.shape_cast %337 : vector<1x128xf32> to vector<128xf32>
    %339 = vector.shape_cast %338 : vector<128xf32> to vector<1x1x1x128xf32>
    %340 = vector.broadcast %339 : vector<1x1x1x128xf32> to vector<1x8x16x128xf32>
    %341 = arith.mulf %336, %340 : vector<1x8x16x128xf32>
    %342 = arith.addf %335, %341 : vector<1x8x16x128xf32>
    %c1_227 = arith.constant 1 : index
    %c8_228 = arith.constant 8 : index
    %c2_229 = arith.constant 2 : index
    %c0_230 = arith.constant 0 : index
    %343 = vector.load %arg15[%c1_227, %c8_228, %c2_229, %c0_230] : memref<2x18x24x128xf32, #tpu.memory_space<vmem>>, vector<1x8x16x128xf32>
    %344 = vector.extract_strided_slice %6 {offsets = [2, 0], sizes = [1, 128], strides = [1, 1]} : vector<9x128xf32> to vector<1x128xf32>
    %345 = vector.shape_cast %344 : vector<1x128xf32> to vector<128xf32>
    %346 = vector.shape_cast %345 : vector<128xf32> to vector<1x1x1x128xf32>
    %347 = vector.broadcast %346 : vector<1x1x1x128xf32> to vector<1x8x16x128xf32>
    %348 = arith.mulf %343, %347 : vector<1x8x16x128xf32>
    %349 = arith.addf %342, %348 : vector<1x8x16x128xf32>
    %c1_231 = arith.constant 1 : index
    %c9_232 = arith.constant 9 : index
    %c0_233 = arith.constant 0 : index
    %c0_234 = arith.constant 0 : index
    %350 = vector.load %arg15[%c1_231, %c9_232, %c0_233, %c0_234] : memref<2x18x24x128xf32, #tpu.memory_space<vmem>>, vector<1x8x16x128xf32>
    %351 = vector.extract_strided_slice %6 {offsets = [3, 0], sizes = [1, 128], strides = [1, 1]} : vector<9x128xf32> to vector<1x128xf32>
    %352 = vector.shape_cast %351 : vector<1x128xf32> to vector<128xf32>
    %353 = vector.shape_cast %352 : vector<128xf32> to vector<1x1x1x128xf32>
    %354 = vector.broadcast %353 : vector<1x1x1x128xf32> to vector<1x8x16x128xf32>
    %355 = arith.mulf %350, %354 : vector<1x8x16x128xf32>
    %356 = arith.addf %349, %355 : vector<1x8x16x128xf32>
    %c1_235 = arith.constant 1 : index
    %c9_236 = arith.constant 9 : index
    %c1_237 = arith.constant 1 : index
    %c0_238 = arith.constant 0 : index
    %357 = vector.load %arg15[%c1_235, %c9_236, %c1_237, %c0_238] : memref<2x18x24x128xf32, #tpu.memory_space<vmem>>, vector<1x8x16x128xf32>
    %358 = vector.extract_strided_slice %6 {offsets = [4, 0], sizes = [1, 128], strides = [1, 1]} : vector<9x128xf32> to vector<1x128xf32>
    %359 = vector.shape_cast %358 : vector<1x128xf32> to vector<128xf32>
    %360 = vector.shape_cast %359 : vector<128xf32> to vector<1x1x1x128xf32>
    %361 = vector.broadcast %360 : vector<1x1x1x128xf32> to vector<1x8x16x128xf32>
    %362 = arith.mulf %357, %361 : vector<1x8x16x128xf32>
    %363 = arith.addf %356, %362 : vector<1x8x16x128xf32>
    %c1_239 = arith.constant 1 : index
    %c9_240 = arith.constant 9 : index
    %c2_241 = arith.constant 2 : index
    %c0_242 = arith.constant 0 : index
    %364 = vector.load %arg15[%c1_239, %c9_240, %c2_241, %c0_242] : memref<2x18x24x128xf32, #tpu.memory_space<vmem>>, vector<1x8x16x128xf32>
    %365 = vector.extract_strided_slice %6 {offsets = [5, 0], sizes = [1, 128], strides = [1, 1]} : vector<9x128xf32> to vector<1x128xf32>
    %366 = vector.shape_cast %365 : vector<1x128xf32> to vector<128xf32>
    %367 = vector.shape_cast %366 : vector<128xf32> to vector<1x1x1x128xf32>
    %368 = vector.broadcast %367 : vector<1x1x1x128xf32> to vector<1x8x16x128xf32>
    %369 = arith.mulf %364, %368 : vector<1x8x16x128xf32>
    %370 = arith.addf %363, %369 : vector<1x8x16x128xf32>
    %c1_243 = arith.constant 1 : index
    %c10_244 = arith.constant 10 : index
    %c0_245 = arith.constant 0 : index
    %c0_246 = arith.constant 0 : index
    %371 = vector.load %arg15[%c1_243, %c10_244, %c0_245, %c0_246] : memref<2x18x24x128xf32, #tpu.memory_space<vmem>>, vector<1x8x16x128xf32>
    %372 = vector.extract_strided_slice %6 {offsets = [6, 0], sizes = [1, 128], strides = [1, 1]} : vector<9x128xf32> to vector<1x128xf32>
    %373 = vector.shape_cast %372 : vector<1x128xf32> to vector<128xf32>
    %374 = vector.shape_cast %373 : vector<128xf32> to vector<1x1x1x128xf32>
    %375 = vector.broadcast %374 : vector<1x1x1x128xf32> to vector<1x8x16x128xf32>
    %376 = arith.mulf %371, %375 : vector<1x8x16x128xf32>
    %377 = arith.addf %370, %376 : vector<1x8x16x128xf32>
    %c1_247 = arith.constant 1 : index
    %c10_248 = arith.constant 10 : index
    %c1_249 = arith.constant 1 : index
    %c0_250 = arith.constant 0 : index
    %378 = vector.load %arg15[%c1_247, %c10_248, %c1_249, %c0_250] : memref<2x18x24x128xf32, #tpu.memory_space<vmem>>, vector<1x8x16x128xf32>
    %379 = vector.extract_strided_slice %6 {offsets = [7, 0], sizes = [1, 128], strides = [1, 1]} : vector<9x128xf32> to vector<1x128xf32>
    %380 = vector.shape_cast %379 : vector<1x128xf32> to vector<128xf32>
    %381 = vector.shape_cast %380 : vector<128xf32> to vector<1x1x1x128xf32>
    %382 = vector.broadcast %381 : vector<1x1x1x128xf32> to vector<1x8x16x128xf32>
    %383 = arith.mulf %378, %382 : vector<1x8x16x128xf32>
    %384 = arith.addf %377, %383 : vector<1x8x16x128xf32>
    %c1_251 = arith.constant 1 : index
    %c10_252 = arith.constant 10 : index
    %c2_253 = arith.constant 2 : index
    %c0_254 = arith.constant 0 : index
    %385 = vector.load %arg15[%c1_251, %c10_252, %c2_253, %c0_254] : memref<2x18x24x128xf32, #tpu.memory_space<vmem>>, vector<1x8x16x128xf32>
    %386 = vector.extract_strided_slice %6 {offsets = [8, 0], sizes = [1, 128], strides = [1, 1]} : vector<9x128xf32> to vector<1x128xf32>
    %387 = vector.shape_cast %386 : vector<1x128xf32> to vector<128xf32>
    %388 = vector.shape_cast %387 : vector<128xf32> to vector<1x1x1x128xf32>
    %389 = vector.broadcast %388 : vector<1x1x1x128xf32> to vector<1x8x16x128xf32>
    %390 = arith.mulf %385, %389 : vector<1x8x16x128xf32>
    %391 = arith.addf %384, %390 : vector<1x8x16x128xf32>
    %392 = vector.shape_cast %391 : vector<1x8x16x128xf32> to vector<128x128xf32>
    %cst_255 = arith.constant dense<0.000000e+00> : vector<128xf32>
    %393 = vector.multi_reduction <add>, %392, %cst_255 [0] : vector<128x128xf32> to vector<128xf32>
    %394 = vector.shape_cast %393 : vector<128xf32> to vector<1x128xf32>
    %395 = arith.addf %324, %394 : vector<1x128xf32>
    %396 = arith.mulf %392, %392 : vector<128x128xf32>
    %cst_256 = arith.constant dense<0.000000e+00> : vector<128xf32>
    %397 = vector.multi_reduction <add>, %396, %cst_256 [0] : vector<128x128xf32> to vector<128xf32>
    %398 = vector.shape_cast %397 : vector<128xf32> to vector<1x128xf32>
    %399 = arith.addf %328, %398 : vector<1x128xf32>
    %c384_257 = arith.constant 384 : index
    %c0_258 = arith.constant 0 : index
    %400 = vector.load %arg16[%c384_257, %c0_258] : memref<512x128xf32, #tpu.memory_space<vmem>>, vector<128x128xf32>
    tpu.vector_store %arg16[%c384_257, %c0_258], %392 {strides = array<i32>} : memref<512x128xf32, #tpu.memory_space<vmem>>, vector<128x128xf32>,
    %cst_259 = arith.constant 0.001953125 : f32
    %401 = vector.broadcast %cst_259 : f32 to vector<1x128xf32>
    %402 = arith.mulf %395, %401 : vector<1x128xf32>
    %cst_260 = arith.constant 0.001953125 : f32
    %403 = vector.broadcast %cst_260 : f32 to vector<1x128xf32>
    %404 = arith.mulf %399, %403 : vector<1x128xf32>
    %405 = arith.mulf %402, %402 : vector<1x128xf32>
    %406 = arith.subf %404, %405 : vector<1x128xf32>
    %cst_261 = arith.constant 0.000000e+00 : f32
    %407 = vector.broadcast %cst_261 : f32 to vector<1x128xf32>
    %408 = arith.maximumf %406, %407 : vector<1x128xf32>
    %cst_262 = arith.constant 9.99999974E-6 : f32
    %409 = vector.broadcast %cst_262 : f32 to vector<1x128xf32>
    %410 = arith.addf %408, %409 : vector<1x128xf32>
    %411 = math.rsqrt %410 : vector<1x128xf32>
    %412 = arith.mulf %411, %2 : vector<1x128xf32>
    %413 = arith.mulf %402, %412 : vector<1x128xf32>
    %414 = arith.subf %3, %413 : vector<1x128xf32>
    %cst_263 = arith.constant 0.000000e+00 : f32
    %415 = vector.broadcast %cst_263 : f32 to vector<1x128xf32>
    %c0_264 = arith.constant 0 : index
    %c0_265 = arith.constant 0 : index
    %416 = vector.load %arg16[%c0_264, %c0_265] : memref<512x128xf32, #tpu.memory_space<vmem>>, vector<128x128xf32>
    %417 = vector.broadcast %412 : vector<1x128xf32> to vector<128x128xf32>
    %418 = arith.mulf %416, %417 : vector<128x128xf32>
    %419 = vector.broadcast %414 : vector<1x128xf32> to vector<128x128xf32>
    %420 = arith.addf %418, %419 : vector<128x128xf32>
    %cst_266 = arith.constant 0.000000e+00 : f32
    %421 = vector.broadcast %cst_266 : f32 to vector<128x128xf32>
    %422 = arith.maximumf %420, %421 : vector<128x128xf32>
    %cst_267 = arith.constant dense<0.000000e+00> : vector<128xf32>
    %423 = vector.multi_reduction <add>, %422, %cst_267 [0] : vector<128x128xf32> to vector<128xf32>
    %424 = vector.shape_cast %423 : vector<128xf32> to vector<1x128xf32>
    %425 = arith.addf %415, %424 : vector<1x128xf32>
    %c128_268 = arith.constant 128 : index
    %c0_269 = arith.constant 0 : index
    %426 = vector.load %arg16[%c128_268, %c0_269] : memref<512x128xf32, #tpu.memory_space<vmem>>, vector<128x128xf32>
    %427 = vector.broadcast %412 : vector<1x128xf32> to vector<128x128xf32>
    %428 = arith.mulf %426, %427 : vector<128x128xf32>
    %429 = vector.broadcast %414 : vector<1x128xf32> to vector<128x128xf32>
    %430 = arith.addf %428, %429 : vector<128x128xf32>
    %cst_270 = arith.constant 0.000000e+00 : f32
    %431 = vector.broadcast %cst_270 : f32 to vector<128x128xf32>
    %432 = arith.maximumf %430, %431 : vector<128x128xf32>
    %cst_271 = arith.constant dense<0.000000e+00> : vector<128xf32>
    %433 = vector.multi_reduction <add>, %432, %cst_271 [0] : vector<128x128xf32> to vector<128xf32>
    %434 = vector.shape_cast %433 : vector<128xf32> to vector<1x128xf32>
    %435 = arith.addf %425, %434 : vector<1x128xf32>
    %cst_272 = arith.constant 3.906250e-03 : f32
    %436 = vector.broadcast %cst_272 : f32 to vector<1x128xf32>
    %437 = arith.mulf %435, %436 : vector<1x128xf32>
    %cst_273 = arith.constant 0.000000e+00 : f32
    %438 = vector.broadcast %cst_273 : f32 to vector<1x128xf32>
    %c256_274 = arith.constant 256 : index
    %c0_275 = arith.constant 0 : index
    %439 = vector.load %arg16[%c256_274, %c0_275] : memref<512x128xf32, #tpu.memory_space<vmem>>, vector<128x128xf32>
    %440 = vector.broadcast %412 : vector<1x128xf32> to vector<128x128xf32>
    %441 = arith.mulf %439, %440 : vector<128x128xf32>
    %442 = vector.broadcast %414 : vector<1x128xf32> to vector<128x128xf32>
    %443 = arith.addf %441, %442 : vector<128x128xf32>
    %cst_276 = arith.constant 0.000000e+00 : f32
    %444 = vector.broadcast %cst_276 : f32 to vector<128x128xf32>
    %445 = arith.maximumf %443, %444 : vector<128x128xf32>
    %cst_277 = arith.constant dense<0.000000e+00> : vector<128xf32>
    %446 = vector.multi_reduction <add>, %445, %cst_277 [0] : vector<128x128xf32> to vector<128xf32>
    %447 = vector.shape_cast %446 : vector<128xf32> to vector<1x128xf32>
    %448 = arith.addf %438, %447 : vector<1x128xf32>
    %c384_278 = arith.constant 384 : index
    %c0_279 = arith.constant 0 : index
    %449 = vector.load %arg16[%c384_278, %c0_279] : memref<512x128xf32, #tpu.memory_space<vmem>>, vector<128x128xf32>
    %450 = vector.broadcast %412 : vector<1x128xf32> to vector<128x128xf32>
    %451 = arith.mulf %449, %450 : vector<128x128xf32>
    %452 = vector.broadcast %414 : vector<1x128xf32> to vector<128x128xf32>
    %453 = arith.addf %451, %452 : vector<128x128xf32>
    %cst_280 = arith.constant 0.000000e+00 : f32
    %454 = vector.broadcast %cst_280 : f32 to vector<128x128xf32>
    %455 = arith.maximumf %453, %454 : vector<128x128xf32>
    %cst_281 = arith.constant dense<0.000000e+00> : vector<128xf32>
    %456 = vector.multi_reduction <add>, %455, %cst_281 [0] : vector<128x128xf32> to vector<128xf32>
    %457 = vector.shape_cast %456 : vector<128xf32> to vector<1x128xf32>
    %458 = arith.addf %448, %457 : vector<1x128xf32>
    %cst_282 = arith.constant 3.906250e-03 : f32
    %459 = vector.broadcast %cst_282 : f32 to vector<1x128xf32>
    %460 = arith.mulf %458, %459 : vector<1x128xf32>
    %461 = tpu.concatenate %437, %460 in 0 : vector<1x128xf32>, vector<1x128xf32> -> vector<2x128xf32>
    %c0_283 = arith.constant 0 : index
    %c0_284 = arith.constant 0 : index
    %462 = vector.load %arg7[%c0_283, %c0_284] : memref<128x128xf32, #tpu.memory_space<vmem>>, vector<128x128xf32>
    %cst_285 = arith.constant dense<0.000000e+00> : vector<2x128xf32>
    %463 = tpu.matmul %461, %462, %cst_285 {dimension_numbers = #tpu.dot_dimension_numbers<[1], [0], [0], [1], [0, 0, 1, 1], [], []>} : vector<2x128xf32>, vector<128x128xf32>, vector<2x128xf32> -> vector<2x128xf32>
    %c0_286 = arith.constant 0 : index
    %c0_287 = arith.constant 0 : index
    %464 = vector.load %arg8[%c0_286, %c0_287] : memref<1x128xf32, #tpu.memory_space<vmem>>, vector<1x128xf32>
    %465 = vector.broadcast %464 : vector<1x128xf32> to vector<2x128xf32>
    %466 = arith.addf %463, %465 : vector<2x128xf32>
    %cst_288 = arith.constant 0.000000e+00 : f32
    %467 = vector.broadcast %cst_288 : f32 to vector<2x128xf32>
    %468 = arith.maximumf %466, %467 : vector<2x128xf32>
    %c0_289 = arith.constant 0 : index
    %c0_290 = arith.constant 0 : index
    %469 = vector.load %arg9[%c0_289, %c0_290] : memref<128x128xf32, #tpu.memory_space<vmem>>, vector<128x128xf32>
    %cst_291 = arith.constant dense<0.000000e+00> : vector<2x128xf32>
    %470 = tpu.matmul %468, %469, %cst_291 {dimension_numbers = #tpu.dot_dimension_numbers<[1], [0], [0], [1], [0, 0, 1, 1], [], []>} : vector<2x128xf32>, vector<128x128xf32>, vector<2x128xf32> -> vector<2x128xf32>
    %c0_292 = arith.constant 0 : index
    %c0_293 = arith.constant 0 : index
    %471 = vector.load %arg10[%c0_292, %c0_293] : memref<1x128xf32, #tpu.memory_space<vmem>>, vector<1x128xf32>
    %472 = vector.broadcast %471 : vector<1x128xf32> to vector<2x128xf32>
    %473 = arith.addf %470, %472 : vector<2x128xf32>
    %cst_294 = arith.constant 3.000000e+00 : f32
    %474 = vector.broadcast %cst_294 : f32 to vector<2x128xf32>
    %475 = arith.addf %473, %474 : vector<2x128xf32>
    %cst_295 = arith.constant 0.000000e+00 : f32
    %cst_296 = arith.constant 6.000000e+00 : f32
    %476 = vector.broadcast %cst_295 : f32 to vector<2x128xf32>
    %477 = arith.maximumf %476, %475 : vector<2x128xf32>
    %478 = vector.broadcast %cst_296 : f32 to vector<2x128xf32>
    %479 = arith.minimumf %478, %477 : vector<2x128xf32>
    %cst_297 = arith.constant 0.166666672 : f32
    %480 = vector.broadcast %cst_297 : f32 to vector<2x128xf32>
    %481 = arith.mulf %479, %480 : vector<2x128xf32>
    %cst_298 = arith.constant 0.000000e+00 : f32
    %482 = vector.broadcast %cst_298 : f32 to vector<1x128xf32>
    %cst_299 = arith.constant 0.000000e+00 : f32
    %483 = vector.broadcast %cst_299 : f32 to vector<1x128xf32>
    %c0_300 = arith.constant 0 : index
    %c0_301 = arith.constant 0 : index
    %484 = vector.load %arg16[%c0_300, %c0_301] : memref<512x128xf32, #tpu.memory_space<vmem>>, vector<128x128xf32>
    %485 = vector.broadcast %412 : vector<1x128xf32> to vector<128x128xf32>
    %486 = arith.mulf %484, %485 : vector<128x128xf32>
    %487 = vector.broadcast %414 : vector<1x128xf32> to vector<128x128xf32>
    %488 = arith.addf %486, %487 : vector<128x128xf32>
    %cst_302 = arith.constant 0.000000e+00 : f32
    %489 = vector.broadcast %cst_302 : f32 to vector<128x128xf32>
    %490 = arith.maximumf %488, %489 : vector<128x128xf32>
    %491 = vector.extract_strided_slice %481 {offsets = [0, 0], sizes = [1, 128], strides = [1, 1]} : vector<2x128xf32> to vector<1x128xf32>
    %492 = vector.broadcast %491 : vector<1x128xf32> to vector<128x128xf32>
    %493 = arith.mulf %490, %492 : vector<128x128xf32>
    %c0_303 = arith.constant 0 : index
    %c0_304 = arith.constant 0 : index
    %494 = vector.load %arg11[%c0_303, %c0_304] : memref<128x128xf32, #tpu.memory_space<vmem>>, vector<128x128xf32>
    %cst_305 = arith.constant dense<0.000000e+00> : vector<128x128xf32>
    %495 = tpu.matmul %493, %494, %cst_305 {dimension_numbers = #tpu.dot_dimension_numbers<[1], [0], [0], [1], [0, 0, 1, 1], [], []>} : vector<128x128xf32>, vector<128x128xf32>, vector<128x128xf32> -> vector<128x128xf32>
    %cst_306 = arith.constant dense<0.000000e+00> : vector<128xf32>
    %496 = vector.multi_reduction <add>, %495, %cst_306 [0] : vector<128x128xf32> to vector<128xf32>
    %497 = vector.shape_cast %496 : vector<128xf32> to vector<1x128xf32>
    %498 = arith.addf %482, %497 : vector<1x128xf32>
    %499 = arith.mulf %495, %495 : vector<128x128xf32>
    %cst_307 = arith.constant dense<0.000000e+00> : vector<128xf32>
    %500 = vector.multi_reduction <add>, %499, %cst_307 [0] : vector<128x128xf32> to vector<128xf32>
    %501 = vector.shape_cast %500 : vector<128xf32> to vector<1x128xf32>
    %502 = arith.addf %483, %501 : vector<1x128xf32>
    %c128_308 = arith.constant 128 : index
    %c0_309 = arith.constant 0 : index
    %503 = vector.load %arg16[%c128_308, %c0_309] : memref<512x128xf32, #tpu.memory_space<vmem>>, vector<128x128xf32>
    %504 = vector.broadcast %412 : vector<1x128xf32> to vector<128x128xf32>
    %505 = arith.mulf %503, %504 : vector<128x128xf32>
    %506 = vector.broadcast %414 : vector<1x128xf32> to vector<128x128xf32>
    %507 = arith.addf %505, %506 : vector<128x128xf32>
    %cst_310 = arith.constant 0.000000e+00 : f32
    %508 = vector.broadcast %cst_310 : f32 to vector<128x128xf32>
    %509 = arith.maximumf %507, %508 : vector<128x128xf32>
    %510 = vector.extract_strided_slice %481 {offsets = [0, 0], sizes = [1, 128], strides = [1, 1]} : vector<2x128xf32> to vector<1x128xf32>
    %511 = vector.broadcast %510 : vector<1x128xf32> to vector<128x128xf32>
    %512 = arith.mulf %509, %511 : vector<128x128xf32>
    %c0_311 = arith.constant 0 : index
    %c0_312 = arith.constant 0 : index
    %513 = vector.load %arg11[%c0_311, %c0_312] : memref<128x128xf32, #tpu.memory_space<vmem>>, vector<128x128xf32>
    %cst_313 = arith.constant dense<0.000000e+00> : vector<128x128xf32>
    %514 = tpu.matmul %512, %513, %cst_313 {dimension_numbers = #tpu.dot_dimension_numbers<[1], [0], [0], [1], [0, 0, 1, 1], [], []>} : vector<128x128xf32>, vector<128x128xf32>, vector<128x128xf32> -> vector<128x128xf32>
    %cst_314 = arith.constant dense<0.000000e+00> : vector<128xf32>
    %515 = vector.multi_reduction <add>, %514, %cst_314 [0] : vector<128x128xf32> to vector<128xf32>
    %516 = vector.shape_cast %515 : vector<128xf32> to vector<1x128xf32>
    %517 = arith.addf %498, %516 : vector<1x128xf32>
    %518 = arith.mulf %514, %514 : vector<128x128xf32>
    %cst_315 = arith.constant dense<0.000000e+00> : vector<128xf32>
    %519 = vector.multi_reduction <add>, %518, %cst_315 [0] : vector<128x128xf32> to vector<128xf32>
    %520 = vector.shape_cast %519 : vector<128xf32> to vector<1x128xf32>
    %521 = arith.addf %502, %520 : vector<1x128xf32>
    %c256_316 = arith.constant 256 : index
    %c0_317 = arith.constant 0 : index
    %522 = vector.load %arg16[%c256_316, %c0_317] : memref<512x128xf32, #tpu.memory_space<vmem>>, vector<128x128xf32>
    %523 = vector.broadcast %412 : vector<1x128xf32> to vector<128x128xf32>
    %524 = arith.mulf %522, %523 : vector<128x128xf32>
    %525 = vector.broadcast %414 : vector<1x128xf32> to vector<128x128xf32>
    %526 = arith.addf %524, %525 : vector<128x128xf32>
    %cst_318 = arith.constant 0.000000e+00 : f32
    %527 = vector.broadcast %cst_318 : f32 to vector<128x128xf32>
    %528 = arith.maximumf %526, %527 : vector<128x128xf32>
    %529 = vector.extract_strided_slice %481 {offsets = [1, 0], sizes = [1, 128], strides = [1, 1]} : vector<2x128xf32> to vector<1x128xf32>
    %530 = vector.broadcast %529 : vector<1x128xf32> to vector<128x128xf32>
    %531 = arith.mulf %528, %530 : vector<128x128xf32>
    %c0_319 = arith.constant 0 : index
    %c0_320 = arith.constant 0 : index
    %532 = vector.load %arg11[%c0_319, %c0_320] : memref<128x128xf32, #tpu.memory_space<vmem>>, vector<128x128xf32>
    %cst_321 = arith.constant dense<0.000000e+00> : vector<128x128xf32>
    %533 = tpu.matmul %531, %532, %cst_321 {dimension_numbers = #tpu.dot_dimension_numbers<[1], [0], [0], [1], [0, 0, 1, 1], [], []>} : vector<128x128xf32>, vector<128x128xf32>, vector<128x128xf32> -> vector<128x128xf32>
    %cst_322 = arith.constant dense<0.000000e+00> : vector<128xf32>
    %534 = vector.multi_reduction <add>, %533, %cst_322 [0] : vector<128x128xf32> to vector<128xf32>
    %535 = vector.shape_cast %534 : vector<128xf32> to vector<1x128xf32>
    %536 = arith.addf %517, %535 : vector<1x128xf32>
    %537 = arith.mulf %533, %533 : vector<128x128xf32>
    %cst_323 = arith.constant dense<0.000000e+00> : vector<128xf32>
    %538 = vector.multi_reduction <add>, %537, %cst_323 [0] : vector<128x128xf32> to vector<128xf32>
    %539 = vector.shape_cast %538 : vector<128xf32> to vector<1x128xf32>
    %540 = arith.addf %521, %539 : vector<1x128xf32>
    %c384_324 = arith.constant 384 : index
    %c0_325 = arith.constant 0 : index
    %541 = vector.load %arg16[%c384_324, %c0_325] : memref<512x128xf32, #tpu.memory_space<vmem>>, vector<128x128xf32>
    %542 = vector.broadcast %412 : vector<1x128xf32> to vector<128x128xf32>
    %543 = arith.mulf %541, %542 : vector<128x128xf32>
    %544 = vector.broadcast %414 : vector<1x128xf32> to vector<128x128xf32>
    %545 = arith.addf %543, %544 : vector<128x128xf32>
    %cst_326 = arith.constant 0.000000e+00 : f32
    %546 = vector.broadcast %cst_326 : f32 to vector<128x128xf32>
    %547 = arith.maximumf %545, %546 : vector<128x128xf32>
    %548 = vector.extract_strided_slice %481 {offsets = [1, 0], sizes = [1, 128], strides = [1, 1]} : vector<2x128xf32> to vector<1x128xf32>
    %549 = vector.broadcast %548 : vector<1x128xf32> to vector<128x128xf32>
    %550 = arith.mulf %547, %549 : vector<128x128xf32>
    %c0_327 = arith.constant 0 : index
    %c0_328 = arith.constant 0 : index
    %551 = vector.load %arg11[%c0_327, %c0_328] : memref<128x128xf32, #tpu.memory_space<vmem>>, vector<128x128xf32>
    %cst_329 = arith.constant dense<0.000000e+00> : vector<128x128xf32>
    %552 = tpu.matmul %550, %551, %cst_329 {dimension_numbers = #tpu.dot_dimension_numbers<[1], [0], [0], [1], [0, 0, 1, 1], [], []>} : vector<128x128xf32>, vector<128x128xf32>, vector<128x128xf32> -> vector<128x128xf32>
    %cst_330 = arith.constant dense<0.000000e+00> : vector<128xf32>
    %553 = vector.multi_reduction <add>, %552, %cst_330 [0] : vector<128x128xf32> to vector<128xf32>
    %554 = vector.shape_cast %553 : vector<128xf32> to vector<1x128xf32>
    %555 = arith.addf %536, %554 : vector<1x128xf32>
    %556 = arith.mulf %552, %552 : vector<128x128xf32>
    %cst_331 = arith.constant dense<0.000000e+00> : vector<128xf32>
    %557 = vector.multi_reduction <add>, %556, %cst_331 [0] : vector<128x128xf32> to vector<128xf32>
    %558 = vector.shape_cast %557 : vector<128xf32> to vector<1x128xf32>
    %559 = arith.addf %540, %558 : vector<1x128xf32>
    %cst_332 = arith.constant 0.001953125 : f32
    %560 = vector.broadcast %cst_332 : f32 to vector<1x128xf32>
    %561 = arith.mulf %555, %560 : vector<1x128xf32>
    %cst_333 = arith.constant 0.001953125 : f32
    %562 = vector.broadcast %cst_333 : f32 to vector<1x128xf32>
    %563 = arith.mulf %559, %562 : vector<1x128xf32>
    %564 = arith.mulf %561, %561 : vector<1x128xf32>
    %565 = arith.subf %563, %564 : vector<1x128xf32>
    %cst_334 = arith.constant 0.000000e+00 : f32
    %566 = vector.broadcast %cst_334 : f32 to vector<1x128xf32>
    %567 = arith.maximumf %565, %566 : vector<1x128xf32>
    %cst_335 = arith.constant 9.99999974E-6 : f32
    %568 = vector.broadcast %cst_335 : f32 to vector<1x128xf32>
    %569 = arith.addf %567, %568 : vector<1x128xf32>
    %570 = math.rsqrt %569 : vector<1x128xf32>
    %571 = arith.mulf %570, %4 : vector<1x128xf32>
    %572 = arith.mulf %561, %571 : vector<1x128xf32>
    %573 = arith.subf %5, %572 : vector<1x128xf32>
    %c0_336 = arith.constant 0 : index
    %c0_337 = arith.constant 0 : index
    %574 = vector.load %arg16[%c0_336, %c0_337] : memref<512x128xf32, #tpu.memory_space<vmem>>, vector<128x128xf32>
    %575 = vector.broadcast %412 : vector<1x128xf32> to vector<128x128xf32>
    %576 = arith.mulf %574, %575 : vector<128x128xf32>
    %577 = vector.broadcast %414 : vector<1x128xf32> to vector<128x128xf32>
    %578 = arith.addf %576, %577 : vector<128x128xf32>
    %cst_338 = arith.constant 0.000000e+00 : f32
    %579 = vector.broadcast %cst_338 : f32 to vector<128x128xf32>
    %580 = arith.maximumf %578, %579 : vector<128x128xf32>
    %581 = vector.extract_strided_slice %481 {offsets = [0, 0], sizes = [1, 128], strides = [1, 1]} : vector<2x128xf32> to vector<1x128xf32>
    %582 = vector.broadcast %581 : vector<1x128xf32> to vector<128x128xf32>
    %583 = arith.mulf %580, %582 : vector<128x128xf32>
    %c0_339 = arith.constant 0 : index
    %c0_340 = arith.constant 0 : index
    %584 = vector.load %arg11[%c0_339, %c0_340] : memref<128x128xf32, #tpu.memory_space<vmem>>, vector<128x128xf32>
    %cst_341 = arith.constant dense<0.000000e+00> : vector<128x128xf32>
    %585 = tpu.matmul %583, %584, %cst_341 {dimension_numbers = #tpu.dot_dimension_numbers<[1], [0], [0], [1], [0, 0, 1, 1], [], []>} : vector<128x128xf32>, vector<128x128xf32>, vector<128x128xf32> -> vector<128x128xf32>
    %586 = vector.broadcast %571 : vector<1x128xf32> to vector<128x128xf32>
    %587 = arith.mulf %585, %586 : vector<128x128xf32>
    %588 = vector.broadcast %573 : vector<1x128xf32> to vector<128x128xf32>
    %589 = arith.addf %587, %588 : vector<128x128xf32>
    %c0_342 = arith.constant 0 : index
    %c0_343 = arith.constant 0 : index
    %590 = vector.load %arg0[%c0_342, %c0_343] : memref<512x128xf32, #tpu.memory_space<vmem>>, vector<128x128xf32>
    %591 = arith.addf %589, %590 : vector<128x128xf32>
    %c0_344 = arith.constant 0 : index
    %c0_345 = arith.constant 0 : index
    %592 = vector.load %arg14[%c0_344, %c0_345] : memref<512x128xf32, #tpu.memory_space<vmem>>, vector<128x128xf32>
    tpu.vector_store %arg14[%c0_344, %c0_345], %591 {strides = array<i32>} : memref<512x128xf32, #tpu.memory_space<vmem>>, vector<128x128xf32>,
    %c128_346 = arith.constant 128 : index
    %c0_347 = arith.constant 0 : index
    %593 = vector.load %arg16[%c128_346, %c0_347] : memref<512x128xf32, #tpu.memory_space<vmem>>, vector<128x128xf32>
    %594 = vector.broadcast %412 : vector<1x128xf32> to vector<128x128xf32>
    %595 = arith.mulf %593, %594 : vector<128x128xf32>
    %596 = vector.broadcast %414 : vector<1x128xf32> to vector<128x128xf32>
    %597 = arith.addf %595, %596 : vector<128x128xf32>
    %cst_348 = arith.constant 0.000000e+00 : f32
    %598 = vector.broadcast %cst_348 : f32 to vector<128x128xf32>
    %599 = arith.maximumf %597, %598 : vector<128x128xf32>
    %600 = vector.extract_strided_slice %481 {offsets = [0, 0], sizes = [1, 128], strides = [1, 1]} : vector<2x128xf32> to vector<1x128xf32>
    %601 = vector.broadcast %600 : vector<1x128xf32> to vector<128x128xf32>
    %602 = arith.mulf %599, %601 : vector<128x128xf32>
    %c0_349 = arith.constant 0 : index
    %c0_350 = arith.constant 0 : index
    %603 = vector.load %arg11[%c0_349, %c0_350] : memref<128x128xf32, #tpu.memory_space<vmem>>, vector<128x128xf32>
    %cst_351 = arith.constant dense<0.000000e+00> : vector<128x128xf32>
    %604 = tpu.matmul %602, %603, %cst_351 {dimension_numbers = #tpu.dot_dimension_numbers<[1], [0], [0], [1], [0, 0, 1, 1], [], []>} : vector<128x128xf32>, vector<128x128xf32>, vector<128x128xf32> -> vector<128x128xf32>
    %605 = vector.broadcast %571 : vector<1x128xf32> to vector<128x128xf32>
    %606 = arith.mulf %604, %605 : vector<128x128xf32>
    %607 = vector.broadcast %573 : vector<1x128xf32> to vector<128x128xf32>
    %608 = arith.addf %606, %607 : vector<128x128xf32>
    %c128_352 = arith.constant 128 : index
    %c0_353 = arith.constant 0 : index
    %609 = vector.load %arg0[%c128_352, %c0_353] : memref<512x128xf32, #tpu.memory_space<vmem>>, vector<128x128xf32>
    %610 = arith.addf %608, %609 : vector<128x128xf32>
    %c128_354 = arith.constant 128 : index
    %c0_355 = arith.constant 0 : index
    %611 = vector.load %arg14[%c128_354, %c0_355] : memref<512x128xf32, #tpu.memory_space<vmem>>, vector<128x128xf32>
    tpu.vector_store %arg14[%c128_354, %c0_355], %610 {strides = array<i32>} : memref<512x128xf32, #tpu.memory_space<vmem>>, vector<128x128xf32>,
    %c256_356 = arith.constant 256 : index
    %c0_357 = arith.constant 0 : index
    %612 = vector.load %arg16[%c256_356, %c0_357] : memref<512x128xf32, #tpu.memory_space<vmem>>, vector<128x128xf32>
    %613 = vector.broadcast %412 : vector<1x128xf32> to vector<128x128xf32>
    %614 = arith.mulf %612, %613 : vector<128x128xf32>
    %615 = vector.broadcast %414 : vector<1x128xf32> to vector<128x128xf32>
    %616 = arith.addf %614, %615 : vector<128x128xf32>
    %cst_358 = arith.constant 0.000000e+00 : f32
    %617 = vector.broadcast %cst_358 : f32 to vector<128x128xf32>
    %618 = arith.maximumf %616, %617 : vector<128x128xf32>
    %619 = vector.extract_strided_slice %481 {offsets = [1, 0], sizes = [1, 128], strides = [1, 1]} : vector<2x128xf32> to vector<1x128xf32>
    %620 = vector.broadcast %619 : vector<1x128xf32> to vector<128x128xf32>
    %621 = arith.mulf %618, %620 : vector<128x128xf32>
    %c0_359 = arith.constant 0 : index
    %c0_360 = arith.constant 0 : index
    %622 = vector.load %arg11[%c0_359, %c0_360] : memref<128x128xf32, #tpu.memory_space<vmem>>, vector<128x128xf32>
    %cst_361 = arith.constant dense<0.000000e+00> : vector<128x128xf32>
    %623 = tpu.matmul %621, %622, %cst_361 {dimension_numbers = #tpu.dot_dimension_numbers<[1], [0], [0], [1], [0, 0, 1, 1], [], []>} : vector<128x128xf32>, vector<128x128xf32>, vector<128x128xf32> -> vector<128x128xf32>
    %624 = vector.broadcast %571 : vector<1x128xf32> to vector<128x128xf32>
    %625 = arith.mulf %623, %624 : vector<128x128xf32>
    %626 = vector.broadcast %573 : vector<1x128xf32> to vector<128x128xf32>
    %627 = arith.addf %625, %626 : vector<128x128xf32>
    %c256_362 = arith.constant 256 : index
    %c0_363 = arith.constant 0 : index
    %628 = vector.load %arg0[%c256_362, %c0_363] : memref<512x128xf32, #tpu.memory_space<vmem>>, vector<128x128xf32>
    %629 = arith.addf %627, %628 : vector<128x128xf32>
    %c256_364 = arith.constant 256 : index
    %c0_365 = arith.constant 0 : index
    %630 = vector.load %arg14[%c256_364, %c0_365] : memref<512x128xf32, #tpu.memory_space<vmem>>, vector<128x128xf32>
    tpu.vector_store %arg14[%c256_364, %c0_365], %629 {strides = array<i32>} : memref<512x128xf32, #tpu.memory_space<vmem>>, vector<128x128xf32>,
    %c384_366 = arith.constant 384 : index
    %c0_367 = arith.constant 0 : index
    %631 = vector.load %arg16[%c384_366, %c0_367] : memref<512x128xf32, #tpu.memory_space<vmem>>, vector<128x128xf32>
    %632 = vector.broadcast %412 : vector<1x128xf32> to vector<128x128xf32>
    %633 = arith.mulf %631, %632 : vector<128x128xf32>
    %634 = vector.broadcast %414 : vector<1x128xf32> to vector<128x128xf32>
    %635 = arith.addf %633, %634 : vector<128x128xf32>
    %cst_368 = arith.constant 0.000000e+00 : f32
    %636 = vector.broadcast %cst_368 : f32 to vector<128x128xf32>
    %637 = arith.maximumf %635, %636 : vector<128x128xf32>
    %638 = vector.extract_strided_slice %481 {offsets = [1, 0], sizes = [1, 128], strides = [1, 1]} : vector<2x128xf32> to vector<1x128xf32>
    %639 = vector.broadcast %638 : vector<1x128xf32> to vector<128x128xf32>
    %640 = arith.mulf %637, %639 : vector<128x128xf32>
    %c0_369 = arith.constant 0 : index
    %c0_370 = arith.constant 0 : index
    %641 = vector.load %arg11[%c0_369, %c0_370] : memref<128x128xf32, #tpu.memory_space<vmem>>, vector<128x128xf32>
    %cst_371 = arith.constant dense<0.000000e+00> : vector<128x128xf32>
    %642 = tpu.matmul %640, %641, %cst_371 {dimension_numbers = #tpu.dot_dimension_numbers<[1], [0], [0], [1], [0, 0, 1, 1], [], []>} : vector<128x128xf32>, vector<128x128xf32>, vector<128x128xf32> -> vector<128x128xf32>
    %643 = vector.broadcast %571 : vector<1x128xf32> to vector<128x128xf32>
    %644 = arith.mulf %642, %643 : vector<128x128xf32>
    %645 = vector.broadcast %573 : vector<1x128xf32> to vector<128x128xf32>
    %646 = arith.addf %644, %645 : vector<128x128xf32>
    %c384_372 = arith.constant 384 : index
    %c0_373 = arith.constant 0 : index
    %647 = vector.load %arg0[%c384_372, %c0_373] : memref<512x128xf32, #tpu.memory_space<vmem>>, vector<128x128xf32>
    %648 = arith.addf %646, %647 : vector<128x128xf32>
    %c384_374 = arith.constant 384 : index
    %c0_375 = arith.constant 0 : index
    %649 = vector.load %arg14[%c384_374, %c0_375] : memref<512x128xf32, #tpu.memory_space<vmem>>, vector<128x128xf32>
    tpu.vector_store %arg14[%c384_374, %c0_375], %648 {strides = array<i32>} : memref<512x128xf32, #tpu.memory_space<vmem>>, vector<128x128xf32>,
    return
  }
}

</mosaic_0001>

<bundles_post_ra>
// kernel: inverted_residual.1
= control target key start
LH: loop header
LB: loop body
LE: loop exit
PB: predicated region body
PF: predicated region fallthrough
CT: control target
= control target key end

     0   :  { %vm8562_vm0 = vmmov 0   ;;  %vm4397_vm1 = vcmask 1040384   ;;  %s14177_s1 = inlined_call_operand.vmem [shape: f32[128,128], index: 1, kind: input, shape index: {}]   ;;  %s14178_s0 = inlined_call_operand.vmem [shape: f32[512,128], index: 0, kind: input, shape index: {}]   ;;  %s14179_s4 = inlined_call_operand.vmem [shape: f32[9,128], index: 4, kind: input, shape index: {}]   ;;  %s14180_s2 = inlined_call_operand.vmem [shape: f32[1,128], index: 2, kind: input, shape index: {}]   ;;  %s14181_s3 = inlined_call_operand.vmem [shape: f32[1,128], index: 3, kind: input, shape index: {}]   ;;  %s14182_s7 = inlined_call_operand.vmem [shape: f32[128,128], index: 7, kind: input, shape index: {}]   ;;  %s14183_s9 = inlined_call_operand.vmem [shape: f32[128,128], index: 9, kind: input, shape index: {}]   ;;  %s14184_s5 = inlined_call_operand.vmem [shape: f32[1,128], index: 5, kind: input, shape index: {}]   ;;  %s14185_s6 = inlined_call_operand.vmem [shape: f32[1,128], index: 6, kind: input, shape index: {}]   ;;  %s14186_s11 = inlined_call_operand.vmem [shape: f32[128,128], index: 11, kind: input, shape index: {}]   ;;  %s14187_s8 = inlined_call_operand.vmem [shape: f32[1,128], index: 8, kind: input, shape index: {}]   ;;  %s14188_s10 = inlined_call_operand.vmem [shape: f32[1,128], index: 10, kind: input, shape index: {}]   ;;  %s14189_s12 = inlined_call_operand.vmem [shape: f32[1,128], index: 12, kind: input, shape index: {}]   ;;  %s14190_s13 = inlined_call_operand.vmem [shape: f32[1,128], index: 13, kind: input, shape index: {}]   ;;  %s14191_s14 = inlined_call_operand.vmem [shape: f32[512,128], index: 14, kind: output, shape index: {}]  }
   0x1   :  { %v71_v0 = vld [vmem:[%s14177_s1] sm:$0xff]  ;;  %v72_v1 = vld [vmem:[%s14177_s1 + $0x8] sm:$0xff]  ;;  %v73_v2 = vld [vmem:[%s14177_s1 + $0x10] sm:$0xff] }
   0x2   :  { %v8647_v3 = vpack.c.bf16 %v72_v1, %v71_v0  ;;  %v74_v4 = vld [vmem:[%s14177_s1 + $0x18] sm:$0xff]  ;;  %v75_v6 = vld [vmem:[%s14177_s1 + $0x20] sm:$0xff]  ;;  %v76_v7 = vld [vmem:[%s14177_s1 + $0x28] sm:$0xff] }
   0x3   :  { %v8652_v5 = vpack.c.bf16 %v74_v4, %v73_v2  ;;  %v8666_v8 = vpack.c.bf16 %v76_v7, %v75_v6  ;;  %v8671_v9 = vld [vmem:[%s14178_s0] sm:$0xff]  ;;  %v77_v11 = vld [vmem:[%s14177_s1 + $0x30] sm:$0xff]  ;;  %v78_v12 = vld [vmem:[%s14177_s1 + $0x38] sm:$0xff] }
   0x4   :  { %7993 = vmatprep.subr.bf16.mxu0 %v8647_v3  ;;  %8025 = vmatprep.subr.bf16.mxu1 %v8647_v3  ;;  %v8676_v10 = vld [vmem:[%s14178_s0 + $0x80] sm:$0xff]  ;;  %v8690_v13 = vpack.c.bf16 %v78_v12, %v77_v11  ;;  %v80_v15 = vld [vmem:[%s14177_s1 + $0x48] sm:$0xff]  ;;  %v81_v17 = vld [vmem:[%s14177_s1 + $0x50] sm:$0xff] }
   0x5   :  { %7995 = vmatpush3.bf16.msra.mxu0 %v8647_v3  ;;  %8027 = vmatpush3.bf16.msra.mxu1 %v8647_v3  ;;  %v79_v14 = vld [vmem:[%s14177_s1 + $0x40] sm:$0xff]  ;;  %v82_v18 = vld [vmem:[%s14177_s1 + $0x58] sm:$0xff]  ;;  %v84_v21 = vld [vmem:[%s14177_s1 + $0x68] sm:$0xff] }
   0x6   :  { %7997 = vmatprep.subr.bf16.mxu0 %v8652_v5  ;;  %8029 = vmatprep.subr.bf16.mxu1 %v8652_v5  ;;  %v8702_v16 = vpack.c.bf16 %v80_v15, %v79_v14  ;;  %v8714_v19 = vpack.c.bf16 %v82_v18, %v81_v17  ;;  %v83_v20 = vld [vmem:[%s14177_s1 + $0x60] sm:$0xff]  ;;  %v85_v23 = vld [vmem:[%s14177_s1 + $0x70] sm:$0xff]  ;;  %v86_v24 = vld [vmem:[%s14177_s1 + $0x78] sm:$0xff] }
   0x7   :  { %7114 = vmatprep.mubr.f32.mxu0 %v8671_v9  ;;  %7170 = vmatprep.mubr.f32.mxu1 %v8676_v10  ;;  %v8726_v22 = vpack.c.bf16 %v84_v21, %v83_v20  ;;  %v8738_v25 = vpack.c.bf16 %v86_v24, %v85_v23  ;;  %v8749_v26 = vld [vmem:[%s14178_s0 + $0x8] sm:$0xff]  ;;  %v8761_v28 = vld [vmem:[%s14178_s0 + $0x10] sm:$0xff]  ;;  %v8775_v30 = vld [vmem:[%s14178_s0 + $0x18] sm:$0xff] }
   0x8   :  { %v8754_v27 = vld [vmem:[%s14178_s0 + $0x88] sm:$0xff]  ;;  %v8766_v29 = vld [vmem:[%s14178_s0 + $0x90] sm:$0xff]  ;;  %v8780_v31 = vld [vmem:[%s14178_s0 + $0x98] sm:$0xff] }
   0x9   :  { %7999 = vmatpush3.bf16.msra.mxu0 %v8652_v5  ;;  %8031 = vmatpush3.bf16.msra.mxu1 %v8652_v5  ;;  %v8789_v32 = vld [vmem:[%s14178_s0 + $0x20] sm:$0xff]  ;;  %v8803_v34 = vld [vmem:[%s14178_s0 + $0x28] sm:$0xff]  ;;  %v8817_v36 = vld [vmem:[%s14178_s0 + $0x30] sm:$0xff] }
   0xa   :  { %8001 = vmatprep.subr.bf16.mxu0 %v8666_v8  ;;  %8033 = vmatprep.subr.bf16.mxu1 %v8666_v8  ;;  %v8794_v33 = vld [vmem:[%s14178_s0 + $0xa0] sm:$0xff]  ;;  %v8808_v35 = vld [vmem:[%s14178_s0 + $0xa8] sm:$0xff]  ;;  %v8822_v37 = vld [vmem:[%s14178_s0 + $0xb0] sm:$0xff] }
   0xb   :  { %v8831_v38 = vld [vmem:[%s14178_s0 + $0x38] sm:$0xff]  ;;  %v8845_v40 = vld [vmem:[%s14178_s0 + $0x40] sm:$0xff]  ;;  %v8859_v42 = vld [vmem:[%s14178_s0 + $0x48] sm:$0xff] }
   0xc   :  { %v8836_v39 = vld [vmem:[%s14178_s0 + $0xb8] sm:$0xff]  ;;  %v8850_v41 = vld [vmem:[%s14178_s0 + $0xc0] sm:$0xff]  ;;  %v8864_v43 = vld [vmem:[%s14178_s0 + $0xc8] sm:$0xff] }
   0xd   :  { %8003 = vmatpush3.bf16.msra.mxu0 %v8666_v8  ;;  %8035 = vmatpush3.bf16.msra.mxu1 %v8666_v8  ;;  %v8873_v44 = vld [vmem:[%s14178_s0 + $0x50] sm:$0xff]  ;;  %v8887_v46 = vld [vmem:[%s14178_s0 + $0x58] sm:$0xff]  ;;  %v8901_v48 = vld [vmem:[%s14178_s0 + $0x60] sm:$0xff] }
   0xe   :  { %8005 = vmatprep.subr.bf16.mxu0 %v8690_v13  ;;  %8037 = vmatprep.subr.bf16.mxu1 %v8690_v13  ;;  %v8878_v45 = vld [vmem:[%s14178_s0 + $0xd0] sm:$0xff]  ;;  %v8892_v47 = vld [vmem:[%s14178_s0 + $0xd8] sm:$0xff]  ;;  %v8906_v49 = vld [vmem:[%s14178_s0 + $0xe0] sm:$0xff] }
   0xf   :  { %v8915_v50 = vld [vmem:[%s14178_s0 + $0x68] sm:$0xff]  ;;  %v8929_v52 = vld [vmem:[%s14178_s0 + $0x70] sm:$0xff]  ;;  %v8943_v54 = vld [vmem:[%s14178_s0 + $0x78] sm:$0xff] }
  0x10   :  { %v8920_v51 = vld [vmem:[%s14178_s0 + $0xe8] sm:$0xff]  ;;  %v8934_v53 = vld [vmem:[%s14178_s0 + $0xf0] sm:$0xff]  ;;  %v8948_v55 = vld [vmem:[%s14178_s0 + $0xf8] sm:$0xff] }
  0x11   :  { %8007 = vmatpush3.bf16.msra.mxu0 %v8690_v13  ;;  %8039 = vmatpush3.bf16.msra.mxu1 %v8690_v13  ;;  %v8957_v56 = vld [vmem:[%s14178_s0 + $0x100] sm:$0xff]  ;;  %v8971_v58 = vld [vmem:[%s14178_s0 + $0x108] sm:$0xff]  ;;  %v8985_v60 = vld [vmem:[%s14178_s0 + $0x110] sm:$0xff] }
  0x12   :  { %8009 = vmatprep.subr.bf16.mxu0 %v8702_v16  ;;  %8041 = vmatprep.subr.bf16.mxu1 %v8702_v16  ;;  %v8962_v57 = vld [vmem:[%s14178_s0 + $0x180] sm:$0xff]  ;;  %v8976_v59 = vld [vmem:[%s14178_s0 + $0x188] sm:$0xff]  ;;  %v8990_v61 = vld [vmem:[%s14178_s0 + $0x190] sm:$0xff] }
  0x13   :  { %v8999_v62 = vld [vmem:[%s14178_s0 + $0x118] sm:$0xff]  ;;  %v9013_v0 = vld [vmem:[%s14178_s0 + $0x120] sm:$0xff]  ;;  %v9027_v2 = vld [vmem:[%s14178_s0 + $0x128] sm:$0xff] }
  0x14   :  { %v9004_v63 = vld [vmem:[%s14178_s0 + $0x198] sm:$0xff]  ;;  %v9018_v1 = vld [vmem:[%s14178_s0 + $0x1a0] sm:$0xff]  ;;  %v9032_v4 = vld [vmem:[%s14178_s0 + $0x1a8] sm:$0xff] }
  0x15   :  { %8011 = vmatpush3.bf16.msra.mxu0 %v8702_v16  ;;  %8043 = vmatpush3.bf16.msra.mxu1 %v8702_v16  ;;  %v9041_v6 = vld [vmem:[%s14178_s0 + $0x130] sm:$0xff]  ;;  %v9055_v11 = vld [vmem:[%s14178_s0 + $0x138] sm:$0xff]  ;;  %v9069_v14 = vld [vmem:[%s14178_s0 + $0x140] sm:$0xff] }
  0x16   :  { %8013 = vmatprep.subr.bf16.mxu0 %v8714_v19  ;;  %8045 = vmatprep.subr.bf16.mxu1 %v8714_v19  ;;  %v9046_v7 = vld [vmem:[%s14178_s0 + $0x1b0] sm:$0xff]  ;;  %v9060_v12 = vld [vmem:[%s14178_s0 + $0x1b8] sm:$0xff]  ;;  %v9074_v15 = vld [vmem:[%s14178_s0 + $0x1c0] sm:$0xff] }
  0x17   :  { %v9083_v17 = vld [vmem:[%s14178_s0 + $0x148] sm:$0xff]  ;;  %v9097_v20 = vld [vmem:[%s14178_s0 + $0x150] sm:$0xff]  ;;  %v9111_v23 = vld [vmem:[%s14178_s0 + $0x158] sm:$0xff] }
  0x18   :  { %14362 = vst [vmem:[#allocation4_spill] sm:$0xff] %v9083_v17  ;;  %v9088_v18 = vld [vmem:[%s14178_s0 + $0x1c8] sm:$0xff]  ;;  %14364 = vst [vmem:[#allocation6_spill] sm:$0xff] %v9097_v20  ;;  %v9102_v21 = vld [vmem:[%s14178_s0 + $0x1d0] sm:$0xff] }
  0x19   :  { %8015 = vmatpush3.bf16.msra.mxu0 %v8714_v19  ;;  %8047 = vmatpush3.bf16.msra.mxu1 %v8714_v19  ;;  %14363 = vst [vmem:[#allocation5_spill] sm:$0xff] %v9088_v18  ;;  %14365 = vst [vmem:[#allocation7_spill] sm:$0xff] %v9102_v21  ;;  %v9116_v24 = vld [vmem:[%s14178_s0 + $0x1d8] sm:$0xff] }
  0x1a   :  { %8017 = vmatprep.subr.bf16.mxu0 %v8726_v22  ;;  %8049 = vmatprep.subr.bf16.mxu1 %v8726_v22  ;;  %14366 = vst [vmem:[#allocation8_spill] sm:$0xff] %v9111_v23  ;;  %14367 = vst [vmem:[#allocation9_spill] sm:$0xff] %v9116_v24 }
  0x1d   :  { %8019 = vmatpush3.bf16.msra.mxu0 %v8726_v22  ;;  %8051 = vmatpush3.bf16.msra.mxu1 %v8726_v22 }
  0x1e   :  { %8021 = vmatprep.subr.bf16.mxu0 %v8738_v25  ;;  %8053 = vmatprep.subr.bf16.mxu1 %v8738_v25 }
  0x21   :  { %8023 = vmatpush3.bf16.msra.mxu0 %v8738_v25  ;;  %8055 = vmatpush3.bf16.msra.mxu1 %v8738_v25 }
  0x22   :  { %8057 = vmatprep.subr.bf16.mxu0 %v8647_v3  ;;  %8089 = vmatprep.subr.bf16.mxu1 %v8647_v3 }
  0x24   :  { %7115 = vmatmul.mubr.f32.vlgmr.msra.gmra.mrb[0].mxu0 %v8749_v26  ;;  %7171 = vmatmul.mubr.f32.vlgmr.msra.gmra.mrb[0].mxu1 %v8754_v27 }
  0x25   :  { %8059 = vmatpush3.bf16.msra.mxu0 %v8647_v3  ;;  %8091 = vmatpush3.bf16.msra.mxu1 %v8647_v3 }
  0x26   :  { %7117 = vmatprep.mubr.f32.mxu0 %v8761_v28  ;;  %7173 = vmatprep.mubr.f32.mxu1 %v8766_v29 }
  0x27   :  { %8061 = vmatprep.subr.bf16.mxu0 %v8652_v5  ;;  %8093 = vmatprep.subr.bf16.mxu1 %v8652_v5 }
  0x28   :  { %7118 = vmatmul.mubr.f32.gmra.mrb[2].mxu0 %v8775_v30  ;;  %7174 = vmatmul.mubr.f32.gmra.mrb[2].mxu1 %v8780_v31 }
  0x29   :  { %8063 = vmatpush3.bf16.msra.mxu0 %v8652_v5  ;;  %8095 = vmatpush3.bf16.msra.mxu1 %v8652_v5 }
  0x2a   :  { %7120 = vmatprep.mubr.f32.mxu0 %v8789_v32  ;;  %7176 = vmatprep.mubr.f32.mxu1 %v8794_v33 }
  0x2b   :  { %8065 = vmatprep.subr.bf16.mxu0 %v8666_v8  ;;  %8097 = vmatprep.subr.bf16.mxu1 %v8666_v8 }
  0x2c   :  { %7121 = vmatmul.mubr.f32.gmra.mrb[4].mxu0 %v8803_v34  ;;  %7177 = vmatmul.mubr.f32.gmra.mrb[4].mxu1 %v8808_v35 }
  0x2d   :  { %8067 = vmatpush3.bf16.msra.mxu0 %v8666_v8  ;;  %8099 = vmatpush3.bf16.msra.mxu1 %v8666_v8 }
  0x2e   :  { %7123 = vmatprep.mubr.f32.mxu0 %v8817_v36  ;;  %7179 = vmatprep.mubr.f32.mxu1 %v8822_v37 }
  0x2f   :  { %8069 = vmatprep.subr.bf16.mxu0 %v8690_v13  ;;  %8101 = vmatprep.subr.bf16.mxu1 %v8690_v13 }
  0x30   :  { %7124 = vmatmul.mubr.f32.gmra.mrb[6].mxu0 %v8831_v38  ;;  %7180 = vmatmul.mubr.f32.gmra.mrb[6].mxu1 %v8836_v39 }
  0x31   :  { %8071 = vmatpush3.bf16.msra.mxu0 %v8690_v13  ;;  %8103 = vmatpush3.bf16.msra.mxu1 %v8690_v13 }
  0x32   :  { %7126 = vmatprep.mubr.f32.mxu0 %v8845_v40  ;;  %7182 = vmatprep.mubr.f32.mxu1 %v8850_v41 }
  0x33   :  { %8073 = vmatprep.subr.bf16.mxu0 %v8702_v16  ;;  %8105 = vmatprep.subr.bf16.mxu1 %v8702_v16 }
  0x34   :  { %7127 = vmatmul.mubr.f32.gmra.mrb[8].mxu0 %v8859_v42  ;;  %7183 = vmatmul.mubr.f32.gmra.mrb[8].mxu1 %v8864_v43 }
  0x35   :  { %8075 = vmatpush3.bf16.msra.mxu0 %v8702_v16  ;;  %8107 = vmatpush3.bf16.msra.mxu1 %v8702_v16 }
  0x36   :  { %7129 = vmatprep.mubr.f32.mxu0 %v8873_v44  ;;  %7185 = vmatprep.mubr.f32.mxu1 %v8878_v45 }
  0x37   :  { %8077 = vmatprep.subr.bf16.mxu0 %v8714_v19  ;;  %8109 = vmatprep.subr.bf16.mxu1 %v8714_v19 }
  0x38   :  { %7130 = vmatmul.mubr.f32.gmra.mrb[10].mxu0 %v8887_v46  ;;  %7186 = vmatmul.mubr.f32.gmra.mrb[10].mxu1 %v8892_v47 }
  0x39   :  { %8079 = vmatpush3.bf16.msra.mxu0 %v8714_v19  ;;  %8111 = vmatpush3.bf16.msra.mxu1 %v8714_v19 }
  0x3a   :  { %7132 = vmatprep.mubr.f32.mxu0 %v8901_v48  ;;  %7188 = vmatprep.mubr.f32.mxu1 %v8906_v49 }
  0x3b   :  { %8081 = vmatprep.subr.bf16.mxu0 %v8726_v22  ;;  %8113 = vmatprep.subr.bf16.mxu1 %v8726_v22 }
  0x3c   :  { %7133 = vmatmul.mubr.f32.gmra.mrb[12].mxu0 %v8915_v50  ;;  %7189 = vmatmul.mubr.f32.gmra.mrb[12].mxu1 %v8920_v51 }
  0x3d   :  { %8083 = vmatpush3.bf16.msra.mxu0 %v8726_v22  ;;  %8115 = vmatpush3.bf16.msra.mxu1 %v8726_v22 }
  0x3e   :  { %7135 = vmatprep.mubr.f32.mxu0 %v8929_v52  ;;  %7191 = vmatprep.mubr.f32.mxu1 %v8934_v53 }
  0x3f   :  { %8085 = vmatprep.subr.bf16.mxu0 %v8738_v25  ;;  %8117 = vmatprep.subr.bf16.mxu1 %v8738_v25 }
  0x40   :  { %7136 = vmatmul.mubr.f32.gmra.mrb[14].mxu0 %v8943_v54  ;;  %7192 = vmatmul.mubr.f32.gmra.mrb[14].mxu1 %v8948_v55 }
  0x41   :  { %8087 = vmatpush3.bf16.msra.mxu0 %v8738_v25  ;;  %8119 = vmatpush3.bf16.msra.mxu1 %v8738_v25 }
  0x42   :  { %7226 = vmatprep.mubr.f32.mxu0 %v8957_v56  ;;  %7282 = vmatprep.mubr.f32.mxu1 %v8962_v57 }
  0x43   :  { %8121 = vmatprep.subr.bf16.mxu0 %v8647_v3  ;;  %8153 = vmatprep.subr.bf16.mxu1 %v8647_v3 }
  0x44   :  { %7227 = vmatmul.mubr.f32.vlgmr.msra.gmra.mrb[16].mxu0 %v8971_v58  ;;  %7283 = vmatmul.mubr.f32.vlgmr.msra.gmra.mrb[16].mxu1 %v8976_v59 }
  0x45   :  { %8123 = vmatpush3.bf16.msra.mxu0 %v8647_v3  ;;  %8155 = vmatpush3.bf16.msra.mxu1 %v8647_v3 }
  0x46   :  { %7229 = vmatprep.mubr.f32.mxu0 %v8985_v60  ;;  %7285 = vmatprep.mubr.f32.mxu1 %v8990_v61 }
  0x47   :  { %8125 = vmatprep.subr.bf16.mxu0 %v8652_v5  ;;  %8157 = vmatprep.subr.bf16.mxu1 %v8652_v5 }
  0x48   :  { %7230 = vmatmul.mubr.f32.gmra.mrb[18].mxu0 %v8999_v62  ;;  %7286 = vmatmul.mubr.f32.gmra.mrb[18].mxu1 %v9004_v63 }
  0x49   :  { %8127 = vmatpush3.bf16.msra.mxu0 %v8652_v5  ;;  %8159 = vmatpush3.bf16.msra.mxu1 %v8652_v5 }
  0x4a   :  { %7232 = vmatprep.mubr.f32.mxu0 %v9013_v0  ;;  %7288 = vmatprep.mubr.f32.mxu1 %v9018_v1 }
  0x4b   :  { %8129 = vmatprep.subr.bf16.mxu0 %v8666_v8  ;;  %8161 = vmatprep.subr.bf16.mxu1 %v8666_v8 }
  0x4c   :  { %7233 = vmatmul.mubr.f32.gmra.mrb[20].mxu0 %v9027_v2  ;;  %7289 = vmatmul.mubr.f32.gmra.mrb[20].mxu1 %v9032_v4 }
  0x4d   :  { %8131 = vmatpush3.bf16.msra.mxu0 %v8666_v8  ;;  %8163 = vmatpush3.bf16.msra.mxu1 %v8666_v8 }
  0x4e   :  { %7235 = vmatprep.mubr.f32.mxu0 %v9041_v6  ;;  %7291 = vmatprep.mubr.f32.mxu1 %v9046_v7 }
  0x4f   :  { %8133 = vmatprep.subr.bf16.mxu0 %v8690_v13  ;;  %8165 = vmatprep.subr.bf16.mxu1 %v8690_v13 }
  0x50   :  { %7236 = vmatmul.mubr.f32.gmra.mrb[22].mxu0 %v9055_v11  ;;  %7292 = vmatmul.mubr.f32.gmra.mrb[22].mxu1 %v9060_v12 }
  0x51   :  { %8135 = vmatpush3.bf16.msra.mxu0 %v8690_v13  ;;  %8167 = vmatpush3.bf16.msra.mxu1 %v8690_v13 }
  0x52   :  { %7238 = vmatprep.mubr.f32.mxu0 %v9069_v14  ;;  %7294 = vmatprep.mubr.f32.mxu1 %v9074_v15 }
  0x53   :  { %8137 = vmatprep.subr.bf16.mxu0 %v8702_v16  ;;  %8169 = vmatprep.subr.bf16.mxu1 %v8702_v16 }
  0x54   :  { %7239 = vmatmul.mubr.f32.gmra.mrb[24].mxu0 %v9083_v17  ;;  %7295 = vmatmul.mubr.f32.gmra.mrb[24].mxu1 %v9088_v18  ;;  %v9125_v18 = vld [vmem:[%s14178_s0 + $0x160] sm:$0xff] }
  0x55   :  { %8139 = vmatpush3.bf16.msra.mxu0 %v8702_v16  ;;  %8171 = vmatpush3.bf16.msra.mxu1 %v8702_v16  ;;  %14368 = vst [vmem:[#allocation10_spill] sm:$0xff] %v9125_v18  ;;  %v9130_v17 = vld [vmem:[%s14178_s0 + $0x1e0] sm:$0xff] }
  0x56   :  { %7241 = vmatprep.mubr.f32.mxu0 %v9097_v20  ;;  %7297 = vmatprep.mubr.f32.mxu1 %v9102_v21  ;;  %14369 = vst [vmem:[#allocation11_spill] sm:$0xff] %v9130_v17  ;;  %v9139_v21 = vld [vmem:[%s14178_s0 + $0x168] sm:$0xff] }
  0x57   :  { %8141 = vmatprep.subr.bf16.mxu0 %v8714_v19  ;;  %8173 = vmatprep.subr.bf16.mxu1 %v8714_v19  ;;  %v9144_v20 = vld [vmem:[%s14178_s0 + $0x1e8] sm:$0xff] }
  0x58   :  { %7242 = vmatmul.mubr.f32.gmra.mrb[26].mxu0 %v9111_v23  ;;  %7298 = vmatmul.mubr.f32.gmra.mrb[26].mxu1 %v9116_v24  ;;  %v9153_v24 = vld [vmem:[%s14178_s0 + $0x170] sm:$0xff] }
  0x59   :  { %8143 = vmatpush3.bf16.msra.mxu0 %v8714_v19  ;;  %8175 = vmatpush3.bf16.msra.mxu1 %v8714_v19  ;;  %v9158_v23 = vld [vmem:[%s14178_s0 + $0x1f0] sm:$0xff] }
  0x5a   :  { %7244 = vmatprep.mubr.f32.mxu0 %v9125_v18  ;;  %7300 = vmatprep.mubr.f32.mxu1 %v9130_v17  ;;  %v9167_v17 = vld [vmem:[%s14178_s0 + $0x178] sm:$0xff] }
  0x5b   :  { %8145 = vmatprep.subr.bf16.mxu0 %v8726_v22  ;;  %8177 = vmatprep.subr.bf16.mxu1 %v8726_v22  ;;  %v9172_v18 = vld [vmem:[%s14178_s0 + $0x1f8] sm:$0xff] }
  0x5c   :  { %7245 = vmatmul.mubr.f32.gmra.mrb[28].mxu0 %v9139_v21  ;;  %7301 = vmatmul.mubr.f32.gmra.mrb[28].mxu1 %v9144_v20 }
  0x5d   :  { %8147 = vmatpush3.bf16.msra.mxu0 %v8726_v22  ;;  %8179 = vmatpush3.bf16.msra.mxu1 %v8726_v22 }
  0x5e   :  { %7247 = vmatprep.mubr.f32.mxu0 %v9153_v24  ;;  %7303 = vmatprep.mubr.f32.mxu1 %v9158_v23 }
  0x5f   :  { %8149 = vmatprep.subr.bf16.mxu0 %v8738_v25  ;;  %8181 = vmatprep.subr.bf16.mxu1 %v8738_v25 }
  0x60   :  { %7248 = vmatmul.mubr.f32.gmra.mrb[30].mxu0 %v9167_v17  ;;  %7304 = vmatmul.mubr.f32.gmra.mrb[30].mxu1 %v9172_v18 }
  0x61   :  { %8151 = vmatpush3.bf16.msra.mxu0 %v8738_v25  ;;  %8183 = vmatpush3.bf16.msra.mxu1 %v8738_v25 }
  0x62   :  { %7338 = vmatprep.mubr.f32.mxu0 %v8671_v9  ;;  %7394 = vmatprep.mubr.f32.mxu1 %v8676_v10  ;;  %v14373_v9 = vld [vmem:[#allocation7_spill] sm:$0xff]  ;;  %v14374_v10 = vld [vmem:[#allocation8_spill] sm:$0xff] }
  0x63   :  { %8185 = vmatprep.subr.bf16.mxu0 %v8647_v3  ;;  %8217 = vmatprep.subr.bf16.mxu1 %v8647_v3 }
  0x64   :  { %7339 = vmatmul.mubr.f32.vlgmr.msra.gmra.mrb[32].mxu0 %v8749_v26  ;;  %7395 = vmatmul.mubr.f32.vlgmr.msra.gmra.mrb[32].mxu1 %v8754_v27 }
  0x65   :  { %8187 = vmatpush3.bf16.msra.mxu0 %v8647_v3  ;;  %8219 = vmatpush3.bf16.msra.mxu1 %v8647_v3  ;;  %v14370_v3 = vld [vmem:[#allocation4_spill] sm:$0xff] }
  0x66   :  { %7341 = vmatprep.mubr.f32.mxu0 %v8761_v28  ;;  %7397 = vmatprep.mubr.f32.mxu1 %v8766_v29 }
  0x67   :  { %8189 = vmatprep.subr.bf16.mxu0 %v8652_v5  ;;  %8221 = vmatprep.subr.bf16.mxu1 %v8652_v5 }
  0x68   :  { %7342 = vmatmul.mubr.f32.gmra.mrb[34].mxu0 %v8775_v30  ;;  %7398 = vmatmul.mubr.f32.gmra.mrb[34].mxu1 %v8780_v31 }
  0x69   :  { %8191 = vmatpush3.bf16.msra.mxu0 %v8652_v5  ;;  %8223 = vmatpush3.bf16.msra.mxu1 %v8652_v5  ;;  %v14371_v5 = vld [vmem:[#allocation5_spill] sm:$0xff] }
  0x6a   :  { %7344 = vmatprep.mubr.f32.mxu0 %v8789_v32  ;;  %7400 = vmatprep.mubr.f32.mxu1 %v8794_v33 }
  0x6b   :  { %8193 = vmatprep.subr.bf16.mxu0 %v8666_v8  ;;  %8225 = vmatprep.subr.bf16.mxu1 %v8666_v8 }
  0x6c   :  { %7345 = vmatmul.mubr.f32.gmra.mrb[36].mxu0 %v8803_v34  ;;  %7401 = vmatmul.mubr.f32.gmra.mrb[36].mxu1 %v8808_v35 }
  0x6d   :  { %8195 = vmatpush3.bf16.msra.mxu0 %v8666_v8  ;;  %8227 = vmatpush3.bf16.msra.mxu1 %v8666_v8  ;;  %v14372_v8 = vld [vmem:[#allocation6_spill] sm:$0xff] }
  0x6e   :  { %7347 = vmatprep.mubr.f32.mxu0 %v8817_v36  ;;  %7403 = vmatprep.mubr.f32.mxu1 %v8822_v37 }
  0x6f   :  { %8197 = vmatprep.subr.bf16.mxu0 %v8690_v13  ;;  %8229 = vmatprep.subr.bf16.mxu1 %v8690_v13 }
  0x70   :  { %7348 = vmatmul.mubr.f32.gmra.mrb[38].mxu0 %v8831_v38  ;;  %7404 = vmatmul.mubr.f32.gmra.mrb[38].mxu1 %v8836_v39 }
  0x71   :  { %8199 = vmatpush3.bf16.msra.mxu0 %v8690_v13  ;;  %8231 = vmatpush3.bf16.msra.mxu1 %v8690_v13  ;;  %v14375_v13 = vld [vmem:[#allocation9_spill] sm:$0xff] }
  0x72   :  { %7350 = vmatprep.mubr.f32.mxu0 %v8845_v40  ;;  %7406 = vmatprep.mubr.f32.mxu1 %v8850_v41 }
  0x73   :  { %8201 = vmatprep.subr.bf16.mxu0 %v8702_v16  ;;  %8233 = vmatprep.subr.bf16.mxu1 %v8702_v16 }
  0x74   :  { %7351 = vmatmul.mubr.f32.gmra.mrb[40].mxu0 %v8859_v42  ;;  %7407 = vmatmul.mubr.f32.gmra.mrb[40].mxu1 %v8864_v43 }
  0x75   :  { %8203 = vmatpush3.bf16.msra.mxu0 %v8702_v16  ;;  %8235 = vmatpush3.bf16.msra.mxu1 %v8702_v16  ;;  %v14376_v16 = vld [vmem:[#allocation10_spill] sm:$0xff] }
  0x76   :  { %7353 = vmatprep.mubr.f32.mxu0 %v8873_v44  ;;  %7409 = vmatprep.mubr.f32.mxu1 %v8878_v45 }
  0x77   :  { %8205 = vmatprep.subr.bf16.mxu0 %v8714_v19  ;;  %8237 = vmatprep.subr.bf16.mxu1 %v8714_v19 }
  0x78   :  { %7354 = vmatmul.mubr.f32.gmra.mrb[42].mxu0 %v8887_v46  ;;  %7410 = vmatmul.mubr.f32.gmra.mrb[42].mxu1 %v8892_v47 }
  0x79   :  { %8207 = vmatpush3.bf16.msra.mxu0 %v8714_v19  ;;  %8239 = vmatpush3.bf16.msra.mxu1 %v8714_v19  ;;  %v14377_v19 = vld [vmem:[#allocation11_spill] sm:$0xff] }
  0x7a   :  { %7356 = vmatprep.mubr.f32.mxu0 %v8901_v48  ;;  %7412 = vmatprep.mubr.f32.mxu1 %v8906_v49 }
  0x7b   :  { %8209 = vmatprep.subr.bf16.mxu0 %v8726_v22  ;;  %8241 = vmatprep.subr.bf16.mxu1 %v8726_v22 }
  0x7c   :  { %7357 = vmatmul.mubr.f32.gmra.mrb[44].mxu0 %v8915_v50  ;;  %7413 = vmatmul.mubr.f32.gmra.mrb[44].mxu1 %v8920_v51 }
  0x7d   :  { %8211 = vmatpush3.bf16.msra.mxu0 %v8726_v22  ;;  %8243 = vmatpush3.bf16.msra.mxu1 %v8726_v22  ;;  %v8560_v22 = vmov 0.0  }
  0x7e   :  { %7359 = vmatprep.mubr.f32.mxu0 %v8929_v52  ;;  %7415 = vmatprep.mubr.f32.mxu1 %v8934_v53  ;;  %1011 = vst [vmem:[#allocation2 + $0x29] sm:$0x1] %v8560_v22  ;;  %965 = vst [vmem:[#allocation2] sm:$0xff] %v8560_v22 }
  0x7f   :  { %8213 = vmatprep.subr.bf16.mxu0 %v8738_v25  ;;  %8245 = vmatprep.subr.bf16.mxu1 %v8738_v25  ;;  %966 = vst [vmem:[#allocation2 + $0x8] sm:$0xff] %v8560_v22  ;;  %967 = vst [vmem:[#allocation2 + $0x10] sm:$0xff] %v8560_v22 }
  0x80   :  { %7360 = vmatmul.mubr.f32.gmra.mrb[46].mxu0 %v8943_v54  ;;  %7416 = vmatmul.mubr.f32.gmra.mrb[46].mxu1 %v8948_v55  ;;  %968 = vst [vmem:[#allocation2 + $0x1b0] sm:$0xff] %v8560_v22  ;;  %969 = vst [vmem:[#allocation2 + $0x1b8] sm:$0xff] %v8560_v22 }
  0x81   :  { %8215 = vmatpush3.bf16.msra.mxu0 %v8738_v25  ;;  %8247 = vmatpush3.bf16.msra.mxu1 %v8738_v25  ;;  %970 = vst [vmem:[#allocation2 + $0x1c0] sm:$0xff] %v8560_v22  ;;  %972 = vst [vmem:[#allocation2 + $0x198] sm:$0xff] %v8560_v22 }
  0x82   :  { %7450 = vmatprep.mubr.f32.mxu0 %v8957_v56  ;;  %7506 = vmatprep.mubr.f32.mxu1 %v8962_v57  ;;  %973 = vst [vmem:[#allocation2 + $0x1a0] sm:$0xff] %v8560_v22  ;;  %974 = vst [vmem:[#allocation2 + $0x1a8] sm:$0xff] %v8560_v22 }
  0x83   :  { %975 = vst [vmem:[#allocation2 + $0x348] sm:$0xff] %v8560_v22  ;;  %976 = vst [vmem:[#allocation2 + $0x350] sm:$0xff] %v8560_v22 }
  0x84   :  { %7451 = vmatmul.mubr.f32.vlgmr.msra.gmra.mrb[48].mxu0 %v8971_v58  ;;  %7507 = vmatmul.mubr.f32.vlgmr.msra.gmra.mrb[48].mxu1 %v8976_v59  ;;  %977 = vst [vmem:[#allocation2 + $0x358] sm:$0xff] %v8560_v22  ;;  %979 = vst [vmem:[#allocation2 + $0x18] sm:$0x1] %v8560_v22 }
  0x85   :  { %7453 = vmatprep.mubr.f32.mxu0 %v8985_v60  ;;  %7509 = vmatprep.mubr.f32.mxu1 %v8990_v61  ;;  %980 = vst [vmem:[#allocation2 + $0x30] sm:$0x1] %v8560_v22  ;;  %981 = vst [vmem:[#allocation2 + $0x48] sm:$0x1] %v8560_v22 }
  0x86   :  { %982 = vst [vmem:[#allocation2 + $0x60] sm:$0x1] %v8560_v22  ;;  %983 = vst [vmem:[#allocation2 + $0x78] sm:$0x1] %v8560_v22 }
  0x87   :  { %984 = vst [vmem:[#allocation2 + $0x90] sm:$0x1] %v8560_v22  ;;  %985 = vst [vmem:[#allocation2 + $0xa8] sm:$0x1] %v8560_v22 }
  0x88   :  { %7454 = vmatmul.mubr.f32.gmra.mrb[50].mxu0 %v8999_v62  ;;  %7510 = vmatmul.mubr.f32.gmra.mrb[50].mxu1 %v9004_v63  ;;  %986 = vst [vmem:[#allocation2 + $0xc0] sm:$0x1] %v8560_v22  ;;  %987 = vst [vmem:[#allocation2 + $0xd8] sm:$0x1] %v8560_v22 }
  0x89   :  { %7456 = vmatprep.mubr.f32.mxu0 %v9013_v0  ;;  %7512 = vmatprep.mubr.f32.mxu1 %v9018_v1  ;;  %988 = vst [vmem:[#allocation2 + $0xf0] sm:$0x1] %v8560_v22  ;;  %989 = vst [vmem:[#allocation2 + $0x108] sm:$0x1] %v8560_v22 }
  0x8a   :  { %990 = vst [vmem:[#allocation2 + $0x120] sm:$0x1] %v8560_v22  ;;  %991 = vst [vmem:[#allocation2 + $0x138] sm:$0x1] %v8560_v22 }
  0x8b   :  { %992 = vst [vmem:[#allocation2 + $0x150] sm:$0x1] %v8560_v22  ;;  %993 = vst [vmem:[#allocation2 + $0x168] sm:$0x1] %v8560_v22 }
  0x8c   :  { %7457 = vmatmul.mubr.f32.gmra.mrb[52].mxu0 %v9027_v2  ;;  %7513 = vmatmul.mubr.f32.gmra.mrb[52].mxu1 %v9032_v4  ;;  %994 = vst [vmem:[#allocation2 + $0x180] sm:$0x1] %v8560_v22  ;;  %995 = vst [vmem:[#allocation2 + $0x1c8] sm:$0x1] %v8560_v22 }
  0x8d   :  { %7459 = vmatprep.mubr.f32.mxu0 %v9041_v6  ;;  %7515 = vmatprep.mubr.f32.mxu1 %v9046_v7  ;;  %996 = vst [vmem:[#allocation2 + $0x1e0] sm:$0x1] %v8560_v22  ;;  %997 = vst [vmem:[#allocation2 + $0x1f8] sm:$0x1] %v8560_v22 }
  0x8e   :  { %998 = vst [vmem:[#allocation2 + $0x210] sm:$0x1] %v8560_v22  ;;  %999 = vst [vmem:[#allocation2 + $0x228] sm:$0x1] %v8560_v22 }
  0x8f   :  { %1000 = vst [vmem:[#allocation2 + $0x240] sm:$0x1] %v8560_v22  ;;  %1001 = vst [vmem:[#allocation2 + $0x258] sm:$0x1] %v8560_v22 }
  0x90   :  { %7460 = vmatmul.mubr.f32.gmra.mrb[54].mxu0 %v9055_v11  ;;  %7516 = vmatmul.mubr.f32.gmra.mrb[54].mxu1 %v9060_v12  ;;  %1002 = vst [vmem:[#allocation2 + $0x270] sm:$0x1] %v8560_v22  ;;  %1003 = vst [vmem:[#allocation2 + $0x288] sm:$0x1] %v8560_v22 }
  0x91   :  { %7462 = vmatprep.mubr.f32.mxu0 %v9069_v14  ;;  %7518 = vmatprep.mubr.f32.mxu1 %v9074_v15  ;;  %1004 = vst [vmem:[#allocation2 + $0x2a0] sm:$0x1] %v8560_v22  ;;  %1005 = vst [vmem:[#allocation2 + $0x2b8] sm:$0x1] %v8560_v22 }
  0x92   :  { %1006 = vst [vmem:[#allocation2 + $0x2d0] sm:$0x1] %v8560_v22  ;;  %1007 = vst [vmem:[#allocation2 + $0x2e8] sm:$0x1] %v8560_v22 }
  0x93   :  { %1008 = vst [vmem:[#allocation2 + $0x300] sm:$0x1] %v8560_v22  ;;  %1009 = vst [vmem:[#allocation2 + $0x318] sm:$0x1] %v8560_v22 }
  0x94   :  { %7463 = vmatmul.mubr.f32.gmra.mrb[56].mxu0 %v14370_v3  ;;  %7519 = vmatmul.mubr.f32.gmra.mrb[56].mxu1 %v14371_v5  ;;  %1010 = vst [vmem:[#allocation2 + $0x330] sm:$0x1] %v8560_v22  ;;  %1012 = vst [vmem:[#allocation2 + $0x41] sm:$0x1] %v8560_v22 }
  0x95   :  { %7465 = vmatprep.mubr.f32.mxu0 %v14372_v8  ;;  %7521 = vmatprep.mubr.f32.mxu1 %v14373_v9  ;;  %1013 = vst [vmem:[#allocation2 + $0x59] sm:$0x1] %v8560_v22  ;;  %1014 = vst [vmem:[#allocation2 + $0x71] sm:$0x1] %v8560_v22 }
  0x96   :  { %1015 = vst [vmem:[#allocation2 + $0x89] sm:$0x1] %v8560_v22  ;;  %1016 = vst [vmem:[#allocation2 + $0xa1] sm:$0x1] %v8560_v22 }
  0x97   :  { %1017 = vst [vmem:[#allocation2 + $0xb9] sm:$0x1] %v8560_v22  ;;  %1018 = vst [vmem:[#allocation2 + $0xd1] sm:$0x1] %v8560_v22 }
  0x98   :  { %7466 = vmatmul.mubr.f32.gmra.mrb[58].mxu0 %v14374_v10  ;;  %7522 = vmatmul.mubr.f32.gmra.mrb[58].mxu1 %v14375_v13  ;;  %1019 = vst [vmem:[#allocation2 + $0xe9] sm:$0x1] %v8560_v22  ;;  %1020 = vst [vmem:[#allocation2 + $0x101] sm:$0x1] %v8560_v22 }
  0x99   :  { %7468 = vmatprep.mubr.f32.mxu0 %v14376_v16  ;;  %7524 = vmatprep.mubr.f32.mxu1 %v14377_v19  ;;  %1021 = vst [vmem:[#allocation2 + $0x119] sm:$0x1] %v8560_v22  ;;  %1022 = vst [vmem:[#allocation2 + $0x131] sm:$0x1] %v8560_v22 }
  0x9a   :  { %1023 = vst [vmem:[#allocation2 + $0x149] sm:$0x1] %v8560_v22  ;;  %1024 = vst [vmem:[#allocation2 + $0x161] sm:$0x1] %v8560_v22 }
  0x9b   :  { %1025 = vst [vmem:[#allocation2 + $0x179] sm:$0x1] %v8560_v22  ;;  %1026 = vst [vmem:[#allocation2 + $0x191] sm:$0x1] %v8560_v22 }
  0x9c   :  { %7469 = vmatmul.mubr.f32.gmra.mrb[60].mxu0 %v9139_v21  ;;  %7525 = vmatmul.mubr.f32.gmra.mrb[60].mxu1 %v9144_v20  ;;  %1027 = vst [vmem:[#allocation2 + $0x1d9] sm:$0x1] %v8560_v22  ;;  %1028 = vst [vmem:[#allocation2 + $0x1f1] sm:$0x1] %v8560_v22 }
  0x9d   :  { %7471 = vmatprep.mubr.f32.mxu0 %v9153_v24  ;;  %7527 = vmatprep.mubr.f32.mxu1 %v9158_v23  ;;  %1029 = vst [vmem:[#allocation2 + $0x209] sm:$0x1] %v8560_v22  ;;  %1030 = vst [vmem:[#allocation2 + $0x221] sm:$0x1] %v8560_v22 }
  0x9e   :  { %1031 = vst [vmem:[#allocation2 + $0x239] sm:$0x1] %v8560_v22  ;;  %1032 = vst [vmem:[#allocation2 + $0x251] sm:$0x1] %v8560_v22 }
  0x9f   :  { %1033 = vst [vmem:[#allocation2 + $0x269] sm:$0x1] %v8560_v22  ;;  %1034 = vst [vmem:[#allocation2 + $0x281] sm:$0x1] %v8560_v22 }
  0xa0   :  { %7472 = vmatmul.mubr.f32.gmra.mrb[62].mxu0 %v9167_v17  ;;  %7528 = vmatmul.mubr.f32.gmra.mrb[62].mxu1 %v9172_v18  ;;  %1035 = vst [vmem:[#allocation2 + $0x299] sm:$0x1] %v8560_v22  ;;  %1036 = vst [vmem:[#allocation2 + $0x2b1] sm:$0x1] %v8560_v22 }
  0xa1   :  { %1037 = vst [vmem:[#allocation2 + $0x2c9] sm:$0x1] %v8560_v22  ;;  %1038 = vst [vmem:[#allocation2 + $0x2e1] sm:$0x1] %v8560_v22 }
  0xa2   :  { %1039 = vst [vmem:[#allocation2 + $0x2f9] sm:$0x1] %v8560_v22  ;;  %1040 = vst [vmem:[#allocation2 + $0x311] sm:$0x1] %v8560_v22 }
  0xa3   :  { %1041 = vst [vmem:[#allocation2 + $0x329] sm:$0x1] %v8560_v22  ;;  %1042 = vst [vmem:[#allocation2 + $0x341] sm:$0x1] %v8560_v22 }
  0xf7   :  { %v7116_v25 = vpop.f32.mrb[0].mxu0  ;;  %v7172_v26 = vpop.f32.mrb[0].mxu1 }
  0xf8   :  { %v255_v27 = vmul.f32 %v7116_v25, %v7116_v25  ;;  %v153_v28 = vpop.f32.mrb[1].mxu0  ;;  %v476_v29 = vmul.f32 %v7172_v26, %v7172_v26  ;;  %v374_v30 = vpop.f32.mrb[1].mxu1 }
  0xf9   :  { %v232_v31 = vadd.f32 %v7116_v25, %v153_v28  ;;  %v254_v32 = vmul.f32 %v153_v28, %v153_v28  ;;  %v453_v33 = vadd.f32 %v7172_v26, %v374_v30  ;;  %v475_v34 = vmul.f32 %v374_v30, %v374_v30 }
  0xfb   :  { %v270_v35 = vadd.f32 %v255_v27, %v254_v32  ;;  %v491_v36 = vadd.f32 %v476_v29, %v475_v34  ;;  %v7119_v37 = vpop.f32.mrb[2].mxu0  ;;  %v7175_v38 = vpop.f32.mrb[2].mxu1 }
  0xfc   :  { %v163_v39 = vpop.f32.mrb[3].mxu0  ;;  %v384_v40 = vpop.f32.mrb[3].mxu1  ;;  %v257_v45 = vmul.f32 %v7119_v37, %v7119_v37  ;;  %v478_v46 = vmul.f32 %v7175_v38, %v7175_v38 }
  0xfd   :  { %v233_v41 = vadd.f32 %v232_v31, %v163_v39  ;;  %v256_v42 = vmul.f32 %v163_v39, %v163_v39  ;;  %v454_v43 = vadd.f32 %v453_v33, %v384_v40  ;;  %v477_v44 = vmul.f32 %v384_v40, %v384_v40 }
  0xff   :  { %v271_v47 = vadd.f32 %v270_v35, %v256_v42  ;;  %v492_v48 = vadd.f32 %v491_v36, %v477_v44  ;;  %v7122_v49 = vpop.f32.mrb[4].mxu0  ;;  %v7178_v50 = vpop.f32.mrb[4].mxu1  ;;  %v234_v51 = vadd.f32 %v7119_v37, %v233_v41  ;;  %v455_v52 = vadd.f32 %v7175_v38, %v454_v43 }
 0x100   :  { %v173_v53 = vpop.f32.mrb[5].mxu0  ;;  %v394_v54 = vpop.f32.mrb[5].mxu1  ;;  %v480_v59 = vmul.f32 %v7178_v50, %v7178_v50  ;;  %v259_v62 = vmul.f32 %v7122_v49, %v7122_v49 }
 0x101   :  { %v235_v55 = vadd.f32 %v234_v51, %v173_v53  ;;  %v258_v56 = vmul.f32 %v173_v53, %v173_v53  ;;  %v272_v57 = vadd.f32 %v271_v47, %v257_v45  ;;  %v456_v58 = vadd.f32 %v455_v52, %v394_v54 }
 0x102   :  { %v479_v60 = vmul.f32 %v394_v54, %v394_v54  ;;  %v493_v61 = vadd.f32 %v492_v48, %v478_v46 }
 0x103   :  { %v273_v63 = vadd.f32 %v272_v57, %v258_v56  ;;  %v7125_v0 = vpop.f32.mrb[6].mxu0  ;;  %v7181_v1 = vpop.f32.mrb[6].mxu1  ;;  %v236_v2 = vadd.f32 %v7122_v49, %v235_v55  ;;  %v457_v4 = vadd.f32 %v7178_v50, %v456_v58 }
 0x104   :  { %v494_v6 = vadd.f32 %v493_v61, %v479_v60  ;;  %v183_v7 = vpop.f32.mrb[7].mxu0  ;;  %v404_v11 = vpop.f32.mrb[7].mxu1  ;;  %v482_v18 = vmul.f32 %v7181_v1, %v7181_v1  ;;  %v261_v23 = vmul.f32 %v7125_v0, %v7125_v0 }
 0x105   :  { %v237_v12 = vadd.f32 %v236_v2, %v183_v7  ;;  %v260_v14 = vmul.f32 %v183_v7, %v183_v7  ;;  %v274_v15 = vadd.f32 %v273_v63, %v259_v62  ;;  %v458_v17 = vadd.f32 %v457_v4, %v404_v11 }
 0x106   :  { %v481_v20 = vmul.f32 %v404_v11, %v404_v11  ;;  %v495_v21 = vadd.f32 %v494_v6, %v480_v59 }
 0x107   :  { %v275_v24 = vadd.f32 %v274_v15, %v260_v14  ;;  %v7128_v3 = vpop.f32.mrb[8].mxu0  ;;  %v7184_v5 = vpop.f32.mrb[8].mxu1  ;;  %v238_v8 = vadd.f32 %v7125_v0, %v237_v12  ;;  %v459_v9 = vadd.f32 %v7181_v1, %v458_v17 }
 0x108   :  { %v496_v10 = vadd.f32 %v495_v21, %v481_v20  ;;  %v193_v13 = vpop.f32.mrb[9].mxu0  ;;  %v414_v16 = vpop.f32.mrb[9].mxu1  ;;  %v484_v27 = vmul.f32 %v7184_v5, %v7184_v5  ;;  %v263_v30 = vmul.f32 %v7128_v3, %v7128_v3 }
 0x109   :  { %v239_v19 = vadd.f32 %v238_v8, %v193_v13  ;;  %v262_v22 = vmul.f32 %v193_v13, %v193_v13  ;;  %v276_v25 = vadd.f32 %v275_v24, %v261_v23  ;;  %v460_v26 = vadd.f32 %v459_v9, %v414_v16 }
 0x10a   :  { %v483_v28 = vmul.f32 %v414_v16, %v414_v16  ;;  %v497_v29 = vadd.f32 %v496_v10, %v482_v18 }
 0x10b   :  { %v277_v31 = vadd.f32 %v276_v25, %v262_v22  ;;  %v7131_v32 = vpop.f32.mrb[10].mxu0  ;;  %v7187_v33 = vpop.f32.mrb[10].mxu1  ;;  %v240_v34 = vadd.f32 %v7128_v3, %v239_v19  ;;  %v461_v35 = vadd.f32 %v7184_v5, %v460_v26 }
 0x10c   :  { %v498_v36 = vadd.f32 %v497_v29, %v483_v28  ;;  %v203_v37 = vpop.f32.mrb[11].mxu0  ;;  %v424_v38 = vpop.f32.mrb[11].mxu1  ;;  %v486_v43 = vmul.f32 %v7187_v33, %v7187_v33  ;;  %v265_v46 = vmul.f32 %v7131_v32, %v7131_v32 }
 0x10d   :  { %v241_v39 = vadd.f32 %v240_v34, %v203_v37  ;;  %v264_v40 = vmul.f32 %v203_v37, %v203_v37  ;;  %v278_v41 = vadd.f32 %v277_v31, %v263_v30  ;;  %v462_v42 = vadd.f32 %v461_v35, %v424_v38 }
 0x10e   :  { %v485_v44 = vmul.f32 %v424_v38, %v424_v38  ;;  %v499_v45 = vadd.f32 %v498_v36, %v484_v27 }
 0x10f   :  { %v279_v47 = vadd.f32 %v278_v41, %v264_v40  ;;  %v7134_v48 = vpop.f32.mrb[12].mxu0  ;;  %v7190_v49 = vpop.f32.mrb[12].mxu1  ;;  %v242_v50 = vadd.f32 %v7131_v32, %v241_v39  ;;  %v463_v51 = vadd.f32 %v7187_v33, %v462_v42 }
 0x110   :  { %v500_v52 = vadd.f32 %v499_v45, %v485_v44  ;;  %v213_v53 = vpop.f32.mrb[13].mxu0  ;;  %v434_v54 = vpop.f32.mrb[13].mxu1  ;;  %v488_v59 = vmul.f32 %v7190_v49, %v7190_v49  ;;  %v267_v62 = vmul.f32 %v7134_v48, %v7134_v48 }
 0x111   :  { %v243_v55 = vadd.f32 %v242_v50, %v213_v53  ;;  %v266_v56 = vmul.f32 %v213_v53, %v213_v53  ;;  %v280_v57 = vadd.f32 %v279_v47, %v265_v46  ;;  %v464_v58 = vadd.f32 %v463_v51, %v434_v54 }
 0x112   :  { %v487_v60 = vmul.f32 %v434_v54, %v434_v54  ;;  %v501_v61 = vadd.f32 %v500_v52, %v486_v43 }
 0x113   :  { %v281_v63 = vadd.f32 %v280_v57, %v266_v56  ;;  %v7137_v0 = vpop.f32.mrb[14].mxu0  ;;  %v7193_v1 = vpop.f32.mrb[14].mxu1  ;;  %v244_v2 = vadd.f32 %v7134_v48, %v243_v55  ;;  %v465_v4 = vadd.f32 %v7190_v49, %v464_v58 }
 0x114   :  { %v502_v6 = vadd.f32 %v501_v61, %v487_v60  ;;  %v223_v7 = vpop.f32.mrb[15].mxu0  ;;  %v444_v11 = vpop.f32.mrb[15].mxu1  ;;  %v490_v18 = vmul.f32 %v7193_v1, %v7193_v1  ;;  %v269_v23 = vmul.f32 %v7137_v0, %v7137_v0 }
 0x115   :  { %v245_v12 = vadd.f32 %v244_v2, %v223_v7  ;;  %v268_v14 = vmul.f32 %v223_v7, %v223_v7  ;;  %v282_v15 = vadd.f32 %v281_v63, %v267_v62  ;;  %v466_v17 = vadd.f32 %v465_v4, %v444_v11 }
 0x116   :  { %v489_v20 = vmul.f32 %v444_v11, %v444_v11  ;;  %v503_v21 = vadd.f32 %v502_v6, %v488_v59 }
 0x117   :  { %v246_v24 = vadd.f32 %v7137_v0, %v245_v12  ;;  %v283_v3 = vadd.f32 %v282_v15, %v268_v14  ;;  %v467_v5 = vadd.f32 %v7193_v1, %v466_v17  ;;  %v7228_v8 = vpop.f32.mrb[16].mxu0  ;;  %v7284_v9 = vpop.f32.mrb[16].mxu1 }
 0x118   :  { %v504_v10 = vadd.f32 %v503_v21, %v489_v20  ;;  %v697_v13 = vmul.f32 %v7228_v8, %v7228_v8  ;;  %v595_v16 = vpop.f32.mrb[17].mxu0  ;;  %v918_v19 = vmul.f32 %v7284_v9, %v7284_v9  ;;  %v816_v22 = vpop.f32.mrb[17].mxu1 }
 0x119   :  { %v247_v25 = vrot.slane %v246_v24, 4  ;;  %v284_v26 = vadd.f32 %v283_v3, %v269_v23  ;;  %v468_v27 = vrot.slane %v467_v5, 4  ;;  %v674_v28 = vadd.f32 %v7228_v8, %v595_v16 }
 0x11a   :  { %v505_v29 = vadd.f32 %v504_v10, %v490_v18  ;;  %v696_v30 = vmul.f32 %v595_v16, %v595_v16  ;;  %v895_v31 = vadd.f32 %v7284_v9, %v816_v22  ;;  %v917_v32 = vmul.f32 %v816_v22, %v816_v22 }
 0x11b   :  { %v248_v33 = vadd.f32 %v247_v25, %v246_v24  ;;  %v285_v34 = vrot.slane %v284_v26, 4  ;;  %v469_v35 = vadd.f32 %v468_v27, %v467_v5  ;;  %v7231_v36 = vpop.f32.mrb[18].mxu0  ;;  %v7287_v37 = vpop.f32.mrb[18].mxu1 }
 0x11c   :  { %v506_v38 = vrot.slane %v505_v29, 4  ;;  %v712_v39 = vadd.f32 %v697_v13, %v696_v30  ;;  %v605_v40 = vpop.f32.mrb[19].mxu0  ;;  %v933_v41 = vadd.f32 %v918_v19, %v917_v32  ;;  %v826_v42 = vpop.f32.mrb[19].mxu1  ;;  %v699_v48 = vmul.f32 %v7231_v36, %v7231_v36 }
 0x11d   :  { %v249_v43 = vrot.slane %v248_v33, 2  ;;  %v286_v44 = vadd.f32 %v285_v34, %v284_v26  ;;  %v470_v45 = vrot.slane %v469_v35, 2  ;;  %v675_v46 = vadd.f32 %v674_v28, %v605_v40 }
 0x11e   :  { %v507_v47 = vadd.f32 %v506_v38, %v505_v29  ;;  %v698_v49 = vmul.f32 %v605_v40, %v605_v40  ;;  %v896_v50 = vadd.f32 %v895_v31, %v826_v42  ;;  %v919_v54 = vmul.f32 %v826_v42, %v826_v42 }
 0x11f   :  { %v250_v51 = vadd.f32 %v249_v43, %v248_v33  ;;  %v287_v52 = vrot.slane %v286_v44, 2  ;;  %v471_v53 = vadd.f32 %v470_v45, %v469_v35  ;;  %v7234_v55 = vpop.f32.mrb[20].mxu0  ;;  %v7290_v56 = vpop.f32.mrb[20].mxu1  ;;  %v920_v59 = vmul.f32 %v7287_v37, %v7287_v37 }
 0x120   :  { %v508_v57 = vrot.slane %v507_v47, 2  ;;  %v713_v58 = vadd.f32 %v712_v39, %v698_v49  ;;  %v615_v60 = vpop.f32.mrb[21].mxu0  ;;  %v676_v61 = vadd.f32 %v7231_v36, %v675_v46  ;;  %v836_v62 = vpop.f32.mrb[21].mxu1  ;;  %v934_v2 = vadd.f32 %v933_v41, %v919_v54 }
 0x121   :  { %v251_v63 = vrot.slane %v250_v51, 1  ;;  %v288_v0 = vadd.f32 %v287_v52, %v286_v44  ;;  %v472_v1 = vrot.slane %v471_v53, 1  ;;  %v700_v7 = vmul.f32 %v615_v60, %v615_v60 }
 0x122   :  { %v509_v4 = vadd.f32 %v508_v57, %v507_v47  ;;  %v677_v6 = vadd.f32 %v676_v61, %v615_v60  ;;  %v714_v11 = vadd.f32 %v713_v58, %v699_v48  ;;  %v701_v17 = vmul.f32 %v7234_v55, %v7234_v55 }
 0x123   :  { %v252_v12 = vadd.f32 %v251_v63, %v250_v51  ;;  %v289_v14 = vrot.slane %v288_v0, 1  ;;  %v473_v15 = vadd.f32 %v472_v1, %v471_v53  ;;  %v7237_v18 = vpop.f32.mrb[22].mxu0  ;;  %v7293_v20 = vpop.f32.mrb[22].mxu1  ;;  %v897_v24 = vadd.f32 %v7287_v37, %v896_v50 }
 0x124   :  { %v510_v21 = vrot.slane %v509_v4, 1  ;;  %v715_v23 = vadd.f32 %v714_v11, %v700_v7  ;;  %v921_v3 = vmul.f32 %v836_v62, %v836_v62  ;;  %v625_v5 = vpop.f32.mrb[23].mxu0  ;;  %v846_v8 = vpop.f32.mrb[23].mxu1  ;;  %v922_v13 = vmul.f32 %v7290_v56, %v7290_v56 }
 0x125   :  { %v290_v9 = vadd.f32 %v289_v14, %v288_v0  ;;  %v9354_v10 = vadd.f32 %v473_v15, %v252_v12  ;;  %v935_v16 = vadd.f32 %v934_v2, %v920_v59  ;;  %v898_v22 = vadd.f32 %v897_v24, %v836_v62 }
 0x126   :  { %v511_v19 = vadd.f32 %v510_v21, %v509_v4  ;;  %v678_v25 = vadd.f32 %v7234_v55, %v677_v6  ;;  %v702_v26 = vmul.f32 %v625_v5, %v625_v5  ;;  %v716_v28 = vadd.f32 %v715_v23, %v701_v17 }
 0x127   :  { %v936_v27 = vadd.f32 %v935_v16, %v921_v3  ;;  %v923_v29 = vmul.f32 %v846_v8, %v846_v8  ;;  %v7240_v30 = vpop.f32.mrb[24].mxu0  ;;  %v7296_v31 = vpop.f32.mrb[24].mxu1  ;;  %v703_v33 = vmul.f32 %v7237_v18, %v7237_v18  ;;  %v899_v35 = vadd.f32 %v7290_v56, %v898_v22 }
 0x128   :  { %v9356_v32 = vadd.f32 %v511_v19, %v290_v9  ;;  %v679_v34 = vadd.f32 %v678_v25, %v625_v5  ;;  %v635_v36 = vpop.f32.mrb[25].mxu0  ;;  %v856_v37 = vpop.f32.mrb[25].mxu1  ;;  %v717_v38 = vadd.f32 %v716_v28, %v702_v26  ;;  %v924_v39 = vmul.f32 %v7293_v20, %v7293_v20 }
 0x129   :  { %v937_v40 = vadd.f32 %v936_v27, %v922_v13  ;;  %v704_v41 = vmul.f32 %v635_v36, %v635_v36  ;;  %v900_v42 = vadd.f32 %v899_v35, %v846_v8  ;;  %v925_v46 = vmul.f32 %v856_v37, %v856_v37 }
 0x12a   :  { %v680_v43 = vadd.f32 %v7237_v18, %v679_v34  ;;  %v718_v45 = vadd.f32 %v717_v38, %v703_v33  ;;  %v705_v49 = vmul.f32 %v7240_v30, %v7240_v30  ;;  %v926_v55 = vmul.f32 %v7296_v31, %v7296_v31 }
 0x12b   :  { %v938_v44 = vadd.f32 %v937_v40, %v923_v29  ;;  %v7243_v47 = vpop.f32.mrb[26].mxu0  ;;  %v7299_v48 = vpop.f32.mrb[26].mxu1  ;;  %v901_v51 = vadd.f32 %v7293_v20, %v900_v42 }
 0x12c   :  { %v681_v50 = vadd.f32 %v680_v43, %v635_v36  ;;  %v645_v52 = vpop.f32.mrb[27].mxu0  ;;  %v866_v53 = vpop.f32.mrb[27].mxu1  ;;  %v719_v54 = vadd.f32 %v718_v45, %v704_v41  ;;  %v707_v1 = vmul.f32 %v7243_v47, %v7243_v47  ;;  %v928_v12 = vmul.f32 %v7299_v48, %v7299_v48 }
 0x12d   :  { %v939_v56 = vadd.f32 %v938_v44, %v924_v39  ;;  %v706_v57 = vmul.f32 %v645_v52, %v645_v52  ;;  %v902_v58 = vadd.f32 %v901_v51, %v856_v37  ;;  %v927_v62 = vmul.f32 %v866_v53, %v866_v53 }
 0x12e   :  { %v682_v59 = vadd.f32 %v7240_v30, %v681_v50  ;;  %v720_v61 = vadd.f32 %v719_v54, %v705_v49 }
 0x12f   :  { %v940_v60 = vadd.f32 %v939_v56, %v925_v46  ;;  %v7246_v63 = vpop.f32.mrb[28].mxu0  ;;  %v7302_v0 = vpop.f32.mrb[28].mxu1  ;;  %v903_v4 = vadd.f32 %v7296_v31, %v902_v58 }
 0x130   :  { %v683_v2 = vadd.f32 %v682_v59, %v645_v52  ;;  %v655_v6 = vpop.f32.mrb[29].mxu0  ;;  %v876_v7 = vpop.f32.mrb[29].mxu1  ;;  %v721_v11 = vadd.f32 %v720_v61, %v706_v57  ;;  %v709_v5 = vmul.f32 %v7246_v63, %v7246_v63  ;;  %v930_v22 = vmul.f32 %v7302_v0, %v7302_v0 }
 0x131   :  { %v941_v14 = vadd.f32 %v940_v60, %v926_v55  ;;  %v708_v15 = vmul.f32 %v655_v6, %v655_v6  ;;  %v904_v17 = vadd.f32 %v903_v4, %v866_v53  ;;  %v929_v23 = vmul.f32 %v876_v7, %v876_v7 }
 0x132   :  { %v684_v18 = vadd.f32 %v7243_v47, %v683_v2  ;;  %v722_v21 = vadd.f32 %v721_v11, %v707_v1 }
 0x133   :  { %v942_v20 = vadd.f32 %v941_v14, %v927_v62  ;;  %v7249_v24 = vpop.f32.mrb[30].mxu0  ;;  %v7305_v3 = vpop.f32.mrb[30].mxu1  ;;  %v905_v9 = vadd.f32 %v7299_v48, %v904_v17 }
 0x134   :  { %v685_v8 = vadd.f32 %v684_v18, %v655_v6  ;;  %v665_v13 = vpop.f32.mrb[31].mxu0  ;;  %v886_v16 = vpop.f32.mrb[31].mxu1  ;;  %v723_v19 = vadd.f32 %v722_v21, %v708_v15  ;;  %v711_v39 = vmul.f32 %v7249_v24, %v7249_v24  ;;  %v932_v41 = vmul.f32 %v7305_v3, %v7305_v3 }
 0x135   :  { %v943_v25 = vadd.f32 %v942_v20, %v928_v12  ;;  %v710_v26 = vmul.f32 %v665_v13, %v665_v13  ;;  %v906_v27 = vadd.f32 %v905_v9, %v876_v7  ;;  %v931_v31 = vmul.f32 %v886_v16, %v886_v16 }
 0x136   :  { %v686_v28 = vadd.f32 %v7246_v63, %v685_v8  ;;  %v724_v30 = vadd.f32 %v723_v19, %v709_v5 }
 0x137   :  { %v944_v29 = vadd.f32 %v943_v25, %v929_v23  ;;  %v9358_v33 = vpop.f32.mrb[32].mxu0  ;;  %v9360_v34 = vpop.f32.mrb[32].mxu1  ;;  %v907_v36 = vadd.f32 %v7302_v0, %v906_v27 }
 0x138   :  { %v687_v35 = vadd.f32 %v686_v28, %v665_v13  ;;  %v9362_v37 = vpop.f32.mrb[33].mxu0  ;;  %v9364_v38 = vpop.f32.mrb[33].mxu1  ;;  %v725_v40 = vadd.f32 %v724_v30, %v710_v26 }
 0x139   :  { %v945_v42 = vadd.f32 %v944_v29, %v930_v22  ;;  %v908_v44 = vadd.f32 %v907_v36, %v886_v16 }
 0x13a   :  { %v688_v43 = vadd.f32 %v7249_v24, %v687_v35  ;;  %v726_v45 = vadd.f32 %v725_v40, %v711_v39 }
 0x13b   :  { %v946_v46 = vadd.f32 %v945_v42, %v931_v31  ;;  %v9366_v47 = vpop.f32.mrb[34].mxu0  ;;  %v9368_v48 = vpop.f32.mrb[34].mxu1  ;;  %v909_v50 = vadd.f32 %v7305_v3, %v908_v44 }
 0x13c   :  { %v689_v49 = vrot.slane %v688_v43, 4  ;;  %v9370_v51 = vpop.f32.mrb[35].mxu0  ;;  %v9372_v52 = vpop.f32.mrb[35].mxu1  ;;  %v727_v53 = vrot.slane %v726_v45, 4 }
 0x13d   :  { %14378 = vst [vmem:[#allocation4_spill] sm:$0xff] %v9372_v52  ;;  %v947_v54 = vadd.f32 %v946_v46, %v932_v41  ;;  %v910_v56 = vrot.slane %v909_v50, 4  ;;  %v1220_v46 = vlaneseq }
 0x13e   :  { %v690_v55 = vadd.f32 %v689_v49, %v688_v43  ;;  %v728_v57 = vadd.f32 %v727_v53, %v726_v45 }
 0x13f   :  { %v948_v58 = vrot.slane %v947_v54, 4  ;;  %v9374_v59 = vpop.f32.mrb[36].mxu0  ;;  %v9376_v60 = vpop.f32.mrb[36].mxu1  ;;  %v911_v62 = vadd.f32 %v910_v56, %v909_v50  ;;  %v9418_v53 = vshrl.u32 %v1220_v46, 7 }
 0x140   :  { %14379 = vst [vmem:[#allocation5_spill] sm:$0xff] %v9376_v60  ;;  %v691_v61 = vrot.slane %v690_v55, 2  ;;  %v9378_v63 = vpop.f32.mrb[37].mxu0  ;;  %v9380_v0 = vpop.f32.mrb[37].mxu1  ;;  %v729_v1 = vrot.slane %v728_v57, 2 }
 0x141   :  { %14380 = vst [vmem:[#allocation6_spill] sm:$0xff] %v9380_v0  ;;  %v949_v2 = vadd.f32 %v948_v58, %v947_v54  ;;  %v912_v6 = vrot.slane %v911_v62, 2  ;;  %14392 = vst [vmem:[#allocation18_spill] sm:$0xff] %v9418_v53  ;;  %v14200_v56 = vsub.s32 1, %v9418_v53  ;;  %v47_v58 = vld [vmem:[%s14180_s2] sm:$0x1] }
 0x142   :  { %v692_v4 = vadd.f32 %v691_v61, %v690_v55  ;;  %v730_v7 = vadd.f32 %v729_v1, %v728_v57  ;;  %v9423_v55 = vsub.s32 0, %v9418_v53  ;;  %v9429_v57 = vld [vmem:[%s14179_s4] sm:$0xff] }
 0x143   :  { %v950_v11 = vrot.slane %v949_v2, 2  ;;  %v9382_v12 = vpop.f32.mrb[38].mxu0  ;;  %v9384_v14 = vpop.f32.mrb[38].mxu1  ;;  %v913_v17 = vadd.f32 %v912_v6, %v911_v62  ;;  %v2056_v62 = vld [vmem:[#allocation2 + $0x1] sm:$0xff] }
 0x144   :  { %14381 = vst [vmem:[#allocation7_spill] sm:$0xff] %v9384_v14  ;;  %v693_v15 = vrot.slane %v692_v4, 1  ;;  %v9386_v18 = vpop.f32.mrb[39].mxu0  ;;  %v9388_v20 = vpop.f32.mrb[39].mxu1  ;;  %v731_v21 = vrot.slane %v730_v7, 1  ;;  %14394 = vst [vmem:[#allocation20_spill] sm:$0xff] %v9423_v55  ;;  %v9436_v61 = vrot.slane %v9429_v57, %v9423_v55 }
 0x145   :  { %14382 = vst [vmem:[#allocation8_spill] sm:$0xff] %v9388_v20  ;;  %v951_v23 = vadd.f32 %v950_v11, %v949_v2  ;;  %v914_v3 = vrot.slane %v913_v17, 1  ;;  %v9441_v2 = vrot.slane %v9429_v57, %v14200_v56  ;;  %v2387_v11 = vsub.s32 7, %v9418_v53 }
 0x146   :  { %v694_v24 = vadd.f32 %v693_v15, %v692_v4  ;;  %v732_v5 = vadd.f32 %v731_v21, %v730_v7  ;;  %v2230_v4 = vsub.s32 4, %v9418_v53  ;;  %v2126_v7 = vsub.s32 2, %v9418_v53  ;;  %v48_v15 = vld [vmem:[%s14181_s3] sm:$0x1] }
 0x147   :  { %v952_v8 = vrot.slane %v951_v23, 1  ;;  %v9390_v9 = vpop.f32.mrb[40].mxu0  ;;  %v9392_v13 = vpop.f32.mrb[40].mxu1  ;;  %v915_v19 = vadd.f32 %v914_v3, %v913_v17  ;;  %v2040_v17 = vmul.f32 0.0, %v9436_v61  ;;  %v2076_v21 = vmul.f32 %v9441_v2, %v2056_v62  ;;  %v2057_v3 = vld [vmem:[#allocation2 + $0x9] sm:$0xff] }
 0x148   :  { %14383 = vst [vmem:[#allocation9_spill] sm:$0xff] %v9392_v13  ;;  %v695_v16 = vadd.f32 %v694_v24, %v9354_v10  ;;  %v9395_v22 = vpop.f32.mrb[41].mxu0  ;;  %v9397_v25 = vpop.f32.mrb[41].mxu1  ;;  %v733_v26 = vadd.f32 %v732_v5, %v9356_v32 }
 0x149   :  { %14384 = vst [vmem:[#allocation10_spill] sm:$0xff] %v9397_v25  ;;  %v953_v27 = vadd.f32 %v952_v8, %v951_v23  ;;  %v9457_v8 = vrot.slane %v9429_v57, %v2230_v4 }
 0x14a   :  { %v916_v28 = vadd.f32 %v915_v19, %v695_v16  ;;  %v9460_v19 = vrot.slane %v9429_v57, %v2126_v7 }
 0x14b   :  { %v954_v29 = vadd.f32 %v953_v27, %v733_v26  ;;  %v9400_v30 = vpop.f32.mrb[42].mxu0  ;;  %v9402_v31 = vpop.f32.mrb[42].mxu1  ;;  %14396 = vst [vmem:[#allocation22_spill] sm:$0xff] %v9457_v8  ;;  %v9464_v27 = vrot.slane %v9429_v57, %v2387_v11 }
 0x14c   :  { %14385 = vst [vmem:[#allocation11_spill] sm:$0xff] %v9402_v31  ;;  %v955_v35 = vmul.f32 0.001953125, %v916_v28  ;;  %v9404_v36 = vpop.f32.mrb[43].mxu0  ;;  %v9408_v41 = vpop.f32.mrb[43].mxu1 }
 0x14d   :  { %v956_v39 = vmul.f32 0.001953125, %v954_v29  ;;  %14387 = vst [vmem:[#allocation13_spill] sm:$0xff] %v9408_v41  ;;  %v2077_v29 = vmul.f32 %v9441_v2, %v2057_v3 }
 0x14e   :  { %v957_v40 = vmul.f32 %v955_v35, %v955_v35 }
 0x14f   :  { %v9406_v10 = vpop.f32.mrb[44].mxu0  ;;  %v9420_v54 = vpop.f32.mrb[44].mxu1 }
 0x150   :  { %14386 = vst [vmem:[#allocation12_spill] sm:$0xff] %v9406_v10  ;;  %v958_v42 = vsub.f32 %v956_v39, %v957_v40  ;;  %v9410_v43 = vpop.f32.mrb[45].mxu0  ;;  %14393 = vst [vmem:[#allocation19_spill] sm:$0xff] %v9420_v54  ;;  %v2178_v39 = vsub.s32 3, %v9418_v53  ;;  %v9491_v4 = vpop.f32.mrb[45].mxu1 }
 0x151   :  { %14388 = vst [vmem:[#allocation14_spill] sm:$0xff] %v9410_v43  ;;  %14397 = vst [vmem:[#allocation23_spill] sm:$0xff] %v9491_v4 }
 0x152   :  { %v959_v32 = vmax.f32 %v958_v42, 0.0 }
 0x153   :  { %v9412_v44 = vpop.f32.mrb[46].mxu0 }
 0x154   :  { %14389 = vst [vmem:[#allocation15_spill] sm:$0xff] %v9412_v44  ;;  %v960_v45 = vadd.f32 1e-05, %v959_v32  ;;  %v9414_v49 = vpop.f32.mrb[47].mxu0 }
 0x155   :  { %14390 = vst [vmem:[#allocation16_spill] sm:$0xff] %v9414_v49 }
 0x156   :  { %8539 = vrsqrt.f32 %v960_v45 }
 0x157   :  { %v9416_v50 = vpop.f32.mrb[48].mxu0 }
 0x158   :  { %14391 = vst [vmem:[#allocation17_spill] sm:$0xff] %v9416_v50  ;;  %v9454_v5 = vpop.f32.mrb[49].mxu0  ;;  %v9576_v50 = vpop.f32.mrb[46].mxu1 }
 0x159   :  { %14395 = vst [vmem:[#allocation21_spill] sm:$0xff] %v9454_v5  ;;  %14399 = vst [vmem:[#allocation24_spill] sm:$0xff] %v9576_v50 }
 0x15b   :  { %v9602_v14 = vpop.f32.mrb[50].mxu0 }
 0x15c   :  { %14401 = vst [vmem:[#allocation26_spill] sm:$0xff] %v9602_v14 }
 0x160   :  { %v8540_v1 = vpop.eup %8539 }
 0x161   :  { %v962_v6 = vmul.f32 %v8540_v1, %v47_v58 }
 0x163   :  { %v963_v23 = vmul.f32 %v962_v6, %v955_v35  ;;  %v9452_v24 = vrot.slane %v962_v6, %v9423_v55  ;;  %v2092_v35 = vadd.f32 %v2076_v21, %v2040_v17 }
 0x165   :  { %v964_v16 = vsub.f32 %v48_v15, %v963_v23  ;;  %v1225_v28 = vmul.f32 %v9358_v33, %v9452_v24  ;;  %v1224_v42 = vmul.f32 %v9452_v24, %v9362_v37  ;;  %v1227_v32 = vmul.f32 %v9366_v47, %v9452_v24  ;;  %v2109_v15 = vld [vmem:[#allocation2 + $0xa] sm:$0xff] }
 0x166   :  { %v1226_v45 = vmul.f32 %v9452_v24, %v9370_v51  ;;  %v1229_v33 = vmul.f32 %v9374_v59, %v9452_v24  ;;  %v1228_v46 = vmul.f32 %v9452_v24, %v9378_v63  ;;  %v1231_v58 = vmul.f32 %v9382_v12, %v9452_v24  ;;  %v2108_v59 = vld [vmem:[#allocation2 + $0x2] sm:$0xff] }
 0x167   :  { %v9471_v40 = vrot.slane %v964_v16, %v9423_v55  ;;  %v1230_v62 = vmul.f32 %v9452_v24, %v9386_v18  ;;  %v14398_v55 = vsub.s32 5, %v9418_v53 }
 0x169   :  { %v1247_v37 = vadd.f32 %v9471_v40, %v1225_v28  ;;  %v1246_v1 = vadd.f32 %v9471_v40, %v1224_v42  ;;  %v1249_v47 = vadd.f32 %v9471_v40, %v1227_v32  ;;  %v1248_v51 = vadd.f32 %v9471_v40, %v1226_v45 }
 0x16a   :  { %v1251_v6 = vadd.f32 %v9471_v40, %v1229_v33  ;;  %v1250_v63 = vadd.f32 %v9471_v40, %v1228_v46  ;;  %v1253_v12 = vadd.f32 %v9471_v40, %v1231_v58  ;;  %v1252_v7 = vadd.f32 %v9471_v40, %v1230_v62 }
 0x16b   :  { %v1263_v18 = vmax.f32 %v1247_v37, 0.0  ;;  %v1262_v11 = vmax.f32 %v1246_v1, 0.0  ;;  %v1265_v21 = vmax.f32 %v1249_v47, 0.0  ;;  %v1264_v23 = vmax.f32 %v1248_v51, 0.0 }
 0x16c   :  { %v9497_v3 = vmax.f32 %v1251_v6, 0.0  ;;  %v9499_v16 = vmax.f32 %v1250_v63, 0.0  ;;  %v9501_v28 = vmax.f32 %v1253_v12, 0.0  ;;  %v9503_v42 = vmax.f32 %v1252_v7, 0.0 }
 0x16d   :  { %1279 = vst [vmem:[#allocation2 + $0x21] sm:$0xff] %v1263_v18  ;;  %v9506_v32 = vmul.f32 %v9457_v8, %v1263_v18  ;;  %1278 = vst [vmem:[#allocation2 + $0x19] sm:$0xff] %v1262_v11  ;;  %v2093_v45 = vadd.f32 %v2077_v29, %v2040_v17  ;;  %v2128_v33 = vmul.f32 %v9460_v19, %v2108_v59  ;;  %v2335_v1 = vsub.s32 6, %v9418_v53 }
 0x16e   :  { %v9510_v46 = vmul.f32 %v9457_v8, %v1262_v11  ;;  %1281 = vst [vmem:[#allocation2 + $0x39] sm:$0xff] %v1265_v21  ;;  %1280 = vst [vmem:[#allocation2 + $0x31] sm:$0xff] %v1264_v23  ;;  %v2129_v58 = vmul.f32 %v9460_v19, %v2109_v15  ;;  %v9514_v62 = vmul.f32 %v9457_v8, %v1265_v21 }
 0x16f   :  { %v9517_v37 = vmul.f32 %v9464_v27, %v1265_v21  ;;  %1283 = vst [vmem:[#allocation2 + $0x51] sm:$0xff] %v9497_v3  ;;  %1282 = vst [vmem:[#allocation2 + $0x49] sm:$0xff] %v9499_v16  ;;  %v9525_v17 = vmul.f32 %v9457_v8, %v1264_v23  ;;  %v9528_v29 = vmul.f32 %v9464_v27, %v1264_v23 }
 0x170   :  { %1285 = vst [vmem:[#allocation2 + $0x69] sm:$0xff] %v9501_v28  ;;  %1284 = vst [vmem:[#allocation2 + $0x61] sm:$0xff] %v9503_v42  ;;  %v9532_v47 = vmul.f32 %v9457_v8, %v9497_v3  ;;  %v1233_v51 = vmul.f32 %v9390_v9, %v9452_v24  ;;  %v9538_v59 = vmul.f32 %v9464_v27, %v9497_v3 }
 0x171   :  { %v9542_v6 = vmul.f32 %v9457_v8, %v9499_v16  ;;  %v9546_v63 = vmul.f32 %v9464_v27, %v9499_v16  ;;  %v1232_v12 = vmul.f32 %v9452_v24, %v9395_v22  ;;  %v9551_v7 = vrot.slane %v9429_v57, %v2178_v39 }
 0x172   :  { %v9555_v9 = vmul.f32 %v9457_v8, %v9501_v28  ;;  %v9559_v15 = vmul.f32 %v9464_v27, %v9501_v28  ;;  %v9563_v56 = vmul.f32 %v9457_v8, %v9503_v42  ;;  %v9567_v26 = vmul.f32 %v9464_v27, %v9503_v42 }
 0x173   :  { %v1255_v22 = vadd.f32 %v9471_v40, %v1233_v51  ;;  %v1254_v39 = vadd.f32 %v9471_v40, %v1232_v12  ;;  %v9574_v4 = vrot.slane %v9429_v57, %v14398_v55  ;;  %v2144_v5 = vadd.f32 %v2128_v33, %v2092_v35 }
 0x174   :  { %v2145_v54 = vadd.f32 %v2129_v58, %v2093_v45  ;;  %v2079_v41 = vmul.f32 %v9441_v2, %v1263_v18  ;;  %v2111_v31 = vld [vmem:[#allocation2 + $0x22] sm:$0xff]  ;;  %v2022_v25 = vld [vmem:[#allocation2 + $0x18] sm:$0xff]  ;;  %v9580_v49 = vrot.slane %v9429_v57, %v2335_v1  ;;  %v2078_v35 = vmul.f32 %v9441_v2, %v1262_v11  ;;  %v9590_v58 = vpop.f32.mrb[47].mxu1 }
 0x175   :  { %v2023_v13 = vld [vmem:[#allocation2 + $0x20] sm:$0xff]  ;;  %v9582_v51 = vmax.f32 %v1255_v22, 0.0  ;;  %v9584_v12 = vmax.f32 %v1254_v39, 0.0  ;;  %v2042_v53 = vmul.f32 %v9436_v61, %v2022_v25  ;;  %v2081_v33 = vmul.f32 %v9441_v2, %v1265_v21  ;;  %v2024_v18 = vld [vmem:[#allocation2 + $0x30] sm:$0xff]  ;;  %14400 = vst [vmem:[#allocation25_spill] sm:$0xff] %v9590_v58  ;;  %v2025_v22 = vld [vmem:[#allocation2 + $0x38] sm:$0xff] }
 0x176   :  { %v2043_v55 = vmul.f32 %v9436_v61, %v2023_v13  ;;  %v2110_v45 = vld [vmem:[#allocation2 + $0x1a] sm:$0xff]  ;;  %v2131_v50 = vmul.f32 %v9460_v19, %v2111_v31  ;;  %v2180_v57 = vmul.f32 %v9551_v7, %v2022_v25  ;;  %v2181_v1 = vmul.f32 %v9551_v7, %v2023_v13  ;;  %v9596_v20 = vld [vmem:[#allocation2 + $0x32] sm:$0xff] }
 0x177   :  { %v2080_v39 = vmul.f32 %v9441_v2, %v1264_v23  ;;  %1287 = vst [vmem:[#allocation2 + $0x81] sm:$0xff] %v9582_v51  ;;  %1286 = vst [vmem:[#allocation2 + $0x79] sm:$0xff] %v9584_v12  ;;  %v2285_v11 = vmul.f32 %v9574_v4, %v2111_v31  ;;  %v2094_v21 = vadd.f32 %v2078_v35, %v2042_v53  ;;  %v9609_v31 = vpop.f32.mrb[51].mxu0 }
 0x178   :  { %v2095_v44 = vadd.f32 %v2079_v41, %v2043_v55  ;;  %v2130_v58 = vmul.f32 %v9460_v19, %v2110_v45  ;;  %v2196_v25 = vadd.f32 %v2180_v57, %v2144_v5  ;;  %v2197_v0 = vadd.f32 %v2181_v1, %v2145_v54  ;;  %14402 = vst [vmem:[#allocation27_spill] sm:$0xff] %v9609_v31  ;;  %v9614_v5 = vld [vmem:[#allocation2 + $0x3a] sm:$0xff]  ;;  %v9618_v31 = vpop.f32.mrb[48].mxu1 }
 0x179   :  { %v2284_v13 = vmul.f32 %v9574_v4, %v2110_v45  ;;  %v2044_v23 = vmul.f32 %v9436_v61, %v2024_v18  ;;  %v2045_v43 = vmul.f32 %v9436_v61, %v2025_v22  ;;  %v2132_v52 = vmul.f32 %v9460_v19, %v9596_v20  ;;  %14403 = vst [vmem:[#allocation28_spill] sm:$0xff] %v9618_v31 }
 0x17a   :  { %v2146_v60 = vadd.f32 %v2130_v58, %v2094_v21  ;;  %v2147_v10 = vadd.f32 %v2131_v50, %v2095_v44  ;;  %v2248_v41 = vadd.f32 %v9510_v46, %v2196_v25  ;;  %v2249_v53 = vadd.f32 %v9506_v32, %v2197_v0  ;;  %v2026_v50 = vld [vmem:[#allocation2 + $0x48] sm:$0xff]  ;;  %v2027_v32 = vld [vmem:[#allocation2 + $0x50] sm:$0xff] }
 0x17b   :  { %v2096_v55 = vadd.f32 %v2080_v39, %v2044_v23  ;;  %v2182_v54 = vmul.f32 %v9551_v7, %v2024_v18  ;;  %v2097_v35 = vadd.f32 %v2081_v33, %v2045_v43  ;;  %v2183_v45 = vmul.f32 %v9551_v7, %v2025_v22 }
 0x17c   :  { %v2337_v58 = vmul.f32 %v9580_v49, %v2024_v18  ;;  %v2300_v57 = vadd.f32 %v2284_v13, %v2248_v41  ;;  %v2301_v44 = vadd.f32 %v2285_v11, %v2249_v53  ;;  %v2338_v0 = vmul.f32 %v9580_v49, %v2025_v22  ;;  %v9628_v18 = vld [vmem:[#allocation2 + $0x4a] sm:$0xff] }
 0x17d   :  { %v2148_v1 = vadd.f32 %v2132_v52, %v2096_v55  ;;  %v2198_v21 = vadd.f32 %v2182_v54, %v2146_v60  ;;  %v2199_v46 = vadd.f32 %v2183_v45, %v2147_v10  ;;  %v2082_v39 = vmul.f32 %v9441_v2, %v9499_v16  ;;  %v9634_v16 = vpop.f32.mrb[49].mxu1 }
 0x17e   :  { %v2133_v43 = vmul.f32 %v9460_v19, %v9614_v5  ;;  %v2286_v52 = vmul.f32 %v9574_v4, %v9596_v20  ;;  %v2353_v60 = vadd.f32 %v2337_v58, %v2300_v57  ;;  %v2287_v10 = vmul.f32 %v9574_v4, %v9614_v5  ;;  %14404 = vst [vmem:[#allocation29_spill] sm:$0xff] %v9634_v16 }
 0x17f   :  { %v2250_v33 = vadd.f32 %v9525_v17, %v2198_v21  ;;  %v2251_v22 = vadd.f32 %v9514_v62, %v2199_v46  ;;  %v2354_v11 = vadd.f32 %v2338_v0, %v2301_v44  ;;  %v2046_v25 = vmul.f32 %v9436_v61, %v2026_v50 }
 0x180   :  { %v9637_v23 = vadd.f32 %v9528_v29, %v2353_v60  ;;  %v2047_v17 = vmul.f32 %v9436_v61, %v2027_v32  ;;  %v2149_v41 = vadd.f32 %v2133_v43, %v2097_v35  ;;  %v2134_v54 = vmul.f32 %v9460_v19, %v9628_v18  ;;  %v9650_v35 = vld [vmem:[#allocation2 + $0x52] sm:$0xff] }
 0x181   :  { %v2302_v13 = vadd.f32 %v2286_v52, %v2250_v33  ;;  %v9641_v53 = vadd.f32 %v9517_v37, %v2354_v11  ;;  %v2098_v55 = vadd.f32 %v2082_v39, %v2046_v25  ;;  %v2184_v62 = vmul.f32 %v9551_v7, %v2026_v50  ;;  %v2028_v52 = vld [vmem:[#allocation2 + $0x60] sm:$0xff] }
 0x182   :  { %v2185_v45 = vmul.f32 %v9551_v7, %v2027_v32  ;;  %v2303_v58 = vadd.f32 %v2287_v10, %v2251_v22  ;;  %v2083_v57 = vmul.f32 %v9441_v2, %v9497_v3  ;;  %v2339_v44 = vmul.f32 %v9580_v49, %v2026_v50  ;;  %v2029_v10 = vld [vmem:[#allocation2 + $0x68] sm:$0xff] }
 0x183   :  { %v2150_v29 = vadd.f32 %v2134_v54, %v2098_v55  ;;  %v2200_v21 = vadd.f32 %v2184_v62, %v2148_v1  ;;  %v2340_v46 = vmul.f32 %v9580_v49, %v2027_v32  ;;  %v2288_v43 = vmul.f32 %v9574_v4, %v9628_v18  ;;  %v9662_v32 = vld [vmem:[#allocation2 + $0x62] sm:$0xff] }
 0x184   :  { %v2201_v37 = vadd.f32 %v2185_v45, %v2149_v41  ;;  %v2099_v0 = vadd.f32 %v2083_v57, %v2047_v17  ;;  %v2355_v33 = vadd.f32 %v2339_v44, %v2302_v13  ;;  %v2135_v1 = vmul.f32 %v9460_v19, %v9650_v35  ;;  %14405 = vst [vmem:[#allocation30_spill] sm:$0xff] %v9662_v32  ;;  %v9682_v44 = vld [vmem:[#allocation2 + $0x6a] sm:$0xff] }
 0x185   :  { %v2252_v39 = vadd.f32 %v9542_v6, %v2200_v21  ;;  %v2356_v3 = vadd.f32 %v2340_v46, %v2303_v58  ;;  %v2048_v11 = vmul.f32 %v9436_v61, %v2028_v52  ;;  %v2084_v25 = vmul.f32 %v9441_v2, %v9503_v42  ;;  %v9680_v21 = vpop.f32.mrb[50].mxu1  ;;  %14408 = vst [vmem:[#allocation33_spill] sm:$0xff] %v9682_v44 }
 0x186   :  { %v2253_v60 = vadd.f32 %v9532_v47, %v2201_v37  ;;  %v9660_v22 = vadd.f32 %v9546_v63, %v2355_v33  ;;  %v2151_v47 = vadd.f32 %v2135_v1, %v2099_v0  ;;  %v2186_v13 = vmul.f32 %v9551_v7, %v2028_v52  ;;  %14407 = vst [vmem:[#allocation32_spill] sm:$0xff] %v9680_v21  ;;  %v2031_v33 = vld [vmem:[#allocation2 + $0x80] sm:$0xff] }
 0x187   :  { %v2304_v50 = vadd.f32 %v2288_v43, %v2252_v39  ;;  %v9665_v6 = vadd.f32 %v9538_v59, %v2356_v3  ;;  %v2187_v17 = vmul.f32 %v9551_v7, %v2029_v10  ;;  %v2289_v41 = vmul.f32 %v9574_v4, %v9650_v35 }
 0x188   :  { %v2049_v63 = vmul.f32 %v9436_v61, %v2029_v10  ;;  %v2100_v55 = vadd.f32 %v2084_v25, %v2048_v11  ;;  %v2136_v59 = vmul.f32 %v9460_v19, %v9662_v32  ;;  %v2202_v54 = vadd.f32 %v2186_v13, %v2150_v29 }
 0x189   :  { %14406 = vst [vmem:[#allocation31_spill] sm:$0xff] %v9665_v6  ;;  %v2203_v62 = vadd.f32 %v2187_v17, %v2151_v47  ;;  %v2085_v45 = vmul.f32 %v9441_v2, %v9501_v28  ;;  %v2305_v58 = vadd.f32 %v2289_v41, %v2253_v60  ;;  %v2341_v57 = vmul.f32 %v9580_v49, %v2028_v52  ;;  %v2030_v28 = vld [vmem:[#allocation2 + $0x78] sm:$0xff] }
 0x18a   :  { %v2152_v42 = vadd.f32 %v2136_v59, %v2100_v55  ;;  %v2254_v37 = vadd.f32 %v9563_v56, %v2202_v54  ;;  %v2290_v0 = vmul.f32 %v9574_v4, %v9662_v32  ;;  %v2342_v29 = vmul.f32 %v9580_v49, %v2029_v10  ;;  %v9693_v56 = vpop.f32.mrb[52].mxu0  ;;  %v9709_v47 = vld [vmem:[#allocation2 + $0x7a] sm:$0xff] }
 0x18b   :  { %v2255_v46 = vadd.f32 %v9555_v9, %v2203_v62  ;;  %v2101_v39 = vadd.f32 %v2085_v45, %v2049_v63  ;;  %v2357_v43 = vadd.f32 %v2341_v57, %v2304_v50  ;;  %v1235_v52 = vmul.f32 %v9400_v30, %v9452_v24  ;;  %14409 = vst [vmem:[#allocation34_spill] sm:$0xff] %v9693_v56  ;;  %v9731_v57 = vld [vmem:[#allocation2 + $0x82] sm:$0xff] }
 0x18c   :  { %v2306_v60 = vadd.f32 %v2290_v0, %v2254_v37  ;;  %v2358_v3 = vadd.f32 %v2342_v29, %v2305_v58  ;;  %v1234_v1 = vmul.f32 %v9452_v24, %v9404_v36  ;;  %v2137_v9 = vmul.f32 %v9460_v19, %v9682_v44  ;;  %14412 = vst [vmem:[#allocation37_spill] sm:$0xff] %v9709_v47  ;;  %v14426_v56 = vld [vmem:[#allocation4_spill] sm:$0xff] }
 0x18d   :  { %v9698_v11 = vadd.f32 %v9567_v26, %v2357_v43  ;;  %v2241_v10 = vmul.f32 %v9457_v8, %v9582_v51  ;;  %v2396_v50 = vmul.f32 %v9464_v27, %v9582_v51  ;;  %v2050_v30 = vmul.f32 %v9436_v61, %v2030_v28  ;;  %14414 = vst [vmem:[#allocation39_spill] sm:$0xff] %v9731_v57 }
 0x18e   :  { %v9705_v25 = vadd.f32 %v9559_v15, %v2358_v3  ;;  %v2051_v36 = vmul.f32 %v9436_v61, %v2031_v33  ;;  %v1472_v13 = vmul.f32 %v9360_v34, %v9452_v24  ;;  %v2086_v26 = vmul.f32 %v9441_v2, %v9584_v12  ;;  %v9718_v15 = vpop.f32.mrb[51].mxu1 }
 0x18f   :  { %14410 = vst [vmem:[#allocation35_spill] sm:$0xff] %v9698_v11  ;;  %v2153_v17 = vadd.f32 %v2137_v9, %v2101_v39  ;;  %v1257_v41 = vadd.f32 %v9471_v40, %v1235_v52  ;;  %v1471_v63 = vmul.f32 %v9364_v38, %v9452_v24  ;;  %14413 = vst [vmem:[#allocation38_spill] sm:$0xff] %v9718_v15 }
 0x190   :  { %14411 = vst [vmem:[#allocation36_spill] sm:$0xff] %v9705_v25  ;;  %v2087_v55 = vmul.f32 %v9441_v2, %v9582_v51  ;;  %v2188_v59 = vmul.f32 %v9551_v7, %v2030_v28  ;;  %v2189_v54 = vmul.f32 %v9551_v7, %v2031_v33  ;;  %v1256_v34 = vadd.f32 %v9471_v40, %v1234_v1  ;;  %v9737_v1 = vpop.f32.mrb[53].mxu0 }
 0x191   :  { %v2291_v62 = vmul.f32 %v9574_v4, %v9682_v44  ;;  %v2102_v45 = vadd.f32 %v2086_v26, %v2050_v30  ;;  %v2138_v58 = vmul.f32 %v9460_v19, %v9709_v47  ;;  %v2240_v38 = vmul.f32 %v9457_v8, %v9584_v12  ;;  %14415 = vst [vmem:[#allocation40_spill] sm:$0xff] %v9737_v1 }
 0x192   :  { %v2103_v37 = vadd.f32 %v2087_v55, %v2051_v36  ;;  %v2204_v51 = vadd.f32 %v2188_v59, %v2152_v42  ;;  %v2205_v0 = vadd.f32 %v2189_v54, %v2153_v17  ;;  %v1488_v29 = vadd.f32 %v1472_v13, %v9471_v40 }
 0x193   :  { %v2154_v39 = vadd.f32 %v2138_v58, %v2102_v45  ;;  %v2292_v43 = vmul.f32 %v9574_v4, %v9709_v47  ;;  %v2307_v3 = vadd.f32 %v2291_v62, %v2255_v46  ;;  %v2343_v52 = vmul.f32 %v9580_v49, %v2030_v28 }
 0x194   :  { %v2256_v9 = vadd.f32 %v2240_v38, %v2204_v51  ;;  %v2257_v30 = vadd.f32 %v2241_v10, %v2205_v0  ;;  %v2344_v26 = vmul.f32 %v9580_v49, %v2031_v33  ;;  %v2395_v36 = vmul.f32 %v9464_v27, %v9584_v12 }
 0x195   :  { %v2139_v42 = vmul.f32 %v9460_v19, %v9731_v57  ;;  %v2293_v13 = vmul.f32 %v9574_v4, %v9731_v57  ;;  %v2359_v17 = vadd.f32 %v2343_v52, %v2306_v60  ;;  %v1487_v46 = vadd.f32 %v1471_v63, %v9471_v40  ;;  %v9753_v60 = vpop.f32.mrb[52].mxu1 }
 0x196   :  { %v2308_v55 = vadd.f32 %v2292_v43, %v2256_v9  ;;  %v2360_v28 = vadd.f32 %v2344_v26, %v2307_v3  ;;  %v1273_v59 = vmax.f32 %v1257_v41, 0.0  ;;  %v1272_v54 = vmax.f32 %v1256_v34, 0.0  ;;  %14418 = vst [vmem:[#allocation43_spill] sm:$0xff] %v9753_v60  ;;  %v9766_v3 = vpop.f32.mrb[53].mxu1 }
 0x197   :  { %v9747_v62 = vadd.f32 %v2395_v36, %v2359_v17  ;;  %v2155_v10 = vadd.f32 %v2139_v42, %v2103_v37  ;;  %v2309_v33 = vadd.f32 %v2293_v13, %v2257_v30  ;;  %v1504_v45 = vmax.f32 %v1488_v29, 0.0  ;;  %v14419_v37 = vld [vmem:[#allocation12_spill] sm:$0xff]  ;;  %14421 = vst [vmem:[#allocation44_spill] sm:$0xff] %v9766_v3 }
 0x198   :  { %v9749_v58 = vadd.f32 %v2396_v50, %v2360_v28  ;;  %1289 = vst [vmem:[#allocation2 + $0x99] sm:$0xff] %v1273_v59  ;;  %v2243_v12 = vmul.f32 %v9457_v8, %v1273_v59  ;;  %v2398_v38 = vmul.f32 %v9464_v27, %v1273_v59  ;;  %1288 = vst [vmem:[#allocation2 + $0x91] sm:$0xff] %v1272_v54  ;;  %v1503_v0 = vmax.f32 %v1487_v46, 0.0 }
 0x199   :  { %14416 = vst [vmem:[#allocation41_spill] sm:$0xff] %v9747_v62  ;;  %v2242_v63 = vmul.f32 %v9457_v8, %v1272_v54  ;;  %v2397_v41 = vmul.f32 %v9464_v27, %v1272_v54  ;;  %1521 = vst [vmem:[#allocation2 + $0xe1] sm:$0xff] %v1504_v45  ;;  %v1474_v34 = vmul.f32 %v9368_v48, %v9452_v24 }
 0x19a   :  { %14417 = vst [vmem:[#allocation42_spill] sm:$0xff] %v9749_v58  ;;  %v1237_v50 = vmul.f32 %v14419_v37, %v9452_v24  ;;  %v9762_v51 = vmul.f32 %v9457_v8, %v1504_v45  ;;  %1520 = vst [vmem:[#allocation2 + $0xd9] sm:$0xff] %v1503_v0  ;;  %v9769_v52 = vmul.f32 %v9457_v8, %v1503_v0 }
 0x19b   :  { %v1490_v29 = vadd.f32 %v1474_v34, %v9471_v40  ;;  %v2088_v17 = vmul.f32 %v9441_v2, %v1272_v54  ;;  %v2089_v28 = vmul.f32 %v9441_v2, %v1273_v59  ;;  %v2600_v59 = vmul.f32 %v9441_v2, %v1503_v0 }
 0x19c   :  { %14420 = vst [vmem:[#allocation12_spill] sm:$0xff] %v9762_v51  ;;  %v1259_v43 = vadd.f32 %v9471_v40, %v1237_v50  ;;  %14422 = vst [vmem:[#allocation45_spill] sm:$0xff] %v9769_v52  ;;  %v1473_v21 = vmul.f32 %v14426_v56, %v9452_v24  ;;  %v2601_v56 = vmul.f32 %v9441_v2, %v1504_v45 }
 0x19d   :  { %v9771_v9 = vmax.f32 %v1490_v29, 0.0 }
 0x19e   :  { %v9773_v48 = vmax.f32 %v1259_v43, 0.0 }
 0x19f   :  { %v2032_v30 = vld [vmem:[#allocation2 + $0x90] sm:$0xff]  ;;  %v2033_v26 = vld [vmem:[#allocation2 + $0x98] sm:$0xff]  ;;  %1523 = vst [vmem:[#allocation2 + $0xf9] sm:$0xff] %v9771_v9  ;;  %v9778_v36 = vmul.f32 %v9457_v8, %v9771_v9  ;;  %v9782_v42 = vmul.f32 %v9464_v27, %v9771_v9  ;;  %v2603_v25 = vmul.f32 %v9441_v2, %v9771_v9 }
 0x1a0   :  { %14423 = vst [vmem:[#allocation46_spill] sm:$0xff] %v9773_v48  ;;  %1291 = vst [vmem:[#allocation2 + $0xb1] sm:$0xff] %v9773_v48  ;;  %v2052_v13 = vmul.f32 %v9436_v61, %v2032_v30  ;;  %v9787_v46 = vld [vmem:[#allocation2 + $0x92] sm:$0xff]  ;;  %v2190_v34 = vmul.f32 %v9551_v7, %v2032_v30  ;;  %v2191_v37 = vmul.f32 %v9551_v7, %v2033_v26 }
 0x1a1   :  { %14424 = vst [vmem:[#allocation47_spill] sm:$0xff] %v9782_v42  ;;  %14425 = vst [vmem:[#allocation48_spill] sm:$0xff] %v9787_v46  ;;  %v2140_v29 = vmul.f32 %v9460_v19, %v9787_v46  ;;  %v2345_v43 = vmul.f32 %v9580_v49, %v2032_v30  ;;  %v2346_v3 = vmul.f32 %v9580_v49, %v2033_v26  ;;  %v9796_v15 = vld [vmem:[#allocation2 + $0xd8] sm:$0xff]  ;;  %v9798_v54 = vld [vmem:[#allocation2 + $0xe0] sm:$0xff] }
 0x1a2   :  { %v2104_v50 = vadd.f32 %v2088_v17, %v2052_v13  ;;  %v2206_v60 = vadd.f32 %v2190_v34, %v2154_v39  ;;  %v2207_v1 = vadd.f32 %v2191_v37, %v2155_v10  ;;  %v2053_v13 = vmul.f32 %v9436_v61, %v2033_v26  ;;  %v9806_v30 = vld [vmem:[#allocation2 + $0xda] sm:$0xff]  ;;  %v14431_v26 = vld [vmem:[#allocation14_spill] sm:$0xff] }
 0x1a3   :  { %v2361_v16 = vadd.f32 %v2345_v43, %v2308_v55  ;;  %v2362_v31 = vadd.f32 %v2346_v3, %v2309_v33  ;;  %v2294_v10 = vmul.f32 %v9574_v4, %v9787_v46  ;;  %v2568_v34 = vmul.f32 %v9796_v15, %v9436_v61  ;;  %v9819_v33 = vld [vmem:[#allocation2 + $0x9a] sm:$0xff]  ;;  %v14433_v43 = vld [vmem:[#allocation5_spill] sm:$0xff] }
 0x1a4   :  { %v9804_v17 = vadd.f32 %v2140_v29, %v2104_v50  ;;  %v2258_v14 = vadd.f32 %v2242_v63, %v2206_v60  ;;  %v2259_v39 = vadd.f32 %v2243_v12, %v2207_v1  ;;  %v2569_v55 = vmul.f32 %v9798_v54, %v9436_v61  ;;  %14429 = vst [vmem:[#allocation50_spill] sm:$0xff] %v9819_v33  ;;  %v9823_v1 = vld [vmem:[#allocation2 + $0xe2] sm:$0xff] }
 0x1a5   :  { %v9812_v0 = vadd.f32 %v2397_v41, %v2361_v16  ;;  %v9814_v37 = vadd.f32 %v2398_v38, %v2362_v31  ;;  %v2616_v12 = vadd.f32 %v2600_v59, %v2568_v34  ;;  %v2648_v60 = vmul.f32 %v9806_v30, %v9460_v19 }
 0x1a6   :  { %v9821_v3 = vadd.f32 %v2294_v10, %v2258_v14  ;;  %v1489_v16 = vadd.f32 %v1473_v21, %v9471_v40  ;;  %v2105_v63 = vadd.f32 %v2089_v28, %v2053_v13  ;;  %v2617_v31 = vadd.f32 %v2601_v56, %v2569_v55  ;;  %v14434_v56 = vld [vmem:[#allocation6_spill] sm:$0xff] }
 0x1a7   :  { %14427 = vst [vmem:[#allocation4_spill] sm:$0xff] %v9812_v0  ;;  %14428 = vst [vmem:[#allocation49_spill] sm:$0xff] %v9814_v37  ;;  %v9828_v38 = vadd.f32 %v2648_v60, %v2616_v12  ;;  %v2141_v45 = vmul.f32 %v9460_v19, %v9819_v33  ;;  %v2649_v41 = vmul.f32 %v9823_v1, %v9460_v19  ;;  %v9853_v12 = vpop.f32.mrb[54].mxu0 }
 0x1a8   :  { %v9836_v14 = vmul.f32 %v9457_v8, %v9773_v48  ;;  %v1236_v50 = vmul.f32 %v9452_v24, %v14431_v26  ;;  %v2295_v21 = vmul.f32 %v9574_v4, %v9819_v33  ;;  %v9844_v28 = vmul.f32 %v9464_v27, %v9773_v48  ;;  %14435 = vst [vmem:[#allocation5_spill] sm:$0xff] %v9853_v12  ;;  %v9888_v12 = vpop.f32.mrb[55].mxu0 }
 0x1a9   :  { %v1505_v29 = vmax.f32 %v1489_v16, 0.0  ;;  %v1476_v59 = vmul.f32 %v14433_v43, %v9452_v24  ;;  %v2665_v13 = vadd.f32 %v2649_v41, %v2617_v31  ;;  %v9849_v34 = vadd.f32 %v2141_v45, %v2105_v63  ;;  %v9863_v63 = vpop.f32.mrb[54].mxu1  ;;  %v14438_v45 = vld [vmem:[#allocation7_spill] sm:$0xff] }
 0x1aa   :  { %14430 = vst [vmem:[#allocation51_spill] sm:$0xff] %v9836_v14  ;;  %14432 = vst [vmem:[#allocation14_spill] sm:$0xff] %v9844_v28  ;;  %v1258_v10 = vadd.f32 %v9471_v40, %v1236_v50  ;;  %v1475_v55 = vmul.f32 %v14434_v56, %v9452_v24  ;;  %v9859_v16 = vadd.f32 %v2295_v21, %v2259_v39  ;;  %v14439_v43 = vld [vmem:[#allocation15_spill] sm:$0xff]  ;;  %v14440_v28 = vld [vmem:[#allocation8_spill] sm:$0xff] }
 0x1ab   :  { %1522 = vst [vmem:[#allocation2 + $0xf1] sm:$0xff] %v1505_v29  ;;  %v2744_v60 = vmul.f32 %v9457_v8, %v1505_v29  ;;  %v9857_v26 = vmul.f32 %v9464_v27, %v1505_v29  ;;  %v1492_v31 = vadd.f32 %v1476_v59, %v9471_v40  ;;  %14437 = vst [vmem:[#allocation52_spill] sm:$0xff] %v9863_v63 }
 0x1ac   :  { %v1274_v37 = vmax.f32 %v1258_v10, 0.0  ;;  %v1491_v41 = vadd.f32 %v1475_v55, %v9471_v40  ;;  %v1478_v50 = vmul.f32 %v14438_v45, %v9452_v24  ;;  %v1239_v56 = vmul.f32 %v14439_v43, %v9452_v24  ;;  %v14441_v10 = vld [vmem:[#allocation16_spill] sm:$0xff]  ;;  %14442 = vst [vmem:[#allocation7_spill] sm:$0xff] %v9888_v12 }
 0x1ad   :  { %14436 = vst [vmem:[#allocation6_spill] sm:$0xff] %v9857_v26  ;;  %v1477_v14 = vmul.f32 %v14440_v28, %v9452_v24  ;;  %v9877_v59 = vmax.f32 %v1492_v31, 0.0  ;;  %v1238_v55 = vmul.f32 %v9452_v24, %v14441_v10  ;;  %v2602_v57 = vmul.f32 %v9441_v2, %v1505_v29  ;;  %v9943_v29 = vpop.f32.mrb[55].mxu1 }
 0x1ae   :  { %1290 = vst [vmem:[#allocation2 + $0xa9] sm:$0xff] %v1274_v37  ;;  %v9872_v39 = vmul.f32 %v9457_v8, %v1274_v37  ;;  %v9875_v21 = vmul.f32 %v9464_v27, %v1274_v37  ;;  %v9881_v63 = vmax.f32 %v1491_v41, 0.0  ;;  %v1494_v45 = vadd.f32 %v1478_v50, %v9471_v40  ;;  %v9903_v50 = vld [vmem:[%s14179_s4 + $0x8] ss:$0 sm:$0xff]  ;;  %14447 = vst [vmem:[#allocation53_spill] sm:$0xff] %v9943_v29 }
 0x1af   :  { %v9885_v43 = vadd.f32 %v9471_v40, %v1239_v56  ;;  %v1493_v28 = vadd.f32 %v1477_v14, %v9471_v40  ;;  %1525 = vst [vmem:[#allocation2 + $0x111] sm:$0xff] %v9877_v59  ;;  %v9893_v31 = vmul.f32 %v9457_v8, %v9877_v59  ;;  %v9897_v10 = vmul.f32 %v9464_v27, %v9877_v59 }
 0x1b0   :  { %v1260_v41 = vadd.f32 %v9471_v40, %v1238_v55  ;;  %1524 = vst [vmem:[#allocation2 + $0x109] sm:$0xff] %v9881_v63  ;;  %v9908_v14 = vmul.f32 %v9457_v8, %v9881_v63  ;;  %v9912_v56 = vmul.f32 %v9464_v27, %v9881_v63  ;;  %v9914_v12 = vmax.f32 %v1494_v45, 0.0 }
 0x1b1   :  { %v9923_v46 = vmax.f32 %v1493_v28, 0.0  ;;  %v2441_v47 = vmul.f32 %v9903_v50, %v9596_v20 }
 0x1b2   :  { %v9916_v48 = vld [vmem:[#allocation2 + $0xf0] sm:$0xff]  ;;  %v9918_v55 = vld [vmem:[#allocation2 + $0xf8] sm:$0xff]  ;;  %v9925_v58 = vmax.f32 %v1260_v41, 0.0  ;;  %1527 = vst [vmem:[#allocation2 + $0x129] sm:$0xff] %v9914_v12  ;;  %v14446_v41 = vmax.f32 %v9885_v43, 0.0 }
 0x1b3   :  { %14443 = vst [vmem:[#allocation15_spill] sm:$0xff] %v9916_v48  ;;  %14444 = vst [vmem:[#allocation8_spill] sm:$0xff] %v9918_v55  ;;  %v9920_v33 = vld [vmem:[#allocation2 + $0xf2] sm:$0xff]  ;;  %v2570_v62 = vmul.f32 %v9916_v48, %v9436_v61  ;;  %v2696_v45 = vmul.f32 %v9916_v48, %v9551_v7  ;;  %v2571_v0 = vmul.f32 %v9918_v55, %v9436_v61 }
 0x1b4   :  { %14445 = vst [vmem:[#allocation16_spill] sm:$0xff] %v9920_v33  ;;  %v2697_v28 = vmul.f32 %v9918_v55, %v9551_v7  ;;  %1293 = vst [vmem:[#allocation2 + $0xc9] sm:$0xff] %v14446_v41  ;;  %v2650_v20 = vmul.f32 %v9920_v33, %v9460_v19  ;;  %v2792_v6 = vmul.f32 %v9920_v33, %v9574_v4 }
 0x1b5   :  { %1526 = vst [vmem:[#allocation2 + $0x121] sm:$0xff] %v9923_v46  ;;  %1292 = vst [vmem:[#allocation2 + $0xc1] sm:$0xff] %v9925_v58  ;;  %v2618_v11 = vadd.f32 %v2602_v57, %v2570_v62  ;;  %v2712_v32 = vadd.f32 %v2696_v45, %v9828_v38  ;;  %v2034_v44 = vld [vmem:[#allocation2 + $0xa8] sm:$0xff]  ;;  %v9950_v42 = vld [vmem:[#allocation2 + $0xb0] sm:$0xff]  ;;  %v2090_v55 = vmul.f32 %v9441_v2, %v1274_v37 }
 0x1b6   :  { %v9952_v26 = vld [vmem:[#allocation2 + $0xaa] sm:$0xff]  ;;  %v2713_v41 = vadd.f32 %v2697_v28, %v2665_v13  ;;  %v2054_v29 = vmul.f32 %v9436_v61, %v2034_v44  ;;  %v2192_v62 = vmul.f32 %v9551_v7, %v2034_v44  ;;  %v2193_v38 = vmul.f32 %v9551_v7, %v9950_v42  ;;  %v9961_v45 = vld [vmem:[#allocation2 + $0xfa] sm:$0xff] }
 0x1b7   :  { %v2666_v9 = vadd.f32 %v2650_v20, %v2618_v11  ;;  %v2760_v57 = vadd.f32 %v2744_v60, %v2712_v32  ;;  %v2619_v51 = vadd.f32 %v2603_v25, %v2571_v0  ;;  %v2142_v28 = vmul.f32 %v9460_v19, %v9952_v26  ;;  %v2556_v37 = vld [vmem:[#allocation2 + $0x108] sm:$0xff] }
 0x1b8   :  { %v2761_v52 = vadd.f32 %v9778_v36, %v2713_v41  ;;  %v2106_v13 = vadd.f32 %v2090_v55, %v2054_v29  ;;  %v2208_v48 = vadd.f32 %v2192_v62, %v9804_v17  ;;  %v9968_v11 = vadd.f32 %v2193_v38, %v9849_v34  ;;  %v2557_v55 = vld [vmem:[#allocation2 + $0x110] sm:$0xff]  ;;  %v10004_v62 = vpop.f32.mrb[56].mxu1 }
 0x1b9   :  { %v2808_v33 = vadd.f32 %v2792_v6, %v2760_v57  ;;  %v2347_v32 = vmul.f32 %v9580_v49, %v2034_v44  ;;  %v2442_v60 = vmul.f32 %v9903_v50, %v9614_v5  ;;  %v9974_v25 = vadd.f32 %v2441_v47, %v9637_v23  ;;  %v9986_v5 = vld [vmem:[#allocation2 + $0x10a] sm:$0xff]  ;;  %v10002_v57 = vpop.f32.mrb[56].mxu0  ;;  %14454 = vst [vmem:[#allocation60_spill] sm:$0xff] %v10004_v62 }
 0x1ba   :  { %14448 = vst [vmem:[#allocation54_spill] sm:$0xff] %v9968_v11  ;;  %v9976_v36 = vadd.f32 %v2142_v28, %v2106_v13  ;;  %v2348_v0 = vmul.f32 %v9580_v49, %v9950_v42  ;;  %v2651_v6 = vmul.f32 %v9961_v45, %v9460_v19  ;;  %v2260_v17 = vadd.f32 %v9872_v39, %v2208_v48 }
 0x1bb   :  { %14449 = vst [vmem:[#allocation55_spill] sm:$0xff] %v9974_v25  ;;  %v2296_v44 = vmul.f32 %v9574_v4, %v9952_v26  ;;  %v2363_v34 = vadd.f32 %v2347_v32, %v9821_v3  ;;  %v2793_v23 = vmul.f32 %v9961_v45, %v9574_v4  ;;  %v2572_v29 = vmul.f32 %v2556_v37, %v9436_v61 }
 0x1bc   :  { %v9991_v47 = vadd.f32 %v2348_v0, %v9859_v16  ;;  %v2604_v20 = vmul.f32 %v9441_v2, %v9881_v63  ;;  %v2667_v3 = vadd.f32 %v2651_v6, %v2619_v51  ;;  %v2698_v41 = vmul.f32 %v2556_v37, %v9551_v7  ;;  %14453 = vst [vmem:[#allocation59_spill] sm:$0xff] %v10002_v57  ;;  %v10012_v0 = vpop.f32.mrb[57].mxu0 }
 0x1bd   :  { %v9996_v48 = vadd.f32 %v2296_v44, %v2260_v17  ;;  %v9999_v39 = vadd.f32 %v9875_v21, %v2363_v34  ;;  %v2573_v16 = vmul.f32 %v2557_v55, %v9436_v61  ;;  %v2652_v13 = vmul.f32 %v9986_v5, %v9460_v19  ;;  %14455 = vst [vmem:[#allocation61_spill] sm:$0xff] %v10012_v0 }
 0x1be   :  { %14450 = vst [vmem:[#allocation56_spill] sm:$0xff] %v9991_v47  ;;  %v2620_v38 = vadd.f32 %v2604_v20, %v2572_v29  ;;  %v2699_v63 = vmul.f32 %v2557_v55, %v9551_v7  ;;  %v2714_v28 = vadd.f32 %v2698_v41, %v2666_v9  ;;  %v2809_v32 = vadd.f32 %v2793_v23, %v2761_v52  ;;  %v10019_v29 = vld [vmem:[#allocation2 + $0x112] sm:$0xff] }
 0x1bf   :  { %14451 = vst [vmem:[#allocation57_spill] sm:$0xff] %v9996_v48  ;;  %14452 = vst [vmem:[#allocation58_spill] sm:$0xff] %v9999_v39  ;;  %v2841_v21 = vmul.f32 %v2556_v37, %v9580_v49  ;;  %v2842_v51 = vmul.f32 %v2557_v55, %v9580_v49  ;;  %v10015_v6 = vadd.f32 %v2442_v60, %v9641_v53  ;;  %v2558_v55 = vld [vmem:[#allocation2 + $0x120] sm:$0xff]  ;;  %v10078_v39 = vld [vmem:[#allocation2 + $0x12a] sm:$0xff] }
 0x1c0   :  { %v2605_v17 = vmul.f32 %v9441_v2, %v9877_v59  ;;  %v2668_v44 = vadd.f32 %v2652_v13, %v2620_v38  ;;  %v2715_v34 = vadd.f32 %v2699_v63, %v2667_v3  ;;  %v2762_v20 = vadd.f32 %v9908_v14, %v2714_v28  ;;  %v2559_v38 = vld [vmem:[#allocation2 + $0x128] sm:$0xff] }
 0x1c1   :  { %14456 = vst [vmem:[#allocation62_spill] sm:$0xff] %v10015_v6  ;;  %v2794_v52 = vmul.f32 %v9986_v5, %v9574_v4  ;;  %v2857_v9 = vadd.f32 %v2841_v21, %v2808_v33  ;;  %v2858_v37 = vadd.f32 %v2842_v51, %v2809_v32  ;;  %v2749_v53 = vmul.f32 %v9457_v8, %v9914_v12  ;;  %v10048_v63 = vld [vmem:[#allocation2 + $0x122] sm:$0xff] }
 0x1c2   :  { %v2621_v23 = vadd.f32 %v2605_v17, %v2573_v16  ;;  %v2763_v41 = vadd.f32 %v9893_v31, %v2715_v34  ;;  %v2892_v59 = vmul.f32 %v9464_v27, %v9914_v12  ;;  %v2443_v60 = vmul.f32 %v9903_v50, %v9628_v18  ;;  %14458 = vst [vmem:[#allocation64_spill] sm:$0xff] %v10048_v63  ;;  %v14460_v17 = vld [vmem:[#allocation9_spill] sm:$0xff] }
 0x1c3   :  { %v2810_v3 = vadd.f32 %v2794_v52, %v2762_v20  ;;  %v10032_v14 = vadd.f32 %v9912_v56, %v2857_v9  ;;  %v10035_v33 = vadd.f32 %v9897_v10, %v2858_v37  ;;  %v10039_v31 = vmul.f32 %v9974_v25, %v9974_v25  ;;  %v10073_v9 = vpop.f32.mrb[57].mxu1 }
 0x1c4   :  { %v10043_v16 = vmul.f32 %v9903_v50, %v9650_v35  ;;  %v2653_v13 = vmul.f32 %v10019_v29, %v9460_v19  ;;  %v2574_v18 = vmul.f32 %v2558_v55, %v9436_v61  ;;  %v10052_v10 = vmul.f32 %v10015_v6, %v10015_v6  ;;  %14461 = vst [vmem:[#allocation9_spill] sm:$0xff] %v10073_v9 }
 0x1c5   :  { %14457 = vst [vmem:[#allocation63_spill] sm:$0xff] %v10035_v33  ;;  %v10055_v56 = vadd.f32 %v2443_v60, %v9660_v22  ;;  %v10059_v28 = vmul.f32 %v9823_v1, %v9574_v4  ;;  %v2606_v35 = vmul.f32 %v9441_v2, %v9923_v46  ;;  %v2700_v21 = vmul.f32 %v2558_v55, %v9551_v7 }
 0x1c6   :  { %v2669_v32 = vadd.f32 %v2653_v13, %v2621_v23  ;;  %v2701_v51 = vmul.f32 %v2559_v38, %v9551_v7  ;;  %v1480_v34 = vmul.f32 %v14460_v17, %v9452_v24  ;;  %v2795_v20 = vmul.f32 %v10019_v29, %v9574_v4  ;;  %v2174_v17 = vld [vmem:[#allocation2 + $0xc0] sm:$0xff] }
 0x1c7   :  { %14459 = vst [vmem:[#allocation65_spill] sm:$0xff] %v10055_v56  ;;  %v2607_v22 = vmul.f32 %v9441_v2, %v9914_v12  ;;  %v2622_v52 = vadd.f32 %v2606_v35, %v2574_v18  ;;  %v2654_v1 = vmul.f32 %v10048_v63, %v9460_v19  ;;  %v2575_v37 = vmul.f32 %v2559_v38, %v9436_v61 }
 0x1c8   :  { %v2716_v23 = vadd.f32 %v2700_v21, %v2668_v44  ;;  %v2717_v60 = vadd.f32 %v2701_v51, %v2669_v32  ;;  %v2748_v13 = vmul.f32 %v9457_v8, %v9923_v46  ;;  %v2811_v48 = vadd.f32 %v2795_v20, %v2763_v41  ;;  %v2175_v51 = vld [vmem:[#allocation2 + $0xc8] sm:$0xff] }
 0x1c9   :  { %v10080_v47 = vadd.f32 %v2654_v1, %v2622_v52  ;;  %v2843_v12 = vmul.f32 %v2558_v55, %v9580_v49  ;;  %v2844_v18 = vmul.f32 %v2559_v38, %v9580_v49  ;;  %v2796_v9 = vmul.f32 %v10048_v63, %v9574_v4  ;;  %v2279_v41 = vld [vmem:[#allocation2 + $0xca] sm:$0xff]  ;;  %v2278_v1 = vld [vmem:[#allocation2 + $0xc2] sm:$0xff]  ;;  %v14490_v63 = vld [vmem:[#allocation35_spill] sm:$0xff] }
 0x1ca   :  { %v2764_v35 = vadd.f32 %v2748_v13, %v2716_v23  ;;  %v2765_v11 = vadd.f32 %v2749_v53, %v2717_v60  ;;  %v2891_v44 = vmul.f32 %v9464_v27, %v9923_v46  ;;  %v2194_v0 = vmul.f32 %v9551_v7, %v2174_v17 }
 0x1cb   :  { %v2859_v32 = vadd.f32 %v2843_v12, %v2810_v3  ;;  %v2860_v21 = vadd.f32 %v2844_v18, %v2811_v48  ;;  %v1496_v52 = vadd.f32 %v1480_v34, %v9471_v40  ;;  %v2655_v55 = vmul.f32 %v10078_v39, %v9460_v19  ;;  %v14468_v18 = vld [vmem:[#allocation10_spill] sm:$0xff] }
 0x1cc   :  { %v2623_v38 = vadd.f32 %v2607_v22, %v2575_v37  ;;  %v10092_v20 = vadd.f32 %v2796_v9, %v2764_v35  ;;  %v10096_v53 = vmul.f32 %v9457_v8, %v9925_v58  ;;  %v14463_v46 = vmax.f32 %v9885_v43, 0.0 }
 0x1cd   :  { %v10101_v3 = vadd.f32 %v2891_v44, %v2859_v32  ;;  %v10103_v23 = vadd.f32 %v2892_v59, %v2860_v21  ;;  %v10106_v34 = vadd.f32 %v2194_v0, %v9976_v36  ;;  %v10110_v22 = vmul.f32 %v9464_v27, %v9925_v58  ;;  %v10137_v21 = vpop.f32.mrb[58].mxu0 }
 0x1ce   :  { %14462 = vst [vmem:[#allocation66_spill] sm:$0xff] %v10096_v53  ;;  %v2599_v48 = vmul.f32 %v9441_v2, %v14463_v46  ;;  %v2566_v9 = vmul.f32 %v2174_v17, %v9436_v61  ;;  %v2567_v37 = vmul.f32 %v2175_v51, %v9436_v61  ;;  %v2598_v43 = vmul.f32 %v9441_v2, %v9925_v58  ;;  %v10139_v51 = vpop.f32.mrb[58].mxu1  ;;  %v14472_v46 = vld [vmem:[#allocation13_spill] sm:$0xff]  ;;  %v14477_v53 = vld [vmem:[#allocation12_spill] sm:$0xff] }
 0x1cf   :  { %14464 = vst [vmem:[#allocation67_spill] sm:$0xff] %v10101_v3  ;;  %14465 = vst [vmem:[#allocation68_spill] sm:$0xff] %v10103_v23  ;;  %v2694_v60 = vmul.f32 %v9796_v15, %v9551_v7  ;;  %v2647_v59 = vmul.f32 %v2279_v41, %v9460_v19  ;;  %v2646_v13 = vmul.f32 %v2278_v1, %v9460_v19  ;;  %v10120_v36 = vmax.f32 %v1496_v52, 0.0 }
 0x1d0   :  { %14466 = vst [vmem:[#allocation69_spill] sm:$0xff] %v10106_v34  ;;  %14467 = vst [vmem:[#allocation70_spill] sm:$0xff] %v10110_v22  ;;  %v2614_v0 = vadd.f32 %v2598_v43, %v2566_v9  ;;  %v2615_v12 = vadd.f32 %v2599_v48, %v2567_v37  ;;  %v1479_v35 = vmul.f32 %v14468_v18, %v9452_v24  ;;  %v14473_v9 = vld [vmem:[#allocation17_spill] sm:$0xff]  ;;  %v14474_v43 = vld [vmem:[#allocation15_spill] sm:$0xff] }
 0x1d1   :  { %v10124_v17 = vadd.f32 %v2655_v55, %v2623_v38  ;;  %v2695_v44 = vmul.f32 %v9798_v54, %v9551_v7  ;;  %v2790_v58 = vmul.f32 %v9806_v30, %v9574_v4  ;;  %v2797_v15 = vmul.f32 %v10078_v39, %v9574_v4  ;;  %1529 = vst [vmem:[#allocation2 + $0x141] sm:$0xff] %v10120_v36  ;;  %v14471_v38 = vld [vmem:[#allocation11_spill] sm:$0xff]  ;;  %v14476_v22 = vld [vmem:[#allocation45_spill] sm:$0xff] }
 0x1d2   :  { %v10135_v32 = vmul.f32 %v9457_v8, %v10120_v36  ;;  %14469 = vst [vmem:[#allocation10_spill] sm:$0xff] %v10137_v21  ;;  %14470 = vst [vmem:[#allocation71_spill] sm:$0xff] %v10139_v51  ;;  %v2662_v52 = vadd.f32 %v2646_v13, %v2614_v0  ;;  %v2663_v55 = vadd.f32 %v2647_v59, %v2615_v12 }
 0x1d3   :  { %v10143_v54 = vmul.f32 %v9464_v27, %v10120_v36  ;;  %v1495_v30 = vadd.f32 %v1479_v35, %v9471_v40  ;;  %v10146_v41 = vadd.f32 %v2797_v15, %v2765_v11  ;;  %v1482_v1 = vmul.f32 %v14471_v38, %v9452_v24  ;;  %v14475_v15 = vld [vmem:[#allocation19_spill] sm:$0xff] }
 0x1d4   :  { %v1481_v48 = vmul.f32 %v14472_v46, %v9452_v24  ;;  %v1714_v37 = vmul.f32 %v14473_v9, %v9452_v24  ;;  %v2839_v59 = vmul.f32 %v14474_v43, %v9580_v49  ;;  %v2710_v13 = vadd.f32 %v2694_v60, %v2662_v52  ;;  %v14478_v60 = vld [vmem:[#allocation21_spill] sm:$0xff] }
 0x1d5   :  { %v2711_v0 = vadd.f32 %v2695_v44, %v2663_v55  ;;  %v1511_v12 = vmax.f32 %v1495_v30, 0.0  ;;  %v1498_v18 = vadd.f32 %v1482_v1, %v9471_v40  ;;  %v1484_v38 = vmul.f32 %v14475_v15, %v9452_v24 }
 0x1d6   :  { %v1497_v11 = vadd.f32 %v1481_v48, %v9471_v40  ;;  %v1730_v35 = vadd.f32 %v1714_v37, %v9471_v40  ;;  %v2758_v46 = vadd.f32 %v14476_v22, %v2710_v13  ;;  %v1713_v44 = vmul.f32 %v14478_v60, %v9452_v24  ;;  %v14479_v48 = vld [vmem:[#allocation8_spill] sm:$0xff] }
 0x1d7   :  { %v2759_v34 = vadd.f32 %v14477_v53, %v2711_v0  ;;  %1528 = vst [vmem:[#allocation2 + $0x139] sm:$0xff] %v1511_v12  ;;  %v2750_v9 = vmul.f32 %v9457_v8, %v1511_v12  ;;  %v10167_v52 = vmul.f32 %v9464_v27, %v1511_v12  ;;  %v10169_v55 = vmax.f32 %v1498_v18, 0.0  ;;  %v14480_v0 = vld [vmem:[#allocation31_spill] sm:$0xff] }
 0x1d8   :  { %v10171_v30 = vmax.f32 %v1497_v11, 0.0  ;;  %v10173_v1 = vmax.f32 %v1730_v35, 0.0  ;;  %v2840_v22 = vmul.f32 %v14479_v48, %v9580_v49  ;;  %v2806_v37 = vadd.f32 %v2790_v58, %v2758_v46  ;;  %v10199_v35 = vpop.f32.mrb[59].mxu0 }
 0x1d9   :  { %v2807_v53 = vadd.f32 %v10059_v28, %v2759_v34  ;;  %v1500_v43 = vadd.f32 %v1484_v38, %v9471_v40  ;;  %v2473_v13 = vadd.f32 %v10015_v6, %v9974_v25  ;;  %v10183_v15 = vadd.f32 %v10043_v16, %v14480_v0  ;;  %1531 = vst [vmem:[#allocation2 + $0x159] sm:$0xff] %v10169_v55 }
 0x1da   :  { %v2497_v18 = vmul.f32 %v10055_v56, %v10055_v56  ;;  %1530 = vst [vmem:[#allocation2 + $0x151] sm:$0xff] %v10171_v30  ;;  %1763 = vst [vmem:[#allocation2 + $0x1d1] sm:$0xff] %v10173_v1  ;;  %v1729_v28 = vadd.f32 %v1713_v44, %v9471_v40  ;;  %v2855_v34 = vadd.f32 %v2839_v59, %v2806_v37  ;;  %v14483_v44 = vld [vmem:[#allocation6_spill] sm:$0xff] }
 0x1db   :  { %14481 = vst [vmem:[#allocation11_spill] sm:$0xff] %v10183_v15  ;;  %v2856_v58 = vadd.f32 %v2840_v22, %v2807_v53  ;;  %v10193_v11 = vmul.f32 %v9457_v8, %v10169_v55  ;;  %v10197_v16 = vmul.f32 %v9464_v27, %v10169_v55  ;;  %14482 = vst [vmem:[#allocation13_spill] sm:$0xff] %v10199_v35  ;;  %v14484_v22 = vld [vmem:[#allocation47_spill] sm:$0xff]  ;;  %v14489_v35 = vld [vmem:[#allocation30_spill] sm:$0xff] }
 0x1dc   :  { %v2511_v38 = vadd.f32 %v10052_v10, %v10039_v31  ;;  %v2474_v46 = vadd.f32 %v2473_v13, %v10055_v56  ;;  %v10206_v60 = vmul.f32 %v9457_v8, %v10171_v30  ;;  %v10210_v59 = vmul.f32 %v9464_v27, %v10171_v30  ;;  %v14487_v10 = vld [vmem:[#allocation33_spill] sm:$0xff] }
 0x1dd   :  { %v10213_v48 = vadd.f32 %v14483_v44, %v2855_v34  ;;  %v10216_v37 = vadd.f32 %v14484_v22, %v2856_v58  ;;  %v10220_v53 = vmul.f32 %v9457_v8, %v10173_v1  ;;  %v10222_v31 = vmax.f32 %v1500_v43, 0.0  ;;  %v10230_v34 = vpop.f32.mrb[59].mxu1 }
 0x1de   :  { %v2446_v13 = vmul.f32 %v9903_v50, %v14487_v10  ;;  %v2560_v0 = vld [vmem:[#allocation2 + $0x138] sm:$0xff]  ;;  %v2561_v56 = vld [vmem:[#allocation2 + $0x140] sm:$0xff]  ;;  %v10228_v25 = vmax.f32 %v1729_v28, 0.0  ;;  %14488 = vst [vmem:[#allocation19_spill] sm:$0xff] %v10230_v34  ;;  %v2498_v58 = vmul.f32 %v10183_v15, %v10183_v15  ;;  %v2512_v44 = vadd.f32 %v2511_v38, %v2497_v18 }
 0x1df   :  { %14485 = vst [vmem:[#allocation17_spill] sm:$0xff] %v10216_v37  ;;  %14486 = vst [vmem:[#allocation15_spill] sm:$0xff] %v10222_v31  ;;  %v10226_v6 = vld [vmem:[#allocation2 + $0x13a] sm:$0xff]  ;;  %v2576_v22 = vmul.f32 %v2560_v0, %v9436_v61  ;;  %v2608_v43 = vmul.f32 %v9441_v2, %v1511_v12  ;;  %v2445_v10 = vmul.f32 %v9903_v50, %v14489_v35  ;;  %v10249_v35 = vld [vmem:[#allocation2 + $0x142] sm:$0xff] }
 0x1e0   :  { %1533 = vst [vmem:[#allocation2 + $0x171] sm:$0xff] %v10222_v31  ;;  %v2577_v51 = vmul.f32 %v2561_v56, %v9436_v61  ;;  %v2702_v28 = vmul.f32 %v2560_v0, %v9551_v7  ;;  %v2703_v21 = vmul.f32 %v2561_v56, %v9551_v7  ;;  %1762 = vst [vmem:[#allocation2 + $0x1c9] sm:$0xff] %v10228_v25 }
 0x1e1   :  { %v2475_v34 = vadd.f32 %v2474_v46, %v10183_v15  ;;  %v2624_v18 = vadd.f32 %v2608_v43, %v2576_v22  ;;  %v2656_v38 = vmul.f32 %v10226_v6, %v9460_v19  ;;  %v2845_v12 = vmul.f32 %v2560_v0, %v9580_v49  ;;  %v2562_v43 = vld [vmem:[#allocation2 + $0x150] sm:$0xff] }
 0x1e2   :  { %v2609_v62 = vmul.f32 %v9441_v2, %v10120_v36  ;;  %v2718_v57 = vadd.f32 %v2702_v28, %v10080_v47  ;;  %v2719_v23 = vadd.f32 %v2703_v21, %v10124_v17  ;;  %v2846_v3 = vmul.f32 %v2561_v56, %v9580_v49 }
 0x1e3   :  { %v10255_v33 = vadd.f32 %v2445_v10, %v14490_v63  ;;  %v2672_v46 = vadd.f32 %v2656_v38, %v2624_v18  ;;  %v2798_v22 = vmul.f32 %v10226_v6, %v9574_v4  ;;  %v2861_v0 = vadd.f32 %v2845_v12, %v10092_v20  ;;  %v10268_v10 = vld [vmem:[#allocation2 + $0x152] sm:$0xff]  ;;  %v14499_v38 = vld [vmem:[#allocation41_spill] sm:$0xff] }
 0x1e4   :  { %v2625_v15 = vadd.f32 %v2609_v62, %v2577_v51  ;;  %v2766_v36 = vadd.f32 %v2750_v9, %v2718_v57  ;;  %v2767_v37 = vadd.f32 %v10135_v32, %v2719_v23  ;;  %v2862_v47 = vadd.f32 %v2846_v3, %v10146_v41  ;;  %14492 = vst [vmem:[#allocation12_spill] sm:$0xff] %v10268_v10  ;;  %v14493_v3 = vld [vmem:[#allocation36_spill] sm:$0xff]  ;;  %v14495_v51 = vld [vmem:[#allocation37_spill] sm:$0xff]  ;;  %v2563_v9 = vld [vmem:[#allocation2 + $0x158] sm:$0xff] }
 0x1e5   :  { %14491 = vst [vmem:[#allocation45_spill] sm:$0xff] %v10255_v33  ;;  %v2476_v17 = vadd.f32 %v2475_v34, %v10255_v33  ;;  %v2513_v21 = vadd.f32 %v2512_v44, %v2498_v58  ;;  %v2657_v63 = vmul.f32 %v10249_v35, %v9460_v19  ;;  %v10266_v56 = vadd.f32 %v10167_v52, %v2861_v0  ;;  %v10283_v52 = vpop.f32.mrb[60].mxu0  ;;  %v10285_v34 = vpop.f32.mrb[60].mxu1 }
 0x1e6   :  { %v2814_v28 = vadd.f32 %v2798_v22, %v2766_v36  ;;  %v10271_v20 = vadd.f32 %v10143_v54, %v2862_v47  ;;  %v2578_v57 = vmul.f32 %v2562_v43, %v9436_v61  ;;  %v2610_v62 = vmul.f32 %v9441_v2, %v10171_v30  ;;  %14496 = vst [vmem:[#allocation8_spill] sm:$0xff] %v10283_v52  ;;  %v14498_v54 = vld [vmem:[#allocation39_spill] sm:$0xff] }
 0x1e7   :  { %v10277_v23 = vadd.f32 %v2446_v13, %v14493_v3  ;;  %v2499_v32 = vmul.f32 %v10255_v33, %v10255_v33  ;;  %v2447_v41 = vmul.f32 %v9903_v50, %v14495_v51  ;;  %14497 = vst [vmem:[#allocation31_spill] sm:$0xff] %v10285_v34  ;;  %v2448_v58 = vmul.f32 %v9903_v50, %v14498_v54  ;;  %v3077_v54 = vld [vmem:[#allocation2 + $0x1b9] sm:$0xff] }
 0x1e8   :  { %v2626_v44 = vadd.f32 %v2610_v62, %v2578_v57  ;;  %v2658_v30 = vmul.f32 %v10268_v10, %v9460_v19  ;;  %v2673_v13 = vadd.f32 %v2657_v63, %v2625_v15  ;;  %v2799_v0 = vmul.f32 %v10249_v35, %v9574_v4  ;;  %v14501_v62 = vld [vmem:[#allocation42_spill] sm:$0xff] }
 0x1e9   :  { %14494 = vst [vmem:[#allocation21_spill] sm:$0xff] %v10277_v23  ;;  %v2514_v18 = vadd.f32 %v2513_v21, %v2499_v32  ;;  %v10292_v12 = vadd.f32 %v2447_v41, %v14499_v38  ;;  %v2477_v22 = vadd.f32 %v2476_v17, %v10277_v23  ;;  %v2704_v47 = vmul.f32 %v2562_v43, %v9551_v7  ;;  %v3076_v41 = vld [vmem:[#allocation2 + $0x1b1] sm:$0xff] }
 0x1ea   :  { %v10297_v36 = vadd.f32 %v2658_v30, %v2626_v44  ;;  %v2705_v3 = vmul.f32 %v2563_v9, %v9551_v7  ;;  %v2500_v57 = vmul.f32 %v10277_v23, %v10277_v23  ;;  %v10304_v15 = vadd.f32 %v2448_v58, %v14501_v62  ;;  %v8545_v62 = vld [vmem:[#allocation2] sm:$0xff] }
 0x1eb   :  { %14500 = vst [vmem:[#allocation6_spill] sm:$0xff] %v10292_v12  ;;  %v2815_v21 = vadd.f32 %v2799_v0, %v2767_v37  ;;  %v2720_v63 = vadd.f32 %v2704_v47, %v2672_v46  ;;  %v2847_v17 = vmul.f32 %v2562_v43, %v9580_v49  ;;  %v2848_v51 = vmul.f32 %v2563_v9, %v9580_v49  ;;  %v3046_v47 = vld [vmem:[#allocation2 + $0x1c8] sm:$0xff] }
 0x1ec   :  { %14502 = vst [vmem:[#allocation47_spill] sm:$0xff] %v10304_v15  ;;  %v2721_v32 = vadd.f32 %v2705_v3, %v2673_v13  ;;  %v10309_v44 = vadd.f32 %v2477_v22, %v10292_v12  ;;  %v10313_v30 = vmul.f32 %v10292_v12, %v10292_v12  ;;  %v10315_v38 = vadd.f32 %v2514_v18, %v2500_v57  ;;  %v10325_v22 = vld [vmem:[#allocation2 + $0x15a] sm:$0xff]  ;;  %v3047_v3 = vld [vmem:[#allocation2 + $0x1d0] sm:$0xff] }
 0x1ed   :  { %v2800_v37 = vmul.f32 %v10268_v10, %v9574_v4  ;;  %v2768_v46 = vadd.f32 %v10206_v60, %v2720_v63  ;;  %v2863_v58 = vadd.f32 %v2847_v17, %v2814_v28  ;;  %v2864_v13 = vadd.f32 %v2848_v51, %v2815_v21  ;;  %14503 = vst [vmem:[#allocation33_spill] sm:$0xff] %v10325_v22  ;;  %v3124_v63 = vld [vmem:[#allocation2 + $0x1b2] sm:$0xff] }
 0x1ee   :  { %v2769_v43 = vadd.f32 %v10193_v11, %v2721_v32  ;;  %v10323_v0 = vmul.f32 %v10304_v15, %v10304_v15  ;;  %v3060_v18 = vmul.f32 %v8545_v62, %v9436_v61  ;;  %v3092_v57 = vmul.f32 %v3076_v41, %v9441_v2  ;;  %v3127_v51 = vld [vmem:[#allocation2 + $0x1d2] sm:$0xff] }
 0x1ef   :  { %v3093_v12 = vmul.f32 %v3077_v54, %v9441_v2  ;;  %v2579_v60 = vmul.f32 %v2563_v9, %v9436_v61  ;;  %v10331_v11 = vadd.f32 %v2800_v37, %v2768_v46  ;;  %v10334_v28 = vadd.f32 %v10210_v59, %v2863_v58  ;;  %v3125_v59 = vld [vmem:[#allocation2 + $0x1ba] sm:$0xff]  ;;  %v3126_v37 = vld [vmem:[#allocation2 + $0x1ca] sm:$0xff]  ;;  %v10357_v46 = vpop.f32.mrb[61].mxu0 }
 0x1f0   :  { %v10337_v21 = vadd.f32 %v10197_v16, %v2864_v13  ;;  %v2611_v32 = vmul.f32 %v9441_v2, %v10169_v55  ;;  %v3095_v17 = vmul.f32 %v9441_v2, %v10173_v1  ;;  %v10345_v41 = vmul.f32 %v9457_v8, %v10222_v31  ;;  %14508 = vst [vmem:[#allocation39_spill] sm:$0xff] %v10357_v46 }
 0x1f1   :  { %14504 = vst [vmem:[#allocation30_spill] sm:$0xff] %v10334_v28  ;;  %v10349_v9 = vmul.f32 %v9464_v27, %v10222_v31  ;;  %v2659_v16 = vmul.f32 %v10325_v22, %v9460_v19  ;;  %v2801_v54 = vmul.f32 %v10325_v22, %v9574_v4  ;;  %v3062_v55 = vmul.f32 %v3046_v47, %v9436_v61 }
 0x1f2   :  { %14505 = vst [vmem:[#allocation35_spill] sm:$0xff] %v10337_v21  ;;  %14506 = vst [vmem:[#allocation36_spill] sm:$0xff] %v10345_v41  ;;  %v3063_v1 = vmul.f32 %v3047_v3, %v9436_v61  ;;  %v3094_v58 = vmul.f32 %v9441_v2, %v10228_v25  ;;  %v3108_v13 = vadd.f32 %v3092_v57, %v3060_v18 }
 0x1f3   :  { %14507 = vst [vmem:[#allocation37_spill] sm:$0xff] %v10349_v9  ;;  %v3109_v62 = vadd.f32 %v3093_v12, %v3060_v18  ;;  %v3140_v23 = vmul.f32 %v3124_v63, %v9460_v19  ;;  %v2627_v33 = vadd.f32 %v2611_v32, %v2579_v60  ;;  %v3143_v21 = vmul.f32 %v3127_v51, %v9460_v19  ;;  %v10370_v18 = vpop.f32.mrb[61].mxu1 }
 0x1f4   :  { %v3285_v9 = vmul.f32 %v3127_v51, %v9574_v4  ;;  %v3141_v41 = vmul.f32 %v3125_v59, %v9460_v19  ;;  %v3110_v34 = vadd.f32 %v3094_v58, %v3062_v55  ;;  %v3142_v52 = vmul.f32 %v3126_v37, %v9460_v19  ;;  %14509 = vst [vmem:[#allocation41_spill] sm:$0xff] %v10370_v18  ;;  %v14510_v51 = vld [vmem:[#allocation23_spill] sm:$0xff] }
 0x1f5   :  { %v3156_v28 = vadd.f32 %v3140_v23, %v3108_v13  ;;  %v3188_v46 = vmul.f32 %v3046_v47, %v9551_v7  ;;  %v3111_v31 = vadd.f32 %v3095_v17, %v3063_v1  ;;  %v3189_v57 = vmul.f32 %v3047_v3, %v9551_v7  ;;  %v14511_v3 = vld [vmem:[#allocation24_spill] sm:$0xff] }
 0x1f6   :  { %v3157_v10 = vadd.f32 %v3141_v41, %v3109_v62  ;;  %v3236_v12 = vmul.f32 %v9457_v8, %v10228_v25  ;;  %v10372_v60 = vadd.f32 %v3142_v52, %v3110_v34  ;;  %v3284_v32 = vmul.f32 %v3126_v37, %v9574_v4  ;;  %v14512_v52 = vld [vmem:[#allocation25_spill] sm:$0xff] }
 0x1f7   :  { %v3204_v63 = vadd.f32 %v3188_v46, %v3156_v28  ;;  %v1483_v59 = vmul.f32 %v14510_v51, %v9452_v24  ;;  %v10377_v55 = vadd.f32 %v2659_v16, %v2627_v33  ;;  %v10379_v47 = vadd.f32 %v2801_v54, %v2769_v43  ;;  %v14513_v28 = vld [vmem:[#allocation26_spill] sm:$0xff]  ;;  %v14515_v33 = vld [vmem:[#allocation27_spill] sm:$0xff] }
 0x1f8   :  { %v3205_v23 = vadd.f32 %v3189_v57, %v3157_v10  ;;  %v1486_v17 = vmul.f32 %v14511_v3, %v9452_v24  ;;  %v1485_v34 = vmul.f32 %v14512_v52, %v9452_v24  ;;  %v1716_v1 = vmul.f32 %v14513_v28, %v9452_v24  ;;  %v10435_v28 = vpop.f32.mrb[62].mxu1 }
 0x1f9   :  { %v3252_v41 = vadd.f32 %v3236_v12, %v3204_v63  ;;  %v1499_v25 = vadd.f32 %v1483_v59, %v9471_v40  ;;  %v1715_v43 = vmul.f32 %v14515_v33, %v9452_v24  ;;  %v10394_v16 = vadd.f32 %v3143_v21, %v3111_v31  ;;  %v14516_v12 = vld [vmem:[#allocation28_spill] sm:$0xff]  ;;  %14522 = vst [vmem:[#allocation26_spill] sm:$0xff] %v10435_v28 }
 0x1fa   :  { %v3253_v37 = vadd.f32 %v10220_v53, %v3205_v23  ;;  %v10390_v10 = vadd.f32 %v1486_v17, %v9471_v40  ;;  %v1501_v58 = vadd.f32 %v1485_v34, %v9471_v40  ;;  %v1732_v13 = vadd.f32 %v1716_v1, %v9471_v40  ;;  %v14517_v59 = vld [vmem:[#allocation48_spill] sm:$0xff]  ;;  %v10433_v34 = vpop.f32.mrb[62].mxu0 }
 0x1fb   :  { %v10396_v54 = vadd.f32 %v3284_v32, %v3252_v41  ;;  %v1515_v46 = vmax.f32 %v1499_v25, 0.0  ;;  %v1731_v57 = vadd.f32 %v1715_v43, %v9471_v40  ;;  %v1956_v63 = vmul.f32 %v14516_v12, %v9452_v24  ;;  %v14520_v25 = vld [vmem:[#allocation29_spill] sm:$0xff]  ;;  %14521 = vst [vmem:[#allocation25_spill] sm:$0xff] %v10433_v34  ;;  %v14523_v1 = vld [vmem:[#allocation4_spill] sm:$0xff]  ;;  %v2123_v12 = vld [vmem:[#allocation2 + $0xb2] sm:$0xff] }
 0x1fc   :  { %14514 = vst [vmem:[#allocation42_spill] sm:$0xff] %v10390_v10  ;;  %v14224_v62 = vmax.f32 %v10390_v10, 0.0  ;;  %v10402_v53 = vadd.f32 %v3285_v9, %v3253_v37  ;;  %v2516_v31 = vadd.f32 %v10315_v38, %v10313_v30  ;;  %v1517_v51 = vmax.f32 %v1501_v58, 0.0  ;;  %v14525_v43 = vld [vmem:[#allocation32_spill] sm:$0xff] }
 0x1fd   :  { %1532 = vst [vmem:[#allocation2 + $0x169] sm:$0xff] %v1515_v46  ;;  %v10409_v21 = vmul.f32 %v9457_v8, %v1515_v46  ;;  %v10412_v32 = vmul.f32 %v9464_v27, %v1515_v46  ;;  %v2449_v23 = vmul.f32 %v9903_v50, %v14517_v59  ;;  %v10418_v9 = vmax.f32 %v1732_v13, 0.0  ;;  %v10452_v13 = vpop.f32.mrb[63].mxu0 }
 0x1fe   :  { %1535 = vst [vmem:[#allocation2 + $0x189] sm:$0xff] %v14224_v62  ;;  %v10420_v3 = vmax.f32 %v1731_v57, 0.0  ;;  %v1972_v30 = vadd.f32 %v1956_v63, %v9471_v40  ;;  %v2479_v38 = vadd.f32 %v10309_v44, %v10304_v15  ;;  %1534 = vst [vmem:[#allocation2 + $0x181] sm:$0xff] %v1517_v51  ;;  %v10426_v17 = vmul.f32 %v9457_v8, %v1517_v51  ;;  %v10454_v57 = vpop.f32.mrb[63].mxu1 }
 0x1ff   :  { %v10429_v41 = vmul.f32 %v9464_v27, %v1517_v51  ;;  %v1955_v52 = vmul.f32 %v14520_v25, %v9452_v24  ;;  %v10438_v37 = vadd.f32 %v2449_v23, %v14523_v1  ;;  %1765 = vst [vmem:[#allocation2 + $0x1e9] sm:$0xff] %v10418_v9  ;;  %v10443_v44 = vmul.f32 %v9457_v8, %v10418_v9  ;;  %v14528_v25 = vld [vmem:[#allocation50_spill] sm:$0xff] }
 0x200   :  { %14518 = vst [vmem:[#allocation23_spill] sm:$0xff] %v10426_v17  ;;  %v10447_v33 = vmul.f32 %v9464_v27, %v10418_v9  ;;  %1764 = vst [vmem:[#allocation2 + $0x1e1] sm:$0xff] %v10420_v3  ;;  %v1958_v58 = vmul.f32 %v14525_v43, %v9452_v24  ;;  %v10458_v63 = vmul.f32 %v9457_v8, %v10420_v3  ;;  %v10464_v59 = vmax.f32 %v1972_v30, 0.0 }
 0x201   :  { %14519 = vst [vmem:[#allocation24_spill] sm:$0xff] %v10429_v41  ;;  %14524 = vst [vmem:[#allocation27_spill] sm:$0xff] %v10438_v37  ;;  %v10462_v51 = vmul.f32 %v9464_v27, %v10420_v3  ;;  %v1971_v23 = vadd.f32 %v1955_v52, %v9471_v40  ;;  %v10469_v1 = vmul.f32 %v9903_v50, %v14528_v25  ;;  %v14530_v41 = vld [vmem:[#allocation46_spill] sm:$0xff] }
 0x202   :  { %14526 = vst [vmem:[#allocation28_spill] sm:$0xff] %v10452_v13  ;;  %14527 = vst [vmem:[#allocation48_spill] sm:$0xff] %v10454_v57  ;;  %v2517_v43 = vadd.f32 %v2516_v31, %v10323_v0  ;;  %v1974_v62 = vadd.f32 %v1958_v58, %v9471_v40  ;;  %v10475_v15 = vmul.f32 %v9903_v50, %v9961_v45 }
 0x203   :  { %14529 = vst [vmem:[#allocation29_spill] sm:$0xff] %v10469_v1  ;;  %v2091_v17 = vmul.f32 %v9441_v2, %v14530_v41  ;;  %2005 = vst [vmem:[#allocation2 + $0x291] sm:$0xff] %v10464_v59  ;;  %v10482_v30 = vmul.f32 %v9457_v8, %v10464_v59  ;;  %v10484_v52 = vmax.f32 %v1971_v23, 0.0  ;;  %v10487_v25 = vadd.f32 %v2479_v38, %v10438_v37 }
 0x204   :  { %v2503_v0 = vmul.f32 %v10438_v37, %v10438_v37  ;;  %v10492_v45 = vmul.f32 %v9460_v19, %v2123_v12  ;;  %v2564_v31 = vld [vmem:[#allocation2 + $0x168] sm:$0xff]  ;;  %v10494_v58 = vld [vmem:[#allocation2 + $0x170] sm:$0xff]  ;;  %v10498_v1 = vmax.f32 %v1974_v62, 0.0  ;;  %v2612_v38 = vmul.f32 %v9441_v2, %v1515_v46 }
 0x205   :  { %14531 = vst [vmem:[#allocation4_spill] sm:$0xff] %v10482_v30  ;;  %14532 = vst [vmem:[#allocation32_spill] sm:$0xff] %v10487_v25  ;;  %v10496_v41 = vld [vmem:[#allocation2 + $0x16a] sm:$0xff]  ;;  %v10501_v30 = vmul.f32 %v9574_v4, %v2123_v12  ;;  %v2580_v23 = vmul.f32 %v2564_v31, %v9436_v61  ;;  %v2706_v25 = vmul.f32 %v2564_v31, %v9551_v7 }
 0x206   :  { %14533 = vst [vmem:[#allocation50_spill] sm:$0xff] %v10492_v45  ;;  %14534 = vst [vmem:[#allocation46_spill] sm:$0xff] %v10494_v58  ;;  %v2055_v37 = vmul.f32 %v9436_v61, %v9950_v42  ;;  %v2707_v45 = vmul.f32 %v10494_v58, %v9551_v7  ;;  %v2849_v62 = vmul.f32 %v2564_v31, %v9580_v49 }
 0x207   :  { %14535 = vst [vmem:[#allocation72_spill] sm:$0xff] %v10496_v41  ;;  %14536 = vst [vmem:[#allocation73_spill] sm:$0xff] %v10501_v30  ;;  %v2850_v57 = vmul.f32 %v10494_v58, %v9580_v49  ;;  %v10514_v30 = vld [vmem:[#allocation2 + $0x180] sm:$0xff]  ;;  %v10518_v46 = vmul.f32 %v9903_v50, %v2123_v12  ;;  %v2628_v13 = vadd.f32 %v2612_v38, %v2580_v23 }
 0x208   :  { %2004 = vst [vmem:[#allocation2 + $0x289] sm:$0xff] %v10484_v52  ;;  %14537 = vst [vmem:[#allocation74_spill] sm:$0xff] %v10514_v30  ;;  %v2660_v28 = vmul.f32 %v10496_v41, %v9460_v19  ;;  %v2722_v42 = vadd.f32 %v2706_v25, %v10297_v36  ;;  %v10523_v34 = vadd.f32 %v2517_v43, %v2503_v0  ;;  %v3048_v36 = vld [vmem:[#allocation2 + $0x1e0] sm:$0xff] }
 0x209   :  { %2007 = vst [vmem:[#allocation2 + $0x2a9] sm:$0xff] %v10498_v1  ;;  %14538 = vst [vmem:[#allocation75_spill] sm:$0xff] %v10518_v46  ;;  %v10526_v31 = vadd.f32 %v2707_v45, %v10377_v55  ;;  %v2865_v18 = vadd.f32 %v2849_v62, %v10331_v11  ;;  %v10530_v10 = vadd.f32 %v2850_v57, %v10379_v47  ;;  %v14542_v43 = vld [vmem:[#allocation16_spill] sm:$0xff] }
 0x20a   :  { %14539 = vst [vmem:[#allocation76_spill] sm:$0xff] %v10523_v34  ;;  %v2676_v58 = vadd.f32 %v2660_v28, %v2628_v13  ;;  %v2770_v12 = vadd.f32 %v10409_v21, %v2722_v42  ;;  %v2802_v23 = vmul.f32 %v10496_v41, %v9574_v4  ;;  %v2708_v38 = vmul.f32 %v10514_v30, %v9551_v7  ;;  %v3049_v21 = vld [vmem:[#allocation2 + $0x1e8] sm:$0xff] }
 0x20b   :  { %14540 = vst [vmem:[#allocation77_spill] sm:$0xff] %v10526_v31  ;;  %14541 = vst [vmem:[#allocation78_spill] sm:$0xff] %v10530_v10  ;;  %v2935_v25 = vmul.f32 %v9903_v50, %v14542_v43  ;;  %v10539_v55 = vadd.f32 %v2091_v17, %v2055_v37  ;;  %v10543_v11 = vmul.f32 %v9903_v50, %v9952_v26  ;;  %v10556_v17 = vld [vmem:[#allocation2 + $0x1e2] sm:$0xff]  ;;  %v14574_v31 = vld [vmem:[#allocation67_spill] sm:$0xff] }
 0x20c   :  { %v10546_v47 = vadd.f32 %v10412_v32, %v2865_v18  ;;  %v2938_v28 = vmul.f32 %v9903_v50, %v10019_v29  ;;  %v10550_v13 = vadd.f32 %v2802_v23, %v2770_v12  ;;  %v10552_v57 = vadd.f32 %v2708_v38, %v2676_v58  ;;  %14548 = vst [vmem:[#allocation83_spill] sm:$0xff] %v10556_v17  ;;  %v14549_v32 = vld [vmem:[#allocation34_spill] sm:$0xff] }
 0x20d   :  { %14543 = vst [vmem:[#allocation16_spill] sm:$0xff] %v10539_v55  ;;  %14544 = vst [vmem:[#allocation79_spill] sm:$0xff] %v10543_v11  ;;  %v3097_v0 = vmul.f32 %v9441_v2, %v10418_v9  ;;  %v3064_v37 = vmul.f32 %v3048_v36, %v9436_v61  ;;  %v3096_v26 = vmul.f32 %v9441_v2, %v10420_v3  ;;  %v14551_v9 = vld [vmem:[#allocation38_spill] sm:$0xff] }
 0x20e   :  { %14545 = vst [vmem:[#allocation80_spill] sm:$0xff] %v10546_v47  ;;  %14546 = vst [vmem:[#allocation81_spill] sm:$0xff] %v10550_v13  ;;  %v3190_v18 = vmul.f32 %v3048_v36, %v9551_v7  ;;  %v1718_v45 = vmul.f32 %v14549_v32, %v9452_v24  ;;  %v3191_v29 = vmul.f32 %v3049_v21, %v9551_v7  ;;  %v14553_v32 = vld [vmem:[#allocation40_spill] sm:$0xff]  ;;  %v14573_v13 = vld [vmem:[#allocation7_spill] sm:$0xff] }
 0x20f   :  { %14547 = vst [vmem:[#allocation82_spill] sm:$0xff] %v10552_v57  ;;  %v3333_v58 = vmul.f32 %v3048_v36, %v9580_v49  ;;  %v3334_v62 = vmul.f32 %v3049_v21, %v9580_v49  ;;  %v10567_v42 = vld [vmem:[#allocation2 + $0x288] sm:$0xff]  ;;  %v1957_v12 = vmul.f32 %v14551_v9, %v9452_v24  ;;  %v3112_v23 = vadd.f32 %v3096_v26, %v3064_v37  ;;  %v10574_v43 = vld [vmem:[#allocation2 + $0x290] sm:$0xff] }
 0x210   :  { %14550 = vst [vmem:[#allocation34_spill] sm:$0xff] %v10567_v42  ;;  %v3144_v3 = vmul.f32 %v10556_v17, %v9460_v19  ;;  %v3206_v38 = vadd.f32 %v3190_v18, %v10372_v60  ;;  %14552 = vst [vmem:[#allocation38_spill] sm:$0xff] %v10574_v43  ;;  %v1717_v47 = vmul.f32 %v14553_v32, %v9452_v24 }
 0x211   :  { %v3065_v36 = vmul.f32 %v3049_v21, %v9436_v61  ;;  %v3207_v34 = vadd.f32 %v3191_v29, %v10394_v16  ;;  %v3349_v46 = vadd.f32 %v3333_v58, %v10396_v54  ;;  %v3350_v11 = vadd.f32 %v3334_v62, %v10402_v53  ;;  %v10598_v53 = vld [vmem:[#allocation2 + $0x28a] sm:$0xff] }
 0x212   :  { %v10582_v9 = vadd.f32 %v3144_v3, %v3112_v23  ;;  %v3254_v37 = vadd.f32 %v10458_v63, %v3206_v38  ;;  %v3286_v60 = vmul.f32 %v10556_v17, %v9574_v4  ;;  %v3556_v26 = vmul.f32 %v10567_v42, %v9436_v61  ;;  %14556 = vst [vmem:[#allocation85_spill] sm:$0xff] %v10598_v53  ;;  %v10602_v29 = vld [vmem:[#allocation2 + $0x1ea] sm:$0xff] }
 0x213   :  { %v3255_v18 = vadd.f32 %v10443_v44, %v3207_v34  ;;  %v10591_v21 = vadd.f32 %v10462_v51, %v3349_v46  ;;  %v10594_v16 = vadd.f32 %v10447_v33, %v3350_v11  ;;  %v3557_v54 = vmul.f32 %v10574_v43, %v9436_v61  ;;  %14557 = vst [vmem:[#allocation86_spill] sm:$0xff] %v10602_v29  ;;  %v10610_v51 = vld [vmem:[#allocation2 + $0x292] sm:$0xff] }
 0x214   :  { %v2937_v63 = vmul.f32 %v9903_v50, %v9986_v5  ;;  %v10604_v58 = vadd.f32 %v3286_v60, %v3254_v37  ;;  %v3589_v34 = vmul.f32 %v9441_v2, %v10464_v59  ;;  %v3588_v44 = vmul.f32 %v9441_v2, %v10484_v52  ;;  %14558 = vst [vmem:[#allocation87_spill] sm:$0xff] %v10610_v51 }
 0x215   :  { %14554 = vst [vmem:[#allocation40_spill] sm:$0xff] %v10591_v21  ;;  %14555 = vst [vmem:[#allocation84_spill] sm:$0xff] %v10594_v16  ;;  %v3113_v33 = vadd.f32 %v3097_v0, %v3065_v36  ;;  %v1734_v46 = vadd.f32 %v1718_v45, %v9471_v40  ;;  %v1973_v11 = vadd.f32 %v1957_v12, %v9471_v40  ;;  %v14563_v36 = vld [vmem:[#allocation17_spill] sm:$0xff] }
 0x216   :  { %v1733_v62 = vadd.f32 %v1717_v47, %v9471_v40  ;;  %v3604_v5 = vadd.f32 %v3588_v44, %v3556_v26  ;;  %v3605_v23 = vadd.f32 %v3589_v34, %v3557_v54  ;;  %v3636_v3 = vmul.f32 %v10598_v53, %v9460_v19 }
 0x217   :  { %v10619_v59 = vmul.f32 %v9457_v8, %v10484_v52  ;;  %v10622_v38 = vadd.f32 %v2937_v63, %v10032_v14  ;;  %v2940_v0 = vmul.f32 %v9903_v50, %v10078_v39  ;;  %v3145_v45 = vmul.f32 %v10602_v29, %v9460_v19 }
 0x218   :  { %v3287_v47 = vmul.f32 %v10602_v29, %v9574_v4  ;;  %v3637_v12 = vmul.f32 %v10610_v51, %v9460_v19  ;;  %v10632_v32 = vadd.f32 %v3636_v3, %v3604_v5  ;;  %v10636_v52 = vmul.f32 %v9457_v8, %v10498_v1  ;;  %v14565_v5 = vld [vmem:[#allocation63_spill] sm:$0xff] }
 0x219   :  { %14559 = vst [vmem:[#allocation88_spill] sm:$0xff] %v10619_v59  ;;  %14560 = vst [vmem:[#allocation89_spill] sm:$0xff] %v10622_v38  ;;  %v10640_v14 = vmul.f32 %v9464_v27, %v10498_v1  ;;  %v10643_v39 = vadd.f32 %v2935_v25, %v10213_v48  ;;  %v10647_v37 = vadd.f32 %v10475_v15, %v14563_v36  ;;  %v10649_v60 = vmax.f32 %v1734_v46, 0.0  ;;  %v14567_v25 = vld [vmem:[#allocation43_spill] sm:$0xff]  ;;  %v14568_v46 = vld [vmem:[#allocation64_spill] sm:$0xff] }
 0x21a   :  { %v1989_v26 = vmax.f32 %v1973_v11, 0.0  ;;  %v10651_v54 = vadd.f32 %v3637_v12, %v3605_v23  ;;  %v10653_v63 = vmax.f32 %v1733_v62, 0.0  ;;  %v10655_v34 = vadd.f32 %v3145_v45, %v3113_v33  ;;  %v14571_v12 = vld [vmem:[#allocation5_spill] sm:$0xff]  ;;  %v14576_v59 = vld [vmem:[#allocation68_spill] sm:$0xff] }
 0x21b   :  { %14561 = vst [vmem:[#allocation90_spill] sm:$0xff] %v10640_v14  ;;  %14562 = vst [vmem:[#allocation91_spill] sm:$0xff] %v10643_v39  ;;  %v10657_v44 = vadd.f32 %v3287_v47, %v3255_v18  ;;  %v10660_v3 = vadd.f32 %v2938_v28, %v14565_v5  ;;  %v10665_v48 = vmul.f32 %v9457_v8, %v10649_v60  ;;  %v14570_v47 = vld [vmem:[#allocation44_spill] sm:$0xff] }
 0x21c   :  { %14564 = vst [vmem:[#allocation17_spill] sm:$0xff] %v10647_v37  ;;  %1767 = vst [vmem:[#allocation2 + $0x201] sm:$0xff] %v10649_v60  ;;  %v10669_v15 = vmul.f32 %v9464_v27, %v10649_v60  ;;  %v1960_v33 = vmul.f32 %v14567_v25, %v9452_v24  ;;  %v2939_v18 = vmul.f32 %v9903_v50, %v14568_v46  ;;  %v14572_v46 = vld [vmem:[#allocation52_spill] sm:$0xff] }
 0x21d   :  { %14566 = vst [vmem:[#allocation63_spill] sm:$0xff] %v10660_v3  ;;  %2006 = vst [vmem:[#allocation2 + $0x2a1] sm:$0xff] %v1989_v26  ;;  %v3732_v28 = vmul.f32 %v9457_v8, %v1989_v26  ;;  %v10677_v11 = vmul.f32 %v9464_v27, %v1989_v26  ;;  %v10682_v62 = vmul.f32 %v9457_v8, %v10653_v63 }
 0x21e   :  { %1766 = vst [vmem:[#allocation2 + $0x1f9] sm:$0xff] %v10653_v63  ;;  %v10686_v23 = vmul.f32 %v9464_v27, %v10653_v63  ;;  %v1976_v45 = vadd.f32 %v1960_v33, %v9471_v40  ;;  %v1959_v50 = vmul.f32 %v14570_v47, %v9452_v24  ;;  %v1720_v36 = vmul.f32 %v14571_v12, %v9452_v24 }
 0x21f   :  { %14569 = vst [vmem:[#allocation43_spill] sm:$0xff] %v10677_v11  ;;  %v2989_v5 = vmul.f32 %v10643_v39, %v10643_v39  ;;  %v2990_v25 = vmul.f32 %v10647_v37, %v10647_v37  ;;  %v1962_v10 = vmul.f32 %v14572_v46, %v9452_v24  ;;  %v1719_v57 = vmul.f32 %v14573_v13, %v9452_v24 }
 0x220   :  { %v10702_v33 = vadd.f32 %v2939_v18, %v14574_v31  ;;  %v10704_v14 = vmax.f32 %v1976_v45, 0.0  ;;  %v1975_v47 = vadd.f32 %v1959_v50, %v9471_v40  ;;  %v1736_v12 = vadd.f32 %v1720_v36, %v9471_v40 }
 0x221   :  { %v2991_v11 = vmul.f32 %v10622_v38, %v10622_v38  ;;  %v10711_v55 = vadd.f32 %v2940_v0, %v14576_v59  ;;  %v1978_v46 = vadd.f32 %v1962_v10, %v9471_v40  ;;  %v1735_v53 = vadd.f32 %v1719_v57, %v9471_v40 }
 0x222   :  { %14575 = vst [vmem:[#allocation64_spill] sm:$0xff] %v10702_v33  ;;  %v2967_v31 = vadd.f32 %v10647_v37, %v10643_v39  ;;  %2009 = vst [vmem:[#allocation2 + $0x2c1] sm:$0xff] %v10704_v14  ;;  %v10720_v13 = vmul.f32 %v9457_v8, %v10704_v14  ;;  %v10724_v18 = vmul.f32 %v9464_v27, %v10704_v14  ;;  %v10726_v45 = vmax.f32 %v1975_v47, 0.0 }
 0x223   :  { %14577 = vst [vmem:[#allocation44_spill] sm:$0xff] %v10711_v55  ;;  %v3005_v59 = vadd.f32 %v2990_v25, %v2989_v5  ;;  %v10732_v57 = vmax.f32 %v1736_v12, 0.0  ;;  %v10734_v50 = vmax.f32 %v1978_v46, 0.0  ;;  %v10736_v36 = vmax.f32 %v1735_v53, 0.0  ;;  %v10755_v53 = vld [vmem:[%s14179_s4 + $0x8] ss:$0 sm:$0xff] }
 0x224   :  { %v10728_v0 = vld [vmem:[#allocation2 + $0x2a0] sm:$0xff]  ;;  %v10730_v10 = vld [vmem:[#allocation2 + $0x2a8] sm:$0xff]  ;;  %v2992_v37 = vmul.f32 %v10660_v3, %v10660_v3  ;;  %v10742_v39 = vmul.f32 %v10702_v33, %v10702_v33  ;;  %v3590_v25 = vmul.f32 %v9441_v2, %v1989_v26  ;;  %2008 = vst [vmem:[#allocation2 + $0x2b9] sm:$0xff] %v10726_v45  ;;  %v10750_v12 = vmul.f32 %v10711_v55, %v10711_v55 }
 0x225   :  { %14578 = vst [vmem:[#allocation5_spill] sm:$0xff] %v10728_v0  ;;  %14579 = vst [vmem:[#allocation52_spill] sm:$0xff] %v10730_v10  ;;  %v3558_v5 = vmul.f32 %v10728_v0, %v9436_v61  ;;  %v3622_v47 = vld [vmem:[#allocation2 + $0x2a2] sm:$0xff]  ;;  %v2942_v46 = vmul.f32 %v10755_v53, %v10249_v35  ;;  %v3684_v43 = vmul.f32 %v10728_v0, %v9551_v7  ;;  %v3050_v16 = vld [vmem:[#allocation2 + $0x1f8] sm:$0xff] }
 0x226   :  { %14580 = vst [vmem:[#allocation7_spill] sm:$0xff] %v10736_v36  ;;  %v3685_v26 = vmul.f32 %v10730_v10, %v9551_v7  ;;  %1769 = vst [vmem:[#allocation2 + $0x219] sm:$0xff] %v10732_v57  ;;  %v2941_v42 = vmul.f32 %v10755_v53, %v10226_v6  ;;  %v2968_v51 = vadd.f32 %v2967_v31, %v10622_v38  ;;  %v3051_v21 = vld [vmem:[#allocation2 + $0x200] sm:$0xff] }
 0x227   :  { %2011 = vst [vmem:[#allocation2 + $0x2d9] sm:$0xff] %v10734_v50  ;;  %1768 = vst [vmem:[#allocation2 + $0x211] sm:$0xff] %v10736_v36  ;;  %v3606_v29 = vadd.f32 %v3590_v25, %v3558_v5  ;;  %v3638_v35 = vmul.f32 %v3622_v47, %v9460_v19  ;;  %v3006_v0 = vadd.f32 %v3005_v59, %v2991_v11  ;;  %v10774_v22 = vld [vmem:[#allocation2 + $0x1fa] sm:$0xff] }
 0x228   :  { %v3700_v30 = vadd.f32 %v3684_v43, %v10632_v32  ;;  %v3701_v17 = vadd.f32 %v3685_v26, %v10651_v54  ;;  %v3098_v41 = vmul.f32 %v9441_v2, %v10653_v63  ;;  %v3559_v36 = vmul.f32 %v10730_v10, %v9436_v61  ;;  %v3623_v26 = vld [vmem:[#allocation2 + $0x2aa] sm:$0xff] }
 0x229   :  { %v3654_v6 = vadd.f32 %v3638_v35, %v3606_v29  ;;  %v3780_v31 = vmul.f32 %v3622_v47, %v9574_v4  ;;  %v3066_v5 = vmul.f32 %v3050_v16, %v9436_v61  ;;  %v3192_v43 = vmul.f32 %v3050_v16, %v9551_v7 }
 0x22a   :  { %v3748_v25 = vadd.f32 %v3732_v28, %v3700_v30  ;;  %v3749_v11 = vadd.f32 %v10636_v52, %v3701_v17  ;;  %v3193_v32 = vmul.f32 %v3051_v21, %v9551_v7  ;;  %v3591_v54 = vmul.f32 %v9441_v2, %v10498_v1 }
 0x22b   :  { %v3114_v63 = vadd.f32 %v3098_v41, %v3066_v5  ;;  %v3146_v59 = vmul.f32 %v10774_v22, %v9460_v19  ;;  %v3335_v29 = vmul.f32 %v3050_v16, %v9580_v49  ;;  %v3208_v35 = vadd.f32 %v3192_v43, %v10582_v9  ;;  %v3544_v52 = vld [vmem:[#allocation2 + $0x2b8] sm:$0xff] }
 0x22c   :  { %v3796_v47 = vadd.f32 %v3780_v31, %v3748_v25  ;;  %v3209_v30 = vadd.f32 %v3193_v32, %v10655_v34  ;;  %v3336_v17 = vmul.f32 %v3051_v21, %v9580_v49  ;;  %v2969_v28 = vadd.f32 %v2968_v51, %v10660_v3 }
 0x22d   :  { %v3607_v38 = vadd.f32 %v3591_v54, %v3559_v36  ;;  %v10792_v10 = vadd.f32 %v3146_v59, %v3114_v63  ;;  %v3351_v1 = vadd.f32 %v3335_v29, %v10604_v58  ;;  %v3256_v41 = vadd.f32 %v10682_v62, %v3208_v35  ;;  %v3545_v36 = vld [vmem:[#allocation2 + $0x2c0] sm:$0xff] }
 0x22e   :  { %v10797_v16 = vadd.f32 %v10665_v48, %v3209_v30  ;;  %v3288_v9 = vmul.f32 %v10774_v22, %v9574_v4  ;;  %v3352_v34 = vadd.f32 %v3336_v17, %v10657_v44  ;;  %v3007_v31 = vadd.f32 %v3006_v0, %v2992_v37  ;;  %v10807_v58 = vld [vmem:[#allocation2 + $0x2ba] sm:$0xff] }
 0x22f   :  { %v3639_v5 = vmul.f32 %v3623_v26, %v9460_v19  ;;  %v10804_v51 = vadd.f32 %v10686_v23, %v3351_v1  ;;  %v3560_v25 = vmul.f32 %v3544_v52, %v9436_v61  ;;  %v10810_v62 = vadd.f32 %v2941_v42, %v10266_v56 }
 0x230   :  { %v10812_v48 = vadd.f32 %v3288_v9, %v3256_v41  ;;  %v10815_v43 = vadd.f32 %v10669_v15, %v3352_v34  ;;  %v3592_v37 = vmul.f32 %v9441_v2, %v10726_v45  ;;  %v10820_v44 = vadd.f32 %v2942_v46, %v10271_v20  ;;  %v14584_v41 = vld [vmem:[#allocation59_spill] sm:$0xff] }
 0x231   :  { %14581 = vst [vmem:[#allocation67_spill] sm:$0xff] %v10810_v62  ;;  %v3781_v23 = vmul.f32 %v3623_v26, %v9574_v4  ;;  %v3655_v0 = vadd.f32 %v3639_v5, %v3607_v38  ;;  %v3686_v32 = vmul.f32 %v3544_v52, %v9551_v7  ;;  %v3640_v56 = vmul.f32 %v10807_v58, %v9460_v19 }
 0x232   :  { %14582 = vst [vmem:[#allocation68_spill] sm:$0xff] %v10820_v44  ;;  %v3608_v54 = vadd.f32 %v3592_v37, %v3560_v25  ;;  %v3687_v42 = vmul.f32 %v3545_v36, %v9551_v7  ;;  %v3734_v15 = vmul.f32 %v9457_v8, %v10726_v45  ;;  %v2970_v63 = vadd.f32 %v2969_v28, %v10702_v33 }
 0x233   :  { %v3008_v59 = vadd.f32 %v3007_v31, %v10742_v39  ;;  %v3099_v20 = vmul.f32 %v9441_v2, %v10649_v60  ;;  %v3702_v46 = vadd.f32 %v3686_v32, %v3654_v6  ;;  %v3067_v38 = vmul.f32 %v3051_v21, %v9436_v61  ;;  %v14583_v6 = vld [vmem:[#allocation53_spill] sm:$0xff] }
 0x234   :  { %v10834_v29 = vadd.f32 %v3640_v56, %v3608_v54  ;;  %v3703_v26 = vadd.f32 %v3687_v42, %v3655_v0  ;;  %v3797_v35 = vadd.f32 %v3781_v23, %v3749_v11  ;;  %v3782_v17 = vmul.f32 %v10807_v58, %v9574_v4  ;;  %v10847_v11 = vld [vmem:[#allocation2 + $0x202] sm:$0xff]  ;;  %v3052_v0 = vld [vmem:[#allocation2 + $0x210] sm:$0xff] }
 0x235   :  { %v3750_v30 = vadd.f32 %v3734_v15, %v3702_v46  ;;  %v3829_v1 = vmul.f32 %v3544_v52, %v9580_v49  ;;  %v3830_v28 = vmul.f32 %v3545_v36, %v9580_v49  ;;  %v3877_v60 = vmul.f32 %v9464_v27, %v10726_v45  ;;  %v14585_v52 = vld [vmem:[#allocation60_spill] sm:$0xff]  ;;  %v10883_v46 = vld [vmem:[#allocation2 + $0x212] sm:$0xff] }
 0x236   :  { %v3751_v39 = vadd.f32 %v10720_v13, %v3703_v26  ;;  %v1961_v21 = vmul.f32 %v14583_v6, %v9452_v24  ;;  %v1722_v9 = vmul.f32 %v14584_v41, %v9452_v24  ;;  %v1964_v25 = vmul.f32 %v14585_v52, %v9452_v24  ;;  %v10869_v15 = vld [vmem:[#allocation2 + $0x2c2] sm:$0xff]  ;;  %14588 = vst [vmem:[#allocation60_spill] sm:$0xff] %v10883_v46 }
 0x237   :  { %v10849_v34 = vadd.f32 %v3782_v17, %v3750_v30  ;;  %v3845_v31 = vadd.f32 %v3829_v1, %v3796_v47  ;;  %v3846_v5 = vadd.f32 %v3830_v28, %v3797_v35  ;;  %v2971_v13 = vadd.f32 %v2970_v63, %v10711_v55  ;;  %v14589_v30 = vld [vmem:[#allocation7_spill] sm:$0xff] }
 0x238   :  { %v3115_v37 = vadd.f32 %v3099_v20, %v3067_v38  ;;  %v3243_v45 = vmul.f32 %v9457_v8, %v10732_v57  ;;  %v3386_v23 = vmul.f32 %v9464_v27, %v10732_v57  ;;  %v10859_v32 = vadd.f32 %v3008_v59, %v10750_v12  ;;  %v3053_v59 = vld [vmem:[#allocation2 + $0x218] sm:$0xff] }
 0x239   :  { %v3561_v54 = vmul.f32 %v3545_v36, %v9436_v61  ;;  %v10862_v47 = vadd.f32 %v3877_v60, %v3845_v31  ;;  %v10865_v56 = vadd.f32 %v10724_v18, %v3846_v5  ;;  %v3147_v42 = vmul.f32 %v10847_v11, %v9460_v19 }
 0x23a   :  { %v10873_v63 = vmul.f32 %v9457_v8, %v10734_v50  ;;  %v10877_v12 = vmul.f32 %v9464_v27, %v10734_v50  ;;  %v1977_v36 = vadd.f32 %v1961_v21, %v9471_v40  ;;  %v3593_v18 = vmul.f32 %v9441_v2, %v10704_v14 }
 0x23b   :  { %14586 = vst [vmem:[#allocation53_spill] sm:$0xff] %v10862_v47  ;;  %14587 = vst [vmem:[#allocation59_spill] sm:$0xff] %v10865_v56  ;;  %v3068_v20 = vmul.f32 %v3052_v0, %v9436_v61  ;;  %v1738_v38 = vadd.f32 %v1722_v9, %v9471_v40  ;;  %v1980_v26 = vadd.f32 %v1964_v25, %v9471_v40 }
 0x23c   :  { %v3289_v35 = vmul.f32 %v10847_v11, %v9574_v4  ;;  %v3100_v17 = vmul.f32 %v9441_v2, %v14589_v30  ;;  %v3163_v1 = vadd.f32 %v3147_v42, %v3115_v37  ;;  %v3194_v28 = vmul.f32 %v3052_v0, %v9551_v7 }
 0x23d   :  { %v3641_v14 = vmul.f32 %v10869_v15, %v9460_v19  ;;  %v3609_v60 = vadd.f32 %v3593_v18, %v3561_v54  ;;  %v3069_v6 = vmul.f32 %v3053_v59, %v9436_v61  ;;  %v3195_v21 = vmul.f32 %v3053_v59, %v9551_v7 }
 0x23e   :  { %v3116_v41 = vadd.f32 %v3100_v17, %v3068_v20  ;;  %v3148_v9 = vmul.f32 %v10883_v46, %v9460_v19  ;;  %v3210_v31 = vadd.f32 %v3194_v28, %v10792_v10  ;;  %v3242_v5 = vmul.f32 %v9457_v8, %v14589_v30 }
 0x23f   :  { %v3211_v52 = vadd.f32 %v3195_v21, %v3163_v1  ;;  %v3305_v25 = vadd.f32 %v3289_v35, %v10797_v16  ;;  %v3337_v37 = vmul.f32 %v3052_v0, %v9580_v49  ;;  %v3338_v54 = vmul.f32 %v3053_v59, %v9580_v49  ;;  %v10915_v59 = vld [vmem:[#allocation2 + $0x21a] sm:$0xff] }
 0x240   :  { %v10904_v42 = vadd.f32 %v3148_v9, %v3116_v41  ;;  %v3258_v18 = vadd.f32 %v3242_v5, %v3210_v31  ;;  %v3290_v20 = vmul.f32 %v10883_v46, %v9574_v4  ;;  %v3385_v17 = vmul.f32 %v9464_v27, %v14589_v30  ;;  %14590 = vst [vmem:[#allocation7_spill] sm:$0xff] %v10915_v59 }
 0x241   :  { %v3783_v10 = vmul.f32 %v10869_v15, %v9574_v4  ;;  %v3259_v28 = vadd.f32 %v3243_v45, %v3211_v52  ;;  %v3353_v1 = vadd.f32 %v3337_v37, %v10812_v48  ;;  %v3354_v16 = vadd.f32 %v3338_v54, %v3305_v25  ;;  %v8548_v37 = vld [vmem:[#allocation2 + $0xc8] sm:$0xff] }
 0x242   :  { %v3101_v0 = vmul.f32 %v9441_v2, %v10732_v57  ;;  %v10917_v35 = vadd.f32 %v3290_v20, %v3258_v18  ;;  %v1993_v21 = vmax.f32 %v1977_v36, 0.0  ;;  %v3657_v41 = vadd.f32 %v3641_v14, %v3609_v60  ;;  %v10956_v60 = vld [vmem:[#allocation2 + $0xc9] sm:$0xff] }
 0x243   :  { %v10919_v9 = vadd.f32 %v3385_v17, %v3353_v1  ;;  %v10921_v31 = vadd.f32 %v3386_v23, %v3354_v16  ;;  %v3799_v30 = vadd.f32 %v3783_v10, %v3751_v39  ;;  %v10923_v5 = vmax.f32 %v1738_v38, 0.0  ;;  %14593 = vst [vmem:[#allocation94_spill] sm:$0xff] %v10956_v60  ;;  %v14596_v20 = vld [vmem:[#allocation61_spill] sm:$0xff]  ;;  %v8550_v16 = vld [vmem:[#allocation2 + $0xc0] sm:$0xff] }
 0x244   :  { %v3117_v45 = vadd.f32 %v3101_v0, %v3069_v6  ;;  %2010 = vst [vmem:[#allocation2 + $0x2d1] sm:$0xff] %v1993_v21  ;;  %v3736_v48 = vmul.f32 %v9457_v8, %v1993_v21  ;;  %v10927_v52 = vmul.f32 %v9464_v27, %v1993_v21  ;;  %v10929_v57 = vmax.f32 %v1980_v26, 0.0  ;;  %v8549_v10 = vld [vmem:[#allocation2 + $0xc2] sm:$0xff] }
 0x245   :  { %14591 = vst [vmem:[#allocation92_spill] sm:$0xff] %v10919_v9  ;;  %14592 = vst [vmem:[#allocation93_spill] sm:$0xff] %v10921_v31  ;;  %v2972_v25 = vadd.f32 %v2971_v13, %v10810_v62  ;;  %v2995_v36 = vmul.f32 %v10810_v62, %v10810_v62  ;;  %v3149_v23 = vmul.f32 %v10915_v59, %v9460_v19  ;;  %v10974_v62 = vld [vmem:[#allocation2 + $0x172] sm:$0xff] }
 0x246   :  { %1771 = vst [vmem:[#allocation2 + $0x231] sm:$0xff] %v10923_v5  ;;  %v10939_v39 = vmul.f32 %v9457_v8, %v10923_v5  ;;  %v3291_v38 = vmul.f32 %v10915_v59, %v9574_v4  ;;  %v10945_v26 = vmul.f32 %v9464_v27, %v10923_v5  ;;  %2013 = vst [vmem:[#allocation2 + $0x2f1] sm:$0xff] %v10929_v57 }
 0x247   :  { %v10950_v13 = vmul.f32 %v9457_v8, %v10929_v57  ;;  %v10954_v14 = vmul.f32 %v9464_v27, %v10929_v57  ;;  %v10960_v6 = vmul.f32 %v10956_v60, %v9457_v8  ;;  %v10963_v54 = vmul.f32 %v8548_v37, %v9551_v7 }
 0x248   :  { %v3010_v18 = vadd.f32 %v10859_v32, %v2995_v36  ;;  %v1721_v17 = vmul.f32 %v14596_v20, %v9452_v24  ;;  %v10969_v1 = vmul.f32 %v8549_v10, %v9574_v4  ;;  %v10972_v0 = vmul.f32 %v8550_v16, %v9580_v49  ;;  %v14600_v36 = vld [vmem:[#allocation33_spill] sm:$0xff]  ;;  %v14602_v16 = vld [vmem:[#allocation12_spill] sm:$0xff] }
 0x249   :  { %14594 = vst [vmem:[#allocation95_spill] sm:$0xff] %v10960_v6  ;;  %14595 = vst [vmem:[#allocation96_spill] sm:$0xff] %v10963_v54  ;;  %v10976_v55 = vadd.f32 %v3149_v23, %v3117_v45  ;;  %v10978_v33 = vadd.f32 %v3291_v38, %v3259_v28  ;;  %v10981_v3 = vmul.f32 %v8548_v37, %v9580_v49  ;;  %v14603_v28 = vld [vmem:[#allocation15_spill] sm:$0xff]  ;;  %v14604_v38 = vld [vmem:[#allocation9_spill] sm:$0xff] }
 0x24a   :  { %14597 = vst [vmem:[#allocation61_spill] sm:$0xff] %v10969_v1  ;;  %14598 = vst [vmem:[#allocation97_spill] sm:$0xff] %v10972_v0  ;;  %v2996_v32 = vmul.f32 %v10820_v44, %v10820_v44  ;;  %v10987_v20 = vmul.f32 %v10755_v53, %v14600_v36  ;;  %v1737_v10 = vadd.f32 %v1721_v17, %v9471_v40  ;;  %v11024_v1 = vld [vmem:[#allocation2 + $0x2da] sm:$0xff] }
 0x24b   :  { %14599 = vst [vmem:[#allocation98_spill] sm:$0xff] %v10981_v3  ;;  %v2943_v56 = vmul.f32 %v10755_v53, %v14602_v16  ;;  %v10993_v45 = vadd.f32 %v2972_v25, %v10820_v44  ;;  %v10997_v23 = vmul.f32 %v9441_v2, %v14603_v28  ;;  %v1963_v37 = vmul.f32 %v14604_v38, %v9452_v24  ;;  %v3546_v17 = vld [vmem:[#allocation2 + $0x2d0] sm:$0xff] }
 0x24c   :  { %14601 = vst [vmem:[#allocation33_spill] sm:$0xff] %v10987_v20  ;;  %v11001_v47 = vadd.f32 %v3010_v18, %v2996_v32  ;;  %v11005_v36 = vmul.f32 %v10974_v62, %v9460_v19  ;;  %v3547_v20 = vld [vmem:[#allocation2 + $0x2d8] sm:$0xff]  ;;  %v1753_v16 = vmax.f32 %v1737_v10, 0.0  ;;  %v14607_v25 = vld [vmem:[#allocation10_spill] sm:$0xff]  ;;  %v3562_v28 = vmul.f32 %v3546_v17, %v9436_v61  ;;  %14608 = vst [vmem:[#allocation9_spill] sm:$0xff] %v11024_v1 }
 0x24d   :  { %v11007_v31 = vld [vmem:[#allocation2 + $0x2d2] sm:$0xff]  ;;  %v1724_v44 = vmul.f32 %v14607_v25, %v9452_v24  ;;  %v3563_v60 = vmul.f32 %v3547_v20, %v9436_v61  ;;  %v3594_v38 = vmul.f32 %v9441_v2, %v1993_v21  ;;  %v3688_v18 = vmul.f32 %v3546_v17, %v9551_v7 }
 0x24e   :  { %14605 = vst [vmem:[#allocation12_spill] sm:$0xff] %v11005_v36  ;;  %14606 = vst [vmem:[#allocation15_spill] sm:$0xff] %v11007_v31  ;;  %v3595_v32 = vmul.f32 %v9441_v2, %v10734_v50  ;;  %v3689_v36 = vmul.f32 %v3547_v20, %v9551_v7  ;;  %v3831_v3 = vmul.f32 %v3546_v17, %v9580_v49 }
 0x24f   :  { %v3832_v10 = vmul.f32 %v3547_v20, %v9580_v49  ;;  %1770 = vst [vmem:[#allocation2 + $0x229] sm:$0xff] %v1753_v16  ;;  %v3610_v0 = vadd.f32 %v3594_v38, %v3562_v28  ;;  %v3642_v25 = vmul.f32 %v11007_v31, %v9460_v19  ;;  %v3704_v6 = vadd.f32 %v3688_v18, %v10834_v29 }
 0x250   :  { %v1979_v21 = vadd.f32 %v1963_v37, %v9471_v40  ;;  %v3705_v54 = vadd.f32 %v3689_v36, %v3657_v41  ;;  %v3847_v50 = vadd.f32 %v3831_v3, %v10849_v34  ;;  %v1740_v46 = vadd.f32 %v1724_v44, %v9471_v40 }
 0x251   :  { %v3848_v9 = vadd.f32 %v3832_v10, %v3799_v30  ;;  %v3611_v17 = vadd.f32 %v3595_v32, %v3563_v60  ;;  %v11028_v59 = vadd.f32 %v3642_v25, %v3610_v0  ;;  %v3752_v20 = vadd.f32 %v3736_v48, %v3704_v6  ;;  %v14612_v48 = vld [vmem:[#allocation71_spill] sm:$0xff]  ;;  %v14613_v6 = vld [vmem:[#allocation30_spill] sm:$0xff] }
 0x252   :  { %v3784_v28 = vmul.f32 %v11007_v31, %v9574_v4  ;;  %v11034_v29 = vmul.f32 %v10974_v62, %v9574_v4  ;;  %v3753_v37 = vadd.f32 %v10873_v63, %v3705_v54  ;;  %v11038_v41 = vadd.f32 %v10927_v52, %v3847_v50  ;;  %v14615_v63 = vld [vmem:[#allocation46_spill] sm:$0xff] }
 0x253   :  { %v11041_v3 = vadd.f32 %v10877_v12, %v3848_v9  ;;  %v3643_v44 = vmul.f32 %v11024_v1, %v9460_v19  ;;  %v3785_v34 = vmul.f32 %v11024_v1, %v9574_v4  ;;  %v1966_v60 = vmul.f32 %v14612_v48, %v9452_v24  ;;  %v11056_v54 = vld [vmem:[#allocation2 + $0x232] sm:$0xff] }
 0x254   :  { %14609 = vst [vmem:[#allocation10_spill] sm:$0xff] %v11034_v29  ;;  %14610 = vst [vmem:[#allocation99_spill] sm:$0xff] %v11038_v41  ;;  %v11047_v30 = vadd.f32 %v3784_v28, %v3752_v20  ;;  %v11052_v0 = vadd.f32 %v2943_v56, %v14613_v6  ;;  %v2581_v52 = vmul.f32 %v14615_v63, %v9436_v61  ;;  %v1995_v32 = vmax.f32 %v1979_v21, 0.0 }
 0x255   :  { %14611 = vst [vmem:[#allocation100_spill] sm:$0xff] %v11041_v3  ;;  %14616 = vst [vmem:[#allocation30_spill] sm:$0xff] %v11056_v54  ;;  %v3244_v12 = vmul.f32 %v9457_v8, %v1753_v16  ;;  %v3387_v9 = vmul.f32 %v9464_v27, %v1753_v16  ;;  %v3659_v10 = vadd.f32 %v3643_v44, %v3611_v17  ;;  %v11064_v50 = vmax.f32 %v1740_v46, 0.0 }
 0x256   :  { %14614 = vst [vmem:[#allocation71_spill] sm:$0xff] %v11052_v0  ;;  %v3054_v36 = vld [vmem:[#allocation2 + $0x228] sm:$0xff]  ;;  %v3055_v38 = vld [vmem:[#allocation2 + $0x230] sm:$0xff]  ;;  %v11062_v25 = vadd.f32 %v3785_v34, %v3753_v37  ;;  %v3103_v56 = vmul.f32 %v9441_v2, %v10923_v5  ;;  %v3102_v48 = vmul.f32 %v9441_v2, %v1753_v16  ;;  %v3151_v6 = vmul.f32 %v11056_v54, %v9460_v19 }
 0x257   :  { %v11060_v18 = vld [vmem:[#allocation2 + $0x22a] sm:$0xff]  ;;  %v3070_v20 = vmul.f32 %v3054_v36, %v9436_v61  ;;  %v3071_v28 = vmul.f32 %v3055_v38, %v9436_v61  ;;  %v3196_v63 = vmul.f32 %v3054_v36, %v9551_v7  ;;  %v3197_v21 = vmul.f32 %v3055_v38, %v9551_v7  ;;  %2012 = vst [vmem:[#allocation2 + $0x2e9] sm:$0xff] %v1995_v32 }
 0x258   :  { %14617 = vst [vmem:[#allocation46_spill] sm:$0xff] %v11060_v18  ;;  %1773 = vst [vmem:[#allocation2 + $0x249] sm:$0xff] %v11064_v50  ;;  %v1982_v46 = vadd.f32 %v1966_v60, %v9471_v40  ;;  %v3150_v5 = vmul.f32 %v11060_v18, %v9460_v19  ;;  %v3339_v37 = vmul.f32 %v3054_v36, %v9580_v49 }
 0x259   :  { %v3118_v17 = vadd.f32 %v3102_v48, %v3070_v20  ;;  %v3340_v16 = vmul.f32 %v3055_v38, %v9580_v49  ;;  %v3293_v44 = vmul.f32 %v11056_v54, %v9574_v4  ;;  %v3119_v34 = vadd.f32 %v3103_v56, %v3071_v28 }
 0x25a   :  { %v3212_v29 = vadd.f32 %v3196_v63, %v10904_v42  ;;  %v3213_v3 = vadd.f32 %v3197_v21, %v10976_v55  ;;  %v3355_v60 = vadd.f32 %v3339_v37, %v10917_v35  ;;  %v3738_v48 = vmul.f32 %v9457_v8, %v1995_v32 }
 0x25b   :  { %v11085_v41 = vadd.f32 %v3150_v5, %v3118_v17  ;;  %v3356_v20 = vadd.f32 %v3340_v16, %v10978_v33  ;;  %v3292_v38 = vmul.f32 %v11060_v18, %v9574_v4  ;;  %v3881_v56 = vmul.f32 %v9464_v27, %v1995_v32  ;;  %v14623_v17 = vld [vmem:[#allocation13_spill] sm:$0xff]  ;;  %v14626_v16 = vld [vmem:[#allocation42_spill] sm:$0xff] }
 0x25c   :  { %v3260_v31 = vadd.f32 %v3244_v12, %v3212_v29  ;;  %v3261_v36 = vadd.f32 %v10939_v39, %v3213_v3  ;;  %v11094_v28 = vadd.f32 %v3387_v9, %v3355_v60  ;;  %v11101_v42 = vmul.f32 %v9457_v8, %v11064_v50 }
 0x25d   :  { %v11097_v55 = vadd.f32 %v10945_v26, %v3356_v20  ;;  %v11105_v33 = vmul.f32 %v9464_v27, %v11064_v50  ;;  %v2997_v35 = vmul.f32 %v11052_v0, %v11052_v0  ;;  %v11111_v29 = vmax.f32 %v1982_v46, 0.0 }
 0x25e   :  { %14618 = vst [vmem:[#allocation101_spill] sm:$0xff] %v11094_v28  ;;  %v11109_v39 = vadd.f32 %v3292_v38, %v3260_v31  ;;  %v11113_v3 = vadd.f32 %v3151_v6, %v3119_v34  ;;  %v11117_v26 = vadd.f32 %v10993_v45, %v11052_v0  ;;  %v11121_v12 = vmul.f32 %v10755_v53, %v10974_v62  ;;  %v3548_v9 = vld [vmem:[#allocation2 + $0x2e8] sm:$0xff]  ;;  %v3549_v63 = vld [vmem:[#allocation2 + $0x2f0] sm:$0xff] }
 0x25f   :  { %14619 = vst [vmem:[#allocation102_spill] sm:$0xff] %v11097_v55  ;;  %v11123_v21 = vld [vmem:[#allocation2 + $0x2ea] sm:$0xff]  ;;  %v1723_v31 = vmul.f32 %v14623_v17, %v9452_v24  ;;  %v11127_v5 = vadd.f32 %v3293_v44, %v3261_v36  ;;  %v11130_v6 = vadd.f32 %v11001_v47, %v2997_v35  ;;  %v3564_v46 = vmul.f32 %v3548_v9, %v9436_v61  ;;  %v14629_v47 = vld [vmem:[#allocation19_spill] sm:$0xff] }
 0x260   :  { %14620 = vst [vmem:[#allocation103_spill] sm:$0xff] %v11117_v26  ;;  %14621 = vst [vmem:[#allocation104_spill] sm:$0xff] %v11121_v12  ;;  %v3596_v45 = vmul.f32 %v9441_v2, %v1995_v32  ;;  %v3690_v37 = vmul.f32 %v3548_v9, %v9551_v7  ;;  %v11137_v62 = vadd.f32 %v10997_v23, %v2581_v52  ;;  %v14627_v34 = vmax.f32 %v14626_v16, 0.0  ;;  %v11162_v12 = vld [vmem:[#allocation2 + $0x2f2] sm:$0xff] }
 0x261   :  { %14622 = vst [vmem:[#allocation105_spill] sm:$0xff] %v11123_v21  ;;  %14624 = vst [vmem:[#allocation13_spill] sm:$0xff] %v11130_v6  ;;  %v3691_v44 = vmul.f32 %v3549_v63, %v9551_v7  ;;  %v1965_v20 = vmul.f32 %v14629_v47, %v9452_v24  ;;  %v3565_v36 = vmul.f32 %v3549_v63, %v9436_v61 }
 0x262   :  { %2015 = vst [vmem:[#allocation2 + $0x309] sm:$0xff] %v11111_v29  ;;  %14625 = vst [vmem:[#allocation106_spill] sm:$0xff] %v11137_v62  ;;  %v11142_v60 = vmul.f32 %v9457_v8, %v14627_v34  ;;  %v3612_v32 = vadd.f32 %v3596_v45, %v3564_v46  ;;  %v3644_v38 = vmul.f32 %v11123_v21, %v9460_v19  ;;  %v11160_v45 = vld [vmem:[#allocation2 + $0x188] sm:$0xff] }
 0x263   :  { %v3706_v35 = vadd.f32 %v3690_v37, %v11028_v59  ;;  %v3707_v23 = vadd.f32 %v3691_v44, %v3659_v10  ;;  %v3833_v52 = vmul.f32 %v3548_v9, %v9580_v49  ;;  %v3834_v17 = vmul.f32 %v3549_v63, %v9580_v49  ;;  %14630 = vst [vmem:[#allocation19_spill] sm:$0xff] %v11160_v45  ;;  %v14632_v63 = vld [vmem:[#allocation8_spill] sm:$0xff] }
 0x264   :  { %14628 = vst [vmem:[#allocation42_spill] sm:$0xff] %v11142_v60  ;;  %v1739_v16 = vadd.f32 %v1723_v31, %v9471_v40  ;;  %v3597_v34 = vmul.f32 %v9441_v2, %v10929_v57  ;;  %v11156_v0 = vadd.f32 %v3644_v38, %v3612_v32  ;;  %v3786_v46 = vmul.f32 %v11123_v21, %v9574_v4  ;;  %v11169_v57 = vld [vmem:[#allocation2 + $0x182] sm:$0xff]  ;;  %v14661_v21 = vld [vmem:[#allocation39_spill] sm:$0xff] }
 0x265   :  { %v3754_v47 = vadd.f32 %v3738_v48, %v3706_v35  ;;  %14631 = vst [vmem:[#allocation107_spill] sm:$0xff] %v11162_v12  ;;  %v3755_v59 = vadd.f32 %v10950_v13, %v3707_v23  ;;  %v3849_v10 = vadd.f32 %v3833_v52, %v11047_v30  ;;  %v3850_v9 = vadd.f32 %v3834_v17, %v11062_v25  ;;  %v14636_v35 = vld [vmem:[#allocation72_spill] sm:$0xff]  ;;  %v14639_v52 = vld [vmem:[#allocation83_spill] sm:$0xff]  ;;  %v14641_v17 = vld [vmem:[#allocation74_spill] sm:$0xff] }
 0x266   :  { %v1726_v31 = vmul.f32 %v14632_v63, %v9452_v24  ;;  %14633 = vst [vmem:[#allocation8_spill] sm:$0xff] %v11169_v57  ;;  %v3613_v37 = vadd.f32 %v3597_v34, %v3565_v36  ;;  %v11175_v44 = vmul.f32 %v9457_v8, %v11111_v29  ;;  %v1981_v32 = vadd.f32 %v1965_v20, %v9471_v40 }
 0x267   :  { %v11171_v48 = vadd.f32 %v3786_v46, %v3754_v47  ;;  %v11178_v38 = vadd.f32 %v3881_v56, %v3849_v10  ;;  %v11181_v13 = vadd.f32 %v10954_v14, %v3850_v9  ;;  %v11185_v30 = vmul.f32 %v9464_v27, %v11111_v29  ;;  %v14643_v46 = vld [vmem:[#allocation40_spill] sm:$0xff] }
 0x268   :  { %v1755_v25 = vmax.f32 %v1739_v16, 0.0  ;;  %v11189_v36 = vmul.f32 %v10755_v53, %v14636_v35  ;;  %v11193_v23 = vmul.f32 %v11160_v45, %v9551_v7  ;;  %v3429_v56 = vmul.f32 %v10755_v53, %v14639_v52  ;;  %v14645_v52 = vld [vmem:[#allocation86_spill] sm:$0xff] }
 0x269   :  { %14634 = vst [vmem:[#allocation108_spill] sm:$0xff] %v11178_v38  ;;  %14635 = vst [vmem:[#allocation109_spill] sm:$0xff] %v11181_v13  ;;  %v3645_v14 = vmul.f32 %v11162_v12, %v9460_v19  ;;  %v11201_v20 = vmul.f32 %v11169_v57, %v9574_v4  ;;  %v11205_v16 = vmul.f32 %v14641_v17, %v9580_v49  ;;  %v1997_v63 = vmax.f32 %v1981_v32, 0.0  ;;  %v14646_v17 = vld [vmem:[#allocation87_spill] sm:$0xff]  ;;  %v14648_v13 = vld [vmem:[#allocation34_spill] sm:$0xff] }
 0x26a   :  { %14637 = vst [vmem:[#allocation72_spill] sm:$0xff] %v11189_v36  ;;  %14638 = vst [vmem:[#allocation110_spill] sm:$0xff] %v11193_v23  ;;  %v3787_v34 = vmul.f32 %v11162_v12, %v9574_v4  ;;  %v3246_v47 = vmul.f32 %v9457_v8, %v1755_v25  ;;  %v11211_v10 = vadd.f32 %v3429_v56, %v14643_v46 }
 0x26b   :  { %14640 = vst [vmem:[#allocation83_spill] sm:$0xff] %v11201_v20  ;;  %14642 = vst [vmem:[#allocation74_spill] sm:$0xff] %v11205_v16  ;;  %v3389_v9 = vmul.f32 %v9464_v27, %v1755_v25  ;;  %v11214_v35 = vadd.f32 %v3645_v14, %v3613_v37  ;;  %v3430_v57 = vmul.f32 %v10755_v53, %v14645_v52  ;;  %v14649_v14 = vld [vmem:[#allocation31_spill] sm:$0xff]  ;;  %v14650_v52 = vld [vmem:[#allocation84_spill] sm:$0xff] }
 0x26c   :  { %1772 = vst [vmem:[#allocation2 + $0x241] sm:$0xff] %v1755_v25  ;;  %14644 = vst [vmem:[#allocation40_spill] sm:$0xff] %v11211_v10  ;;  %v11220_v6 = vmul.f32 %v14646_v17, %v9574_v4  ;;  %v11222_v26 = vadd.f32 %v3787_v34, %v3755_v59  ;;  %v1742_v36 = vadd.f32 %v1726_v31, %v9471_v40  ;;  %v14652_v59 = vld [vmem:[#allocation38_spill] sm:$0xff] }
 0x26d   :  { %v11227_v56 = vmul.f32 %v14648_v13, %v9551_v7  ;;  %2014 = vst [vmem:[#allocation2 + $0x301] sm:$0xff] %v1997_v63  ;;  %v11230_v32 = vmul.f32 %v9457_v8, %v1997_v63  ;;  %v11233_v37 = vmul.f32 %v9464_v27, %v1997_v63  ;;  %v1968_v46 = vmul.f32 %v14649_v14, %v9452_v24  ;;  %v11246_v34 = vld [vmem:[#allocation2 + $0x24a] sm:$0xff] }
 0x26e   :  { %14647 = vst [vmem:[#allocation86_spill] sm:$0xff] %v11220_v6  ;;  %v11238_v17 = vadd.f32 %v3430_v57, %v14650_v52  ;;  %v11242_v31 = vmul.f32 %v14652_v59, %v9551_v7  ;;  %v3431_v13 = vmul.f32 %v10755_v53, %v10774_v22  ;;  %14654 = vst [vmem:[#allocation31_spill] sm:$0xff] %v11246_v34  ;;  %v11248_v16 = vmax.f32 %v1742_v36, 0.0  ;;  %v14656_v14 = vld [vmem:[#allocation85_spill] sm:$0xff] }
 0x26f   :  { %v11252_v60 = vmul.f32 %v11211_v10, %v11211_v10  ;;  %v11256_v38 = vmul.f32 %v14656_v14, %v9574_v4  ;;  %v11260_v57 = vmul.f32 %v10755_v53, %v10847_v11  ;;  %v1984_v52 = vadd.f32 %v1968_v46, %v9471_v40 }
 0x270   :  { %14651 = vst [vmem:[#allocation87_spill] sm:$0xff] %v11238_v17  ;;  %14653 = vst [vmem:[#allocation34_spill] sm:$0xff] %v11242_v31  ;;  %v11264_v22 = vadd.f32 %v3431_v13, %v10804_v51  ;;  %v3105_v36 = vmul.f32 %v9441_v2, %v11064_v50  ;;  %v11271_v59 = vmul.f32 %v9457_v8, %v11248_v16 }
 0x271   :  { %14655 = vst [vmem:[#allocation84_spill] sm:$0xff] %v11248_v16  ;;  %14657 = vst [vmem:[#allocation38_spill] sm:$0xff] %v11256_v38  ;;  %v11275_v14 = vmul.f32 %v9464_v27, %v11248_v16  ;;  %v11279_v11 = vmul.f32 %v11246_v34, %v9460_v19  ;;  %v11283_v51 = vmul.f32 %v11246_v34, %v9574_v4  ;;  %v11288_v23 = vmax.f32 %v1984_v52, 0.0 }
 0x272   :  { %14658 = vst [vmem:[#allocation85_spill] sm:$0xff] %v11264_v22  ;;  %1775 = vst [vmem:[#allocation2 + $0x261] sm:$0xff] %v11248_v16  ;;  %v3104_v13 = vmul.f32 %v9441_v2, %v1755_v25  ;;  %v3598_v16 = vmul.f32 %v9441_v2, %v1997_v63  ;;  %v1725_v12 = vmul.f32 %v14661_v21, %v9452_v24  ;;  %v14662_v25 = vld [vmem:[#allocation41_spill] sm:$0xff] }
 0x273   :  { %14659 = vst [vmem:[#allocation111_spill] sm:$0xff] %v11271_v59  ;;  %14660 = vst [vmem:[#allocation112_spill] sm:$0xff] %v11275_v14  ;;  %v3056_v46 = vld [vmem:[#allocation2 + $0x240] sm:$0xff]  ;;  %v3057_v50 = vld [vmem:[#allocation2 + $0x248] sm:$0xff]  ;;  %v1967_v52 = vmul.f32 %v14662_v25, %v9452_v24 }
 0x274   :  { %v11286_v20 = vld [vmem:[#allocation2 + $0x242] sm:$0xff]  ;;  %v3072_v59 = vmul.f32 %v3056_v46, %v9436_v61  ;;  %v3198_v14 = vmul.f32 %v3056_v46, %v9551_v7  ;;  %v3199_v34 = vmul.f32 %v3057_v50, %v9551_v7  ;;  %v3341_v62 = vmul.f32 %v3056_v46, %v9580_v49  ;;  %2017 = vst [vmem:[#allocation2 + $0x321] sm:$0xff] %v11288_v23 }
 0x275   :  { %v3342_v55 = vmul.f32 %v3057_v50, %v9580_v49  ;;  %v3073_v45 = vmul.f32 %v3057_v50, %v9436_v61  ;;  %v3152_v63 = vmul.f32 %v11286_v20, %v9460_v19  ;;  %v3550_v21 = vld [vmem:[#allocation2 + $0x300] sm:$0xff]  ;;  %v3551_v38 = vld [vmem:[#allocation2 + $0x308] sm:$0xff]  ;;  %v3294_v50 = vmul.f32 %v11286_v20, %v9574_v4 }
 0x276   :  { %v3120_v28 = vadd.f32 %v3104_v13, %v3072_v59  ;;  %v3214_v54 = vadd.f32 %v3198_v14, %v11085_v41  ;;  %v11305_v18 = vld [vmem:[#allocation2 + $0x302] sm:$0xff]  ;;  %v3215_v46 = vadd.f32 %v3199_v34, %v11113_v3  ;;  %v3357_v1 = vadd.f32 %v3341_v62, %v11109_v39  ;;  %v14666_v34 = vld [vmem:[#allocation26_spill] sm:$0xff] }
 0x277   :  { %14663 = vst [vmem:[#allocation39_spill] sm:$0xff] %v11305_v18  ;;  %v3358_v6 = vadd.f32 %v3342_v55, %v11127_v5  ;;  %v3566_v25 = vmul.f32 %v3550_v21, %v9436_v61  ;;  %v3646_v41 = vmul.f32 %v11305_v18, %v9460_v19  ;;  %v3599_v3 = vmul.f32 %v9441_v2, %v11111_v29 }
 0x278   :  { %v11311_v31 = vadd.f32 %v3152_v63, %v3120_v28  ;;  %v3262_v59 = vadd.f32 %v3246_v47, %v3214_v54  ;;  %v3263_v14 = vadd.f32 %v11101_v42, %v3215_v46  ;;  %v11318_v13 = vadd.f32 %v3389_v9, %v3357_v1  ;;  %v14665_v42 = vld [vmem:[#allocation25_spill] sm:$0xff] }
 0x279   :  { %v11321_v39 = vadd.f32 %v11105_v33, %v3358_v6  ;;  %v3614_v55 = vadd.f32 %v3598_v16, %v3566_v25  ;;  %v3692_v54 = vmul.f32 %v3550_v21, %v9551_v7  ;;  %v3693_v5 = vmul.f32 %v3551_v38, %v9551_v7  ;;  %v11335_v6 = vld [vmem:[#allocation2 + $0x30a] sm:$0xff] }
 0x27a   :  { %v11325_v28 = vadd.f32 %v3294_v50, %v3262_v59  ;;  %v3567_v62 = vmul.f32 %v3551_v38, %v9436_v61  ;;  %v3835_v1 = vmul.f32 %v3550_v21, %v9580_v49  ;;  %v1728_v33 = vmul.f32 %v14665_v42, %v9452_v24 }
 0x27b   :  { %14664 = vst [vmem:[#allocation41_spill] sm:$0xff] %v11321_v39  ;;  %v11330_v47 = vadd.f32 %v3646_v41, %v3614_v55  ;;  %v3708_v16 = vadd.f32 %v3692_v54, %v11156_v0  ;;  %v3709_v29 = vadd.f32 %v3693_v5, %v11214_v35  ;;  %v3836_v9 = vmul.f32 %v3551_v38, %v9580_v49  ;;  %v14672_v54 = vld [vmem:[#allocation48_spill] sm:$0xff] }
 0x27c   :  { %v1970_v63 = vmul.f32 %v14666_v34, %v9452_v24  ;;  %v3121_v46 = vadd.f32 %v3105_v36, %v3073_v45  ;;  %v3851_v25 = vadd.f32 %v3835_v1, %v11171_v48  ;;  %v1741_v59 = vadd.f32 %v1725_v12, %v9471_v40  ;;  %v4399_v34 = vld [vmem:[%s14182_s7] sm:$0xff] }
 0x27d   :  { %v1983_v21 = vadd.f32 %v1967_v52, %v9471_v40  ;;  %v3756_v50 = vadd.f32 %v11230_v32, %v3708_v16  ;;  %v3757_v41 = vadd.f32 %v11175_v44, %v3709_v29  ;;  %v3788_v0 = vmul.f32 %v11305_v18, %v9574_v4  ;;  %v14671_v52 = vld [vmem:[#allocation28_spill] sm:$0xff]  ;;  %v14686_v18 = vld [vmem:[#allocation69_spill] sm:$0xff] }
 0x27e   :  { %v3852_v35 = vadd.f32 %v3836_v9, %v11222_v26  ;;  %v3647_v38 = vmul.f32 %v11335_v6, %v9460_v19  ;;  %v3615_v55 = vadd.f32 %v3599_v3, %v3567_v62  ;;  %v11353_v45 = vadd.f32 %v11233_v37, %v3851_v25 }
 0x27f   :  { %v1744_v12 = vadd.f32 %v1728_v33, %v9471_v40  ;;  %v3789_v48 = vmul.f32 %v11335_v6, %v9574_v4  ;;  %v11358_v32 = vadd.f32 %v3788_v0, %v3756_v50  ;;  %v11365_v26 = vmul.f32 %v9457_v8, %v11288_v23  ;;  %v4402_v0 = vld [vmem:[%s14182_s7 + $0x18] sm:$0xff] }
 0x280   :  { %14667 = vst [vmem:[#allocation25_spill] sm:$0xff] %v11353_v45  ;;  %v11361_v44 = vadd.f32 %v11185_v30, %v3852_v35  ;;  %v11369_v36 = vmul.f32 %v9464_v27, %v11288_v23  ;;  %v1986_v37 = vadd.f32 %v1970_v63, %v9471_v40  ;;  %v1727_v3 = vmul.f32 %v14671_v52, %v9452_v24 }
 0x281   :  { %14669 = vst [vmem:[#allocation113_spill] sm:$0xff] %v11365_v26  ;;  %v1969_v5 = vmul.f32 %v14672_v54, %v9452_v24  ;;  %v11376_v62 = vmax.f32 %v1741_v59, 0.0  ;;  %v11379_v30 = vadd.f32 %v11279_v11, %v3121_v46  ;;  %v11382_v1 = vadd.f32 %v11283_v51, %v3263_v14 }
 0x282   :  { %14668 = vst [vmem:[#allocation26_spill] sm:$0xff] %v11361_v44  ;;  %14670 = vst [vmem:[#allocation114_spill] sm:$0xff] %v11369_v36  ;;  %v11384_v42 = vmax.f32 %v1983_v21, 0.0  ;;  %v3484_v33 = vmul.f32 %v11238_v17, %v11238_v17  ;;  %v11388_v16 = vadd.f32 %v3647_v38, %v3615_v55  ;;  %v11390_v29 = vadd.f32 %v3789_v48, %v3757_v41  ;;  %v4401_v41 = vld [vmem:[%s14182_s7 + $0x10] sm:$0xff]  ;;  %v14676_v38 = vld [vmem:[#allocation5_spill] sm:$0xff] }
 0x283   :  { %v11392_v9 = vmax.f32 %v1744_v12, 0.0  ;;  %v3461_v24 = vadd.f32 %v11238_v17, %v11211_v10  ;;  %v11398_v11 = vadd.f32 %v11260_v57, %v10815_v43  ;;  %1774 = vst [vmem:[#allocation2 + $0x259] sm:$0xff] %v11376_v62  ;;  %v11403_v51 = vmul.f32 %v9457_v8, %v11376_v62  ;;  %v4400_v43 = vld [vmem:[%s14182_s7 + $0x8] sm:$0xff]  ;;  %v14677_v12 = vld [vmem:[#allocation52_spill] sm:$0xff]  ;;  %v14684_v10 = vld [vmem:[#allocation54_spill] sm:$0xff] }
 0x284   :  { %v11407_v14 = vmul.f32 %v9464_v27, %v11376_v62  ;;  %2016 = vst [vmem:[#allocation2 + $0x319] sm:$0xff] %v11384_v42  ;;  %v3485_v57 = vmul.f32 %v11264_v22, %v11264_v22  ;;  %v11420_v63 = vmul.f32 %v9457_v8, %v11384_v42  ;;  %v11424_v46 = vmul.f32 %v9464_v27, %v11384_v42  ;;  %v14685_v44 = vld [vmem:[#allocation51_spill] sm:$0xff]  ;;  %v14687_v36 = vld [vmem:[#allocation66_spill] sm:$0xff] }
 0x285   :  { %14673 = vst [vmem:[#allocation28_spill] sm:$0xff] %v11398_v11  ;;  %1777 = vst [vmem:[#allocation2 + $0x279] sm:$0xff] %v11392_v9  ;;  %v11429_v25 = vmul.f32 %v9457_v8, %v11392_v9  ;;  %v11431_v59 = vmax.f32 %v1986_v37, 0.0  ;;  %v1743_v21 = vadd.f32 %v1727_v3, %v9471_v40  ;;  %v1985_v50 = vadd.f32 %v1969_v5, %v9471_v40 }
 0x286   :  { %v3499_v35 = vadd.f32 %v3484_v33, %v11252_v60  ;;  %v11444_v55 = vmul.f32 %v14676_v38, %v9580_v49  ;;  %v11448_v48 = vmul.f32 %v14677_v12, %v9580_v49  ;;  %v14264_v37 = vmov 0.0|0.0  }
 0x287   :  { %14674 = vst [vmem:[#allocation48_spill] sm:$0xff] %v11429_v25  ;;  %14675 = vst [vmem:[#allocation115_spill] sm:$0xff] %v11431_v59  ;;  %8248 = vmatprep.subr.bf16.mxu0 %v14264_v37  ;;  %v8249_v40 = vpack.c.bf16 %v4400_v43, %v4399_v34  ;;  %v11452_v52 = vadd.f32 %v3461_v24, %v11264_v22  ;;  %v11456_v3 = vmul.f32 %v10755_v53, %v10869_v15  ;;  %v4403_v15 = vld [vmem:[%s14182_s7 + $0x20] sm:$0xff]  ;;  %v14683_v22 = vld [vmem:[#allocation50_spill] sm:$0xff] }
 0x288   :  { %2019 = vst [vmem:[#allocation2 + $0x339] sm:$0xff] %v11431_v59  ;;  %v11459_v60 = vmax.f32 %v1743_v21, 0.0  ;;  %v2001_v54 = vmax.f32 %v1985_v50, 0.0  ;;  %8272 = vmatprep.subr.bf16.mxu1 %v14264_v37  ;;  %v11464_v5 = vmul.f32 %v11398_v11, %v11398_v11  ;;  %v11466_v33 = vadd.f32 %v3499_v35, %v3485_v57  ;;  %v11494_v50 = vld [vmem:[%s14182_s7 + $0x30] sm:$0xff] }
 0x289   :  { %8250 = vmatpush3.bf16.msra.mxu0 %v8249_v40  ;;  %v8252_v24 = vpack.c.bf16 %v4402_v0, %v4401_v41  ;;  %v11473_v34 = vmul.f32 %v10755_v53, %v10807_v58  ;;  %v4404_v58 = vld [vmem:[%s14182_s7 + $0x28] sm:$0xff]  ;;  %v11499_v41 = vld [vmem:[%s14182_s7 + $0x38] sm:$0xff]  ;;  %v11508_v40 = vld [vmem:[#allocation2] sm:$0xff]  ;;  %v11517_v45 = vadd.f32 %v14685_v44, %v14684_v10 }
 0x28a   :  { %1776 = vst [vmem:[#allocation2 + $0x271] sm:$0xff] %v11459_v60  ;;  %v11478_v43 = vmul.f32 %v9457_v8, %v11459_v60  ;;  %v11482_v57 = vmul.f32 %v9464_v27, %v11459_v60  ;;  %2018 = vst [vmem:[#allocation2 + $0x331] sm:$0xff] %v2001_v54  ;;  %v11485_v21 = vmul.f32 %v9457_v8, %v2001_v54  ;;  %8251 = vmatprep.subr.bf16.mxu0 %v14264_v37  ;;  %v3058_v0 = vld [vmem:[#allocation2 + $0x258] sm:$0xff]  ;;  %v11501_v35 = vld [vmem:[#allocation2 + $0x260] sm:$0xff] }
 0x28b   :  { %v11503_v38 = vld [vmem:[#allocation2 + $0x25a] sm:$0xff]  ;;  %v11506_v12 = vmul.f32 %v9464_v27, %v2001_v54  ;;  %7562 = vmatprep.mubr.msk.f32.mxu0 %vm8562_vm0, %v11508_v40  ;;  %v3074_v54 = vmul.f32 %v3058_v0, %v9436_v61  ;;  %v3200_v26 = vmul.f32 %v3058_v0, %v9551_v7  ;;  %7597 = vmatprep.mubr.msk.f32.mxu1 %vm8562_vm0, %v11508_v40 }
 0x28c   :  { %14678 = vst [vmem:[#allocation5_spill] sm:$0xff] %v11478_v43  ;;  %14679 = vst [vmem:[#allocation52_spill] sm:$0xff] %v11482_v57  ;;  %v14682_v37 = vld [vmem:[#allocation16_spill] sm:$0xff]  ;;  %v3552_v39 = vld [vmem:[#allocation2 + $0x318] sm:$0xff]  ;;  %v3201_v10 = vmul.f32 %v11501_v35, %v9551_v7  ;;  %v3343_v44 = vmul.f32 %v3058_v0, %v9580_v49  ;;  %v3154_v57 = vmul.f32 %v11503_v38, %v9460_v19  ;;  %v14689_v43 = vmov 0.0|0.0  }
 0x28d   :  { %14680 = vst [vmem:[#allocation116_spill] sm:$0xff] %v11485_v21  ;;  %14681 = vst [vmem:[#allocation117_spill] sm:$0xff] %v11506_v12  ;;  %v11513_v17 = vadd.f32 %v14683_v22, %v14682_v37  ;;  %v11521_v21 = vadd.f32 %v14687_v36, %v14686_v18  ;;  %v3106_v12 = vmul.f32 %v9441_v2, %v11376_v62  ;;  %v11535_v36 = vld [vmem:[#allocation2 + $0x31a] sm:$0xff]  ;;  %8253 = vmatpush3.bf16.msra.mxu0 %v8252_v24 }
 0x28e   :  { %v3600_v22 = vmul.f32 %v9441_v2, %v11384_v42  ;;  %v3344_v18 = vmul.f32 %v11501_v35, %v9580_v49  ;;  %14688 = vst [vmem:[#allocation16_spill] sm:$0xff] %v11535_v36  ;;  %v8255_v62 = vpack.c.bf16 %v4404_v58, %v4403_v15  ;;  %v3216_v42 = vadd.f32 %v3200_v26, %v11311_v31  ;;  %v11540_v25 = vld [vmem:[#allocation2 + $0x320] sm:$0xff] }
 0x28f   :  { %v3122_v37 = vadd.f32 %v3106_v12, %v3074_v54  ;;  %8254 = vmatprep.subr.bf16.mxu0 %v14689_v43  ;;  %v8258_v0 = vpack.c.bf16 %v11499_v41, %v11494_v50  ;;  %v11546_v8 = vadd.f32 %v3201_v10, %v11379_v30  ;;  %v3359_v59 = vadd.f32 %v3343_v44, %v11325_v28  ;;  %v14692_v54 = vld [vmem:[#allocation60_spill] sm:$0xff] }
 0x290   :  { %v11550_v24 = vadd.f32 %v3344_v18, %v11382_v1  ;;  %v3568_v15 = vmul.f32 %v3552_v39, %v9436_v61  ;;  %v3264_v31 = vadd.f32 %v11403_v51, %v3216_v42  ;;  %v3296_v26 = vmul.f32 %v11503_v38, %v9574_v4 }
 0x291   :  { %v3170_v58 = vadd.f32 %v3154_v57, %v3122_v37  ;;  %v3648_v12 = vmul.f32 %v11535_v36, %v9460_v19  ;;  %v11559_v50 = vadd.f32 %v11407_v14, %v3359_v59  ;;  %v3694_v28 = vmul.f32 %v3552_v39, %v9551_v7  ;;  %v11564_v41 = vld [vmem:[#allocation2 + $0x270] sm:$0xff]  ;;  %8256 = vmatpush3.bf16.msra.mxu0 %v8255_v62  ;;  %v14691_v57 = vld [vmem:[#allocation7_spill] sm:$0xff]  ;;  %v4407_v59 = vld [vmem:[%s14182_s7 + $0x40] sm:$0xff] }
 0x292   :  { %v3616_v30 = vadd.f32 %v3600_v22, %v3568_v15  ;;  %v3695_v1 = vmul.f32 %v11540_v25, %v9551_v7  ;;  %v11568_v51 = vmul.f32 %v10755_v53, %v14691_v57  ;;  %v3433_v10 = vmul.f32 %v10755_v53, %v14692_v54  ;;  %8257 = vmatprep.subr.bf16.mxu0 %v14689_v43  ;;  %v4408_v22 = vld [vmem:[%s14182_s7 + $0x48] sm:$0xff]  ;;  %v14695_v57 = vld [vmem:[#allocation92_spill] sm:$0xff] }
 0x293   :  { %14690 = vst [vmem:[#allocation50_spill] sm:$0xff] %v11559_v50  ;;  %v11572_v44 = vadd.f32 %v3296_v26, %v3264_v31  ;;  %v3837_v14 = vmul.f32 %v3552_v39, %v9580_v49  ;;  %v3710_v62 = vadd.f32 %v3694_v28, %v11330_v47  ;;  %v3838_v53 = vmul.f32 %v11540_v25, %v9580_v49  ;;  %v4409_v39 = vld [vmem:[%s14182_s7 + $0x50] sm:$0xff]  ;;  %v11600_v31 = vld [vmem:[#allocation2 + $0x278] sm:$0xff] }
 0x294   :  { %v3664_v18 = vadd.f32 %v3648_v12, %v3616_v30  ;;  %v11584_v37 = vadd.f32 %v3695_v1, %v11388_v16  ;;  %v11593_v42 = vadd.f32 %v11452_v52, %v11398_v11  ;;  %v11597_v15 = vadd.f32 %v11466_v33, %v11464_v5  ;;  %v4410_v26 = vld [vmem:[%s14182_s7 + $0x58] sm:$0xff]  ;;  %v11610_v52 = vld [vmem:[%s14182_s7 + $0x60] sm:$0xff]  ;;  %v11620_v30 = vld [vmem:[#allocation2 + $0x330] sm:$0xff] }
 0x295   :  { %v3853_v47 = vadd.f32 %v3837_v14, %v11358_v32  ;;  %v3202_v16 = vmul.f32 %v11564_v41, %v9551_v7  ;;  %v3758_v12 = vadd.f32 %v11420_v63, %v3710_v62  ;;  %v3790_v5 = vmul.f32 %v11535_v36, %v9574_v4  ;;  %v11618_v33 = vld [vmem:[#allocation2 + $0x27a] sm:$0xff]  ;;  %8259 = vmatpush3.bf16.msra.mxu0 %v8258_v0  ;;  %v4412_v1 = vld [vmem:[%s14182_s7 + $0x68] sm:$0xff]  ;;  %v11635_v62 = vld [vmem:[#allocation2 + $0x272] sm:$0xff] }
 0x296   :  { %14693 = vst [vmem:[#allocation54_spill] sm:$0xff] %v11584_v37  ;;  %v11616_v32 = vadd.f32 %v3838_v53, %v11390_v29  ;;  %v8261_v28 = vpack.c.bf16 %v4408_v22, %v4407_v59  ;;  %v11626_v54 = vadd.f32 %v3433_v10, %v14695_v57  ;;  %v3587_v29 = vmul.f32 %v9441_v2, %v11392_v9  ;;  %v14699_v57 = vld [vmem:[#allocation96_spill] sm:$0xff]  ;;  %v8552_v36 = vld [vmem:[#allocation2 + $0xca] sm:$0xff] }
 0x297   :  { %v11629_v63 = vadd.f32 %v11424_v46, %v3853_v47  ;;  %v11633_v14 = vadd.f32 %v3202_v16, %v3170_v58  ;;  %8260 = vmatprep.subr.bf16.mxu0 %v14689_v43  ;;  %v11638_v0 = vadd.f32 %v3790_v5, %v3758_v12  ;;  %v3554_v59 = vmul.f32 %v11564_v41, %v9436_v61  ;;  %v14706_v37 = vld [vmem:[#allocation98_spill] sm:$0xff] }
 0x298   :  { %14694 = vst [vmem:[#allocation51_spill] sm:$0xff] %v11616_v32  ;;  %14696 = vst [vmem:[#allocation69_spill] sm:$0xff] %v11626_v54  ;;  %v3555_v10 = vmul.f32 %v11600_v31, %v9436_v61  ;;  %v3586_v46 = vmul.f32 %v9441_v2, %v11459_v60  ;;  %v3635_v22 = vmul.f32 %v11618_v33, %v9460_v19 }
 0x299   :  { %14697 = vst [vmem:[#allocation66_spill] sm:$0xff] %v11629_v63  ;;  %14698 = vst [vmem:[#allocation7_spill] sm:$0xff] %v11638_v0  ;;  %v3696_v58 = vmul.f32 %v11620_v30, %v9551_v7  ;;  %v8264_v53 = vpack.c.bf16 %v4410_v26, %v4409_v39  ;;  %v8267_v47 = vpack.c.bf16 %v4412_v1, %v11610_v52  ;;  %8262 = vmatpush3.bf16.msra.mxu0 %v8261_v28  ;;  %v2332_v63 = vld [vmem:[#allocation2 + $0xe0] sm:$0xff]  ;;  %v14701_v39 = vld [vmem:[#allocation73_spill] sm:$0xff] }
 0x29a   :  { %v3602_v16 = vadd.f32 %v3586_v46, %v3554_v59  ;;  %v3603_v12 = vadd.f32 %v3587_v29, %v3555_v10  ;;  %v3634_v5 = vmul.f32 %v11635_v62, %v9460_v19  ;;  %v2211_v11 = vadd.f32 %v14699_v57, %v11513_v17  ;;  %8263 = vmatprep.subr.bf16.mxu0 %v14689_v43  ;;  %v14702_v52 = vld [vmem:[#allocation61_spill] sm:$0xff]  ;;  %v14703_v28 = vld [vmem:[#allocation95_spill] sm:$0xff] }
 0x29b   :  { %v11655_v60 = vadd.f32 %v3696_v58, %v3664_v18  ;;  %v2299_v32 = vmul.f32 %v8552_v36, %v9574_v4  ;;  %v2313_v26 = vadd.f32 %v14701_v39, %v11517_v45  ;;  %v2314_v1 = vadd.f32 %v14702_v52, %v11521_v21  ;;  %v8553_v46 = vld [vmem:[#allocation2 + $0xd8] sm:$0xff]  ;;  %v2384_v58 = vld [vmem:[#allocation2 + $0xe1] sm:$0xff]  ;;  %v14707_v45 = vld [vmem:[#allocation94_spill] sm:$0xff] }
 0x29c   :  { %v3650_v29 = vadd.f32 %v3634_v5, %v3602_v16  ;;  %v3651_v59 = vadd.f32 %v3635_v22, %v3603_v12  ;;  %v2263_v10 = vadd.f32 %v14703_v28, %v2211_v11  ;;  %v2351_v17 = vmul.f32 %v8553_v46, %v9580_v49  ;;  %v2383_v18 = vld [vmem:[#allocation2 + $0xd9] sm:$0xff]  ;;  %v14704_v0 = vld [vmem:[#allocation57_spill] sm:$0xff]  ;;  %v14708_v22 = vld [vmem:[#allocation34_spill] sm:$0xff] }
 0x29d   :  { %14700 = vst [vmem:[#allocation60_spill] sm:$0xff] %v11655_v60  ;;  %v2352_v57 = vmul.f32 %v9580_v49, %v2332_v63  ;;  %v14705_v60 = vld [vmem:[#allocation97_spill] sm:$0xff]  ;;  %v2366_v50 = vadd.f32 %v14706_v37, %v2313_v26  ;;  %v2402_v39 = vmul.f32 %v14707_v45, %v9464_v27  ;;  %8265 = vmatpush3.bf16.msra.mxu0 %v8264_v53  ;;  %v4413_v63 = vld [vmem:[%s14182_s7 + $0x70] sm:$0xff]  ;;  %v4414_v37 = vld [vmem:[%s14182_s7 + $0x78] sm:$0xff] }
 0x29e   :  { %v2365_v36 = vadd.f32 %v14705_v60, %v14704_v0  ;;  %v3698_v21 = vadd.f32 %v11227_v56, %v3650_v29  ;;  %v3699_v16 = vadd.f32 %v14708_v22, %v3651_v59  ;;  %v2315_v11 = vadd.f32 %v2299_v32, %v2263_v10  ;;  %8266 = vmatprep.subr.bf16.mxu0 %v14689_v43  ;;  %v14709_v56 = vld [vmem:[#allocation56_spill] sm:$0xff]  ;;  %v14710_v60 = vld [vmem:[#allocation14_spill] sm:$0xff]  ;;  %v14714_v46 = vld [vmem:[#allocation93_spill] sm:$0xff] }
 0x29f   :  { %v2367_v12 = vadd.f32 %v2351_v17, %v2314_v1  ;;  %v2403_v0 = vmul.f32 %v9464_v27, %v2383_v18  ;;  %v2404_v5 = vmul.f32 %v9464_v27, %v2384_v58  ;;  %v11684_v26 = vadd.f32 %v14710_v60, %v14709_v56  ;;  %v14711_v32 = vld [vmem:[#allocation70_spill] sm:$0xff]  ;;  %v14712_v52 = vld [vmem:[#allocation88_spill] sm:$0xff] }
 0x2a0   :  { %v11687_v53 = vadd.f32 %v14711_v32, %v2365_v36  ;;  %v3746_v1 = vadd.f32 %v14712_v52, %v3698_v21  ;;  %v14713_v29 = vld [vmem:[#allocation4_spill] sm:$0xff]  ;;  %v2368_v28 = vadd.f32 %v2352_v57, %v2315_v11  ;;  %v11691_v10 = vadd.f32 %v2402_v39, %v2366_v50  ;;  %v14716_v36 = vld [vmem:[#allocation38_spill] sm:$0xff]  ;;  %v14719_v39 = vld [vmem:[#allocation53_spill] sm:$0xff] }
 0x2a1   :  { %v3747_v59 = vadd.f32 %v14713_v29, %v3699_v16  ;;  %v11695_v17 = vadd.f32 %v11568_v51, %v14714_v46  ;;  %v3464_v18 = vadd.f32 %v11593_v42, %v11626_v54  ;;  %v3487_v58 = vmul.f32 %v11626_v54, %v11626_v54  ;;  %v14717_v21 = vld [vmem:[#allocation86_spill] sm:$0xff]  ;;  %8268 = vmatpush3.bf16.msra.mxu0 %v8267_v47  ;;  %v14720_v16 = vld [vmem:[#allocation59_spill] sm:$0xff]  ;;  %v11718_v11 = vld [vmem:[%s14179_s4 + $0x8] ss:$0 sm:$0xff] }
 0x2a2   :  { %v11701_v45 = vadd.f32 %v2403_v0, %v2367_v12  ;;  %v3794_v22 = vadd.f32 %v14716_v36, %v3746_v1  ;;  %v8270_v57 = vpack.c.bf16 %v4414_v37, %v4413_v63  ;;  %v11705_v50 = vadd.f32 %v2404_v5, %v2368_v28  ;;  %v14722_v12 = vld [vmem:[#allocation9_spill] sm:$0xff]  ;;  %v14723_v47 = vld [vmem:[#allocation15_spill] sm:$0xff]  ;;  %8269 = vmatprep.subr.bf16.mxu0 %v14689_v43  ;;  %v14724_v37 = vld [vmem:[#allocation46_spill] sm:$0xff] }
 0x2a3   :  { %14715 = vst [vmem:[#allocation92_spill] sm:$0xff] %v11695_v17  ;;  %v3795_v56 = vadd.f32 %v14717_v21, %v3747_v59  ;;  %v11709_v51 = vadd.f32 %v11473_v34, %v14719_v39  ;;  %v11713_v42 = vadd.f32 %v11456_v3, %v14720_v16  ;;  %v3928_v0 = vmul.f32 %v11718_v11, %v14722_v12  ;;  %v14725_v52 = vld [vmem:[#allocation99_spill] sm:$0xff]  ;;  %v14727_v29 = vld [vmem:[#allocation30_spill] sm:$0xff]  ;;  %v14728_v46 = vld [vmem:[#allocation100_spill] sm:$0xff] }
 0x2a4   :  { %14718 = vst [vmem:[#allocation96_spill] sm:$0xff] %v11705_v50  ;;  %v3927_v63 = vmul.f32 %v11718_v11, %v14723_v47  ;;  %v3502_v34 = vadd.f32 %v11597_v15, %v3487_v58  ;;  %v3435_v5 = vmul.f32 %v11718_v11, %v14724_v37  ;;  %v3843_v3 = vadd.f32 %v11444_v55, %v3794_v22  ;;  %v14730_v58 = vld [vmem:[#allocation101_spill] sm:$0xff]  ;;  %v14732_v55 = vld [vmem:[#allocation43_spill] sm:$0xff]  ;;  %v14735_v47 = vld [vmem:[#allocation102_spill] sm:$0xff] }
 0x2a5   :  { %14721 = vst [vmem:[#allocation73_spill] sm:$0xff] %v11713_v42  ;;  %v3844_v60 = vadd.f32 %v11448_v48, %v3795_v56  ;;  %v3488_v32 = vmul.f32 %v11695_v17, %v11695_v17  ;;  %v3436_v59 = vmul.f32 %v11718_v11, %v14727_v29  ;;  %v3465_v28 = vadd.f32 %v3464_v18, %v11695_v17  ;;  %v14733_v48 = vld [vmem:[#allocation90_spill] sm:$0xff]  ;;  %v14734_v56 = vld [vmem:[#allocation19_spill] sm:$0xff]  ;;  %v8556_v18 = vld [vmem:[#allocation2 + $0x2a2] sm:$0xff] }
 0x2a6   :  { %v11733_v1 = vadd.f32 %v3927_v63, %v14725_v52  ;;  %v11739_v15 = vadd.f32 %v3928_v0, %v14728_v46  ;;  %v11742_v36 = vadd.f32 %v3435_v5, %v14730_v58  ;;  %v11745_v22 = vadd.f32 %v14732_v55, %v3843_v3  ;;  %8271 = vmatpush3.bf16.msra.mxu0 %v8270_v57  ;;  %v8555_v16 = vld [vmem:[#allocation2 + $0x2aa] sm:$0xff]  ;;  %v14742_v46 = vld [vmem:[#allocation107_spill] sm:$0xff]  ;;  %v14744_v55 = vld [vmem:[#allocation36_spill] sm:$0xff] }
 0x2a7   :  { %v11748_v21 = vadd.f32 %v14733_v48, %v3844_v60  ;;  %v2852_v39 = vmul.f32 %v14734_v56, %v9580_v49  ;;  %v11753_v12 = vmul.f32 %v8555_v16, %v11718_v11  ;;  %v11756_v0 = vmul.f32 %v8556_v18, %v11718_v11  ;;  %v14739_v3 = vld [vmem:[#allocation106_spill] sm:$0xff]  ;;  %v14740_v60 = vld [vmem:[#allocation12_spill] sm:$0xff]  ;;  %v14743_v58 = vld [vmem:[#allocation77_spill] sm:$0xff] }
 0x2a8   :  { %14726 = vst [vmem:[#allocation61_spill] sm:$0xff] %v11733_v1  ;;  %14729 = vst [vmem:[#allocation95_spill] sm:$0xff] %v11739_v15  ;;  %v11759_v63 = vadd.f32 %v3436_v59, %v14735_v47  ;;  %v11763_v37 = vmul.f32 %v11709_v51, %v11709_v51  ;;  %v11767_v57 = vmul.f32 %v11713_v42, %v11713_v42  ;;  %v14745_v56 = vld [vmem:[#allocation82_spill] sm:$0xff]  ;;  %v14746_v16 = vld [vmem:[#allocation23_spill] sm:$0xff] }
 0x2a9   :  { %14731 = vst [vmem:[#allocation57_spill] sm:$0xff] %v11742_v36  ;;  %v3503_v5 = vadd.f32 %v3502_v34, %v3488_v32  ;;  %v2677_v52 = vadd.f32 %v14740_v60, %v14739_v3  ;;  %v11773_v29 = vmul.f32 %v11733_v1, %v11733_v1  ;;  %v3930_v59 = vmul.f32 %v11718_v11, %v14742_v46  ;;  %v2789_v47 = vld [vmem:[#allocation2 + $0x18a] sm:$0xff] }
 0x2aa   :  { %14736 = vst [vmem:[#allocation97_spill] sm:$0xff] %v11759_v63  ;;  %14737 = vst [vmem:[#allocation98_spill] sm:$0xff] %v11763_v37  ;;  %v2771_v48 = vadd.f32 %v14744_v55, %v14743_v58  ;;  %v2772_v18 = vadd.f32 %v14746_v16, %v14745_v56  ;;  %v11783_v34 = vmul.f32 %v11739_v15, %v11739_v15  ;;  %v14748_v60 = vld [vmem:[#allocation105_spill] sm:$0xff]  ;;  %v14749_v58 = vld [vmem:[#allocation110_spill] sm:$0xff] }
 0x2ab   :  { %14738 = vst [vmem:[#allocation94_spill] sm:$0xff] %v11767_v57  ;;  %14741 = vst [vmem:[#allocation34_spill] sm:$0xff] %v11773_v29  ;;  %v3466_v32 = vadd.f32 %v3465_v28, %v11742_v36  ;;  %v3489_v3 = vmul.f32 %v11742_v36, %v11742_v36  ;;  %v3929_v17 = vmul.f32 %v11718_v11, %v14748_v60  ;;  %v14750_v54 = vld [vmem:[#allocation10_spill] sm:$0xff]  ;;  %v14751_v16 = vld [vmem:[#allocation83_spill] sm:$0xff] }
 0x2ac   :  { %14747 = vst [vmem:[#allocation56_spill] sm:$0xff] %v11783_v34  ;;  %v3490_v46 = vmul.f32 %v11759_v63, %v11759_v63  ;;  %v2725_v55 = vadd.f32 %v14749_v58, %v2677_v52  ;;  %v2819_v56 = vadd.f32 %v14750_v54, %v2771_v48  ;;  %v2820_v43 = vadd.f32 %v14751_v16, %v2772_v18  ;;  %v14752_v15 = vld [vmem:[#allocation108_spill] sm:$0xff]  ;;  %v14754_v1 = vld [vmem:[#allocation42_spill] sm:$0xff]  ;;  %v14755_v54 = vld [vmem:[#allocation81_spill] sm:$0xff] }
 0x2ad   :  { %v3504_v29 = vadd.f32 %v3503_v5, %v3489_v3  ;;  %v11796_v34 = vadd.f32 %v3929_v17, %v14752_v15  ;;  %v3437_v28 = vmul.f32 %v11718_v11, %v11286_v20  ;;  %v11802_v36 = vmul.f32 %v11508_v40, %v9580_v49  ;;  %v2885_v60 = vld [vmem:[#allocation2 + $0x199] sm:$0xff]  ;;  %v2886_v57 = vld [vmem:[#allocation2 + $0x1a1] sm:$0xff]  ;;  %v14756_v48 = vld [vmem:[#allocation74_spill] sm:$0xff] }
 0x2ae   :  { %v2773_v50 = vadd.f32 %v14754_v1, %v2725_v55  ;;  %v2805_v52 = vmul.f32 %v2789_v47, %v9574_v4  ;;  %v2867_v18 = vadd.f32 %v14756_v48, %v14755_v54  ;;  %v2868_v5 = vadd.f32 %v2852_v39, %v2819_v56  ;;  %v14757_v3 = vld [vmem:[#allocation109_spill] sm:$0xff]  ;;  %v14760_v39 = vld [vmem:[#allocation78_spill] sm:$0xff]  ;;  %v14762_v48 = vld [vmem:[#allocation24_spill] sm:$0xff] }
 0x2af   :  { %14753 = vst [vmem:[#allocation14_spill] sm:$0xff] %v11796_v34  ;;  %v11809_v17 = vadd.f32 %v3930_v59, %v14757_v3  ;;  %v11812_v15 = vadd.f32 %v3437_v28, %v11318_v13  ;;  %v2869_v20 = vadd.f32 %v11802_v36, %v2820_v43  ;;  %v8557_v40 = vld [vmem:[#allocation2 + $0x189] sm:$0xff]  ;;  %v3467_v16 = vadd.f32 %v3466_v32, %v11759_v63  ;;  %v14763_v43 = vld [vmem:[#allocation31_spill] sm:$0xff] }
 0x2b0   :  { %v2900_v58 = vmul.f32 %v8557_v40, %v9464_v27  ;;  %v2821_v1 = vadd.f32 %v2805_v52, %v2773_v50  ;;  %v2901_v47 = vmul.f32 %v2885_v60, %v9464_v27  ;;  %v2902_v55 = vmul.f32 %v2886_v57, %v9464_v27  ;;  %v14761_v56 = vld [vmem:[#allocation37_spill] sm:$0xff]  ;;  %v14778_v63 = vld [vmem:[#allocation79_spill] sm:$0xff]  ;;  %v3332_v37 = vld [vmem:[#allocation2 + $0x290] sm:$0xff] }
 0x2b1   :  { %14758 = vst [vmem:[#allocation70_spill] sm:$0xff] %v11809_v17  ;;  %14759 = vst [vmem:[#allocation88_spill] sm:$0xff] %v11812_v15  ;;  %v3505_v54 = vadd.f32 %v3504_v29, %v3490_v46  ;;  %v11821_v59 = vadd.f32 %v14761_v56, %v14760_v39  ;;  %v11824_v13 = vadd.f32 %v14762_v48, %v2867_v18  ;;  %v3139_v32 = vld [vmem:[#allocation2 + $0x262] sm:$0xff] }
 0x2b2   :  { %v11826_v28 = vadd.f32 %v2900_v58, %v2868_v5  ;;  %v11830_v3 = vmul.f32 %v11718_v11, %v14763_v43  ;;  %v3075_v50 = vmul.f32 %v11501_v35, %v9436_v61  ;;  %v2870_v57 = vadd.f32 %v11802_v36, %v2821_v1  ;;  %v11851_v35 = vld [vmem:[#allocation2 + $0x322] sm:$0xff] }
 0x2b3   :  { %v11835_v29 = vadd.f32 %v2901_v47, %v2869_v20  ;;  %v11839_v46 = vmul.f32 %v11796_v34, %v11796_v34  ;;  %v11843_v60 = vmul.f32 %v11809_v17, %v11809_v17  ;;  %v11847_v52 = vmul.f32 %v11718_v11, %v11335_v6  ;;  %14767 = vst [vmem:[#allocation86_spill] sm:$0xff] %v11851_v35  ;;  %v14768_v20 = vld [vmem:[#allocation84_spill] sm:$0xff]  ;;  %v14770_v56 = vld [vmem:[#allocation49_spill] sm:$0xff] }
 0x2b4   :  { %v3491_v18 = vmul.f32 %v11812_v15, %v11812_v15  ;;  %v11854_v5 = vadd.f32 %v3467_v16, %v11812_v15  ;;  %v3107_v40 = vmul.f32 %v9441_v2, %v14768_v20  ;;  %v3569_v58 = vmul.f32 %v11540_v25, %v9436_v61  ;;  %v14771_v48 = vld [vmem:[#allocation29_spill] sm:$0xff] }
 0x2b5   :  { %14764 = vst [vmem:[#allocation4_spill] sm:$0xff] %v11839_v46  ;;  %14765 = vst [vmem:[#allocation93_spill] sm:$0xff] %v11843_v60  ;;  %v11860_v1 = vadd.f32 %v2902_v55, %v2870_v57  ;;  %v3155_v6 = vmul.f32 %v3139_v32, %v9460_v19  ;;  %v3297_v39 = vmul.f32 %v3139_v32, %v9574_v4  ;;  %v11879_v55 = vld [vmem:[#allocation2 + $0x338] sm:$0xff]  ;;  %v2434_v15 = vld [vmem:[#allocation2 + $0xca] sm:$0xff] }
 0x2b6   :  { %14766 = vst [vmem:[#allocation38_spill] sm:$0xff] %v11847_v52  ;;  %v11862_v47 = vadd.f32 %v3505_v54, %v3491_v18  ;;  %v11868_v43 = vadd.f32 %v14771_v48, %v14770_v56  ;;  %v11871_v16 = vmul.f32 %v11718_v11, %v3139_v32  ;;  %v3601_v20 = vmul.f32 %v9441_v2, %v11288_v23  ;;  %v14773_v32 = vld [vmem:[#allocation115_spill] sm:$0xff]  ;;  %v14774_v18 = vld [vmem:[#allocation22_spill] sm:$0xff]  ;;  %v14785_v42 = vld [vmem:[#allocation33_spill] sm:$0xff] }
 0x2b7   :  { %14769 = vst [vmem:[#allocation53_spill] sm:$0xff] %v11860_v1  ;;  %v11877_v61 = vmul.f32 %v11851_v35, %v9460_v19  ;;  %v3123_v25 = vadd.f32 %v3107_v40, %v3075_v50  ;;  %v11883_v54 = vmul.f32 %v11851_v35, %v9574_v4  ;;  %v11887_v57 = vmul.f32 %v11718_v11, %v11503_v38  ;;  %v11893_v2 = vld [vmem:[#allocation2 + $0x332] sm:$0xff]  ;;  %v14776_v19 = vld [vmem:[#allocation32_spill] sm:$0xff] }
 0x2b8   :  { %14772 = vst [vmem:[#allocation59_spill] sm:$0xff] %v11868_v43  ;;  %v11891_v56 = vmul.f32 %v14774_v18, %v14773_v32  ;;  %14775 = vst [vmem:[#allocation9_spill] sm:$0xff] %v11893_v2  ;;  %v2481_v23 = vadd.f32 %v14776_v19, %v11868_v43  ;;  %v11897_v50 = vadd.f32 %v3601_v20, %v3569_v58  ;;  %v14777_v38 = vld [vmem:[#allocation58_spill] sm:$0xff]  ;;  %v14780_v20 = vld [vmem:[#allocation75_spill] sm:$0xff] }
 0x2b9   :  { %v3203_v40 = vmul.f32 %v11600_v31, %v9551_v7  ;;  %v3298_v48 = vmul.f32 %v11635_v62, %v9574_v4  ;;  %v11905_v60 = vadd.f32 %v14778_v63, %v14777_v38  ;;  %v3345_v18 = vmul.f32 %v11564_v41, %v9580_v49  ;;  %v8558_v63 = vld [vmem:[#allocation2 + $0xc2] sm:$0xff]  ;;  %v14781_v41 = vld [vmem:[#allocation111_spill] sm:$0xff] }
 0x2ba   :  { %v3346_v46 = vmul.f32 %v11600_v31, %v9580_v49  ;;  %v11913_v58 = vmul.f32 %v11879_v55, %v9551_v7  ;;  %v11917_v19 = vadd.f32 %v14780_v20, %v11684_v26  ;;  %v11921_v52 = vmul.f32 %v11893_v2, %v9574_v4  ;;  %v14782_v26 = vld [vmem:[#allocation5_spill] sm:$0xff] }
 0x2bb   :  { %14779 = vst [vmem:[#allocation15_spill] sm:$0xff] %v11905_v60  ;;  %v2453_v38 = vmul.f32 %v8558_v63, %v11718_v11  ;;  %v3171_v17 = vadd.f32 %v3155_v6, %v3123_v25  ;;  %v3265_v35 = vadd.f32 %v14781_v41, %v11546_v8  ;;  %v2454_v31 = vmul.f32 %v11718_v11, %v2434_v15  ;;  %v14783_v15 = vld [vmem:[#allocation76_spill] sm:$0xff] }
 0x2bc   :  { %v2482_v7 = vadd.f32 %v2481_v23, %v11905_v60  ;;  %v2504_v34 = vmul.f32 %v11868_v43, %v11868_v43  ;;  %v3266_v20 = vadd.f32 %v14782_v26, %v11633_v14  ;;  %v2505_v63 = vmul.f32 %v11905_v60, %v11905_v60  ;;  %v14784_v23 = vld [vmem:[#allocation35_spill] sm:$0xff] }
 0x2bd   :  { %v11933_v2 = vadd.f32 %v2453_v38, %v11687_v53  ;;  %v3219_v6 = vadd.f32 %v3203_v40, %v3171_v17  ;;  %v3313_v25 = vadd.f32 %v3297_v39, %v3265_v35  ;;  %v2506_v8 = vmul.f32 %v11917_v19, %v11917_v19  ;;  %v14786_v53 = vld [vmem:[#allocation48_spill] sm:$0xff]  ;;  %v8559_v35 = vld [vmem:[#allocation2 + $0x288] sm:$0xff] }
 0x2be   :  { %v2519_v41 = vadd.f32 %v14783_v15, %v2504_v34  ;;  %v11942_v1 = vadd.f32 %v14785_v42, %v14784_v23  ;;  %v3314_v43 = vadd.f32 %v3298_v48, %v3266_v20  ;;  %v11946_v14 = vadd.f32 %v11756_v0, %v11745_v22  ;;  %v3379_v40 = vld [vmem:[#allocation2 + $0x289] sm:$0xff]  ;;  %v3380_v22 = vld [vmem:[#allocation2 + $0x291] sm:$0xff] }
 0x2bf   :  { %v3267_v38 = vadd.f32 %v14786_v53, %v3219_v6  ;;  %v3299_v17 = vmul.f32 %v11618_v33, %v9574_v4  ;;  %v3347_v39 = vmul.f32 %v8559_v35, %v9580_v49  ;;  %v11954_v34 = vadd.f32 %v11753_v12, %v11748_v21  ;;  %v14787_v53 = vld [vmem:[#allocation80_spill] sm:$0xff] }
 0x2c0   :  { %v2483_v42 = vadd.f32 %v2482_v7, %v11917_v19  ;;  %v3361_v48 = vadd.f32 %v3345_v18, %v11572_v44  ;;  %v3362_v26 = vadd.f32 %v3346_v46, %v3313_v25  ;;  %v3348_v20 = vmul.f32 %v3332_v37, %v9580_v49  ;;  %v14788_v35 = vld [vmem:[#allocation72_spill] sm:$0xff] }
 0x2c1   :  { %v3315_v0 = vadd.f32 %v3299_v17, %v3267_v38  ;;  %v3363_v6 = vadd.f32 %v3347_v39, %v3314_v43  ;;  %v3394_v15 = vmul.f32 %v9464_v27, %v11392_v9  ;;  %v2520_v23 = vadd.f32 %v2519_v41, %v2505_v63  ;;  %v2435_v44 = vld [vmem:[#allocation2 + $0xda] sm:$0xff] }
 0x2c2   :  { %v11963_v60 = vadd.f32 %v14788_v35, %v14787_v53  ;;  %v2998_v21 = vmul.f32 %v11942_v1, %v11942_v1  ;;  %v3395_v12 = vmul.f32 %v3379_v40, %v9464_v27  ;;  %v3396_v18 = vmul.f32 %v3380_v22, %v9464_v27  ;;  %v14789_v37 = vld [vmem:[#allocation112_spill] sm:$0xff]  ;;  %v14791_v39 = vld [vmem:[#allocation103_spill] sm:$0xff]  ;;  %v2932_v35 = vld [vmem:[#allocation2 + $0x18a] sm:$0xff] }
 0x2c3   :  { %v3364_v46 = vadd.f32 %v3348_v20, %v3315_v0  ;;  %v3408_v43 = vadd.f32 %v14789_v37, %v11550_v24  ;;  %v14790_v7 = vld [vmem:[#allocation52_spill] sm:$0xff]  ;;  %v3955_v9 = vadd.f32 %v11954_v34, %v11946_v14  ;;  %v3977_v63 = vmul.f32 %v11946_v14, %v11946_v14  ;;  %v14792_v24 = vld [vmem:[#allocation13_spill] sm:$0xff] }
 0x2c4   :  { %v11972_v25 = vadd.f32 %v14790_v7, %v3361_v48  ;;  %v11978_v41 = vadd.f32 %v3394_v15, %v3362_v26  ;;  %v11980_v38 = vadd.f32 %v3395_v12, %v3363_v6  ;;  %v3978_v17 = vmul.f32 %v11954_v34, %v11954_v34  ;;  %v14793_v12 = vld [vmem:[#allocation104_spill] sm:$0xff] }
 0x2c5   :  { %v2975_v40 = vadd.f32 %v14791_v39, %v11942_v1  ;;  %v3013_v22 = vadd.f32 %v14792_v24, %v2998_v21  ;;  %v11987_v48 = vadd.f32 %v3396_v18, %v3364_v46  ;;  %v3839_v0 = vmul.f32 %v11620_v30, %v9580_v49 }
 0x2c6   :  { %v2455_v20 = vmul.f32 %v11718_v11, %v2435_v44  ;;  %v2484_v26 = vadd.f32 %v2483_v42, %v11933_v2  ;;  %v2521_v15 = vadd.f32 %v2520_v23, %v2506_v8  ;;  %v3840_v6 = vmul.f32 %v11879_v55, %v9580_v49  ;;  %v2933_v42 = vld [vmem:[#allocation2 + $0x19a] sm:$0xff]  ;;  %v2934_v23 = vld [vmem:[#allocation2 + $0x1a2] sm:$0xff] }
 0x2c7   :  { %v11996_v53 = vadd.f32 %v2454_v31, %v11691_v10  ;;  %v12000_v21 = vadd.f32 %v14793_v12, %v11821_v59  ;;  %v2999_v46 = vmul.f32 %v11963_v60, %v11963_v60  ;;  %v2507_v8 = vmul.f32 %v11933_v2, %v11933_v2  ;;  %v14794_v49 = vld [vmem:[#allocation8_spill] sm:$0xff]  ;;  %v14795_v55 = vld [vmem:[#allocation41_spill] sm:$0xff] }
 0x2c8   :  { %v12005_v30 = vadd.f32 %v2455_v20, %v11701_v45  ;;  %v2947_v10 = vmul.f32 %v11718_v11, %v14794_v49  ;;  %v12013_v31 = vadd.f32 %v11830_v3, %v14795_v55  ;;  %v12016_v59 = vadd.f32 %v3955_v9, %v11709_v51  ;;  %v12040_v12 = vld [vmem:[#allocation2 + $0x33a] sm:$0xff] }
 0x2c9   :  { %v3993_v44 = vadd.f32 %v3978_v17, %v3977_v63  ;;  %v2976_v18 = vadd.f32 %v2975_v40, %v11963_v60  ;;  %v3014_v45 = vadd.f32 %v3013_v22, %v2999_v46  ;;  %v2485_v37 = vadd.f32 %v2484_v26, %v11996_v53  ;;  %v14796_v17 = vld [vmem:[#allocation50_spill] sm:$0xff] }
 0x2ca   :  { %v2522_v7 = vadd.f32 %v2521_v15, %v2507_v8  ;;  %v2948_v39 = vmul.f32 %v11718_v11, %v2932_v35  ;;  %v12022_v24 = vadd.f32 %v2947_v10, %v11824_v13  ;;  %v2949_v20 = vmul.f32 %v11718_v11, %v2933_v42  ;;  %v14797_v26 = vld [vmem:[#allocation54_spill] sm:$0xff]  ;;  %v14798_v15 = vld [vmem:[#allocation113_spill] sm:$0xff]  ;;  %v14799_v42 = vld [vmem:[#allocation60_spill] sm:$0xff] }
 0x2cb   :  { %v2950_v3 = vmul.f32 %v11718_v11, %v2934_v23  ;;  %v3000_v9 = vmul.f32 %v12000_v21, %v12000_v21  ;;  %v3469_v63 = vadd.f32 %v11854_v5, %v12013_v31  ;;  %v12032_v40 = vadd.f32 %v11887_v57, %v14796_v17  ;;  %v14800_v57 = vld [vmem:[#allocation116_spill] sm:$0xff] }
 0x2cc   :  { %v3492_v22 = vmul.f32 %v12013_v31, %v12013_v31  ;;  %v3665_v13 = vadd.f32 %v11877_v61, %v11897_v50  ;;  %v3759_v35 = vadd.f32 %v14798_v15, %v14797_v26  ;;  %v12043_v46 = vadd.f32 %v2948_v39, %v11826_v28 }
 0x2cd   :  { %v2977_v5 = vadd.f32 %v2976_v18, %v12000_v21  ;;  %v3015_v8 = vadd.f32 %v3014_v45, %v3000_v9  ;;  %v3760_v23 = vadd.f32 %v14800_v57, %v14799_v42  ;;  %v3001_v49 = vmul.f32 %v12022_v24, %v12022_v24  ;;  %v14801_v45 = vld [vmem:[#allocation7_spill] sm:$0xff]  ;;  %v3873_v9 = vld [vmem:[#allocation2 + $0x349] sm:$0xff] }
 0x2ce   :  { %v3507_v10 = vadd.f32 %v11862_v47, %v3492_v22  ;;  %v3713_v61 = vadd.f32 %v11913_v58, %v3665_v13  ;;  %v3807_v50 = vadd.f32 %v11883_v54, %v3759_v35  ;;  %v12054_v55 = vadd.f32 %v11871_v16, %v3408_v43  ;;  %v3874_v54 = vld [vmem:[#allocation2 + $0x351] sm:$0xff] }
 0x2cf   :  { %v3470_v28 = vadd.f32 %v3469_v63, %v12032_v40  ;;  %v3808_v18 = vadd.f32 %v11921_v52, %v3760_v23  ;;  %v3855_v39 = vadd.f32 %v3839_v0, %v14801_v45  ;;  %v3493_v17 = vmul.f32 %v12032_v40, %v12032_v40  ;;  %v14803_v35 = vld [vmem:[#allocation114_spill] sm:$0xff] }
 0x2d0   :  { %v3761_v26 = vadd.f32 %v11891_v56, %v3713_v61  ;;  %v3793_v47 = vmul.f32 %v12040_v12, %v9574_v4  ;;  %v3856_v58 = vadd.f32 %v3840_v6, %v3807_v50  ;;  %v2978_v16 = vadd.f32 %v2977_v5, %v12022_v24  ;;  %v14802_v6 = vld [vmem:[#allocation51_spill] sm:$0xff]  ;;  %v14805_v45 = vld [vmem:[#allocation98_spill] sm:$0xff] }
 0x2d1   :  { %v3016_v43 = vadd.f32 %v3015_v8, %v3001_v49  ;;  %v3441_v63 = vmul.f32 %v11718_v11, %v11635_v62  ;;  %v3857_v52 = vadd.f32 %v3808_v18, %v11802_v36  ;;  %v3508_v0 = vadd.f32 %v3507_v10, %v3493_v17  ;;  %v14804_v8 = vld [vmem:[#allocation117_spill] sm:$0xff] }
 0x2d2   :  { %v3809_v22 = vadd.f32 %v3793_v47, %v3761_v26  ;;  %v3888_v13 = vmul.f32 %v9464_v27, %v14773_v32  ;;  %v3889_v56 = vmul.f32 %v3873_v9, %v9464_v27  ;;  %v3471_v15 = vadd.f32 %v3470_v28, %v12054_v55  ;;  %v2436_v62 = vld [vmem:[#allocation2 + $0xe2] sm:$0xff]  ;;  %v3427_v9 = vld [vmem:[#allocation2 + $0x28a] sm:$0xff] }
 0x2d3   :  { %v3890_v4 = vmul.f32 %v3874_v54, %v9464_v27  ;;  %v12075_v5 = vadd.f32 %v14803_v35, %v14802_v6  ;;  %v12078_v42 = vadd.f32 %v14804_v8, %v3855_v39  ;;  %v12081_v57 = vadd.f32 %v3441_v63, %v11972_v25  ;;  %v14806_v54 = vld [vmem:[#allocation53_spill] sm:$0xff] }
 0x2d4   :  { %v3494_v32 = vmul.f32 %v12054_v55, %v12054_v55  ;;  %v3858_v23 = vadd.f32 %v3809_v22, %v11802_v36  ;;  %v12086_v49 = vadd.f32 %v3888_v13, %v3856_v58  ;;  %v12089_v27 = vadd.f32 %v2949_v20, %v11835_v29  ;;  %v14807_v63 = vld [vmem:[#allocation73_spill] sm:$0xff] }
 0x2d5   :  { %v2979_v10 = vadd.f32 %v2978_v16, %v12043_v46  ;;  %v3002_v61 = vmul.f32 %v12043_v46, %v12043_v46  ;;  %v12094_v50 = vadd.f32 %v3889_v56, %v3857_v52  ;;  %v2508_v25 = vmul.f32 %v11996_v53, %v11996_v53  ;;  %v14810_v6 = vld [vmem:[#allocation61_spill] sm:$0xff] }
 0x2d6   :  { %v3442_v28 = vmul.f32 %v11718_v11, %v11618_v33  ;;  %v3509_v18 = vadd.f32 %v3508_v0, %v3494_v32  ;;  %v12100_v36 = vadd.f32 %v3890_v4, %v3858_v23  ;;  %v3994_v39 = vadd.f32 %v3993_v44, %v14805_v45  ;;  %v14808_v0 = vld [vmem:[#allocation39_spill] sm:$0xff]  ;;  %v14811_v32 = vld [vmem:[#allocation94_spill] sm:$0xff]  ;;  %v14813_v45 = vld [vmem:[#allocation25_spill] sm:$0xff] }
 0x2d7   :  { %v2456_v29 = vmul.f32 %v11718_v11, %v2436_v62  ;;  %v3017_v20 = vadd.f32 %v3016_v43, %v3002_v61  ;;  %v3472_v17 = vadd.f32 %v3471_v15, %v12081_v57  ;;  %v2486_v26 = vadd.f32 %v2485_v37, %v12005_v30  ;;  %v3428_v15 = vld [vmem:[#allocation2 + $0x292] sm:$0xff] }
 0x2d8   :  { %v2523_v47 = vadd.f32 %v2522_v7, %v2508_v25  ;;  %v12107_v58 = vadd.f32 %v3442_v28, %v11978_v41  ;;  %v3495_v33 = vmul.f32 %v12081_v57, %v12081_v57  ;;  %v12112_v16 = vadd.f32 %v2950_v3, %v14806_v54  ;;  %v14809_v7 = vld [vmem:[#allocation96_spill] sm:$0xff]  ;;  %v14812_v28 = vld [vmem:[#allocation95_spill] sm:$0xff] }
 0x2d9   :  { %v2980_v44 = vadd.f32 %v2979_v10, %v12089_v27  ;;  %v3003_v43 = vmul.f32 %v12089_v27, %v12089_v27  ;;  %v3957_v52 = vadd.f32 %v12016_v59, %v14807_v63  ;;  %v3931_v37 = vmul.f32 %v11718_v11, %v14808_v0  ;;  %v14816_v0 = vld [vmem:[#allocation56_spill] sm:$0xff] }
 0x2da   :  { %v12122_v41 = vadd.f32 %v2456_v29, %v14809_v7  ;;  %v3443_v22 = vmul.f32 %v11718_v11, %v3427_v9  ;;  %v3510_v13 = vadd.f32 %v3509_v18, %v3495_v33  ;;  %v2509_v3 = vmul.f32 %v12005_v30, %v12005_v30  ;;  %v14814_v9 = vld [vmem:[#allocation34_spill] sm:$0xff] }
 0x2db   :  { %v3018_v56 = vadd.f32 %v3017_v20, %v3003_v43  ;;  %v3473_v4 = vadd.f32 %v3472_v17, %v12107_v58  ;;  %v3958_v35 = vadd.f32 %v3957_v52, %v14810_v6  ;;  %v3496_v62 = vmul.f32 %v12107_v58, %v12107_v58  ;;  %v14815_v33 = vld [vmem:[#allocation14_spill] sm:$0xff] }
 0x2dc   :  { %v2487_v59 = vadd.f32 %v2486_v26, %v12122_v41  ;;  %v12131_v8 = vadd.f32 %v3443_v22, %v11980_v38  ;;  %v3995_v23 = vadd.f32 %v3994_v39, %v14811_v32  ;;  %v2524_v10 = vadd.f32 %v2523_v47, %v2509_v3  ;;  %v14817_v7 = vld [vmem:[#allocation86_spill] sm:$0xff] }
 0x2dd   :  { %v2981_v61 = vadd.f32 %v2980_v44, %v12112_v16  ;;  %v3004_v25 = vmul.f32 %v12112_v16, %v12112_v16  ;;  %v3959_v18 = vadd.f32 %v3958_v35, %v14812_v28  ;;  %v12141_v29 = vadd.f32 %v3931_v37, %v14813_v45  ;;  %v14819_v35 = vld [vmem:[#allocation16_spill] sm:$0xff]  ;;  %v14820_v32 = vld [vmem:[#allocation26_spill] sm:$0xff] }
 0x2de   :  { %v3444_v20 = vmul.f32 %v11718_v11, %v3428_v15  ;;  %v3511_v38 = vadd.f32 %v3510_v13, %v3496_v62  ;;  %v3996_v17 = vadd.f32 %v3995_v23, %v14814_v9  ;;  %v2510_v26 = vmul.f32 %v12122_v41, %v12122_v41  ;;  %v14818_v15 = vld [vmem:[#allocation70_spill] sm:$0xff] }
 0x2df   :  { %v3019_v39 = vadd.f32 %v3018_v56, %v3004_v25  ;;  %v3474_v47 = vadd.f32 %v3473_v4, %v12131_v8  ;;  %v3960_v54 = vadd.f32 %v3959_v18, %v14815_v33  ;;  %v2488_v44 = vrot.slane %v2487_v59, 4  ;;  %v14821_v23 = vld [vmem:[#allocation38_spill] sm:$0xff]  ;;  %v14822_v25 = vld [vmem:[#allocation4_spill] sm:$0xff] }
 0x2e0   :  { %v12150_v43 = vadd.f32 %v3444_v20, %v11987_v48  ;;  %v3497_v52 = vmul.f32 %v12131_v8, %v12131_v8  ;;  %v3997_v37 = vadd.f32 %v3996_v17, %v14816_v0  ;;  %v3934_v22 = vmul.f32 %v11718_v11, %v14817_v7 }
 0x2e1   :  { %v2525_v13 = vadd.f32 %v2524_v10, %v2510_v26  ;;  %v2982_v3 = vrot.slane %v2981_v61, 4  ;;  %v3961_v56 = vadd.f32 %v3960_v54, %v14818_v15  ;;  %v3933_v4 = vmul.f32 %v11718_v11, %v14819_v35  ;;  %v14823_v54 = vld [vmem:[#allocation66_spill] sm:$0xff] }
 0x2e2   :  { %v3512_v62 = vadd.f32 %v3511_v38, %v3497_v52  ;;  %v12162_v48 = vadd.f32 %v14821_v23, %v14820_v32  ;;  %v3998_v18 = vadd.f32 %v3997_v37, %v14822_v25  ;;  %v3985_v45 = vmul.f32 %v12141_v29, %v12141_v29  ;;  %v14824_v52 = vld [vmem:[#allocation93_spill] sm:$0xff]  ;;  %v3922_v15 = vld [vmem:[#allocation2 + $0x352] sm:$0xff] }
 0x2e3   :  { %v3020_v20 = vrot.slane %v3019_v39, 4  ;;  %v3475_v9 = vadd.f32 %v3474_v47, %v12150_v43  ;;  %v3962_v10 = vadd.f32 %v3961_v56, %v12141_v29  ;;  %v2489_v17 = vadd.f32 %v2488_v44, %v2487_v59  ;;  %v3921_v37 = vld [vmem:[#allocation2 + $0x34a] sm:$0xff] }
 0x2e4   :  { %v3498_v26 = vmul.f32 %v12150_v43, %v12150_v43  ;;  %v12172_v38 = vadd.f32 %v3933_v4, %v14823_v54  ;;  %v3999_v0 = vadd.f32 %v3998_v18, %v14824_v52  ;;  %v2526_v7 = vrot.slane %v2525_v13, 4  ;;  %v14825_v32 = vld [vmem:[#allocation9_spill] sm:$0xff] }
 0x2e5   :  { %v2983_v35 = vadd.f32 %v2982_v3, %v2981_v61  ;;  %v3935_v23 = vmul.f32 %v11718_v11, %v14825_v32  ;;  %v3963_v25 = vadd.f32 %v3962_v10, %v12162_v48  ;;  %v12179_v59 = vadd.f32 %v3934_v22, %v12075_v5 }
 0x2e6   :  { %v3513_v47 = vadd.f32 %v3512_v62, %v3498_v26  ;;  %v3986_v44 = vmul.f32 %v12162_v48, %v12162_v48  ;;  %v4000_v56 = vadd.f32 %v3999_v0, %v3985_v45  ;;  %v3021_v4 = vadd.f32 %v3020_v20, %v3019_v39 }
 0x2e7   :  { %v3476_v54 = vrot.slane %v3475_v9, 4  ;;  %v3936_v61 = vmul.f32 %v11718_v11, %v12040_v12  ;;  %v3964_v3 = vadd.f32 %v3963_v25, %v12172_v38  ;;  %v3937_v18 = vmul.f32 %v11718_v11, %v3921_v37 }
 0x2e8   :  { %v12188_v10 = vadd.f32 %v3935_v23, %v12078_v42  ;;  %v3987_v5 = vmul.f32 %v12172_v38, %v12172_v38  ;;  %v4001_v22 = vadd.f32 %v4000_v56, %v3986_v44  ;;  %v2527_v62 = vadd.f32 %v2526_v7, %v2525_v13 }
 0x2e9   :  { %v2984_v26 = vrot.slane %v2983_v35, 2  ;;  %v3938_v45 = vmul.f32 %v11718_v11, %v3922_v15  ;;  %v3965_v39 = vadd.f32 %v3964_v3, %v12179_v59  ;;  %v3514_v20 = vrot.slane %v3513_v47, 4 }
 0x2ea   :  { %14826 = vst [vmem:[#allocation46_spill] sm:$0xff] %v12188_v10  ;;  %v12195_v12 = vadd.f32 %v3936_v61, %v12086_v49  ;;  %v3988_v52 = vmul.f32 %v12179_v59, %v12179_v59  ;;  %v4002_v0 = vadd.f32 %v4001_v22, %v3987_v5  ;;  %v2490_v42 = vrot.slane %v2489_v17, 2 }
 0x2eb   :  { %v3477_v37 = vadd.f32 %v3476_v54, %v3475_v9  ;;  %v3966_v32 = vadd.f32 %v3965_v39, %v12188_v10  ;;  %v3022_v23 = vrot.slane %v3021_v4, 2  ;;  %v12201_v13 = vadd.f32 %v3937_v18, %v12094_v50 }
 0x2ec   :  { %14827 = vst [vmem:[#allocation99_spill] sm:$0xff] %v12195_v12  ;;  %v3989_v11 = vmul.f32 %v12188_v10, %v12188_v10  ;;  %v4003_v15 = vadd.f32 %v4002_v0, %v3988_v52  ;;  %v2528_v7 = vrot.slane %v2527_v62, 2  ;;  %v2985_v25 = vadd.f32 %v2984_v26, %v2983_v35 }
 0x2ed   :  { %14828 = vst [vmem:[#allocation30_spill] sm:$0xff] %v12201_v13  ;;  %v3967_v49 = vadd.f32 %v3966_v32, %v12195_v12  ;;  %v3515_v44 = vadd.f32 %v3514_v20, %v3513_v47  ;;  %v12207_v56 = vadd.f32 %v3938_v45, %v12100_v36  ;;  %v3990_v9 = vmul.f32 %v12195_v12, %v12195_v12 }
 0x2ee   :  { %v4004_v54 = vadd.f32 %v4003_v15, %v3989_v11  ;;  %v2491_v61 = vadd.f32 %v2490_v42, %v2489_v17  ;;  %v3478_v3 = vrot.slane %v3477_v37, 2  ;;  %v3023_v18 = vadd.f32 %v3022_v23, %v3021_v4 }
 0x2ef   :  { %14829 = vst [vmem:[#allocation100_spill] sm:$0xff] %v12207_v56  ;;  %v3968_v50 = vadd.f32 %v3967_v49, %v12201_v13  ;;  %v3991_v5 = vmul.f32 %v12201_v13, %v12201_v13  ;;  %v2986_v35 = vrot.slane %v2985_v25, 1  ;;  %v2529_v47 = vadd.f32 %v2528_v7, %v2527_v62 }
 0x2f0   :  { %v4005_v22 = vadd.f32 %v4004_v54, %v3990_v9  ;;  %v3516_v39 = vrot.slane %v3515_v44, 2  ;;  %v3992_v36 = vmul.f32 %v12207_v56, %v12207_v56  ;;  %v2492_v20 = vrot.slane %v2491_v61, 1 }
 0x2f1   :  { %v3969_v26 = vadd.f32 %v3968_v50, %v12207_v56  ;;  %v3479_v52 = vadd.f32 %v3478_v3, %v3477_v37  ;;  %v3024_v0 = vrot.slane %v3023_v18, 1  ;;  %v2987_v32 = vadd.f32 %v2986_v35, %v2985_v25 }
 0x2f2   :  { %v4006_v45 = vadd.f32 %v4005_v22, %v3991_v5  ;;  %v2530_v23 = vrot.slane %v2529_v47, 1  ;;  %v3517_v11 = vadd.f32 %v3516_v39, %v3515_v44  ;;  %v2493_v49 = vadd.f32 %v2492_v20, %v2491_v61 }
 0x2f3   :  { %v3970_v17 = vrot.slane %v3969_v26, 4  ;;  %v3480_v9 = vrot.slane %v3479_v52, 1  ;;  %v3025_v50 = vadd.f32 %v3024_v0, %v3023_v18 }
 0x2f4   :  { %v4007_v42 = vadd.f32 %v4006_v45, %v3992_v36  ;;  %v2988_v7 = vadd.f32 %v2987_v32, %v2493_v49  ;;  %v2531_v12 = vadd.f32 %v2530_v23, %v2529_v47  ;;  %v3518_v56 = vrot.slane %v3517_v11, 1  ;;  %v4493_v47 = vld [vmem:[%s14183_s9] sm:$0xff]  ;;  %v4499_v49 = vld [vmem:[%s14183_s9 + $0x30] sm:$0xff] }
 0x2f5   :  { %v3971_v4 = vadd.f32 %v3970_v17, %v3969_v26  ;;  %v3481_v22 = vadd.f32 %v3480_v9, %v3479_v52  ;;  %v4497_v23 = vld [vmem:[%s14183_s9 + $0x20] sm:$0xff]  ;;  %v4500_v9 = vld [vmem:[%s14183_s9 + $0x38] sm:$0xff] }
 0x2f6   :  { %v4008_v15 = vrot.slane %v4007_v42, 4  ;;  %v3026_v3 = vadd.f32 %v3025_v50, %v2531_v12  ;;  %v3519_v35 = vadd.f32 %v3518_v56, %v3517_v11  ;;  %v4494_v12 = vld [vmem:[%s14183_s9 + $0x8] sm:$0xff]  ;;  %v4501_v50 = vld [vmem:[%s14183_s9 + $0x40] sm:$0xff] }
 0x2f7   :  { %v3972_v54 = vrot.slane %v3971_v4, 2  ;;  %v3482_v36 = vadd.f32 %v3481_v22, %v2988_v7  ;;  %v8273_v52 = vpack.c.bf16 %v4494_v12, %v4493_v47  ;;  %v4498_v11 = vld [vmem:[%s14183_s9 + $0x28] sm:$0xff]  ;;  %v49_v7 = vld [vmem:[%s14184_s5] sm:$0x1]  ;;  %v14833_v47 = vld [vmem:[#allocation62_spill] sm:$0xff] }
 0x2f8   :  { %v4009_v62 = vadd.f32 %v4008_v15, %v4007_v42  ;;  %v3520_v39 = vadd.f32 %v3519_v35, %v3026_v3  ;;  %v8279_v15 = vpack.c.bf16 %v4498_v11, %v4497_v23  ;;  %v4503_v3 = vld [vmem:[%s14183_s9 + $0x50] sm:$0xff] }
 0x2f9   :  { %v3973_v13 = vadd.f32 %v3972_v54, %v3971_v4  ;;  %8274 = vmatpush3.bf16.msra.mxu1 %v8273_v52  ;;  %v14830_v4 = vmov 0.0|0.0   ;;  %v8282_v54 = vpack.c.bf16 %v4500_v9, %v4499_v49 }
 0x2fa   :  { %v4010_v5 = vrot.slane %v4009_v62, 2  ;;  %8275 = vmatprep.subr.bf16.mxu1 %v14830_v4 }
 0x2fb   :  { %v3974_v37 = vrot.slane %v3973_v13, 1 }
 0x2fc   :  { %v4011_v10 = vadd.f32 %v4010_v5, %v4009_v62  ;;  %v4502_v62 = vld [vmem:[%s14183_s9 + $0x48] sm:$0xff] }
 0x2fd   :  { %v3975_v25 = vadd.f32 %v3974_v37, %v3973_v13  ;;  %v4495_v13 = vld [vmem:[%s14183_s9 + $0x10] sm:$0xff]  ;;  %v8285_v22 = vpack.c.bf16 %v4502_v62, %v4501_v50  ;;  %v14836_v50 = vld [vmem:[#allocation91_spill] sm:$0xff] }
 0x2fe   :  { %v4012_v26 = vrot.slane %v4011_v10, 1 }
 0x2ff   :  { %v3976_v44 = vadd.f32 %v3975_v25, %v3482_v36  ;;  %v4504_v36 = vld [vmem:[%s14183_s9 + $0x58] sm:$0xff]  ;;  %v50_v25 = vld [vmem:[%s14185_s6] sm:$0x1] }
 0x300   :  { %v4013_v61 = vadd.f32 %v4012_v26, %v4011_v10  ;;  %v4496_v10 = vld [vmem:[%s14183_s9 + $0x18] sm:$0xff]  ;;  %v8288_v26 = vpack.c.bf16 %v4504_v36, %v4503_v3 }
 0x301   :  { %v4031_v45 = vmul.f32 0.001953125, %v3976_v44  ;;  %v8276_v32 = vpack.c.bf16 %v4496_v10, %v4495_v13  ;;  %v14834_v10 = vld [vmem:[#allocation65_spill] sm:$0xff] }
 0x302   :  { %v4014_v20 = vadd.f32 %v4013_v61, %v3520_v39  ;;  %v14831_v39 = vld [vmem:[#allocation20_spill] sm:$0xff] }
 0x303   :  { %v4033_v18 = vmul.f32 %v4031_v45, %v4031_v45  ;;  %8277 = vmatpush3.bf16.msra.mxu1 %v8276_v32 }
 0x304   :  { %v4032_v17 = vmul.f32 0.001953125, %v4014_v20  ;;  %8278 = vmatprep.subr.bf16.mxu1 %v14830_v4  ;;  %v4505_v20 = vld [vmem:[%s14183_s9 + $0x60] sm:$0xff] }
 0x306   :  { %v4034_v0 = vsub.f32 %v4032_v17, %v4033_v18  ;;  %v4506_v18 = vld [vmem:[%s14183_s9 + $0x68] sm:$0xff] }
 0x307   :  { %8280 = vmatpush3.bf16.msra.mxu1 %v8279_v15  ;;  %v8291_v17 = vpack.c.bf16 %v4506_v18, %v4505_v20  ;;  %v14835_v15 = vld [vmem:[#allocation11_spill] sm:$0xff]  ;;  %v14841_v18 = vld [vmem:[#allocation6_spill] sm:$0xff] }
 0x308   :  { %v4035_v56 = vmax.f32 %v4034_v0, 0.0  ;;  %8281 = vmatprep.subr.bf16.mxu1 %v14830_v4  ;;  %v14832_v0 = vld [vmem:[#allocation55_spill] sm:$0xff] }
 0x30a   :  { %v4036_v42 = vadd.f32 1e-05, %v4035_v56 }
 0x30b   :  { %8283 = vmatpush3.bf16.msra.mxu1 %v8282_v54 }
 0x30c   :  { %8541 = vrsqrt.f32 %v4036_v42  ;;  %8284 = vmatprep.subr.bf16.mxu1 %v14830_v4 }
 0x30f   :  { %8286 = vmatpush3.bf16.msra.mxu1 %v8285_v22  ;;  %v14838_v22 = vld [vmem:[#allocation45_spill] sm:$0xff] }
 0x310   :  { %8287 = vmatprep.subr.bf16.mxu1 %v14830_v4 }
 0x313   :  { %8289 = vmatpush3.bf16.msra.mxu1 %v8288_v26 }
 0x314   :  { %8290 = vmatprep.subr.bf16.mxu1 %v14830_v4 }
 0x316   :  { %v8542_v5 = vpop.eup %8541 }
 0x317   :  { %v4038_v37 = vmul.f32 %v8542_v5, %v49_v7  ;;  %8292 = vmatpush3.bf16.msra.mxu1 %v8291_v17  ;;  %v14837_v7 = vld [vmem:[#allocation17_spill] sm:$0xff] }
 0x318   :  { %8293 = vmatprep.subr.bf16.mxu1 %v14830_v4 }
 0x319   :  { %v4039_v35 = vmul.f32 %v4038_v37, %v4031_v45  ;;  %v12264_v61 = vrot.slane %v4038_v37, %v14831_v39 }
 0x31b   :  { %v4040_v44 = vsub.f32 %v50_v25, %v4039_v35  ;;  %v4061_v45 = vmul.f32 %v12264_v61, %v14832_v0  ;;  %v4062_v12 = vmul.f32 %v12264_v61, %v14833_v47  ;;  %v4063_v42 = vmul.f32 %v12264_v61, %v14834_v10  ;;  %v14842_v0 = vld [vmem:[#allocation89_spill] sm:$0xff]  ;;  %v14843_v47 = vld [vmem:[#allocation47_spill] sm:$0xff] }
 0x31c   :  { %v4064_v49 = vmul.f32 %v12264_v61, %v14835_v15  ;;  %v4153_v62 = vmul.f32 %v12264_v61, %v14836_v50  ;;  %v4154_v5 = vmul.f32 %v12264_v61, %v14837_v7  ;;  %v4065_v37 = vmul.f32 %v12264_v61, %v14838_v22  ;;  %v14844_v10 = vld [vmem:[#allocation27_spill] sm:$0xff] }
 0x31d   :  { %v12278_v13 = vrot.slane %v4040_v44, %v14831_v39  ;;  %v14840_v44 = vld [vmem:[#allocation21_spill] sm:$0xff]  ;;  %v4067_v17 = vmul.f32 %v12264_v61, %v14841_v18  ;;  %v14845_v15 = vld [vmem:[#allocation59_spill] sm:$0xff]  ;;  %v4072_v18 = vmul.f32 %v12264_v61, %v11917_v19  ;;  %v4075_v19 = vmul.f32 %v12264_v61, %v12005_v30 }
 0x31e   :  { %v4066_v20 = vmul.f32 %v12264_v61, %v14840_v44  ;;  %v14846_v50 = vld [vmem:[#allocation63_spill] sm:$0xff] }
 0x31f   :  { %v12282_v56 = vadd.f32 %v12278_v13, %v4061_v45  ;;  %v12285_v52 = vadd.f32 %v12278_v13, %v4062_v12  ;;  %v12293_v11 = vadd.f32 %v12278_v13, %v4063_v42  ;;  %v12302_v4 = vadd.f32 %v12278_v13, %v4064_v49 }
 0x320   :  { %v12314_v36 = vadd.f32 %v4153_v62, %v12278_v13  ;;  %v12317_v25 = vadd.f32 %v4154_v5, %v12278_v13  ;;  %v12320_v35 = vadd.f32 %v12278_v13, %v4065_v37  ;;  %v4155_v45 = vmul.f32 %v12264_v61, %v14842_v0  ;;  %v14847_v37 = vld [vmem:[#allocation15_spill] sm:$0xff] }
 0x321   :  { %v14305_v32 = vmax.f32 %v12282_v56, 0.0  ;;  %v14302_v23 = vmax.f32 %v12285_v52, 0.0  ;;  %v14301_v54 = vmax.f32 %v12293_v11, 0.0  ;;  %v14299_v26 = vmax.f32 %v12302_v4, 0.0 }
 0x322   :  { %14839 = vst [vmem:[#allocation101_spill] sm:$0xff] %v12320_v35  ;;  %v4068_v12 = vmul.f32 %v12264_v61, %v14843_v47  ;;  %v4069_v42 = vmul.f32 %v12264_v61, %v14844_v10  ;;  %v4070_v49 = vmul.f32 %v12264_v61, %v14845_v15  ;;  %v4156_v62 = vmul.f32 %v12264_v61, %v14846_v50  ;;  %v14849_v10 = vld [vmem:[#allocation64_spill] sm:$0xff] }
 0x323   :  { %v4115_v9 = vadd.f32 %v14302_v23, %v14305_v32  ;;  %v12340_v7 = vadd.f32 %v4155_v45, %v12278_v13  ;;  %v14304_v5 = vmax.f32 %v12314_v36, 0.0  ;;  %v14303_v22 = vmax.f32 %v12317_v25, 0.0 }
 0x324   :  { %v4071_v44 = vmul.f32 %v12264_v61, %v14847_v37  ;;  %v12349_v0 = vadd.f32 %v12278_v13, %v4066_v20  ;;  %v4073_v47 = vmul.f32 %v12264_v61, %v11933_v2  ;;  %v4074_v45 = vmul.f32 %v12264_v61, %v11996_v53 }
 0x325   :  { %v4116_v3 = vadd.f32 %v4115_v9, %v14301_v54  ;;  %v4157_v15 = vmul.f32 %v12264_v61, %v14849_v10  ;;  %v12359_v50 = vadd.f32 %v4156_v62, %v12278_v13  ;;  %v4076_v20 = vmul.f32 %v12264_v61, %v12122_v41 }
 0x326   :  { %14848 = vst [vmem:[#allocation43_spill] sm:$0xff] %v12349_v0  ;;  %v12370_v53 = vadd.f32 %v12278_v13, %v4067_v17  ;;  %v14306_v62 = vmax.f32 %v12340_v7, 0.0  ;;  %v4201_v30 = vadd.f32 %v14303_v22, %v14304_v5  ;;  %v12381_v41 = vadd.f32 %v12278_v13, %v4068_v12  ;;  %v14856_v5 = vld [vmem:[#allocation68_spill] sm:$0xff] }
 0x327   :  { %v4117_v9 = vadd.f32 %v4116_v3, %v14299_v26  ;;  %v14300_v3 = vmax.f32 %v12320_v35, 0.0  ;;  %v14850_v26 = vld [vmem:[#allocation44_spill] sm:$0xff]  ;;  %v12373_v10 = vadd.f32 %v4157_v15, %v12278_v13  ;;  %v14307_v17 = vmax.f32 %v12349_v0, 0.0  ;;  %v14854_v15 = vld [vmem:[#allocation67_spill] sm:$0xff] }
 0x328   :  { %v4158_v2 = vmul.f32 %v12264_v61, %v14850_v26  ;;  %14851 = vst [vmem:[#allocation90_spill] sm:$0xff] %v12370_v53  ;;  %v12387_v26 = vadd.f32 %v12278_v13, %v4070_v49  ;;  %v14309_v23 = vmax.f32 %v12359_v50, 0.0  ;;  %v4202_v12 = vadd.f32 %v4201_v30, %v14306_v62  ;;  %v14860_v35 = vld [vmem:[#allocation71_spill] sm:$0xff] }
 0x329   :  { %v4118_v37 = vadd.f32 %v4117_v9, %v14300_v3  ;;  %14852 = vst [vmem:[#allocation19_spill] sm:$0xff] %v12373_v10  ;;  %v12384_v9 = vadd.f32 %v12278_v13, %v4069_v42  ;;  %v4159_v3 = vmul.f32 %v12264_v61, %v14854_v15  ;;  %v12399_v22 = vadd.f32 %v12278_v13, %v4071_v44 }
 0x32a   :  { %v12393_v54 = vadd.f32 %v4158_v2, %v12278_v13  ;;  %v12402_v42 = vadd.f32 %v12278_v13, %v4072_v18  ;;  %v4160_v15 = vmul.f32 %v12264_v61, %v14856_v5  ;;  %v12409_v2 = vadd.f32 %v12278_v13, %v4073_v47 }
 0x32b   :  { %14853 = vst [vmem:[#allocation102_spill] sm:$0xff] %v12384_v9  ;;  %v4119_v49 = vadd.f32 %v4118_v37, %v14307_v17  ;;  %v12412_v32 = vadd.f32 %v4159_v3, %v12278_v13  ;;  %v14312_v30 = vmax.f32 %v12373_v10, 0.0  ;;  %v4203_v44 = vadd.f32 %v4202_v12, %v14309_v23  ;;  %v14858_v17 = vld [vmem:[#allocation40_spill] sm:$0xff]  ;;  %v14859_v12 = vld [vmem:[#allocation87_spill] sm:$0xff] }
 0x32c   :  { %14855 = vst [vmem:[#allocation106_spill] sm:$0xff] %v12393_v54  ;;  %v12418_v18 = vadd.f32 %v12278_v13, %v4074_v45  ;;  %v12421_v62 = vadd.f32 %v12278_v13, %v4075_v19  ;;  %v14313_v37 = vmax.f32 %v12370_v53, 0.0  ;;  %v12425_v5 = vadd.f32 %v4160_v15, %v12278_v13 }
 0x32d   :  { %14857 = vst [vmem:[#allocation12_spill] sm:$0xff] %v12412_v32  ;;  %v4204_v3 = vadd.f32 %v4203_v44, %v14312_v30  ;;  %v4240_v0 = vmul.f32 %v12264_v61, %v14858_v17  ;;  %v4241_v45 = vmul.f32 %v12264_v61, %v14859_v12  ;;  %v12435_v23 = vadd.f32 %v12278_v13, %v4076_v20 }
 0x32e   :  { %v4120_v15 = vadd.f32 %v4119_v49, %v14313_v37  ;;  %v4161_v47 = vmul.f32 %v12264_v61, %v14860_v35  ;;  %v14861_v44 = vmax.f32 %v12393_v54, 0.0  ;;  %v14317_v10 = vmax.f32 %v12425_v5, 0.0 }
 0x32f   :  { %v12446_v17 = vadd.f32 %v4240_v0, %v12278_v13  ;;  %v12449_v12 = vadd.f32 %v4241_v45, %v12278_v13  ;;  %v14867_v20 = vmax.f32 %v12381_v41, 0.0  ;;  %v4162_v49 = vmul.f32 %v12264_v61, %v11942_v1 }
 0x330   :  { %v4205_v30 = vadd.f32 %v4204_v3, %v14861_v44  ;;  %v12455_v37 = vadd.f32 %v4161_v47, %v12278_v13  ;;  %v14865_v3 = vmax.f32 %v12412_v32, 0.0  ;;  %v14866_v44 = vld [vmem:[#allocation85_spill] sm:$0xff]  ;;  %v14868_v47 = vld [vmem:[#allocation28_spill] sm:$0xff] }
 0x331   :  { %14862 = vst [vmem:[#allocation107_spill] sm:$0xff] %v12446_v17  ;;  %14863 = vst [vmem:[#allocation77_spill] sm:$0xff] %v12449_v12  ;;  %v4242_v45 = vmul.f32 %v12264_v61, %v14866_v44  ;;  %v4121_v19 = vadd.f32 %v4120_v15, %v14867_v20  ;;  %v4243_v54 = vmul.f32 %v12264_v61, %v14868_v47  ;;  %v14872_v44 = vmax.f32 %v12384_v9, 0.0 }
 0x332   :  { %14864 = vst [vmem:[#allocation36_spill] sm:$0xff] %v12455_v37  ;;  %v4206_v0 = vadd.f32 %v4205_v30, %v14865_v3  ;;  %v12480_v20 = vadd.f32 %v4162_v49, %v12278_v13  ;;  %v14319_v1 = vmax.f32 %v12455_v37, 0.0  ;;  %v4163_v47 = vmul.f32 %v12264_v61, %v11963_v60  ;;  %v14873_v30 = vld [vmem:[#allocation92_spill] sm:$0xff]  ;;  %v14879_v37 = vld [vmem:[#allocation97_spill] sm:$0xff] }
 0x333   :  { %v12473_v32 = vadd.f32 %v4242_v45, %v12278_v13  ;;  %v14870_v45 = vld [vmem:[#allocation69_spill] sm:$0xff]  ;;  %v12490_v53 = vadd.f32 %v4243_v54, %v12278_v13  ;;  %v4122_v15 = vadd.f32 %v4121_v19, %v14872_v44  ;;  %v4165_v49 = vmul.f32 %v12264_v61, %v12022_v24 }
 0x334   :  { %v4207_v35 = vadd.f32 %v4206_v0, %v14317_v10  ;;  %v4164_v0 = vmul.f32 %v12264_v61, %v12000_v21  ;;  %v4244_v10 = vmul.f32 %v12264_v61, %v14870_v45  ;;  %v4166_v3 = vmul.f32 %v12264_v61, %v12043_v46 }
 0x335   :  { %14869 = vst [vmem:[#allocation82_spill] sm:$0xff] %v12473_v32  ;;  %14871 = vst [vmem:[#allocation23_spill] sm:$0xff] %v12490_v53  ;;  %v4245_v21 = vmul.f32 %v12264_v61, %v14873_v30  ;;  %v14874_v9 = vmax.f32 %v12446_v17, 0.0  ;;  %v14875_v19 = vmax.f32 %v12449_v12, 0.0  ;;  %v4167_v24 = vmul.f32 %v12264_v61, %v12089_v27 }
 0x336   :  { %v4208_v60 = vadd.f32 %v4207_v35, %v14319_v1  ;;  %v12503_v45 = vadd.f32 %v4244_v10, %v12278_v13  ;;  %v4168_v46 = vmul.f32 %v12264_v61, %v12112_v16  ;;  %v12515_v35 = vadd.f32 %v4163_v47, %v12278_v13  ;;  %v14876_v10 = vld [vmem:[#allocation57_spill] sm:$0xff] }
 0x337   :  { %v4288_v44 = vadd.f32 %v14875_v19, %v14874_v9  ;;  %v14323_v30 = vmax.f32 %v12480_v20, 0.0  ;;  %v4246_v1 = vmul.f32 %v12264_v61, %v14876_v10  ;;  %v12521_v54 = vadd.f32 %v4245_v21, %v12278_v13 }
 0x338   :  { %v14877_v9 = vmax.f32 %v12473_v32, 0.0  ;;  %v14878_v27 = vmax.f32 %v12387_v26, 0.0  ;;  %v12529_v16 = vadd.f32 %v4164_v0, %v12278_v13  ;;  %v12532_v47 = vadd.f32 %v4165_v49, %v12278_v13 }
 0x339   :  { %v4209_v10 = vadd.f32 %v4208_v60, %v14323_v30  ;;  %v4247_v21 = vmul.f32 %v12264_v61, %v14879_v37  ;;  %v12539_v12 = vadd.f32 %v4246_v1, %v12278_v13  ;;  %v12545_v0 = vadd.f32 %v4166_v3, %v12278_v13  ;;  %v14881_v60 = vld [vmem:[#allocation88_spill] sm:$0xff] }
 0x33a   :  { %v4289_v19 = vadd.f32 %v4288_v44, %v14877_v9  ;;  %v4123_v17 = vadd.f32 %v4122_v15, %v14878_v27  ;;  %v14880_v9 = vmax.f32 %v12490_v53, 0.0  ;;  %v12548_v49 = vadd.f32 %v4167_v24, %v12278_v13 }
 0x33b   :  { %v14327_v27 = vmax.f32 %v12515_v35, 0.0  ;;  %v4248_v30 = vmul.f32 %v12264_v61, %v14881_v60  ;;  %v12554_v37 = vadd.f32 %v4168_v46, %v12278_v13  ;;  %v12557_v1 = vadd.f32 %v4247_v21, %v12278_v13 }
 0x33c   :  { %v4290_v15 = vadd.f32 %v4289_v19, %v14880_v9  ;;  %v14326_v44 = vmax.f32 %v12521_v54, 0.0  ;;  %v14882_v19 = vmax.f32 %v12503_v45, 0.0  ;;  %v14883_v9 = vmax.f32 %v12399_v22, 0.0 }
 0x33d   :  { %v4210_v53 = vadd.f32 %v4209_v10, %v14327_v27  ;;  %v4249_v60 = vmul.f32 %v12264_v61, %v12013_v31  ;;  %v12569_v46 = vadd.f32 %v4248_v30, %v12278_v13  ;;  %v14328_v21 = vmax.f32 %v12539_v12, 0.0 }
 0x33e   :  { %v4291_v3 = vadd.f32 %v4290_v15, %v14882_v19  ;;  %v4124_v24 = vadd.f32 %v4123_v17, %v14883_v9  ;;  %v4326_v15 = vmul.f32 %v12264_v61, %v11946_v14  ;;  %v4327_v17 = vmul.f32 %v12264_v61, %v11954_v34 }
 0x33f   :  { %v14329_v19 = vmax.f32 %v12529_v16, 0.0  ;;  %v4250_v31 = vmul.f32 %v12264_v61, %v12032_v40  ;;  %v12583_v30 = vadd.f32 %v4249_v60, %v12278_v13  ;;  %v4251_v60 = vmul.f32 %v12264_v61, %v12054_v55 }
 0x340   :  { %v4292_v32 = vadd.f32 %v4291_v3, %v14326_v44  ;;  %v12589_v14 = vadd.f32 %v4326_v15, %v12278_v13  ;;  %v12592_v34 = vadd.f32 %v4327_v17, %v12278_v13  ;;  %v14885_v44 = vmax.f32 %v12402_v42, 0.0 }
 0x341   :  { %14884 = vst [vmem:[#allocation105_spill] sm:$0xff] %v12583_v30  ;;  %v4211_v40 = vadd.f32 %v4210_v53, %v14329_v19  ;;  %v12602_v9 = vadd.f32 %v4250_v31, %v12278_v13  ;;  %v14887_v15 = vmax.f32 %v12557_v1, 0.0  ;;  %v4329_v55 = vmul.f32 %v12264_v61, %v14807_v63 }
 0x342   :  { %v4293_v3 = vadd.f32 %v4292_v32, %v14328_v21  ;;  %v4125_v27 = vadd.f32 %v4124_v24, %v14885_v44  ;;  %v14330_v32 = vmax.f32 %v12569_v46, 0.0  ;;  %v4328_v21 = vmul.f32 %v12264_v61, %v11709_v51 }
 0x343   :  { %14886 = vst [vmem:[#allocation110_spill] sm:$0xff] %v12602_v9  ;;  %v4252_v44 = vmul.f32 %v12264_v61, %v12081_v57  ;;  %v12612_v24 = vadd.f32 %v4251_v60, %v12278_v13  ;;  %v14889_v57 = vmax.f32 %v12409_v2, 0.0  ;;  %v14890_v60 = vmax.f32 %v12532_v47, 0.0 }
 0x344   :  { %v4294_v17 = vadd.f32 %v4293_v3, %v14887_v15  ;;  %v12620_v19 = vadd.f32 %v4328_v21, %v12278_v13  ;;  %v4253_v53 = vmul.f32 %v12264_v61, %v12107_v58  ;;  %v14892_v21 = vmax.f32 %v12583_v30, 0.0 }
 0x345   :  { %14888 = vst [vmem:[#allocation10_spill] sm:$0xff] %v12612_v24  ;;  %v4126_v15 = vadd.f32 %v4125_v27, %v14889_v57  ;;  %v4212_v10 = vadd.f32 %v4211_v40, %v14890_v60  ;;  %v12631_v63 = vadd.f32 %v4252_v44, %v12278_v13  ;;  %v4330_v51 = vmul.f32 %v12264_v61, %v14810_v6 }
 0x346   :  { %v4295_v31 = vadd.f32 %v4294_v17, %v14330_v32  ;;  %v14332_v17 = vmax.f32 %v12602_v9, 0.0  ;;  %v12639_v3 = vadd.f32 %v4329_v55, %v12278_v13  ;;  %v4254_v27 = vmul.f32 %v12264_v61, %v12131_v8 }
 0x347   :  { %14891 = vst [vmem:[#allocation83_spill] sm:$0xff] %v12631_v63  ;;  %v12644_v40 = vadd.f32 %v4253_v53, %v12278_v13  ;;  %v4331_v44 = vmul.f32 %v12264_v61, %v14812_v28  ;;  %v12652_v57 = vadd.f32 %v4330_v51, %v12278_v13  ;;  %v14894_v55 = vmax.f32 %v12589_v14, 0.0 }
 0x348   :  { %v4296_v32 = vadd.f32 %v4295_v31, %v14892_v21  ;;  %v14895_v8 = vmax.f32 %v12592_v34, 0.0  ;;  %v14896_v53 = vmax.f32 %v12418_v18, 0.0  ;;  %v14897_v58 = vmax.f32 %v12545_v0, 0.0 }
 0x349   :  { %14893 = vst [vmem:[#allocation108_spill] sm:$0xff] %v12644_v40  ;;  %v14334_v28 = vmax.f32 %v12631_v63, 0.0  ;;  %v14898_v51 = vmax.f32 %v12612_v24, 0.0  ;;  %v12669_v6 = vadd.f32 %v4331_v44, %v12278_v13  ;;  %v14335_v9 = vmax.f32 %v12639_v3, 0.0  ;;  %v14915_v24 = vld [vmem:[#allocation30_spill] sm:$0xff] }
 0x34a   :  { %v4297_v31 = vadd.f32 %v4296_v32, %v14332_v17  ;;  %v4374_v60 = vadd.f32 %v14895_v8, %v14894_v55  ;;  %v4127_v21 = vadd.f32 %v4126_v15, %v14896_v53  ;;  %v4213_v30 = vadd.f32 %v4212_v10, %v14897_v58  ;;  %v14901_v53 = vld [vmem:[#allocation70_spill] sm:$0xff] }
 0x34b   :  { %v4332_v32 = vmul.f32 %v12264_v61, %v14815_v33  ;;  %v14899_v55 = vmax.f32 %v12620_v19, 0.0  ;;  %v12676_v10 = vadd.f32 %v4254_v27, %v12278_v13  ;;  %v4333_v33 = vmul.f32 %v12264_v61, %v14901_v53 }
 0x34c   :  { %v4298_v17 = vadd.f32 %v4297_v31, %v14898_v51  ;;  %v4255_v58 = vmul.f32 %v12264_v61, %v12150_v43  ;;  %v4334_v53 = vmul.f32 %v12264_v61, %v12141_v29  ;;  %v14338_v43 = vmax.f32 %v12554_v37, 0.0 }
 0x34d   :  { %v4375_v8 = vadd.f32 %v4374_v60, %v14899_v55  ;;  %14900 = vst [vmem:[#allocation42_spill] sm:$0xff] %v12676_v10  ;;  %v12684_v44 = vadd.f32 %v4332_v32, %v12278_v13  ;;  %v14902_v55 = vmax.f32 %v12421_v62, 0.0  ;;  %v12696_v15 = vadd.f32 %v4333_v33, %v12278_v13 }
 0x34e   :  { %v4299_v31 = vadd.f32 %v4298_v17, %v14334_v28  ;;  %v14903_v17 = vmax.f32 %v12548_v49, 0.0  ;;  %v14904_v28 = vmax.f32 %v12644_v40, 0.0  ;;  %v12708_v29 = vadd.f32 %v4255_v58, %v12278_v13 }
 0x34f   :  { %v4376_v60 = vadd.f32 %v4375_v8, %v14335_v9  ;;  %v4128_v27 = vadd.f32 %v4127_v21, %v14902_v55  ;;  %v14337_v8 = vmax.f32 %v12669_v6, 0.0  ;;  %v14905_v9 = vmax.f32 %v12652_v57, 0.0 }
 0x350   :  { %v4214_v32 = vadd.f32 %v4213_v30, %v14903_v17  ;;  %v4300_v51 = vadd.f32 %v4299_v31, %v14904_v28  ;;  %v14340_v55 = vmax.f32 %v12435_v23, 0.0  ;;  %14906 = vst [vmem:[#allocation81_spill] sm:$0xff] %v12708_v29  ;;  %v4335_v33 = vmul.f32 %v12264_v61, %v12162_v48 }
 0x351   :  { %v4377_v21 = vadd.f32 %v4376_v60, %v14905_v9  ;;  %v14339_v30 = vmax.f32 %v12676_v10, 0.0  ;;  %v12714_v17 = vadd.f32 %v4334_v53, %v12278_v13  ;;  %v4336_v58 = vmul.f32 %v12264_v61, %v12172_v38  ;;  %v14913_v10 = vld [vmem:[#allocation99_spill] sm:$0xff] }
 0x352   :  { %v4129_v31 = vadd.f32 %v4128_v27, %v14340_v55  ;;  %v12724_v60 = vadd.f32 %v4335_v33, %v12278_v13  ;;  %v4215_v48 = vadd.f32 %v4214_v32, %v14338_v43  ;;  %v14343_v28 = vmax.f32 %v12696_v15, 0.0 }
 0x353   :  { %14907 = vst [vmem:[#allocation74_spill] sm:$0xff] %v12714_v17  ;;  %v4378_v9 = vadd.f32 %v4377_v21, %v14337_v8  ;;  %v4301_v53 = vadd.f32 %v4300_v51, %v14339_v30  ;;  %v14909_v40 = vmax.f32 %v12684_v44, 0.0  ;;  %v4337_v27 = vmul.f32 %v12264_v61, %v12179_v59  ;;  %v14911_v51 = vld [vmem:[#allocation46_spill] sm:$0xff] }
 0x354   :  { %14908 = vst [vmem:[#allocation109_spill] sm:$0xff] %v12724_v60  ;;  %v14345_v8 = vmax.f32 %v12708_v29, 0.0  ;;  %v12737_v38 = vadd.f32 %v4336_v58, %v12278_v13  ;;  %v14347_v33 = vmax.f32 %v12714_v17, 0.0  ;;  %v4130_v43 = vrot.slane %v4129_v31, 4 }
 0x355   :  { %v4379_v21 = vadd.f32 %v4378_v9, %v14909_v40  ;;  %v4338_v30 = vmul.f32 %v12264_v61, %v14911_v51  ;;  %v12745_v55 = vadd.f32 %v4337_v27, %v12278_v13  ;;  %v4216_v40 = vrot.slane %v4215_v48, 4 }
 0x356   :  { %14910 = vst [vmem:[#allocation78_spill] sm:$0xff] %v12737_v38  ;;  %v4302_v59 = vadd.f32 %v4301_v53, %v14345_v8  ;;  %v14351_v9 = vmax.f32 %v12724_v60, 0.0  ;;  %v4339_v63 = vmul.f32 %v12264_v61, %v14913_v10  ;;  %v14350_v51 = vmax.f32 %v12737_v38, 0.0 }
 0x357   :  { %v4380_v32 = vadd.f32 %v4379_v21, %v14343_v28  ;;  %14912 = vst [vmem:[#allocation37_spill] sm:$0xff] %v12745_v55  ;;  %v12755_v21 = vadd.f32 %v4338_v30, %v12278_v13  ;;  %v4131_v28 = vadd.f32 %v4130_v43, %v4129_v31  ;;  %v4340_v53 = vmul.f32 %v12264_v61, %v14915_v24  ;;  %v14917_v30 = vld [vmem:[#allocation100_spill] sm:$0xff] }
 0x358   :  { %v12763_v8 = vadd.f32 %v4339_v63, %v12278_v13  ;;  %v4217_v29 = vadd.f32 %v4216_v40, %v4215_v48  ;;  %v4341_v17 = vmul.f32 %v12264_v61, %v14917_v30 }
 0x359   :  { %v4381_v58 = vadd.f32 %v4380_v32, %v14347_v33  ;;  %14914 = vst [vmem:[#allocation24_spill] sm:$0xff] %v12755_v21  ;;  %v4303_v32 = vrot.slane %v4302_v59, 4  ;;  %v14352_v33 = vmax.f32 %v12745_v55, 0.0  ;;  %v12771_v60 = vadd.f32 %v4340_v53, %v12278_v13 }
 0x35a   :  { %14916 = vst [vmem:[#allocation31_spill] sm:$0xff] %v12763_v8  ;;  %v14353_v43 = vmax.f32 %v12755_v21, 0.0  ;;  %v4132_v63 = vrot.slane %v4131_v28, 2  ;;  %v12777_v31 = vadd.f32 %v4341_v17, %v12278_v13  ;;  %v4218_v48 = vrot.slane %v4217_v29, 2 }
 0x35b   :  { %v4382_v27 = vadd.f32 %v4381_v58, %v14351_v9  ;;  %14918 = vst [vmem:[#allocation84_spill] sm:$0xff] %v12771_v60  ;;  %v4304_v40 = vadd.f32 %v4303_v32, %v4302_v59  ;;  %v14357_v58 = vmax.f32 %v12763_v8, 0.0  ;;  %v14360_v61 = vmax.f32 %v12771_v60, 0.0 }
 0x35c   :  { %v4133_v30 = vadd.f32 %v4132_v63, %v4131_v28 }
 0x35d   :  { %v4383_v10 = vadd.f32 %v4382_v27, %v14350_v51  ;;  %v4219_v51 = vadd.f32 %v4218_v48, %v4217_v29  ;;  %v4305_v9 = vrot.slane %v4304_v40, 2 }
 0x35e   :  { %v4134_v59 = vrot.slane %v4133_v30, 1 }
 0x35f   :  { %v4384_v24 = vadd.f32 %v4383_v10, %v14352_v33  ;;  %v14361_v10 = vmax.f32 %v12777_v31, 0.0  ;;  %v4220_v32 = vrot.slane %v4219_v51, 1  ;;  %v4306_v33 = vadd.f32 %v4305_v9, %v4304_v40  ;;  %v4507_v9 = vld [vmem:[%s14183_s9 + $0x70] sm:$0xff] }
 0x360   :  { %v4135_v21 = vadd.f32 %v4134_v59, %v4133_v30  ;;  %v4616_v30 = vld [vmem:[%s14186_s11 + $0x30] sm:$0xff]  ;;  %v6566_v59 = vld [vmem:[%s14187_s8] ss:$0 sm:$0xff] }
 0x361   :  { %v4385_v27 = vadd.f32 %v4384_v24, %v14353_v43  ;;  %v4221_v55 = vadd.f32 %v4220_v32, %v4219_v51  ;;  %v4307_v8 = vrot.slane %v4306_v33, 1  ;;  %v4508_v51 = vld [vmem:[%s14183_s9 + $0x78] sm:$0xff] }
 0x362   :  { %v8294_v40 = vpack.c.bf16 %v4508_v51, %v4507_v9  ;;  %v4621_v9 = vld [vmem:[%s14186_s11 + $0x58] sm:$0xff] }
 0x363   :  { %v4386_v53 = vadd.f32 %v4385_v27, %v14357_v58  ;;  %v4222_v29 = vadd.f32 %v4221_v55, %v4135_v21  ;;  %v4308_v63 = vadd.f32 %v4307_v8, %v4306_v33  ;;  %v4610_v8 = vld [vmem:[%s14186_s11] sm:$0xff]  ;;  %v4611_v55 = vld [vmem:[%s14186_s11 + $0x8] sm:$0xff]  ;;  %v4613_v33 = vld [vmem:[%s14186_s11 + $0x18] sm:$0xff] }
 0x364   :  { %8295 = vmatpush3.bf16.msra.mxu1 %v8294_v40  ;;  %v4622_v40 = vld [vmem:[%s14186_s11 + $0x60] sm:$0xff] }
 0x365   :  { %v4387_v13 = vadd.f32 %v4386_v53, %v14360_v61  ;;  %v4223_v38 = vmul.f32 0.00390625, %v4222_v29  ;;  %v4618_v29 = vld [vmem:[%s14186_s11 + $0x40] sm:$0xff] }
 0x367   :  { %v4388_v17 = vadd.f32 %v4387_v13, %v14361_v10  ;;  %v4617_v13 = vld [vmem:[%s14186_s11 + $0x38] sm:$0xff] }
 0x369   :  { %v4389_v24 = vrot.slane %v4388_v17, 4 }
 0x36b   :  { %v4390_v43 = vadd.f32 %v4389_v24, %v4388_v17  ;;  %v12832_v17 = vpack.c.bf16 %v4617_v13, %v4616_v30 }
 0x36d   :  { %v4391_v27 = vrot.slane %v4390_v43, 2 }
 0x36f   :  { %v4392_v28 = vadd.f32 %v4391_v27, %v4390_v43  ;;  %v4614_v43 = vld [vmem:[%s14186_s11 + $0x20] sm:$0xff] }
 0x371   :  { %v4393_v48 = vrot.slane %v4392_v28, 1 }
 0x373   :  { %v4394_v58 = vadd.f32 %v4393_v48, %v4392_v28 }
 0x375   :  { %v4395_v60 = vadd.f32 %v4394_v58, %v4308_v63  ;;  %v4615_v58 = vld [vmem:[%s14186_s11 + $0x28] sm:$0xff] }
 0x376   :  { %v4619_v63 = vld [vmem:[%s14186_s11 + $0x48] sm:$0xff] }
 0x377   :  { %v4396_v53 = vmul.f32 0.00390625, %v4395_v60  ;;  %v4612_v60 = vld [vmem:[%s14186_s11 + $0x10] sm:$0xff]  ;;  %v12853_v48 = vpack.c.bf16 %v4619_v63, %v4618_v29  ;;  %v14919_v63 = vmax.f32 %v12282_v56, 0.0  ;;  %v14923_v56 = vmax.f32 %v12293_v11, 0.0 }
 0x378   :  { %v12810_v21 = vpack.c.bf16 %v4613_v33, %v4612_v60  ;;  %v4624_v60 = vld [vmem:[%s14186_s11 + $0x70] sm:$0xff]  ;;  %v4625_v33 = vld [vmem:[%s14186_s11 + $0x78] sm:$0xff] }
 0x379   :  { %v4398_v61 = vsel %vm4397_vm1, %v4223_v38, %v4396_v53  ;;  %v12805_v38 = vpack.c.bf16 %v4611_v55, %v4610_v8  ;;  %v4620_v53 = vld [vmem:[%s14186_s11 + $0x50] sm:$0xff]  ;;  %v4623_v8 = vld [vmem:[%s14186_s11 + $0x68] sm:$0xff] }
 0x37a   :  { %7563 = vmatmul.mubr.f32.vlgmr.msra.gmra.mrb[64].mxu0 %v4398_v61  ;;  %v12822_v61 = vpack.c.bf16 %v4615_v58, %v4614_v43  ;;  %v12865_v51 = vpack.c.bf16 %v4621_v9, %v4620_v53  ;;  %v12877_v55 = vpack.c.bf16 %v4623_v8, %v4622_v40  ;;  %v12889_v43 = vpack.c.bf16 %v4625_v33, %v4624_v60  ;;  %v6567_v58 = vld [vmem:[%s14188_s10] ss:$0 sm:$0xff] }
 0x37b   :  { %8297 = vmatprep.subr.bf16.mxu0 %v12805_v38  ;;  %8329 = vmatprep.subr.bf16.mxu1 %v12805_v38  ;;  %v14920_v9 = vmax.f32 %v12314_v36, 0.0  ;;  %v14921_v8 = vmax.f32 %v12285_v52, 0.0  ;;  %v14922_v33 = vmax.f32 %v12317_v25, 0.0  ;;  %v14924_v36 = vmax.f32 %v12340_v7, 0.0 }
 0x37c   :  { %8299 = vmatpush3.bf16.msra.mxu0 %v12805_v38  ;;  %v14925_v52 = vmax.f32 %v12302_v4, 0.0  ;;  %v14926_v25 = vmax.f32 %v12359_v50, 0.0  ;;  %v14931_v4 = vld [vmem:[#allocation43_spill] sm:$0xff] }
 0x37d   :  { %8301 = vmatprep.subr.bf16.mxu0 %v12810_v21  ;;  %v14932_v50 = vmax.f32 %v14931_v4, 0.0 }
 0x380   :  { %8303 = vmatpush3.bf16.msra.mxu0 %v12810_v21 }
 0x381   :  { %8305 = vmatprep.subr.bf16.mxu0 %v12822_v61 }
 0x384   :  { %8307 = vmatpush3.bf16.msra.mxu0 %v12822_v61 }
 0x385   :  { %8309 = vmatprep.subr.bf16.mxu0 %v12832_v17 }
 0x388   :  { %8311 = vmatpush3.bf16.msra.mxu0 %v12832_v17 }
 0x389   :  { %8313 = vmatprep.subr.bf16.mxu0 %v12853_v48 }
 0x38c   :  { %8315 = vmatpush3.bf16.msra.mxu0 %v12853_v48 }
 0x38d   :  { %8317 = vmatprep.subr.bf16.mxu0 %v12865_v51 }
 0x390   :  { %8319 = vmatpush3.bf16.msra.mxu0 %v12865_v51 }
 0x391   :  { %8321 = vmatprep.subr.bf16.mxu0 %v12877_v55 }
 0x394   :  { %8323 = vmatpush3.bf16.msra.mxu0 %v12877_v55 }
 0x395   :  { %8325 = vmatprep.subr.bf16.mxu0 %v12889_v43 }
 0x398   :  { %8327 = vmatpush3.bf16.msra.mxu0 %v12889_v43 }
 0x399   :  { %8361 = vmatprep.subr.bf16.mxu0 %v12805_v38 }
 0x44d   :  { %v4488_v32 = vpop.f32.mrb[64].mxu0 }
 0x44e   :  { %v4489_v24 = vadd.f32 %v6566_v59, %v4488_v32  ;;  %v7564_v27 = vpop.f32.mrb[65].mxu0 }
 0x450   :  { %v4492_v28 = vmax.f32 %v4489_v24, 0.0 }
 0x452   :  { %7598 = vmatmul.mubr.f32.vlgmr.msra.gmra.mrb[64].mxu1 %v4492_v28 }
 0x453   :  { %8331 = vmatpush3.bf16.msra.mxu1 %v12805_v38 }
 0x454   :  { %8333 = vmatprep.subr.bf16.mxu1 %v12810_v21 }
 0x457   :  { %8335 = vmatpush3.bf16.msra.mxu1 %v12810_v21 }
 0x458   :  { %8337 = vmatprep.subr.bf16.mxu1 %v12822_v61 }
 0x45b   :  { %8339 = vmatpush3.bf16.msra.mxu1 %v12822_v61 }
 0x45c   :  { %8341 = vmatprep.subr.bf16.mxu1 %v12832_v17 }
 0x45f   :  { %8343 = vmatpush3.bf16.msra.mxu1 %v12832_v17 }
 0x460   :  { %8345 = vmatprep.subr.bf16.mxu1 %v12853_v48 }
 0x463   :  { %8347 = vmatpush3.bf16.msra.mxu1 %v12853_v48 }
 0x464   :  { %8349 = vmatprep.subr.bf16.mxu1 %v12865_v51 }
 0x467   :  { %8351 = vmatpush3.bf16.msra.mxu1 %v12865_v51 }
 0x468   :  { %8353 = vmatprep.subr.bf16.mxu1 %v12877_v55 }
 0x46b   :  { %8355 = vmatpush3.bf16.msra.mxu1 %v12877_v55 }
 0x46c   :  { %8357 = vmatprep.subr.bf16.mxu1 %v12889_v43 }
 0x46f   :  { %8359 = vmatpush3.bf16.msra.mxu1 %v12889_v43 }
 0x470   :  { %8393 = vmatprep.subr.bf16.mxu1 %v12805_v38 }
 0x525   :  { %v4582_v30 = vpop.f32.mrb[64].mxu1 }
 0x526   :  { %v4583_v13 = vadd.f32 %v6567_v58, %v4582_v30  ;;  %v7599_v59 = vpop.f32.mrb[65].mxu1 }
 0x527   :  { %v14927_v59 = vld [vmem:[#allocation101_spill] sm:$0xff] }
 0x528   :  { %v4586_v32 = vadd.f32 3.0, %v4583_v13 }
 0x52a   :  { %v4587_v24 = vmax.f32 %v4586_v32, 0.0  ;;  %v14928_v32 = vmax.f32 %v14927_v59, 0.0  ;;  %v14939_v59 = vmax.f32 %v12381_v41, 0.0  ;;  %v14945_v41 = vmax.f32 %v12387_v26, 0.0 }
 0x52b   :  { %v14949_v26 = vmax.f32 %v12402_v42, 0.0  ;;  %v14953_v42 = vmax.f32 %v12418_v18, 0.0 }
 0x52c   :  { %v4588_v27 = vmin.f32 %v4587_v24, 6.0 }
 0x52e   :  { %v12900_v28 = vmul.f32 0.16666667, %v4588_v27  ;;  %v14929_v27 = vld [vmem:[#allocation19_spill] sm:$0xff] }
 0x530   :  { %v12904_v29 = vrot.slane %v12900_v28, %v14831_v39 }
 0x532   :  { %v4594_v53 = vmul.f32 %v12904_v29, %v14919_v63  ;;  %v12912_v40 = vmul.f32 %v12904_v29, %v14920_v9  ;;  %v4595_v60 = vmul.f32 %v12904_v29, %v14921_v8  ;;  %v12920_v58 = vmul.f32 %v12904_v29, %v14922_v33  ;;  %v14933_v8 = vld [vmem:[#allocation106_spill] sm:$0xff] }
 0x533   :  { %v4596_v30 = vmul.f32 %v12904_v29, %v14923_v56  ;;  %v12929_v13 = vmul.f32 %v12904_v29, %v14924_v36  ;;  %v4597_v11 = vmul.f32 %v12904_v29, %v14925_v52  ;;  %v12941_v7 = vmul.f32 %v12904_v29, %v14926_v25  ;;  %v14935_v56 = vld [vmem:[#allocation90_spill] sm:$0xff]  ;;  %v14937_v52 = vld [vmem:[#allocation12_spill] sm:$0xff] }
 0x534   :  { %7632 = vmatprep.mubr.f32.mxu0 %v4594_v53  ;;  %7688 = vmatprep.mubr.f32.mxu1 %v12912_v40  ;;  %v4598_v24 = vmul.f32 %v12904_v29, %v14928_v32  ;;  %v14930_v63 = vmax.f32 %v14929_v27, 0.0  ;;  %v4599_v9 = vmul.f32 %v12904_v29, %v14932_v50  ;;  %v4601_v32 = vmul.f32 %v12904_v29, %v14939_v59 }
 0x535   :  { %7633 = vmatmul.mubr.f32.vlgmr.msra.gmra.mrb[66].mxu0 %v4595_v60  ;;  %7689 = vmatmul.mubr.f32.vlgmr.msra.gmra.mrb[66].mxu1 %v12920_v58  ;;  %v14934_v60 = vmax.f32 %v14933_v8, 0.0 }
 0x536   :  { %7635 = vmatprep.mubr.f32.mxu0 %v4596_v30  ;;  %7691 = vmatprep.mubr.f32.mxu1 %v12929_v13  ;;  %v12951_v53 = vmul.f32 %v12904_v29, %v14930_v63  ;;  %v14936_v30 = vmax.f32 %v14935_v56, 0.0  ;;  %v14941_v63 = vld [vmem:[#allocation102_spill] sm:$0xff]  ;;  %v14946_v56 = vmax.f32 %v12480_v20, 0.0  ;;  %v14950_v20 = vmax.f32 %v12529_v16, 0.0 }
 0x537   :  { %8363 = vmatpush3.bf16.msra.mxu0 %v12805_v38  ;;  %8395 = vmatpush3.bf16.msra.mxu1 %v12805_v38  ;;  %v12963_v33 = vmul.f32 %v12904_v29, %v14934_v60  ;;  %v14942_v4 = vmax.f32 %v14941_v63, 0.0  ;;  %v14952_v63 = vmax.f32 %v12532_v47, 0.0  ;;  %v14954_v16 = vmax.f32 %v12545_v0, 0.0 }
 0x538   :  { %8365 = vmatprep.subr.bf16.mxu0 %v12810_v21  ;;  %8397 = vmatprep.subr.bf16.mxu1 %v12810_v21  ;;  %v4600_v36 = vmul.f32 %v12904_v29, %v14936_v30  ;;  %v13007_v30 = vmul.f32 %v12904_v29, %v14946_v56  ;;  %v14960_v56 = vmax.f32 %v12554_v37, 0.0  ;;  %v14964_v37 = vld [vmem:[#allocation77_spill] sm:$0xff] }
 0x539   :  { %7636 = vmatmul.mubr.f32.gmra.mrb[68].mxu0 %v4597_v11  ;;  %7692 = vmatmul.mubr.f32.gmra.mrb[68].mxu1 %v12941_v7  ;;  %v14938_v11 = vmax.f32 %v14937_v52, 0.0  ;;  %v4602_v50 = vmul.f32 %v12904_v29, %v14942_v4  ;;  %v13039_v4 = vmul.f32 %v12904_v29, %v14952_v63  ;;  %v13051_v47 = vmul.f32 %v12904_v29, %v14954_v16 }
 0x53a   :  { %7638 = vmatprep.mubr.f32.mxu0 %v4598_v24  ;;  %7694 = vmatprep.mubr.f32.mxu1 %v12951_v53  ;;  %v14940_v24 = vmax.f32 %v12425_v5, 0.0  ;;  %v4603_v5 = vmul.f32 %v12904_v29, %v14945_v41  ;;  %v14957_v41 = vmax.f32 %v12421_v62, 0.0 }
 0x53b   :  { %8367 = vmatpush3.bf16.msra.mxu0 %v12810_v21  ;;  %8399 = vmatpush3.bf16.msra.mxu1 %v12810_v21  ;;  %v12973_v25 = vmul.f32 %v12904_v29, %v14938_v11  ;;  %v14948_v11 = vmax.f32 %v12515_v35, 0.0  ;;  %v13029_v35 = vmul.f32 %v12904_v29, %v14950_v20 }
 0x53c   :  { %8369 = vmatprep.subr.bf16.mxu0 %v12822_v61  ;;  %8401 = vmatprep.subr.bf16.mxu1 %v12822_v61  ;;  %v12985_v27 = vmul.f32 %v12904_v29, %v14940_v24  ;;  %v4608_v18 = vmul.f32 %v12904_v29, %v14957_v41  ;;  %v14973_v41 = vmax.f32 %v12503_v45, 0.0  ;;  %v14975_v45 = vmax.f32 %v12521_v54, 0.0 }
 0x53d   :  { %7639 = vmatmul.mubr.f32.gmra.mrb[70].mxu0 %v4599_v9  ;;  %7695 = vmatmul.mubr.f32.gmra.mrb[70].mxu1 %v12963_v33  ;;  %v14943_v9 = vld [vmem:[#allocation36_spill] sm:$0xff]  ;;  %v13017_v59 = vmul.f32 %v12904_v29, %v14948_v11 }
 0x53e   :  { %7641 = vmatprep.mubr.f32.mxu0 %v4600_v36  ;;  %7697 = vmatprep.mubr.f32.mxu1 %v12973_v25  ;;  %v14944_v8 = vmax.f32 %v14943_v9, 0.0  ;;  %v14947_v36 = vmax.f32 %v12399_v22, 0.0  ;;  %v4605_v22 = vmul.f32 %v12904_v29, %v14949_v26  ;;  %v14963_v26 = vmax.f32 %v12589_v14, 0.0 }
 0x53f   :  { %8371 = vmatpush3.bf16.msra.mxu0 %v12822_v61  ;;  %8403 = vmatpush3.bf16.msra.mxu1 %v12822_v61  ;;  %v14966_v14 = vmax.f32 %v12592_v34, 0.0  ;;  %v14970_v34 = vld [vmem:[#allocation23_spill] sm:$0xff] }
 0x540   :  { %8373 = vmatprep.subr.bf16.mxu0 %v12832_v17  ;;  %8405 = vmatprep.subr.bf16.mxu1 %v12832_v17  ;;  %v12995_v60 = vmul.f32 %v12904_v29, %v14944_v8  ;;  %v4604_v52 = vmul.f32 %v12904_v29, %v14947_v36  ;;  %v14961_v36 = vld [vmem:[#allocation107_spill] sm:$0xff]  ;;  %v14971_v16 = vmax.f32 %v14970_v34, 0.0 }
 0x541   :  { %7642 = vmatmul.mubr.f32.gmra.mrb[72].mxu0 %v4601_v32  ;;  %7698 = vmatmul.mubr.f32.gmra.mrb[72].mxu1 %v12985_v27  ;;  %v14951_v32 = vmax.f32 %v12409_v2, 0.0  ;;  %v4607_v2 = vmul.f32 %v12904_v29, %v14953_v42  ;;  %v14969_v42 = vmax.f32 %v12620_v19, 0.0  ;;  %v14972_v19 = vmax.f32 %v12639_v3, 0.0 }
 0x542   :  { %7644 = vmatprep.mubr.f32.mxu0 %v4602_v50  ;;  %7700 = vmatprep.mubr.f32.mxu1 %v12995_v60  ;;  %v14955_v50 = vld [vmem:[#allocation18_spill] sm:$0xff] }
 0x543   :  { %8375 = vmatpush3.bf16.msra.mxu0 %v12832_v17  ;;  %8407 = vmatpush3.bf16.msra.mxu1 %v12832_v17  ;;  %v4606_v24 = vmul.f32 %v12904_v29, %v14951_v32  ;;  %v14956_v9 = vsub.s32 1, %v14955_v50  ;;  %v14967_v32 = vld [vmem:[#allocation82_spill] sm:$0xff] }
 0x544   :  { %8377 = vmatprep.subr.bf16.mxu0 %v12853_v48  ;;  %8409 = vmatprep.subr.bf16.mxu1 %v12853_v48 }
 0x545   :  { %7645 = vmatmul.mubr.f32.gmra.mrb[74].mxu0 %v4603_v5  ;;  %7701 = vmatmul.mubr.f32.gmra.mrb[74].mxu1 %v13007_v30  ;;  %v13056_v8 = vrot.slane %v12900_v28, %v14956_v9  ;;  %v14958_v5 = vmax.f32 %v12548_v49, 0.0  ;;  %v14959_v28 = vmax.f32 %v12435_v23, 0.0  ;;  %v13078_v49 = vmul.f32 %v12904_v29, %v14960_v56 }
 0x546   :  { %7647 = vmatprep.mubr.f32.mxu0 %v4604_v52  ;;  %7703 = vmatprep.mubr.f32.mxu1 %v13017_v59  ;;  %v14962_v52 = vmax.f32 %v14961_v36, 0.0  ;;  %v14977_v56 = vmax.f32 %v12539_v12, 0.0  ;;  %v14979_v12 = vmax.f32 %v12557_v1, 0.0 }
 0x547   :  { %8379 = vmatpush3.bf16.msra.mxu0 %v12853_v48  ;;  %8411 = vmatpush3.bf16.msra.mxu1 %v12853_v48  ;;  %v13066_v0 = vmul.f32 %v12904_v29, %v14958_v5  ;;  %v4609_v62 = vmul.f32 %v12904_v29, %v14959_v28  ;;  %v13090_v23 = vmul.f32 %v13056_v8, %v14963_v26  ;;  %v14965_v29 = vmax.f32 %v14964_v37, 0.0 }
 0x548   :  { %8381 = vmatprep.subr.bf16.mxu0 %v12865_v51  ;;  %8413 = vmatprep.subr.bf16.mxu1 %v12865_v51  ;;  %v13085_v11 = vmul.f32 %v13056_v8, %v14962_v52  ;;  %v13105_v20 = vmul.f32 %v13056_v8, %v14966_v14  ;;  %v13128_v50 = vmul.f32 %v13056_v8, %v14971_v16  ;;  %v14974_v5 = vmax.f32 %v12652_v57, 0.0  ;;  %v14982_v14 = vld [vmem:[#allocation74_spill] sm:$0xff] }
 0x549   :  { %7648 = vmatmul.mubr.f32.gmra.mrb[76].mxu0 %v4605_v22  ;;  %7704 = vmatmul.mubr.f32.gmra.mrb[76].mxu1 %v13029_v35  ;;  %v13100_v22 = vmul.f32 %v13056_v8, %v14965_v29  ;;  %v13133_v9 = vmul.f32 %v13056_v8, %v14972_v19  ;;  %v13156_v3 = vmul.f32 %v13056_v8, %v14975_v45  ;;  %v14976_v57 = vmax.f32 %v12669_v6, 0.0  ;;  %v14988_v19 = vld [vmem:[#allocation110_spill] sm:$0xff] }
 0x54a   :  { %7650 = vmatprep.mubr.f32.mxu0 %v4606_v24  ;;  %7706 = vmatprep.mubr.f32.mxu1 %v13039_v4  ;;  %v14968_v24 = vmax.f32 %v14967_v32, 0.0  ;;  %v13145_v28 = vmul.f32 %v13056_v8, %v14974_v5  ;;  %v13168_v36 = vmul.f32 %v13056_v8, %v14977_v56  ;;  %v14978_v52 = vmax.f32 %v12684_v44, 0.0  ;;  %v14990_v45 = vld [vmem:[#allocation78_spill] sm:$0xff] }
 0x54b   :  { %8383 = vmatpush3.bf16.msra.mxu0 %v12865_v51  ;;  %8415 = vmatpush3.bf16.msra.mxu1 %v12865_v51  ;;  %v13184_v6 = vmul.f32 %v13056_v8, %v14979_v12  ;;  %v14980_v44 = vmax.f32 %v12696_v15, 0.0  ;;  %v14981_v37 = vmax.f32 %v12569_v46, 0.0  ;;  %v14983_v32 = vmax.f32 %v14982_v14, 0.0  ;;  %v14984_v46 = vld [vmem:[#allocation105_spill] sm:$0xff] }
 0x54c   :  { %8385 = vmatprep.subr.bf16.mxu0 %v12877_v55  ;;  %8417 = vmatprep.subr.bf16.mxu1 %v12877_v55  ;;  %v13112_v63 = vmul.f32 %v13056_v8, %v14968_v24  ;;  %v13173_v54 = vmul.f32 %v13056_v8, %v14978_v52  ;;  %v14985_v15 = vmax.f32 %v14984_v46, 0.0  ;;  %v14992_v52 = vld [vmem:[#allocation10_spill] sm:$0xff]  ;;  %v14996_v46 = vld [vmem:[#allocation83_spill] sm:$0xff] }
 0x54d   :  { %7651 = vmatmul.mubr.f32.gmra.mrb[78].mxu0 %v4607_v2  ;;  %7707 = vmatmul.mubr.f32.gmra.mrb[78].mxu1 %v13051_v47  ;;  %v13117_v2 = vmul.f32 %v13056_v8, %v14969_v42  ;;  %v13189_v26 = vmul.f32 %v13056_v8, %v14980_v44  ;;  %v13196_v29 = vmul.f32 %v13056_v8, %v14981_v37  ;;  %v14986_v42 = vld [vmem:[#allocation109_spill] sm:$0xff]  ;;  %v14993_v12 = vmax.f32 %v14992_v52, 0.0 }
 0x54e   :  { %7653 = vmatprep.mubr.f32.mxu0 %v4608_v18  ;;  %7709 = vmatprep.mubr.f32.mxu1 %v13066_v0  ;;  %v13140_v18 = vmul.f32 %v13056_v8, %v14973_v41  ;;  %v13201_v1 = vmul.f32 %v13056_v8, %v14983_v32  ;;  %v13212_v24 = vmul.f32 %v13056_v8, %v14985_v15  ;;  %v14987_v34 = vmax.f32 %v14986_v42, 0.0  ;;  %v14994_v37 = vld [vmem:[#allocation37_spill] sm:$0xff] }
 0x54f   :  { %8387 = vmatpush3.bf16.msra.mxu0 %v12877_v55  ;;  %8419 = vmatpush3.bf16.msra.mxu1 %v12877_v55  ;;  %v14989_v41 = vmax.f32 %v14988_v19, 0.0  ;;  %v13240_v44 = vmul.f32 %v13056_v8, %v14993_v12  ;;  %v14995_v14 = vmax.f32 %v14994_v37, 0.0  ;;  %v14997_v15 = vmax.f32 %v14996_v46, 0.0  ;;  %v15002_v12 = vld [vmem:[#allocation31_spill] sm:$0xff]  ;;  %v15004_v46 = vld [vmem:[#allocation42_spill] sm:$0xff] }
 0x550   :  { %8389 = vmatprep.subr.bf16.mxu0 %v12889_v43  ;;  %8421 = vmatprep.subr.bf16.mxu1 %v12889_v43  ;;  %v13217_v16 = vmul.f32 %v13056_v8, %v14987_v34  ;;  %v14998_v34 = vld [vmem:[#allocation24_spill] sm:$0xff]  ;;  %v15003_v37 = vmax.f32 %v15002_v12, 0.0 }
 0x551   :  { %7654 = vmatmul.mubr.f32.gmra.mrb[80].mxu0 %v4609_v62  ;;  %7710 = vmatmul.mubr.f32.gmra.mrb[80].mxu1 %v13078_v49  ;;  %v13161_v62 = vmul.f32 %v13056_v8, %v14976_v57  ;;  %v13224_v5 = vmul.f32 %v13056_v8, %v14989_v41  ;;  %v14991_v57 = vmax.f32 %v14990_v45, 0.0  ;;  %v13245_v32 = vmul.f32 %v13056_v8, %v14995_v14  ;;  %v15000_v45 = vld [vmem:[#allocation108_spill] sm:$0xff] }
 0x552   :  { %7744 = vmatprep.mubr.f32.mxu0 %v13085_v11  ;;  %7800 = vmatprep.mubr.f32.mxu1 %v13090_v23  ;;  %v13252_v42 = vmul.f32 %v13056_v8, %v14997_v15  ;;  %v14999_v19 = vmax.f32 %v14998_v34, 0.0  ;;  %v13273_v14 = vmul.f32 %v13056_v8, %v15003_v37  ;;  %v15005_v15 = vmax.f32 %v15004_v46, 0.0 }
 0x553   :  { %8391 = vmatpush3.bf16.msra.mxu0 %v12889_v43  ;;  %8423 = vmatpush3.bf16.msra.mxu1 %v12889_v43  ;;  %v13229_v56 = vmul.f32 %v13056_v8, %v14991_v57  ;;  %v15001_v57 = vmax.f32 %v15000_v45, 0.0 }
 0x554   :  { %8425 = vmatprep.subr.bf16.mxu0 %v12805_v38  ;;  %8457 = vmatprep.subr.bf16.mxu1 %v12805_v38  ;;  %v13257_v41 = vmul.f32 %v13056_v8, %v14999_v19  ;;  %v13280_v34 = vmul.f32 %v13056_v8, %v15005_v15  ;;  %v15006_v19 = vld [vmem:[#allocation84_spill] sm:$0xff] }
 0x555   :  { %v13268_v52 = vmul.f32 %v13056_v8, %v15001_v57  ;;  %v15007_v10 = vmax.f32 %v15006_v19, 0.0  ;;  %v15008_v57 = vld [vmem:[#allocation81_spill] sm:$0xff] }
 0x556   :  { %7745 = vmatmul.mubr.f32.vlgmr.msra.gmra.mrb[82].mxu0 %v13100_v22  ;;  %7801 = vmatmul.mubr.f32.vlgmr.msra.gmra.mrb[82].mxu1 %v13105_v20  ;;  %v15009_v12 = vmax.f32 %v15008_v57, 0.0 }
 0x557   :  { %7747 = vmatprep.mubr.f32.mxu0 %v13112_v63  ;;  %7803 = vmatprep.mubr.f32.mxu1 %v13117_v2  ;;  %v13285_v45 = vmul.f32 %v13056_v8, %v15007_v10  ;;  %v15010_v10 = vmax.f32 %v12777_v31, 0.0 }
 0x558   :  { %8427 = vmatpush3.bf16.msra.mxu0 %v12805_v38  ;;  %8459 = vmatpush3.bf16.msra.mxu1 %v12805_v38  ;;  %v13296_v37 = vmul.f32 %v13056_v8, %v15009_v12 }
 0x559   :  { %8429 = vmatprep.subr.bf16.mxu0 %v12810_v21  ;;  %8461 = vmatprep.subr.bf16.mxu1 %v12810_v21  ;;  %v13301_v46 = vmul.f32 %v13056_v8, %v15010_v10 }
 0x55a   :  { %7748 = vmatmul.mubr.f32.gmra.mrb[84].mxu0 %v13128_v50  ;;  %7804 = vmatmul.mubr.f32.gmra.mrb[84].mxu1 %v13133_v9 }
 0x55b   :  { %7750 = vmatprep.mubr.f32.mxu0 %v13140_v18  ;;  %7806 = vmatprep.mubr.f32.mxu1 %v13145_v28 }
 0x55c   :  { %8431 = vmatpush3.bf16.msra.mxu0 %v12810_v21  ;;  %8463 = vmatpush3.bf16.msra.mxu1 %v12810_v21 }
 0x55d   :  { %8433 = vmatprep.subr.bf16.mxu0 %v12822_v61  ;;  %8465 = vmatprep.subr.bf16.mxu1 %v12822_v61 }
 0x55e   :  { %7751 = vmatmul.mubr.f32.gmra.mrb[86].mxu0 %v13156_v3  ;;  %7807 = vmatmul.mubr.f32.gmra.mrb[86].mxu1 %v13161_v62 }
 0x55f   :  { %7753 = vmatprep.mubr.f32.mxu0 %v13168_v36  ;;  %7809 = vmatprep.mubr.f32.mxu1 %v13173_v54 }
 0x560   :  { %8435 = vmatpush3.bf16.msra.mxu0 %v12822_v61  ;;  %8467 = vmatpush3.bf16.msra.mxu1 %v12822_v61 }
 0x561   :  { %8437 = vmatprep.subr.bf16.mxu0 %v12832_v17  ;;  %8469 = vmatprep.subr.bf16.mxu1 %v12832_v17 }
 0x562   :  { %7754 = vmatmul.mubr.f32.gmra.mrb[88].mxu0 %v13184_v6  ;;  %7810 = vmatmul.mubr.f32.gmra.mrb[88].mxu1 %v13189_v26 }
 0x563   :  { %7756 = vmatprep.mubr.f32.mxu0 %v13196_v29  ;;  %7812 = vmatprep.mubr.f32.mxu1 %v13201_v1 }
 0x564   :  { %8439 = vmatpush3.bf16.msra.mxu0 %v12832_v17  ;;  %8471 = vmatpush3.bf16.msra.mxu1 %v12832_v17 }
 0x565   :  { %8441 = vmatprep.subr.bf16.mxu0 %v12853_v48  ;;  %8473 = vmatprep.subr.bf16.mxu1 %v12853_v48 }
 0x566   :  { %7757 = vmatmul.mubr.f32.gmra.mrb[90].mxu0 %v13212_v24  ;;  %7813 = vmatmul.mubr.f32.gmra.mrb[90].mxu1 %v13217_v16 }
 0x567   :  { %7759 = vmatprep.mubr.f32.mxu0 %v13224_v5  ;;  %7815 = vmatprep.mubr.f32.mxu1 %v13229_v56 }
 0x568   :  { %8443 = vmatpush3.bf16.msra.mxu0 %v12853_v48  ;;  %8475 = vmatpush3.bf16.msra.mxu1 %v12853_v48 }
 0x569   :  { %8445 = vmatprep.subr.bf16.mxu0 %v12865_v51  ;;  %8477 = vmatprep.subr.bf16.mxu1 %v12865_v51 }
 0x56a   :  { %7760 = vmatmul.mubr.f32.gmra.mrb[92].mxu0 %v13240_v44  ;;  %7816 = vmatmul.mubr.f32.gmra.mrb[92].mxu1 %v13245_v32 }
 0x56b   :  { %7762 = vmatprep.mubr.f32.mxu0 %v13252_v42  ;;  %7818 = vmatprep.mubr.f32.mxu1 %v13257_v41 }
 0x56c   :  { %8447 = vmatpush3.bf16.msra.mxu0 %v12865_v51  ;;  %8479 = vmatpush3.bf16.msra.mxu1 %v12865_v51 }
 0x56d   :  { %8449 = vmatprep.subr.bf16.mxu0 %v12877_v55  ;;  %8481 = vmatprep.subr.bf16.mxu1 %v12877_v55 }
 0x56e   :  { %7763 = vmatmul.mubr.f32.gmra.mrb[94].mxu0 %v13268_v52  ;;  %7819 = vmatmul.mubr.f32.gmra.mrb[94].mxu1 %v13273_v14 }
 0x56f   :  { %7765 = vmatprep.mubr.f32.mxu0 %v13280_v34  ;;  %7821 = vmatprep.mubr.f32.mxu1 %v13285_v45 }
 0x570   :  { %8451 = vmatpush3.bf16.msra.mxu0 %v12877_v55  ;;  %8483 = vmatpush3.bf16.msra.mxu1 %v12877_v55 }
 0x571   :  { %8453 = vmatprep.subr.bf16.mxu0 %v12889_v43  ;;  %8485 = vmatprep.subr.bf16.mxu1 %v12889_v43 }
 0x572   :  { %7766 = vmatmul.mubr.f32.gmra.mrb[96].mxu0 %v13296_v37  ;;  %7822 = vmatmul.mubr.f32.gmra.mrb[96].mxu1 %v13301_v46 }
 0x573   :  { %7856 = vmatprep.mubr.f32.mxu0 %v12912_v40  ;;  %7912 = vmatprep.mubr.f32.mxu1 %v13085_v11 }
 0x574   :  { %8455 = vmatpush3.bf16.msra.mxu0 %v12889_v43  ;;  %8487 = vmatpush3.bf16.msra.mxu1 %v12889_v43 }
 0x575   :  { %8489 = vmatprep.subr.bf16.mxu0 %v12805_v38  ;;  %8520 = vmatprep.subr.bf16.mxu1 %v12805_v38 }
 0x577   :  { %7857 = vmatmul.mubr.f32.vlgmr.msra.gmra.mrb[98].mxu0 %v12920_v58  ;;  %7913 = vmatmul.mubr.f32.vlgmr.msra.gmra.mrb[98].mxu1 %v13100_v22 }
 0x578   :  { %7859 = vmatprep.mubr.f32.mxu0 %v12929_v13  ;;  %7915 = vmatprep.mubr.f32.mxu1 %v13112_v63 }
 0x579   :  { %8491 = vmatpush3.bf16.msra.mxu0 %v12805_v38  ;;  %8528 = vmatpush3.bf16.msra.mxu1 %v12805_v38 }
 0x57a   :  { %8493 = vmatprep.subr.bf16.mxu0 %v12810_v21  ;;  %8521 = vmatprep.subr.bf16.mxu1 %v12810_v21 }
 0x57b   :  { %7860 = vmatmul.mubr.f32.gmra.mrb[100].mxu0 %v12941_v7  ;;  %7916 = vmatmul.mubr.f32.gmra.mrb[100].mxu1 %v13128_v50 }
 0x57c   :  { %7862 = vmatprep.mubr.f32.mxu0 %v12951_v53  ;;  %7918 = vmatprep.mubr.f32.mxu1 %v13140_v18 }
 0x57d   :  { %8495 = vmatpush3.bf16.msra.mxu0 %v12810_v21  ;;  %8529 = vmatpush3.bf16.msra.mxu1 %v12810_v21 }
 0x57e   :  { %8497 = vmatprep.subr.bf16.mxu0 %v12822_v61  ;;  %8522 = vmatprep.subr.bf16.mxu1 %v12822_v61 }
 0x57f   :  { %7863 = vmatmul.mubr.f32.gmra.mrb[102].mxu0 %v12963_v33  ;;  %7919 = vmatmul.mubr.f32.gmra.mrb[102].mxu1 %v13156_v3 }
 0x580   :  { %7865 = vmatprep.mubr.f32.mxu0 %v12973_v25  ;;  %7921 = vmatprep.mubr.f32.mxu1 %v13168_v36 }
 0x581   :  { %8499 = vmatpush3.bf16.msra.mxu0 %v12822_v61  ;;  %8530 = vmatpush3.bf16.msra.mxu1 %v12822_v61 }
 0x582   :  { %8501 = vmatprep.subr.bf16.mxu0 %v12832_v17  ;;  %8523 = vmatprep.subr.bf16.mxu1 %v12832_v17 }
 0x583   :  { %7866 = vmatmul.mubr.f32.gmra.mrb[104].mxu0 %v12985_v27  ;;  %7922 = vmatmul.mubr.f32.gmra.mrb[104].mxu1 %v13184_v6 }
 0x584   :  { %7868 = vmatprep.mubr.f32.mxu0 %v12995_v60  ;;  %7924 = vmatprep.mubr.f32.mxu1 %v13196_v29 }
 0x585   :  { %8503 = vmatpush3.bf16.msra.mxu0 %v12832_v17  ;;  %8531 = vmatpush3.bf16.msra.mxu1 %v12832_v17 }
 0x586   :  { %8505 = vmatprep.subr.bf16.mxu0 %v12853_v48  ;;  %8524 = vmatprep.subr.bf16.mxu1 %v12853_v48 }
 0x587   :  { %7869 = vmatmul.mubr.f32.gmra.mrb[106].mxu0 %v13007_v30  ;;  %7925 = vmatmul.mubr.f32.gmra.mrb[106].mxu1 %v13212_v24 }
 0x588   :  { %7871 = vmatprep.mubr.f32.mxu0 %v13017_v59  ;;  %7927 = vmatprep.mubr.f32.mxu1 %v13224_v5 }
 0x589   :  { %8507 = vmatpush3.bf16.msra.mxu0 %v12853_v48  ;;  %8532 = vmatpush3.bf16.msra.mxu1 %v12853_v48 }
 0x58a   :  { %8509 = vmatprep.subr.bf16.mxu0 %v12865_v51  ;;  %8525 = vmatprep.subr.bf16.mxu1 %v12865_v51 }
 0x58b   :  { %7872 = vmatmul.mubr.f32.gmra.mrb[108].mxu0 %v13029_v35  ;;  %7928 = vmatmul.mubr.f32.gmra.mrb[108].mxu1 %v13240_v44 }
 0x58c   :  { %7874 = vmatprep.mubr.f32.mxu0 %v13039_v4  ;;  %7930 = vmatprep.mubr.f32.mxu1 %v13252_v42 }
 0x58d   :  { %8511 = vmatpush3.bf16.msra.mxu0 %v12865_v51  ;;  %8533 = vmatpush3.bf16.msra.mxu1 %v12865_v51 }
 0x58e   :  { %8513 = vmatprep.subr.bf16.mxu0 %v12877_v55  ;;  %8526 = vmatprep.subr.bf16.mxu1 %v12877_v55 }
 0x58f   :  { %7875 = vmatmul.mubr.f32.gmra.mrb[110].mxu0 %v13051_v47  ;;  %7931 = vmatmul.mubr.f32.gmra.mrb[110].mxu1 %v13268_v52 }
 0x590   :  { %7877 = vmatprep.mubr.f32.mxu0 %v13066_v0  ;;  %7933 = vmatprep.mubr.f32.mxu1 %v13280_v34 }
 0x591   :  { %8515 = vmatpush3.bf16.msra.mxu0 %v12877_v55  ;;  %8534 = vmatpush3.bf16.msra.mxu1 %v12877_v55 }
 0x592   :  { %8517 = vmatprep.subr.bf16.mxu0 %v12889_v43  ;;  %8527 = vmatprep.subr.bf16.mxu1 %v12889_v43 }
 0x593   :  { %7878 = vmatmul.mubr.f32.gmra.mrb[112].mxu0 %v13078_v49  ;;  %7934 = vmatmul.mubr.f32.gmra.mrb[112].mxu1 %v13296_v37 }
 0x594   :  { %7968 = vmatprep.mubr.f32.mxu0 %v13090_v23  ;;  %7980 = vmatprep.mubr.f32.mxu1 %v13201_v1 }
 0x595   :  { %8519 = vmatpush3.bf16.msra.mxu0 %v12889_v43  ;;  %8535 = vmatpush3.bf16.msra.mxu1 %v12889_v43 }
 0x598   :  { %7969 = vmatmul.mubr.f32.vlgmr.msra.gmra.mrb[114].mxu0 %v13105_v20  ;;  %7981 = vmatmul.mubr.f32.vlgmr.msra.gmra.mrb[114].mxu1 %v13217_v16 }
 0x599   :  { %7971 = vmatprep.mubr.f32.mxu0 %v13117_v2  ;;  %7983 = vmatprep.mubr.f32.mxu1 %v13229_v56 }
 0x59c   :  { %7972 = vmatmul.mubr.f32.gmra.mrb[116].mxu0 %v13133_v9  ;;  %7984 = vmatmul.mubr.f32.gmra.mrb[116].mxu1 %v13245_v32 }
 0x59d   :  { %7974 = vmatprep.mubr.f32.mxu0 %v13145_v28  ;;  %7986 = vmatprep.mubr.f32.mxu1 %v13257_v41 }
 0x5a0   :  { %7975 = vmatmul.mubr.f32.gmra.mrb[118].mxu0 %v13161_v62  ;;  %7987 = vmatmul.mubr.f32.gmra.mrb[118].mxu1 %v13273_v14 }
 0x5a1   :  { %7977 = vmatprep.mubr.f32.mxu0 %v13173_v54  ;;  %7989 = vmatprep.mubr.f32.mxu1 %v13285_v45 }
 0x5a4   :  { %7978 = vmatmul.mubr.f32.gmra.mrb[120].mxu0 %v13189_v26  ;;  %7990 = vmatmul.mubr.f32.gmra.mrb[120].mxu1 %v13301_v46 }
 0x608   :  { %v13389_v31 = vpop.f32.mrb[66].mxu0  ;;  %v7690_v38 = vpop.f32.mrb[66].mxu1 }
 0x609   :  { %v4794_v21 = vmul.f32 %v13389_v31, %v13389_v31  ;;  %v5015_v61 = vmul.f32 %v7690_v38, %v7690_v38  ;;  %v13393_v17 = vpop.f32.mrb[67].mxu0  ;;  %v4913_v48 = vpop.f32.mrb[67].mxu1 }
 0x60a   :  { %v4771_v51 = vadd.f32 %v13389_v31, %v13393_v17  ;;  %v4793_v55 = vmul.f32 %v13393_v17, %v13393_v17  ;;  %v4992_v43 = vadd.f32 %v7690_v38, %v4913_v48  ;;  %v5014_v40 = vmul.f32 %v4913_v48, %v4913_v48 }
 0x60c   :  { %v4809_v58 = vadd.f32 %v4794_v21, %v4793_v55  ;;  %v5030_v13 = vadd.f32 %v5015_v61, %v5014_v40  ;;  %v13399_v7 = vpop.f32.mrb[68].mxu0  ;;  %v7693_v53 = vpop.f32.mrb[68].mxu1 }
 0x60d   :  { %v13401_v33 = vpop.f32.mrb[69].mxu0  ;;  %v4923_v25 = vpop.f32.mrb[69].mxu1  ;;  %v4796_v35 = vmul.f32 %v13399_v7, %v13399_v7  ;;  %v5017_v23 = vmul.f32 %v7693_v53, %v7693_v53 }
 0x60e   :  { %v4772_v27 = vadd.f32 %v4771_v51, %v13401_v33  ;;  %v4795_v60 = vmul.f32 %v13401_v33, %v13401_v33  ;;  %v4993_v30 = vadd.f32 %v4992_v43, %v4923_v25  ;;  %v5016_v59 = vmul.f32 %v4923_v25, %v4923_v25 }
 0x610   :  { %v4810_v4 = vadd.f32 %v4809_v58, %v4795_v60  ;;  %v5031_v47 = vadd.f32 %v5030_v13, %v5016_v59  ;;  %v13408_v8 = vpop.f32.mrb[70].mxu0  ;;  %v7696_v0 = vpop.f32.mrb[70].mxu1  ;;  %v4773_v49 = vadd.f32 %v13399_v7, %v4772_v27  ;;  %v4994_v11 = vadd.f32 %v7693_v53, %v4993_v30 }
 0x611   :  { %v13411_v22 = vpop.f32.mrb[71].mxu0  ;;  %v4933_v20 = vpop.f32.mrb[71].mxu1  ;;  %v4798_v3 = vmul.f32 %v13408_v8, %v13408_v8  ;;  %v5019_v29 = vmul.f32 %v7696_v0, %v7696_v0 }
 0x612   :  { %v4774_v63 = vadd.f32 %v4773_v49, %v13411_v22  ;;  %v4797_v2 = vmul.f32 %v13411_v22, %v13411_v22  ;;  %v4811_v50 = vadd.f32 %v4810_v4, %v4796_v35  ;;  %v4995_v9 = vadd.f32 %v4994_v11, %v4933_v20 }
 0x613   :  { %v5018_v18 = vmul.f32 %v4933_v20, %v4933_v20  ;;  %v5032_v28 = vadd.f32 %v5031_v47, %v5017_v23 }
 0x614   :  { %v4812_v62 = vadd.f32 %v4811_v50, %v4797_v2  ;;  %v13418_v36 = vpop.f32.mrb[72].mxu0  ;;  %v7699_v54 = vpop.f32.mrb[72].mxu1  ;;  %v4775_v6 = vadd.f32 %v13408_v8, %v4774_v63  ;;  %v4996_v26 = vadd.f32 %v7696_v0, %v4995_v9 }
 0x615   :  { %v5033_v1 = vadd.f32 %v5032_v28, %v5018_v18  ;;  %v13421_v24 = vpop.f32.mrb[73].mxu0  ;;  %v4943_v16 = vpop.f32.mrb[73].mxu1  ;;  %v4800_v52 = vmul.f32 %v13418_v36, %v13418_v36  ;;  %v5021_v57 = vmul.f32 %v7699_v54, %v7699_v54 }
 0x616   :  { %v4776_v5 = vadd.f32 %v4775_v6, %v13421_v24  ;;  %v4799_v56 = vmul.f32 %v13421_v24, %v13421_v24  ;;  %v4813_v44 = vadd.f32 %v4812_v62, %v4798_v3  ;;  %v4997_v32 = vadd.f32 %v4996_v26, %v4943_v16 }
 0x617   :  { %v5020_v42 = vmul.f32 %v4943_v16, %v4943_v16  ;;  %v5034_v41 = vadd.f32 %v5033_v1, %v5019_v29 }
 0x618   :  { %v4814_v14 = vadd.f32 %v4813_v44, %v4799_v56  ;;  %v13428_v15 = vpop.f32.mrb[74].mxu0  ;;  %v7702_v34 = vpop.f32.mrb[74].mxu1  ;;  %v4777_v19 = vadd.f32 %v13418_v36, %v4776_v5  ;;  %v4998_v45 = vadd.f32 %v7699_v54, %v4997_v32 }
 0x619   :  { %v5035_v12 = vadd.f32 %v5034_v41, %v5020_v42  ;;  %v13431_v37 = vpop.f32.mrb[75].mxu0  ;;  %v4953_v10 = vpop.f32.mrb[75].mxu1  ;;  %v4802_v55 = vmul.f32 %v13428_v15, %v13428_v15  ;;  %v5023_v25 = vmul.f32 %v7702_v34, %v7702_v34 }
 0x61a   :  { %v4778_v46 = vadd.f32 %v4777_v19, %v13431_v37  ;;  %v4801_v38 = vmul.f32 %v13431_v37, %v13431_v37  ;;  %v4815_v21 = vadd.f32 %v4814_v14, %v4800_v52  ;;  %v4999_v61 = vadd.f32 %v4998_v45, %v4953_v10 }
 0x61b   :  { %v5022_v48 = vmul.f32 %v4953_v10, %v4953_v10  ;;  %v5036_v51 = vadd.f32 %v5035_v12, %v5021_v57 }
 0x61c   :  { %v4816_v43 = vadd.f32 %v4815_v21, %v4801_v38  ;;  %v13438_v40 = vpop.f32.mrb[76].mxu0  ;;  %v7705_v58 = vpop.f32.mrb[76].mxu1  ;;  %v4779_v13 = vadd.f32 %v13428_v15, %v4778_v46  ;;  %v5000_v53 = vadd.f32 %v7702_v34, %v4999_v61 }
 0x61d   :  { %v5037_v27 = vadd.f32 %v5036_v51, %v5022_v48  ;;  %v13441_v60 = vpop.f32.mrb[77].mxu0  ;;  %v4963_v30 = vpop.f32.mrb[77].mxu1  ;;  %v4804_v11 = vmul.f32 %v13438_v40, %v13438_v40  ;;  %v5025_v9 = vmul.f32 %v7705_v58, %v7705_v58 }
 0x61e   :  { %v4780_v59 = vadd.f32 %v4779_v13, %v13441_v60  ;;  %v4803_v35 = vmul.f32 %v13441_v60, %v13441_v60  ;;  %v4817_v4 = vadd.f32 %v4816_v43, %v4802_v55  ;;  %v5001_v47 = vadd.f32 %v5000_v53, %v4963_v30 }
 0x61f   :  { %v5024_v0 = vmul.f32 %v4963_v30, %v4963_v30  ;;  %v5038_v49 = vadd.f32 %v5037_v27, %v5023_v25 }
 0x620   :  { %v4818_v23 = vadd.f32 %v4817_v4, %v4803_v35  ;;  %v13448_v20 = vpop.f32.mrb[78].mxu0  ;;  %v7708_v63 = vpop.f32.mrb[78].mxu1  ;;  %v4781_v2 = vadd.f32 %v13438_v40, %v4780_v59  ;;  %v5002_v50 = vadd.f32 %v7705_v58, %v5001_v47 }
 0x621   :  { %v5039_v18 = vadd.f32 %v5038_v49, %v5024_v0  ;;  %v13451_v28 = vpop.f32.mrb[79].mxu0  ;;  %v4973_v3 = vpop.f32.mrb[79].mxu1  ;;  %v4806_v16 = vmul.f32 %v13448_v20, %v13448_v20  ;;  %v5027_v41 = vmul.f32 %v7708_v63, %v7708_v63 }
 0x622   :  { %v4782_v62 = vadd.f32 %v4781_v2, %v13451_v28  ;;  %v4805_v54 = vmul.f32 %v13451_v28, %v13451_v28  ;;  %v4819_v6 = vadd.f32 %v4818_v23, %v4804_v11  ;;  %v5003_v26 = vadd.f32 %v5002_v50, %v4973_v3 }
 0x623   :  { %v5026_v29 = vmul.f32 %v4973_v3, %v4973_v3  ;;  %v5040_v1 = vadd.f32 %v5039_v18, %v5025_v9 }
 0x624   :  { %v4820_v5 = vadd.f32 %v4819_v6, %v4805_v54  ;;  %v13458_v56 = vpop.f32.mrb[80].mxu0  ;;  %v7711_v44 = vpop.f32.mrb[80].mxu1  ;;  %v4783_v32 = vadd.f32 %v13448_v20, %v4782_v62  ;;  %v5004_v42 = vadd.f32 %v7708_v63, %v5003_v26 }
 0x625   :  { %v5041_v52 = vadd.f32 %v5040_v1, %v5026_v29  ;;  %v13461_v14 = vpop.f32.mrb[81].mxu0  ;;  %v4983_v34 = vpop.f32.mrb[81].mxu1  ;;  %v4808_v38 = vmul.f32 %v13458_v56, %v13458_v56  ;;  %v5029_v51 = vmul.f32 %v7711_v44, %v7711_v44 }
 0x626   :  { %v4784_v19 = vadd.f32 %v4783_v32, %v13461_v14  ;;  %v4807_v45 = vmul.f32 %v13461_v14, %v13461_v14  ;;  %v4821_v57 = vadd.f32 %v4820_v5, %v4806_v16  ;;  %v5005_v12 = vadd.f32 %v5004_v42, %v4983_v34 }
 0x627   :  { %v5028_v10 = vmul.f32 %v4983_v34, %v4983_v34  ;;  %v5042_v46 = vadd.f32 %v5041_v52, %v5027_v41 }
 0x628   :  { %v4785_v21 = vadd.f32 %v13458_v56, %v4784_v19  ;;  %v4822_v61 = vadd.f32 %v4821_v57, %v4807_v45  ;;  %v5006_v48 = vadd.f32 %v7711_v44, %v5005_v12 }
 0x629   :  { %v5043_v55 = vadd.f32 %v5042_v46, %v5028_v10  ;;  %v7746_v43 = vpop.f32.mrb[82].mxu0  ;;  %v7802_v58 = vpop.f32.mrb[82].mxu1 }
 0x62a   :  { %v4786_v13 = vrot.slane %v4785_v21, 4  ;;  %v4823_v53 = vadd.f32 %v4822_v61, %v4808_v38  ;;  %v5007_v25 = vrot.slane %v5006_v48, 4  ;;  %v5240_v27 = vmul.f32 %v7746_v43, %v7746_v43  ;;  %v5138_v30 = vpop.f32.mrb[83].mxu0  ;;  %v5359_v59 = vpop.f32.mrb[83].mxu1 }
 0x62b   :  { %v5044_v35 = vadd.f32 %v5043_v55, %v5029_v51  ;;  %v5461_v4 = vmul.f32 %v7802_v58, %v7802_v58  ;;  %v5217_v47 = vadd.f32 %v7746_v43, %v5138_v30  ;;  %v5239_v0 = vmul.f32 %v5138_v30, %v5138_v30 }
 0x62c   :  { %v4787_v49 = vadd.f32 %v4786_v13, %v4785_v21  ;;  %v4824_v11 = vrot.slane %v4823_v53, 4  ;;  %v5008_v23 = vadd.f32 %v5007_v25, %v5006_v48  ;;  %v5438_v63 = vadd.f32 %v7802_v58, %v5359_v59 }
 0x62d   :  { %v5045_v2 = vrot.slane %v5044_v35, 4  ;;  %v5255_v50 = vadd.f32 %v5240_v27, %v5239_v0  ;;  %v5460_v9 = vmul.f32 %v5359_v59, %v5359_v59  ;;  %v7749_v18 = vpop.f32.mrb[84].mxu0  ;;  %v7805_v3 = vpop.f32.mrb[84].mxu1 }
 0x62e   :  { %v4788_v62 = vrot.slane %v4787_v49, 2  ;;  %v4825_v54 = vadd.f32 %v4824_v11, %v4823_v53  ;;  %v5009_v6 = vrot.slane %v5008_v23, 2  ;;  %v5148_v26 = vpop.f32.mrb[85].mxu0  ;;  %v5369_v29 = vpop.f32.mrb[85].mxu1  ;;  %v5242_v55 = vmul.f32 %v7749_v18, %v7749_v18 }
 0x62f   :  { %v5046_v1 = vadd.f32 %v5045_v2, %v5044_v35  ;;  %v5476_v16 = vadd.f32 %v5461_v4, %v5460_v9  ;;  %v5218_v5 = vadd.f32 %v5217_v47, %v5148_v26  ;;  %v5241_v41 = vmul.f32 %v5148_v26, %v5148_v26 }
 0x630   :  { %v4789_v44 = vadd.f32 %v4788_v62, %v4787_v49  ;;  %v4826_v32 = vrot.slane %v4825_v54, 2  ;;  %v5010_v42 = vadd.f32 %v5009_v6, %v5008_v23  ;;  %v5439_v34 = vadd.f32 %v5438_v63, %v5369_v29 }
 0x631   :  { %v5047_v52 = vrot.slane %v5046_v1, 2  ;;  %v5462_v19 = vmul.f32 %v5369_v29, %v5369_v29  ;;  %v7752_v45 = vpop.f32.mrb[86].mxu0  ;;  %v7808_v57 = vpop.f32.mrb[86].mxu1  ;;  %v5219_v12 = vadd.f32 %v7749_v18, %v5218_v5  ;;  %v5256_v21 = vadd.f32 %v5255_v50, %v5241_v41 }
 0x632   :  { %v4790_v10 = vrot.slane %v4789_v44, 1  ;;  %v4827_v46 = vadd.f32 %v4826_v32, %v4825_v54  ;;  %v5011_v38 = vrot.slane %v5010_v42, 1  ;;  %v5158_v61 = vpop.f32.mrb[87].mxu0  ;;  %v5379_v48 = vpop.f32.mrb[87].mxu1  ;;  %v5463_v43 = vmul.f32 %v7805_v3, %v7805_v3 }
 0x633   :  { %v5048_v51 = vadd.f32 %v5047_v52, %v5046_v1  ;;  %v5477_v58 = vadd.f32 %v5476_v16, %v5462_v19  ;;  %v5220_v27 = vadd.f32 %v5219_v12, %v5158_v61  ;;  %v5243_v59 = vmul.f32 %v5158_v61, %v5158_v61 }
 0x634   :  { %v4791_v13 = vadd.f32 %v4790_v10, %v4789_v44  ;;  %v4828_v53 = vrot.slane %v4827_v46, 1  ;;  %v5012_v25 = vadd.f32 %v5011_v38, %v5010_v42  ;;  %v5257_v35 = vadd.f32 %v5256_v21, %v5242_v55 }
 0x635   :  { %v5049_v30 = vrot.slane %v5048_v51, 1  ;;  %v5440_v4 = vadd.f32 %v7805_v3, %v5439_v34  ;;  %v7755_v47 = vpop.f32.mrb[88].mxu0  ;;  %v7811_v0 = vpop.f32.mrb[88].mxu1  ;;  %v5464_v23 = vmul.f32 %v5379_v48, %v5379_v48  ;;  %v5478_v63 = vadd.f32 %v5477_v58, %v5463_v43 }
 0x636   :  { %v4829_v49 = vadd.f32 %v4828_v53, %v4827_v46  ;;  %v13469_v11 = vadd.f32 %v5012_v25, %v4791_v13  ;;  %v5168_v2 = vpop.f32.mrb[89].mxu0  ;;  %v5389_v50 = vpop.f32.mrb[89].mxu1  ;;  %v5244_v18 = vmul.f32 %v7752_v45, %v7752_v45  ;;  %v5258_v62 = vadd.f32 %v5257_v35, %v5243_v59 }
 0x637   :  { %v5050_v9 = vadd.f32 %v5049_v30, %v5048_v51  ;;  %v5441_v54 = vadd.f32 %v5440_v4, %v5379_v48  ;;  %v5465_v6 = vmul.f32 %v7808_v57, %v7808_v57  ;;  %v5479_v26 = vadd.f32 %v5478_v63, %v5464_v23 }
 0x638   :  { %v5221_v29 = vadd.f32 %v7752_v45, %v5220_v27  ;;  %v5245_v1 = vmul.f32 %v5168_v2, %v5168_v2  ;;  %v5259_v3 = vadd.f32 %v5258_v62, %v5244_v18  ;;  %v5466_v44 = vmul.f32 %v5389_v50, %v5389_v50 }
 0x639   :  { %v13471_v16 = vadd.f32 %v5050_v9, %v4829_v49  ;;  %v5442_v5 = vadd.f32 %v7808_v57, %v5441_v54  ;;  %v7758_v32 = vpop.f32.mrb[90].mxu0  ;;  %v7814_v42 = vpop.f32.mrb[90].mxu1  ;;  %v5480_v52 = vadd.f32 %v5479_v26, %v5465_v6  ;;  %v5246_v12 = vmul.f32 %v7755_v47, %v7755_v47 }
 0x63a   :  { %v5222_v41 = vadd.f32 %v5221_v29, %v5168_v2  ;;  %v5178_v34 = vpop.f32.mrb[91].mxu0  ;;  %v5399_v19 = vpop.f32.mrb[91].mxu1  ;;  %v5260_v10 = vadd.f32 %v5259_v3, %v5245_v1  ;;  %v5467_v21 = vmul.f32 %v7811_v0, %v7811_v0  ;;  %v5248_v27 = vmul.f32 %v7758_v32, %v7758_v32 }
 0x63b   :  { %v5443_v46 = vadd.f32 %v5442_v5, %v5389_v50  ;;  %v5247_v38 = vmul.f32 %v5178_v34, %v5178_v34  ;;  %v5481_v61 = vadd.f32 %v5480_v52, %v5466_v44  ;;  %v5468_v45 = vmul.f32 %v5399_v19, %v5399_v19 }
 0x63c   :  { %v5223_v48 = vadd.f32 %v7755_v47, %v5222_v41  ;;  %v5261_v51 = vadd.f32 %v5260_v10, %v5246_v12  ;;  %v5469_v4 = vmul.f32 %v7814_v42, %v7814_v42 }
 0x63d   :  { %v5444_v55 = vadd.f32 %v7811_v0, %v5443_v46  ;;  %v7761_v43 = vpop.f32.mrb[92].mxu0  ;;  %v7817_v58 = vpop.f32.mrb[92].mxu1  ;;  %v5482_v13 = vadd.f32 %v5481_v61, %v5467_v21 }
 0x63e   :  { %v5224_v57 = vadd.f32 %v5223_v48, %v5178_v34  ;;  %v5188_v53 = vpop.f32.mrb[93].mxu0  ;;  %v5409_v25 = vpop.f32.mrb[93].mxu1  ;;  %v5262_v30 = vadd.f32 %v5261_v51, %v5247_v38  ;;  %v5250_v6 = vmul.f32 %v7761_v43, %v7761_v43  ;;  %v5471_v3 = vmul.f32 %v7817_v58, %v7817_v58 }
 0x63f   :  { %v5445_v59 = vadd.f32 %v5444_v55, %v5399_v19  ;;  %v5249_v35 = vmul.f32 %v5188_v53, %v5188_v53  ;;  %v5483_v49 = vadd.f32 %v5482_v13, %v5468_v45  ;;  %v5470_v63 = vmul.f32 %v5409_v25, %v5409_v25 }
 0x640   :  { %v5225_v23 = vadd.f32 %v7758_v32, %v5224_v57  ;;  %v5263_v2 = vadd.f32 %v5262_v30, %v5248_v27 }
 0x641   :  { %v5446_v50 = vadd.f32 %v7814_v42, %v5445_v59  ;;  %v7764_v47 = vpop.f32.mrb[94].mxu0  ;;  %v7820_v9 = vpop.f32.mrb[94].mxu1  ;;  %v5484_v0 = vadd.f32 %v5483_v49, %v5469_v4 }
 0x642   :  { %v5226_v18 = vadd.f32 %v5225_v23, %v5188_v53  ;;  %v5198_v62 = vpop.f32.mrb[95].mxu0  ;;  %v5419_v54 = vpop.f32.mrb[95].mxu1  ;;  %v5264_v26 = vadd.f32 %v5263_v2, %v5249_v35  ;;  %v5252_v38 = vmul.f32 %v7764_v47, %v7764_v47  ;;  %v5473_v45 = vmul.f32 %v7820_v9, %v7820_v9 }
 0x643   :  { %v5447_v29 = vadd.f32 %v5446_v50, %v5409_v25  ;;  %v5251_v1 = vmul.f32 %v5198_v62, %v5198_v62  ;;  %v5485_v5 = vadd.f32 %v5484_v0, %v5470_v63  ;;  %v5472_v41 = vmul.f32 %v5419_v54, %v5419_v54 }
 0x644   :  { %v5227_v44 = vadd.f32 %v7761_v43, %v5226_v18  ;;  %v5265_v52 = vadd.f32 %v5264_v26, %v5250_v6 }
 0x645   :  { %v5448_v34 = vadd.f32 %v7817_v58, %v5447_v29  ;;  %v7767_v32 = vpop.f32.mrb[96].mxu0  ;;  %v7823_v19 = vpop.f32.mrb[96].mxu1  ;;  %v5486_v42 = vadd.f32 %v5485_v5, %v5471_v3 }
 0x646   :  { %v5228_v12 = vadd.f32 %v5227_v44, %v5198_v62  ;;  %v5208_v10 = vpop.f32.mrb[97].mxu0  ;;  %v5429_v46 = vpop.f32.mrb[97].mxu1  ;;  %v5266_v21 = vadd.f32 %v5265_v52, %v5251_v1  ;;  %v5254_v30 = vmul.f32 %v7767_v32, %v7767_v32  ;;  %v5475_v23 = vmul.f32 %v7823_v19, %v7823_v19 }
 0x647   :  { %v5449_v61 = vadd.f32 %v5448_v34, %v5419_v54  ;;  %v5253_v48 = vmul.f32 %v5208_v10, %v5208_v10  ;;  %v5487_v51 = vadd.f32 %v5486_v42, %v5472_v41  ;;  %v5474_v57 = vmul.f32 %v5429_v46, %v5429_v46 }
 0x648   :  { %v5229_v55 = vadd.f32 %v7764_v47, %v5228_v12  ;;  %v5267_v13 = vadd.f32 %v5266_v21, %v5252_v38 }
 0x649   :  { %v5450_v53 = vadd.f32 %v7820_v9, %v5449_v61  ;;  %v5488_v25 = vadd.f32 %v5487_v51, %v5473_v45 }
 0x64a   :  { %v5230_v43 = vadd.f32 %v5229_v55, %v5208_v10  ;;  %v13473_v27 = vpop.f32.mrb[98].mxu0  ;;  %v13475_v58 = vpop.f32.mrb[98].mxu1  ;;  %v5268_v59 = vadd.f32 %v5267_v13, %v5253_v48 }
 0x64b   :  { %v5451_v35 = vadd.f32 %v5450_v53, %v5429_v46  ;;  %v13477_v4 = vpop.f32.mrb[99].mxu0  ;;  %v13479_v49 = vpop.f32.mrb[99].mxu1  ;;  %v5489_v2 = vadd.f32 %v5488_v25, %v5474_v57 }
 0x64c   :  { %v5231_v63 = vadd.f32 %v7767_v32, %v5230_v43  ;;  %v5269_v50 = vadd.f32 %v5268_v59, %v5254_v30 }
 0x64d   :  { %v5452_v47 = vadd.f32 %v7823_v19, %v5451_v35  ;;  %v5490_v9 = vadd.f32 %v5489_v2, %v5475_v23 }
 0x64e   :  { %v5232_v18 = vrot.slane %v5231_v63, 4  ;;  %v13481_v0 = vpop.f32.mrb[100].mxu0  ;;  %v13483_v62 = vpop.f32.mrb[100].mxu1  ;;  %v5270_v54 = vrot.slane %v5269_v50, 4 }
 0x64f   :  { %v5453_v6 = vrot.slane %v5452_v47, 4  ;;  %v13485_v26 = vpop.f32.mrb[101].mxu0  ;;  %v13487_v29 = vpop.f32.mrb[101].mxu1  ;;  %v5491_v3 = vrot.slane %v5490_v9, 4 }
 0x650   :  { %v5233_v1 = vadd.f32 %v5232_v18, %v5231_v63  ;;  %v5271_v5 = vadd.f32 %v5270_v54, %v5269_v50 }
 0x651   :  { %v5454_v44 = vadd.f32 %v5453_v6, %v5452_v47  ;;  %v5492_v52 = vadd.f32 %v5491_v3, %v5490_v9 }
 0x652   :  { %v5234_v41 = vrot.slane %v5233_v1, 2  ;;  %v13489_v34 = vpop.f32.mrb[102].mxu0  ;;  %v13491_v32 = vpop.f32.mrb[102].mxu1  ;;  %v5272_v19 = vrot.slane %v5271_v5, 2 }
 0x653   :  { %v5455_v12 = vrot.slane %v5454_v44, 2  ;;  %v13493_v42 = vpop.f32.mrb[103].mxu0  ;;  %v13495_v10 = vpop.f32.mrb[103].mxu1  ;;  %v5493_v38 = vrot.slane %v5492_v52, 2 }
 0x654   :  { %v5235_v46 = vadd.f32 %v5234_v41, %v5233_v1  ;;  %v5273_v21 = vadd.f32 %v5272_v19, %v5271_v5 }
 0x655   :  { %v5456_v61 = vadd.f32 %v5455_v12, %v5454_v44  ;;  %v5494_v45 = vadd.f32 %v5493_v38, %v5492_v52 }
 0x656   :  { %v5236_v48 = vrot.slane %v5235_v46, 1  ;;  %v13497_v51 = vpop.f32.mrb[104].mxu0  ;;  %v13499_v55 = vpop.f32.mrb[104].mxu1  ;;  %v5274_v57 = vrot.slane %v5273_v21, 1 }
 0x657   :  { %v5457_v13 = vrot.slane %v5456_v61, 1  ;;  %v13501_v53 = vpop.f32.mrb[105].mxu0  ;;  %v13503_v43 = vpop.f32.mrb[105].mxu1  ;;  %v5495_v30 = vrot.slane %v5494_v45, 1 }
 0x658   :  { %v5237_v25 = vadd.f32 %v5236_v48, %v5235_v46  ;;  %v5275_v59 = vadd.f32 %v5274_v57, %v5273_v21 }
 0x659   :  { %v5458_v23 = vadd.f32 %v5457_v13, %v5456_v61  ;;  %v5496_v47 = vadd.f32 %v5495_v30, %v5494_v45 }
 0x65a   :  { %v5238_v35 = vadd.f32 %v5237_v25, %v13469_v11  ;;  %v13506_v63 = vpop.f32.mrb[106].mxu0  ;;  %v13508_v2 = vpop.f32.mrb[106].mxu1  ;;  %v5276_v50 = vadd.f32 %v5275_v59, %v13471_v16 }
 0x65b   :  { %v13511_v18 = vpop.f32.mrb[107].mxu0  ;;  %v13513_v9 = vpop.f32.mrb[107].mxu1 }
 0x65c   :  { %15011 = vst [vmem:[#allocation49_spill] sm:$0xff] %v13511_v18  ;;  %15012 = vst [vmem:[#allocation29_spill] sm:$0xff] %v13513_v9  ;;  %v5459_v54 = vadd.f32 %v5458_v23, %v5238_v35  ;;  %v5497_v6 = vadd.f32 %v5496_v47, %v5276_v50  ;;  %v51_v47 = vld [vmem:[%s14189_s12] sm:$0x1] }
 0x65e   :  { %v5498_v1 = vmul.f32 0.001953125, %v5459_v54  ;;  %v13515_v3 = vpop.f32.mrb[108].mxu0  ;;  %v13517_v5 = vpop.f32.mrb[108].mxu1  ;;  %v5499_v11 = vmul.f32 0.001953125, %v5497_v6 }
 0x65f   :  { %15013 = vst [vmem:[#allocation115_spill] sm:$0xff] %v13515_v3  ;;  %15014 = vst [vmem:[#allocation22_spill] sm:$0xff] %v13517_v5  ;;  %v13519_v44 = vpop.f32.mrb[109].mxu0  ;;  %v13521_v41 = vpop.f32.mrb[109].mxu1 }
 0x660   :  { %15015 = vst [vmem:[#allocation32_spill] sm:$0xff] %v13519_v44  ;;  %15016 = vst [vmem:[#allocation58_spill] sm:$0xff] %v13521_v41  ;;  %v5500_v52 = vmul.f32 %v5498_v1, %v5498_v1 }
 0x662   :  { %v5501_v19 = vsub.f32 %v5499_v11, %v5500_v52  ;;  %v13523_v16 = vpop.f32.mrb[110].mxu0  ;;  %v13525_v12 = vpop.f32.mrb[110].mxu1 }
 0x663   :  { %15017 = vst [vmem:[#allocation79_spill] sm:$0xff] %v13523_v16  ;;  %15018 = vst [vmem:[#allocation75_spill] sm:$0xff] %v13525_v12  ;;  %v13527_v46 = vpop.f32.mrb[111].mxu0  ;;  %v13529_v38 = vpop.f32.mrb[111].mxu1 }
 0x664   :  { %15019 = vst [vmem:[#allocation111_spill] sm:$0xff] %v13527_v46  ;;  %15020 = vst [vmem:[#allocation5_spill] sm:$0xff] %v13529_v38  ;;  %v5502_v21 = vmax.f32 %v5501_v19, 0.0 }
 0x666   :  { %v5503_v61 = vadd.f32 1e-05, %v5502_v21  ;;  %v13531_v48 = vpop.f32.mrb[112].mxu0  ;;  %v13533_v45 = vpop.f32.mrb[112].mxu1 }
 0x667   :  { %15021 = vst [vmem:[#allocation76_spill] sm:$0xff] %v13531_v48  ;;  %15022 = vst [vmem:[#allocation35_spill] sm:$0xff] %v13533_v45  ;;  %v13535_v57 = vpop.f32.mrb[113].mxu0  ;;  %v13537_v13 = vpop.f32.mrb[113].mxu1  ;;  %v5562_v45 = vld [vmem:[%s14178_s0 + $0x60] sm:$0xff] }
 0x668   :  { %15023 = vst [vmem:[#allocation33_spill] sm:$0xff] %v13535_v57  ;;  %15024 = vst [vmem:[#allocation48_spill] sm:$0xff] %v13537_v13  ;;  %8543 = vrsqrt.f32 %v5503_v61  ;;  %v52_v61 = vld [vmem:[%s14190_s13] sm:$0x1]  ;;  %v5560_v13 = vld [vmem:[%s14178_s0 + $0x50] sm:$0xff] }
 0x669   :  { %v5561_v57 = vld [vmem:[%s14178_s0 + $0x58] sm:$0xff] }
 0x66b   :  { %v13539_v25 = vpop.f32.mrb[114].mxu0  ;;  %v13541_v30 = vpop.f32.mrb[114].mxu1 }
 0x66c   :  { %15025 = vst [vmem:[#allocation80_spill] sm:$0xff] %v13539_v25  ;;  %15026 = vst [vmem:[#allocation72_spill] sm:$0xff] %v13541_v30  ;;  %v13543_v59 = vpop.f32.mrb[115].mxu0  ;;  %v13545_v35 = vpop.f32.mrb[115].mxu1  ;;  %v5558_v30 = vld [vmem:[%s14178_s0 + $0x40] sm:$0xff]  ;;  %v5559_v25 = vld [vmem:[%s14178_s0 + $0x48] sm:$0xff] }
 0x66d   :  { %15027 = vst [vmem:[#allocation112_spill] sm:$0xff] %v13543_v59  ;;  %15028 = vst [vmem:[#allocation52_spill] sm:$0xff] %v13545_v35 }
 0x66f   :  { %v13547_v23 = vpop.f32.mrb[116].mxu0  ;;  %v13549_v50 = vpop.f32.mrb[116].mxu1 }
 0x670   :  { %15029 = vst [vmem:[#allocation103_spill] sm:$0xff] %v13547_v23  ;;  %15030 = vst [vmem:[#allocation13_spill] sm:$0xff] %v13549_v50  ;;  %v13554_v54 = vpop.f32.mrb[117].mxu0  ;;  %v13556_v6 = vpop.f32.mrb[117].mxu1 }
 0x671   :  { %15031 = vst [vmem:[#allocation104_spill] sm:$0xff] %v13554_v54  ;;  %15032 = vst [vmem:[#allocation8_spill] sm:$0xff] %v13556_v6 }
 0x672   :  { %v8544_v11 = vpop.eup %8543 }
 0x673   :  { %v5505_v52 = vmul.f32 %v8544_v11, %v51_v47  ;;  %v13558_v19 = vpop.f32.mrb[118].mxu0  ;;  %v13560_v21 = vpop.f32.mrb[118].mxu1 }
 0x674   :  { %15033 = vst [vmem:[#allocation41_spill] sm:$0xff] %v13558_v19  ;;  %15034 = vst [vmem:[#allocation50_spill] sm:$0xff] %v13560_v21  ;;  %v13565_v23 = vpop.f32.mrb[119].mxu0  ;;  %v13567_v50 = vpop.f32.mrb[119].mxu1 }
 0x675   :  { %15035 = vst [vmem:[#allocation54_spill] sm:$0xff] %v13565_v23  ;;  %15036 = vst [vmem:[#allocation113_spill] sm:$0xff] %v13567_v50  ;;  %v5506_v35 = vmul.f32 %v5505_v52, %v5498_v1  ;;  %v13570_v59 = vrot.slane %v5505_v52, %v14831_v39  ;;  %v5556_v50 = vld [vmem:[%s14178_s0 + $0x30] sm:$0xff]  ;;  %v5557_v23 = vld [vmem:[%s14178_s0 + $0x38] sm:$0xff] }
 0x677   :  { %v5507_v54 = vsub.f32 %v52_v61, %v5506_v35  ;;  %v5512_v47 = vmul.f32 %v13570_v59, %v13393_v17  ;;  %v5513_v11 = vmul.f32 %v13389_v31, %v13570_v59  ;;  %v5514_v21 = vmul.f32 %v13570_v59, %v13401_v33  ;;  %v13578_v19 = vpop.f32.mrb[120].mxu0  ;;  %v13580_v6 = vpop.f32.mrb[120].mxu1 }
 0x678   :  { %15037 = vst [vmem:[#allocation60_spill] sm:$0xff] %v13578_v19  ;;  %15038 = vst [vmem:[#allocation116_spill] sm:$0xff] %v13580_v6  ;;  %v5515_v1 = vmul.f32 %v13399_v7, %v13570_v59  ;;  %v5516_v52 = vmul.f32 %v13570_v59, %v13411_v22  ;;  %v5517_v35 = vmul.f32 %v13408_v8, %v13570_v59  ;;  %v13590_v31 = vpop.f32.mrb[121].mxu0  ;;  %v13592_v61 = vpop.f32.mrb[121].mxu1  ;;  %v5555_v19 = vld [vmem:[%s14178_s0 + $0x28] sm:$0xff] }
 0x679   :  { %v5518_v17 = vmul.f32 %v13570_v59, %v13421_v24  ;;  %15039 = vst [vmem:[#allocation7_spill] sm:$0xff] %v13590_v31  ;;  %15040 = vst [vmem:[#allocation51_spill] sm:$0xff] %v13592_v61  ;;  %v5519_v33 = vmul.f32 %v13418_v36, %v13570_v59  ;;  %v5520_v6 = vmul.f32 %v13570_v59, %v13431_v37  ;;  %v5554_v31 = vld [vmem:[%s14178_s0 + $0x20] sm:$0xff] }
 0x67a   :  { %v5521_v7 = vmul.f32 %v13428_v15, %v13570_v59  ;;  %v5522_v22 = vmul.f32 %v13570_v59, %v13441_v60  ;;  %v5523_v8 = vmul.f32 %v13438_v40, %v13570_v59  ;;  %v5524_v24 = vmul.f32 %v13570_v59, %v13451_v28 }
 0x67b   :  { %v5525_v61 = vmul.f32 %v13448_v20, %v13570_v59  ;;  %v5526_v36 = vmul.f32 %v13570_v59, %v13461_v14  ;;  %v5527_v37 = vmul.f32 %v13458_v56, %v13570_v59  ;;  %v13613_v15 = vrot.slane %v5507_v54, %v14831_v39  ;;  %v5550_v20 = vld [vmem:[%s14178_s0] sm:$0xff] }
 0x67c   :  { %v13617_v60 = vmul.f32 %v13473_v27, %v13570_v59  ;;  %v13621_v40 = vmul.f32 %v13475_v58, %v13570_v59  ;;  %v13628_v28 = vmul.f32 %v13477_v4, %v13570_v59  ;;  %v13632_v39 = vmul.f32 %v13479_v49, %v13570_v59  ;;  %v5551_v49 = vld [vmem:[%s14178_s0 + $0x8] sm:$0xff] }
 0x67d   :  { %v13636_v56 = vmul.f32 %v13481_v0, %v13570_v59  ;;  %v13640_v14 = vmul.f32 %v13483_v62, %v13570_v59  ;;  %v5534_v27 = vadd.f32 %v13613_v15, %v5512_v47  ;;  %v5535_v58 = vadd.f32 %v13613_v15, %v5513_v11  ;;  %v5552_v0 = vld [vmem:[%s14178_s0 + $0x10] sm:$0xff]  ;;  %v5553_v62 = vld [vmem:[%s14178_s0 + $0x18] sm:$0xff] }
 0x67e   :  { %v5536_v54 = vadd.f32 %v13613_v15, %v5514_v21  ;;  %v5537_v4 = vadd.f32 %v13613_v15, %v5515_v1  ;;  %v5538_v47 = vadd.f32 %v13613_v15, %v5516_v52  ;;  %v5539_v11 = vadd.f32 %v13613_v15, %v5517_v35 }
 0x67f   :  { %v5540_v21 = vadd.f32 %v13613_v15, %v5518_v17  ;;  %v5541_v1 = vadd.f32 %v13613_v15, %v5519_v33  ;;  %v5542_v52 = vadd.f32 %v13613_v15, %v5520_v6  ;;  %v5543_v35 = vadd.f32 %v13613_v15, %v5521_v7 }
 0x680   :  { %v5544_v17 = vadd.f32 %v13613_v15, %v5522_v22  ;;  %v5545_v33 = vadd.f32 %v13613_v15, %v5523_v8  ;;  %v5546_v6 = vadd.f32 %v13613_v15, %v5524_v24  ;;  %v5547_v7 = vadd.f32 %v13613_v15, %v5525_v61  ;;  %v5563_v61 = vld [vmem:[%s14178_s0 + $0x68] sm:$0xff]  ;;  %v5564_v24 = vld [vmem:[%s14178_s0 + $0x70] sm:$0xff] }
 0x681   :  { %v5548_v22 = vadd.f32 %v13613_v15, %v5526_v36  ;;  %v5549_v8 = vadd.f32 %v13613_v15, %v5527_v37  ;;  %v5565_v36 = vld [vmem:[%s14178_s0 + $0x78] sm:$0xff]  ;;  %v5566_v37 = vadd.f32 %v5550_v20, %v5534_v27  ;;  %v5567_v48 = vadd.f32 %v5551_v49, %v5535_v58  ;;  %v5873_v20 = vld [vmem:[%s14178_s0 + $0x90] sm:$0xff]  ;;  %v5876_v27 = vld [vmem:[%s14178_s0 + $0xa8] sm:$0xff] }
 0x682   :  { %v5568_v38 = vadd.f32 %v5552_v0, %v5536_v54  ;;  %v5569_v46 = vadd.f32 %v5553_v62, %v5537_v4  ;;  %v5570_v12 = vadd.f32 %v5554_v31, %v5538_v47  ;;  %v5571_v16 = vadd.f32 %v5555_v19, %v5539_v11 }
 0x683   :  { %v5572_v41 = vadd.f32 %v5556_v50, %v5540_v21  ;;  %v5573_v44 = vadd.f32 %v5557_v23, %v5541_v1  ;;  %v5574_v5 = vadd.f32 %v5558_v30, %v5542_v52  ;;  %v5575_v3 = vadd.f32 %v5559_v25, %v5543_v35  ;;  %5582 = vst [vmem:[%s14191_s14] sm:$0xff] %v5566_v37  ;;  %v5878_v52 = vld [vmem:[%s14178_s0 + $0xb8] sm:$0xff] }
 0x684   :  { %v5576_v9 = vadd.f32 %v5560_v13, %v5544_v17  ;;  %v5577_v18 = vadd.f32 %v5561_v57, %v5545_v33  ;;  %5583 = vst [vmem:[%s14191_s14 + $0x8] sm:$0xff] %v5567_v48  ;;  %5584 = vst [vmem:[%s14191_s14 + $0x10] sm:$0xff] %v5568_v38  ;;  %v5872_v57 = vld [vmem:[%s14178_s0 + $0x88] sm:$0xff]  ;;  %v5578_v13 = vadd.f32 %v5562_v45, %v5546_v6  ;;  %v6199_v35 = vld [vmem:[%s14178_s0 + $0x138] sm:$0xff] }
 0x685   :  { %5585 = vst [vmem:[%s14191_s14 + $0x18] sm:$0xff] %v5569_v46  ;;  %v5579_v25 = vadd.f32 %v5563_v61, %v5547_v7  ;;  %v5580_v30 = vadd.f32 %v5564_v24, %v5548_v22  ;;  %v5581_v23 = vadd.f32 %v5565_v36, %v5549_v8  ;;  %5586 = vst [vmem:[%s14191_s14 + $0x20] sm:$0xff] %v5570_v12  ;;  %v6193_v46 = vld [vmem:[%s14178_s0 + $0x108] sm:$0xff]  ;;  %v5871_v12 = vld [vmem:[%s14178_s0 + $0x80] sm:$0xff] }
 0x686   :  { %5587 = vst [vmem:[%s14191_s14 + $0x28] sm:$0xff] %v5571_v16  ;;  %5588 = vst [vmem:[%s14191_s14 + $0x30] sm:$0xff] %v5572_v41  ;;  %v6192_v16 = vld [vmem:[%s14178_s0 + $0x100] sm:$0xff]  ;;  %v6177_v41 = vadd.f32 %v13621_v40, %v13613_v15  ;;  %v5858_v38 = vadd.f32 %v13636_v56, %v13613_v15  ;;  %v6179_v48 = vadd.f32 %v13640_v14, %v13613_v15  ;;  %v5877_v61 = vld [vmem:[%s14178_s0 + $0xb0] sm:$0xff] }
 0x687   :  { %5589 = vst [vmem:[%s14191_s14 + $0x38] sm:$0xff] %v5573_v44  ;;  %5590 = vst [vmem:[%s14191_s14 + $0x40] sm:$0xff] %v5574_v5  ;;  %v5856_v44 = vadd.f32 %v13617_v60, %v13613_v15  ;;  %v5855_v5 = vadd.f32 %v13628_v28, %v13613_v15  ;;  %v5841_v45 = vmul.f32 %v13485_v26, %v13570_v59  ;;  %v6194_v28 = vld [vmem:[%s14178_s0 + $0x110] sm:$0xff] }
 0x688   :  { %5591 = vst [vmem:[%s14191_s14 + $0x48] sm:$0xff] %v5575_v3  ;;  %5592 = vst [vmem:[%s14191_s14 + $0x50] sm:$0xff] %v5576_v9  ;;  %v6176_v3 = vadd.f32 %v13632_v39, %v13613_v15  ;;  %v5874_v9 = vld [vmem:[%s14178_s0 + $0x98] sm:$0xff]  ;;  %v6162_v50 = vmul.f32 %v13487_v29, %v13570_v59  ;;  %v6209_v31 = vadd.f32 %v6193_v46, %v6177_v41  ;;  %v6198_v24 = vld [vmem:[%s14178_s0 + $0x130] sm:$0xff] }
 0x689   :  { %5593 = vst [vmem:[%s14191_s14 + $0x58] sm:$0xff] %v5577_v18  ;;  %v6195_v18 = vld [vmem:[%s14178_s0 + $0x118] sm:$0xff]  ;;  %5594 = vst [vmem:[%s14191_s14 + $0x60] sm:$0xff] %v5578_v13  ;;  %v5888_v19 = vadd.f32 %v5872_v57, %v5856_v44  ;;  %v5887_v60 = vadd.f32 %v5871_v12, %v5855_v5  ;;  %v5890_v39 = vadd.f32 %v5874_v9, %v5858_v38  ;;  %v5880_v13 = vld [vmem:[%s14178_s0 + $0xc8] sm:$0xff] }
 0x68a   :  { %5595 = vst [vmem:[%s14191_s14 + $0x68] sm:$0xff] %v5579_v25  ;;  %5596 = vst [vmem:[%s14191_s14 + $0x70] sm:$0xff] %v5580_v30  ;;  %v6208_v40 = vadd.f32 %v6192_v16, %v6176_v3  ;;  %v6211_v56 = vadd.f32 %v6195_v18, %v6179_v48  ;;  %v5857_v14 = vadd.f32 %v5841_v45, %v13613_v15  ;;  %v15041_v30 = vld [vmem:[#allocation49_spill] sm:$0xff]  ;;  %v5879_v44 = vld [vmem:[%s14178_s0 + $0xc0] sm:$0xff] }
 0x68b   :  { %5597 = vst [vmem:[%s14191_s14 + $0x78] sm:$0xff] %v5581_v23  ;;  %v6178_v26 = vadd.f32 %v6162_v50, %v13613_v15  ;;  %5904 = vst [vmem:[%s14191_s14 + $0x88] sm:$0xff] %v5888_v19  ;;  %v5844_v29 = vmul.f32 %v13489_v34, %v13570_v59  ;;  %v6165_v58 = vmul.f32 %v13491_v32, %v13570_v59  ;;  %v6197_v32 = vld [vmem:[%s14178_s0 + $0x128] sm:$0xff]  ;;  %v6200_v41 = vld [vmem:[%s14178_s0 + $0x140] sm:$0xff] }
 0x68c   :  { %6225 = vst [vmem:[%s14191_s14 + $0x108] sm:$0xff] %v6209_v31  ;;  %5903 = vst [vmem:[%s14191_s14 + $0x80] sm:$0xff] %v5887_v60  ;;  %v5843_v54 = vmul.f32 %v13493_v42, %v13570_v59  ;;  %v6164_v4 = vmul.f32 %v13495_v10, %v13570_v59  ;;  %v5889_v34 = vadd.f32 %v5873_v20, %v5857_v14  ;;  %v5875_v42 = vld [vmem:[%s14178_s0 + $0xa0] sm:$0xff]  ;;  %v15042_v46 = vld [vmem:[#allocation29_spill] sm:$0xff] }
 0x68d   :  { %6224 = vst [vmem:[%s14191_s14 + $0x100] sm:$0xff] %v6208_v40  ;;  %5906 = vst [vmem:[%s14191_s14 + $0x98] sm:$0xff] %v5890_v39  ;;  %v6210_v49 = vadd.f32 %v6194_v28, %v6178_v26  ;;  %v6196_v10 = vld [vmem:[%s14178_s0 + $0x120] sm:$0xff]  ;;  %v5846_v0 = vmul.f32 %v13497_v51, %v13570_v59  ;;  %v6167_v62 = vmul.f32 %v13499_v55, %v13570_v59  ;;  %v15043_v5 = vld [vmem:[#allocation115_spill] sm:$0xff] }
 0x68e   :  { %6227 = vst [vmem:[%s14191_s14 + $0x118] sm:$0xff] %v6211_v56  ;;  %v5860_v47 = vadd.f32 %v5844_v29, %v13613_v15  ;;  %v6181_v11 = vadd.f32 %v6165_v58, %v13613_v15  ;;  %v5859_v21 = vadd.f32 %v5843_v54, %v13613_v15  ;;  %v6180_v1 = vadd.f32 %v6164_v4, %v13613_v15  ;;  %v15044_v9 = vld [vmem:[#allocation22_spill] sm:$0xff]  ;;  %v5882_v19 = vld [vmem:[%s14178_s0 + $0xd8] sm:$0xff]  ;;  %v15045_v20 = vld [vmem:[#allocation32_spill] sm:$0xff] }
 0x68f   :  { %5905 = vst [vmem:[%s14191_s14 + $0x90] sm:$0xff] %v5889_v34  ;;  %6226 = vst [vmem:[%s14191_s14 + $0x110] sm:$0xff] %v6210_v49  ;;  %v5862_v51 = vadd.f32 %v5846_v0, %v13613_v15  ;;  %v6183_v55 = vadd.f32 %v6167_v62, %v13613_v15  ;;  %v5845_v17 = vmul.f32 %v13501_v53, %v13570_v59  ;;  %v6203_v31 = vld [vmem:[%s14178_s0 + $0x158] sm:$0xff]  ;;  %v15046_v39 = vld [vmem:[#allocation58_spill] sm:$0xff] }
 0x690   :  { %v6166_v33 = vmul.f32 %v13503_v43, %v13570_v59  ;;  %v5892_v6 = vadd.f32 %v5876_v27, %v5860_v47  ;;  %v6213_v7 = vadd.f32 %v6197_v32, %v6181_v11  ;;  %v5891_v22 = vadd.f32 %v5875_v42, %v5859_v21  ;;  %v5881_v58 = vld [vmem:[%s14178_s0 + $0xd0] sm:$0xff]  ;;  %v15047_v42 = vld [vmem:[#allocation79_spill] sm:$0xff]  ;;  %v5884_v0 = vld [vmem:[%s14178_s0 + $0xe8] sm:$0xff] }
 0x691   :  { %v6212_v8 = vadd.f32 %v6196_v10, %v6180_v1  ;;  %v5894_v36 = vadd.f32 %v5878_v52, %v5862_v51  ;;  %v6215_v37 = vadd.f32 %v6199_v35, %v6183_v55  ;;  %v5861_v57 = vadd.f32 %v5845_v17, %v13613_v15  ;;  %v6202_v54 = vld [vmem:[%s14178_s0 + $0x150] sm:$0xff]  ;;  %v15048_v62 = vld [vmem:[#allocation75_spill] sm:$0xff]  ;;  %v15050_v1 = vld [vmem:[#allocation5_spill] sm:$0xff] }
 0x692   :  { %v6182_v53 = vadd.f32 %v6166_v33, %v13613_v15  ;;  %5908 = vst [vmem:[%s14191_s14 + $0xa8] sm:$0xff] %v5892_v6  ;;  %6229 = vst [vmem:[%s14191_s14 + $0x128] sm:$0xff] %v6213_v7  ;;  %v5848_v43 = vmul.f32 %v13506_v63, %v13570_v59  ;;  %v6169_v25 = vmul.f32 %v13508_v2, %v13570_v59  ;;  %v6201_v2 = vld [vmem:[%s14178_s0 + $0x148] sm:$0xff]  ;;  %v15049_v11 = vld [vmem:[#allocation111_spill] sm:$0xff] }
 0x693   :  { %5907 = vst [vmem:[%s14191_s14 + $0xa0] sm:$0xff] %v5891_v22  ;;  %6228 = vst [vmem:[%s14191_s14 + $0x120] sm:$0xff] %v6212_v8  ;;  %v5847_v23 = vmul.f32 %v15041_v30, %v13570_v59  ;;  %v6168_v12 = vmul.f32 %v15042_v46, %v13570_v59  ;;  %v5893_v63 = vadd.f32 %v5877_v61, %v5861_v57  ;;  %v6205_v55 = vld [vmem:[%s14178_s0 + $0x168] sm:$0xff]  ;;  %v5883_v17 = vld [vmem:[%s14178_s0 + $0xe0] sm:$0xff] }
 0x694   :  { %5910 = vst [vmem:[%s14191_s14 + $0xb8] sm:$0xff] %v5894_v36  ;;  %6231 = vst [vmem:[%s14191_s14 + $0x138] sm:$0xff] %v6215_v37  ;;  %v6214_v16 = vadd.f32 %v6198_v24, %v6182_v53  ;;  %v5850_v3 = vmul.f32 %v15043_v5, %v13570_v59  ;;  %v6171_v18 = vmul.f32 %v15044_v9, %v13570_v59  ;;  %v6204_v33 = vld [vmem:[%s14178_s0 + $0x160] sm:$0xff]  ;;  %v15052_v22 = vld [vmem:[#allocation35_spill] sm:$0xff] }
 0x695   :  { %v5864_v38 = vadd.f32 %v5848_v43, %v13613_v15  ;;  %v6185_v48 = vadd.f32 %v6169_v25, %v13613_v15  ;;  %v5863_v45 = vadd.f32 %v5847_v23, %v13613_v15  ;;  %v6184_v50 = vadd.f32 %v6168_v12, %v13613_v15  ;;  %5909 = vst [vmem:[%s14191_s14 + $0xb0] sm:$0xff] %v5893_v63  ;;  %v15051_v6 = vld [vmem:[#allocation76_spill] sm:$0xff]  ;;  %v5886_v57 = vld [vmem:[%s14178_s0 + $0xf8] sm:$0xff]  ;;  %v15053_v25 = vld [vmem:[#allocation33_spill] sm:$0xff] }
 0x696   :  { %6230 = vst [vmem:[%s14191_s14 + $0x130] sm:$0xff] %v6214_v16  ;;  %v5866_v60 = vadd.f32 %v5850_v3, %v13613_v15  ;;  %v6187_v40 = vadd.f32 %v6171_v18, %v13613_v15  ;;  %v5849_v28 = vmul.f32 %v15045_v20, %v13570_v59  ;;  %v6170_v56 = vmul.f32 %v15046_v39, %v13570_v59  ;;  %v6207_v53 = vld [vmem:[%s14178_s0 + $0x178] sm:$0xff]  ;;  %v15054_v23 = vld [vmem:[#allocation48_spill] sm:$0xff] }
 0x697   :  { %v5896_v14 = vadd.f32 %v5880_v13, %v5864_v38  ;;  %v6217_v26 = vadd.f32 %v6201_v2, %v6185_v48  ;;  %v5895_v29 = vadd.f32 %v5879_v44, %v5863_v45  ;;  %v6216_v27 = vadd.f32 %v6200_v41, %v6184_v50  ;;  %v5885_v44 = vld [vmem:[%s14178_s0 + $0xf0] sm:$0xff]  ;;  %v15055_v38 = vld [vmem:[#allocation80_spill] sm:$0xff]  ;;  %v6514_v45 = vld [vmem:[%s14178_s0 + $0x188] sm:$0xff] }
 0x698   :  { %v5898_v4 = vadd.f32 %v5882_v19, %v5866_v60  ;;  %v6219_v34 = vadd.f32 %v6203_v31, %v6187_v40  ;;  %v5865_v49 = vadd.f32 %v5849_v28, %v13613_v15  ;;  %v6186_v32 = vadd.f32 %v6170_v56, %v13613_v15  ;;  %v6206_v41 = vld [vmem:[%s14178_s0 + $0x170] sm:$0xff]  ;;  %v15056_v50 = vld [vmem:[#allocation72_spill] sm:$0xff]  ;;  %v6522_v56 = vld [vmem:[%s14178_s0 + $0x1c8] sm:$0xff] }
 0x699   :  { %5912 = vst [vmem:[%s14191_s14 + $0xc8] sm:$0xff] %v5896_v14  ;;  %6233 = vst [vmem:[%s14191_s14 + $0x148] sm:$0xff] %v6217_v26  ;;  %v5852_v10 = vmul.f32 %v15047_v42, %v13570_v59  ;;  %v6173_v47 = vmul.f32 %v15048_v62, %v13570_v59  ;;  %v5851_v21 = vmul.f32 %v15049_v11, %v13570_v59  ;;  %v15057_v31 = vld [vmem:[#allocation112_spill] sm:$0xff]  ;;  %v6516_v42 = vld [vmem:[%s14178_s0 + $0x198] sm:$0xff] }
 0x69a   :  { %5911 = vst [vmem:[%s14191_s14 + $0xc0] sm:$0xff] %v5895_v29  ;;  %6232 = vst [vmem:[%s14191_s14 + $0x140] sm:$0xff] %v6216_v27  ;;  %v6172_v52 = vmul.f32 %v15050_v1, %v13570_v59  ;;  %v5897_v35 = vadd.f32 %v5881_v58, %v5865_v49  ;;  %v6218_v51 = vadd.f32 %v6202_v54, %v6186_v32  ;;  %v15058_v40 = vld [vmem:[#allocation52_spill] sm:$0xff]  ;;  %v15059_v29 = vld [vmem:[#allocation103_spill] sm:$0xff] }
 0x69b   :  { %5914 = vst [vmem:[%s14191_s14 + $0xd8] sm:$0xff] %v5898_v4  ;;  %6235 = vst [vmem:[%s14191_s14 + $0x158] sm:$0xff] %v6219_v34  ;;  %v5854_v7 = vmul.f32 %v15051_v6, %v13570_v59  ;;  %v6175_v8 = vmul.f32 %v15052_v22, %v13570_v59  ;;  %v5868_v61 = vadd.f32 %v5852_v10, %v13613_v15  ;;  %v6513_v14 = vld [vmem:[%s14178_s0 + $0x180] sm:$0xff]  ;;  %v15060_v58 = vld [vmem:[#allocation13_spill] sm:$0xff] }
 0x69c   :  { %v6189_v24 = vadd.f32 %v6173_v47, %v13613_v15  ;;  %v5867_v36 = vadd.f32 %v5851_v21, %v13613_v15  ;;  %v6188_v37 = vadd.f32 %v6172_v52, %v13613_v15  ;;  %5913 = vst [vmem:[%s14191_s14 + $0xd0] sm:$0xff] %v5897_v35  ;;  %6234 = vst [vmem:[%s14191_s14 + $0x150] sm:$0xff] %v6218_v51  ;;  %v6521_v26 = vld [vmem:[%s14178_s0 + $0x1c0] sm:$0xff]  ;;  %v6524_v10 = vld [vmem:[%s14178_s0 + $0x1d8] sm:$0xff] }
 0x69d   :  { %v5870_v43 = vadd.f32 %v5854_v7, %v13613_v15  ;;  %v6191_v13 = vadd.f32 %v6175_v8, %v13613_v15  ;;  %v5853_v30 = vmul.f32 %v15053_v25, %v13570_v59  ;;  %v6174_v46 = vmul.f32 %v15054_v23, %v13570_v59  ;;  %v15061_v47 = vld [vmem:[#allocation104_spill] sm:$0xff] }
 0x69e   :  { %v5900_v12 = vadd.f32 %v5884_v0, %v5868_v61  ;;  %v6221_v63 = vadd.f32 %v6205_v55, %v6189_v24  ;;  %v5899_v16 = vadd.f32 %v5883_v17, %v5867_v36  ;;  %v6220_v2 = vadd.f32 %v6204_v33, %v6188_v37  ;;  %v15062_v21 = vld [vmem:[#allocation8_spill] sm:$0xff]  ;;  %v6515_v17 = vld [vmem:[%s14178_s0 + $0x190] sm:$0xff]  ;;  %v15063_v61 = vld [vmem:[#allocation41_spill] sm:$0xff] }
 0x69f   :  { %v5902_v5 = vadd.f32 %v5886_v57, %v5870_v43  ;;  %v6223_v3 = vadd.f32 %v6207_v53, %v6191_v13  ;;  %v5869_v9 = vadd.f32 %v5853_v30, %v13613_v15  ;;  %v6190_v18 = vadd.f32 %v6174_v46, %v13613_v15  ;;  %v6523_v33 = vld [vmem:[%s14178_s0 + $0x1d0] sm:$0xff]  ;;  %v6518_v36 = vld [vmem:[%s14178_s0 + $0x1a8] sm:$0xff] }
 0x6a0   :  { %5916 = vst [vmem:[%s14191_s14 + $0xe8] sm:$0xff] %v5900_v12  ;;  %6237 = vst [vmem:[%s14191_s14 + $0x168] sm:$0xff] %v6221_v63  ;;  %v6482_v48 = vmul.f32 %v15055_v38, %v13570_v59  ;;  %v6490_v19 = vmul.f32 %v15056_v50, %v13570_v59  ;;  %v6481_v60 = vmul.f32 %v15057_v31, %v13570_v59  ;;  %v15064_v37 = vld [vmem:[#allocation50_spill] sm:$0xff]  ;;  %v15066_v13 = vld [vmem:[#allocation113_spill] sm:$0xff] }
 0x6a1   :  { %5915 = vst [vmem:[%s14191_s14 + $0xe0] sm:$0xff] %v5899_v16  ;;  %6236 = vst [vmem:[%s14191_s14 + $0x160] sm:$0xff] %v6220_v2  ;;  %v6489_v20 = vmul.f32 %v15058_v40, %v13570_v59  ;;  %v5901_v28 = vadd.f32 %v5885_v44, %v5869_v9  ;;  %v6222_v39 = vadd.f32 %v6206_v41, %v6190_v18  ;;  %v15065_v53 = vld [vmem:[#allocation54_spill] sm:$0xff]  ;;  %v6526_v46 = vld [vmem:[%s14178_s0 + $0x1e8] sm:$0xff] }
 0x6a2   :  { %5918 = vst [vmem:[%s14191_s14 + $0xf8] sm:$0xff] %v5902_v5  ;;  %6239 = vst [vmem:[%s14191_s14 + $0x178] sm:$0xff] %v6223_v3  ;;  %v6484_v27 = vmul.f32 %v15059_v29, %v13570_v59  ;;  %v6492_v54 = vmul.f32 %v15060_v58, %v13570_v59  ;;  %v6498_v4 = vadd.f32 %v6482_v48, %v13613_v15  ;;  %v6517_v12 = vld [vmem:[%s14178_s0 + $0x1a0] sm:$0xff]  ;;  %v6520_v38 = vld [vmem:[%s14178_s0 + $0x1b8] sm:$0xff] }
 0x6a3   :  { %v6506_v34 = vadd.f32 %v6490_v19, %v13613_v15  ;;  %v6497_v49 = vadd.f32 %v6481_v60, %v13613_v15  ;;  %v6505_v32 = vadd.f32 %v6489_v20, %v13613_v15  ;;  %5917 = vst [vmem:[%s14191_s14 + $0xf0] sm:$0xff] %v5901_v28  ;;  %6238 = vst [vmem:[%s14191_s14 + $0x170] sm:$0xff] %v6222_v39  ;;  %v6525_v63 = vld [vmem:[%s14178_s0 + $0x1e0] sm:$0xff]  ;;  %v6528_v48 = vld [vmem:[%s14178_s0 + $0x1f8] sm:$0xff] }
 0x6a4   :  { %v6500_v0 = vadd.f32 %v6484_v27, %v13613_v15  ;;  %v6508_v62 = vadd.f32 %v6492_v54, %v13613_v15  ;;  %v6483_v11 = vmul.f32 %v15061_v47, %v13570_v59  ;;  %v6491_v1 = vmul.f32 %v15062_v21, %v13570_v59  ;;  %v15067_v16 = vld [vmem:[#allocation60_spill] sm:$0xff]  ;;  %v15069_v19 = vld [vmem:[#allocation7_spill] sm:$0xff] }
 0x6a5   :  { %v6530_v52 = vadd.f32 %v6514_v45, %v6498_v4  ;;  %v6538_v35 = vadd.f32 %v6522_v56, %v6506_v34  ;;  %v6529_v51 = vadd.f32 %v6513_v14, %v6497_v49  ;;  %v6537_v55 = vadd.f32 %v6521_v26, %v6505_v32  ;;  %v15068_v44 = vld [vmem:[#allocation116_spill] sm:$0xff]  ;;  %v15070_v60 = vld [vmem:[#allocation51_spill] sm:$0xff]  ;;  %v6519_v14 = vld [vmem:[%s14178_s0 + $0x1b0] sm:$0xff] }
 0x6a6   :  { %v6532_v6 = vadd.f32 %v6516_v42, %v6500_v0  ;;  %v6540_v7 = vadd.f32 %v6524_v10, %v6508_v62  ;;  %v6499_v22 = vadd.f32 %v6483_v11, %v13613_v15  ;;  %v6507_v8 = vadd.f32 %v6491_v1, %v13613_v15  ;;  %v6527_v26 = vld [vmem:[%s14178_s0 + $0x1f0] sm:$0xff] }
 0x6a7   :  { %6546 = vst [vmem:[%s14191_s14 + $0x188] sm:$0xff] %v6530_v52  ;;  %6554 = vst [vmem:[%s14191_s14 + $0x1c8] sm:$0xff] %v6538_v35  ;;  %v6486_v24 = vmul.f32 %v15063_v61, %v13570_v59  ;;  %v6494_v57 = vmul.f32 %v15064_v37, %v13570_v59  ;;  %v6485_v43 = vmul.f32 %v15065_v53, %v13570_v59 }
 0x6a8   :  { %6545 = vst [vmem:[%s14191_s14 + $0x180] sm:$0xff] %v6529_v51  ;;  %6553 = vst [vmem:[%s14191_s14 + $0x1c0] sm:$0xff] %v6537_v55  ;;  %v6493_v25 = vmul.f32 %v15066_v13, %v13570_v59  ;;  %v6531_v30 = vadd.f32 %v6515_v17, %v6499_v22  ;;  %v6539_v23 = vadd.f32 %v6523_v33, %v6507_v8 }
 0x6a9   :  { %6548 = vst [vmem:[%s14191_s14 + $0x198] sm:$0xff] %v6532_v6  ;;  %6556 = vst [vmem:[%s14191_s14 + $0x1d8] sm:$0xff] %v6540_v7  ;;  %v6488_v2 = vmul.f32 %v15067_v16, %v13570_v59  ;;  %v6496_v41 = vmul.f32 %v15068_v44, %v13570_v59  ;;  %v6502_v5 = vadd.f32 %v6486_v24, %v13613_v15 }
 0x6aa   :  { %v6510_v3 = vadd.f32 %v6494_v57, %v13613_v15  ;;  %v6501_v9 = vadd.f32 %v6485_v43, %v13613_v15  ;;  %v6509_v18 = vadd.f32 %v6493_v25, %v13613_v15  ;;  %6547 = vst [vmem:[%s14191_s14 + $0x190] sm:$0xff] %v6531_v30  ;;  %6555 = vst [vmem:[%s14191_s14 + $0x1d0] sm:$0xff] %v6539_v23 }
 0x6ab   :  { %v6504_v45 = vadd.f32 %v6488_v2, %v13613_v15  ;;  %v6512_v50 = vadd.f32 %v6496_v41, %v13613_v15  ;;  %v6487_v31 = vmul.f32 %v15069_v19, %v13570_v59  ;;  %v6495_v40 = vmul.f32 %v15070_v60, %v13570_v59 }
 0x6ac   :  { %v6534_v20 = vadd.f32 %v6518_v36, %v6502_v5  ;;  %v6542_v28 = vadd.f32 %v6526_v46, %v6510_v3  ;;  %v6533_v39 = vadd.f32 %v6517_v12, %v6501_v9  ;;  %v6541_v56 = vadd.f32 %v6525_v63, %v6509_v18 }
 0x6ad   :  { %v6536_v29 = vadd.f32 %v6520_v38, %v6504_v45  ;;  %v6544_v27 = vadd.f32 %v6528_v48, %v6512_v50  ;;  %v6503_v58 = vadd.f32 %v6487_v31, %v13613_v15  ;;  %v6511_v54 = vadd.f32 %v6495_v40, %v13613_v15 }
 0x6ae   :  { %6550 = vst [vmem:[%s14191_s14 + $0x1a8] sm:$0xff] %v6534_v20  ;;  %6558 = vst [vmem:[%s14191_s14 + $0x1e8] sm:$0xff] %v6542_v28 }
 0x6af   :  { %6549 = vst [vmem:[%s14191_s14 + $0x1a0] sm:$0xff] %v6533_v39  ;;  %6557 = vst [vmem:[%s14191_s14 + $0x1e0] sm:$0xff] %v6541_v56  ;;  %v6535_v59 = vadd.f32 %v6519_v14, %v6503_v58  ;;  %v6543_v15 = vadd.f32 %v6527_v26, %v6511_v54 }
 0x6b0   :  { %6552 = vst [vmem:[%s14191_s14 + $0x1b8] sm:$0xff] %v6536_v29  ;;  %6560 = vst [vmem:[%s14191_s14 + $0x1f8] sm:$0xff] %v6544_v27 }
 0x6b1   :  { %6551 = vst [vmem:[%s14191_s14 + $0x1b0] sm:$0xff] %v6535_v59  ;;  %6559 = vst [vmem:[%s14191_s14 + $0x1f0] sm:$0xff] %v6543_v15 }

</bundles_post_ra>
